<compile_context>
chip_gen: v7x
topology: tpu7x:2x2x1
jax: 0.10.0
libtpu: 0.0.40
codegen_flags: <defaults>
</compile_context>

<pallas_src>
import functools

import jax
import jax.numpy as jnp
from jax.experimental import pallas as pl
from jax.experimental.pallas import tpu as pltpu

# ----------------------- synthetic config (deterministic) --------------------
VOXEL_SIZE = (0.2, 0.2)
OFFSET = (0.0, -20.0)
VX, VY = VOXEL_SIZE
X_OFFSET = VX / 2.0 + OFFSET[0]
Y_OFFSET = VY / 2.0 + OFFSET[1]

P = 64              # number of pillars        (real model: 16000)
NPOINT = 8          # max points per pillar    (real model: 15)
C_RAW = 4           # raw point features (x, y, z, intensity)
C_AUG = 9           # 4 raw + 3 cluster + 2 center
C_AUG_PAD = 16      # K padded 9 -> 16 for clean MXU feed
C_PFN = 64          # PFN output channels
NX, NY = 16, 16     # pseudo-image grid        (real model: e.g. 400x400)
C_RPN = 64          # RPN output channels
NUM_ANCHORS = 2     # anchors per location
N_CLS = NUM_ANCHORS * 1
N_BOX = NUM_ANCHORS * 7
N_DIR = NUM_ANCHORS * 2
HEAD_PAD = 128      # cls|box|dir (20) zero-padded to 128 lanes (lane-dense store)

VMEM_LIMIT = 32 * 1024 * 1024


# ------------------------------- Pallas kernels ------------------------------
def pfn_kernel(vox_ref, meta_ref, w_ref, b_ref, out_ref):
    """Augment + mask + ONE matmul + BN(folded)/ReLU + max over points."""
    vox = vox_ref[...]                       # (TP, NPT, 4) f32
    meta = meta_ref[...]                     # (TP, 4) f32: [1/n, cx, cy, n]
    tp, npt, _ = vox.shape

    inv_n = meta[:, 0:1]                     # (TP, 1)
    cx = meta[:, 1:2]
    cy = meta[:, 2:3]
    npts = meta[:, 3:4]

    # points_mean = voxels[:,:,:3].sum(1) / num_points  (guarded: empty pillars
    # use 1/max(n,1) so they produce 0 instead of NaN).
    mean = jnp.sum(vox[:, :, :3], axis=1) * inv_n            # (TP, 3)

    # mask: point slot n is valid iff n < num_points (applied BEFORE the linear,
    # matching the torch reference: masked rows still receive bias through max).
    pt_idx = jax.lax.broadcasted_iota(jnp.int32, (tp, npt), 1).astype(jnp.float32)
    mask = (pt_idx < npts).astype(jnp.float32)[:, :, None]   # (TP, NPT, 1)

    f_cluster = vox[:, :, :3] - mean[:, None, :]             # (TP, NPT, 3)
    f_cx = vox[:, :, 0:1] - cx[:, None, :]                   # (TP, NPT, 1)
    f_cy = vox[:, :, 1:2] - cy[:, None, :]                   # (TP, NPT, 1)
    pad = jnp.zeros((tp, npt, C_AUG_PAD - C_AUG), jnp.float32)
    feat = jnp.concatenate([vox, f_cluster, f_cx, f_cy, pad], axis=-1) * mask

    # one MXU pass over all points of the tile
    h = jnp.dot(feat.reshape(tp * npt, C_AUG_PAD), w_ref[...],
                preferred_element_type=jnp.float32) + b_ref[...]
    h = jnp.maximum(h, 0.0).reshape(tp, npt, -1)             # Linear+BN+ReLU
    out_ref[...] = jnp.max(h, axis=1).astype(out_ref.dtype)  # max over points


def _conv3x3_acc(xp_ref, w_ref, tile_h, width, cin):
    """Accumulate 9 shifted matmuls over a row-tile of the padded canvas."""
    row0 = pl.multiple_of(pl.program_id(0) * tile_h, tile_h)
    x = xp_ref[pl.ds(row0, tile_h + 2), :, :]                # (tile_h+2, W+2, Cin)
    cout = w_ref.shape[2]
    acc = jnp.zeros((tile_h * width, cout), jnp.float32)
    for k in range(9):
        dy, dx = divmod(k, 3)
        patch = x[dy:dy + tile_h, dx:dx + width, :]
        patch = patch.reshape(tile_h * width, cin).astype(jnp.bfloat16)
        acc = acc + jnp.dot(patch, w_ref[k], preferred_element_type=jnp.float32)
    return acc


def conv_relu_kernel(xp_ref, w_ref, b_ref, o_ref, *, tile_h, width, cin):
    """3x3 conv (stride 1, pre-padded input) + BN(folded) + ReLU."""
    acc = _conv3x3_acc(xp_ref, w_ref, tile_h, width, cin)
    y = jnp.maximum(acc + b_ref[...], 0.0)
    o_ref[...] = y.reshape(tile_h, width, -1).astype(o_ref.dtype)


def conv_relu_heads_kernel(xp_ref, w_ref, b_ref, wh_ref, bh_ref, o_ref,
                           *, tile_h, width, cin):
    """3x3 conv + ReLU fused with the three 1x1 detection heads.

    The RPN feature never leaves VMEM; cls|box|dir weights are concatenated
    and zero-padded to 128 output lanes for a lane-dense store.
    """
    acc = _conv3x3_acc(xp_ref, w_ref, tile_h, width, cin)
    y = jnp.maximum(acc + b_ref[...], 0.0)                   # (tile_h*W, C_RPN)
    heads = jnp.dot(y.astype(jnp.bfloat16), wh_ref[...],
                    preferred_element_type=jnp.float32) + bh_ref[...]
    o_ref[...] = heads.reshape(tile_h, width, -1).astype(o_ref.dtype)


# ------------------------------ kernel wrappers -------------------------------
def pfn_forward(voxels, meta, w, b, *, tile_p=None):
    n_pillars, n_points, c_raw = voxels.shape
    # big pillar tiles: per-grid-step overhead (~0.35us) is amortized; at the
    # real P~16000 this gives ~32 steps instead of 500.
    if tile_p is None:
        tile_p = min(512, n_pillars)
    assert n_pillars % tile_p == 0
    return pl.pallas_call(
        pfn_kernel,
        out_shape=jax.ShapeDtypeStruct((n_pillars, w.shape[1]), jnp.bfloat16),
        grid=(n_pillars // tile_p,),
        in_specs=[
            pl.BlockSpec((tile_p, n_points, c_raw), lambda i: (i, 0, 0)),
            pl.BlockSpec((tile_p, meta.shape[1]), lambda i: (i, 0)),
            pl.BlockSpec(w.shape, lambda i: (0, 0)),
            pl.BlockSpec(b.shape, lambda i: (0, 0)),
        ],
        out_specs=pl.BlockSpec((tile_p, w.shape[1]), lambda i: (i, 0)),
        compiler_params=pltpu.CompilerParams(
            dimension_semantics=("parallel",),
            vmem_limit_bytes=VMEM_LIMIT),
    )(voxels, meta, w, b)


def conv3x3_relu(xpad, w, b, *, tile_h=8, out_dtype=jnp.bfloat16):
    hp, wp, cin = xpad.shape
    h, wdt = hp - 2, wp - 2
    cout = w.shape[2]
    assert h % tile_h == 0
    kernel = functools.partial(conv_relu_kernel, tile_h=tile_h, width=wdt, cin=cin)
    # TODO(synk): at production spatial sizes (400x400+) the full padded canvas
    # should be halo-tiled / streamed rather than held resident in VMEM.
    return pl.pallas_call(
        kernel,
        out_shape=jax.ShapeDtypeStruct((h, wdt, cout), out_dtype),
        grid=(h // tile_h,),
        in_specs=[
            pl.BlockSpec((hp, wp, cin), lambda i: (0, 0, 0)),   # resident, DMA'd once
            pl.BlockSpec(w.shape, lambda i: (0, 0, 0)),
            pl.BlockSpec(b.shape, lambda i: (0, 0)),
        ],
        out_specs=pl.BlockSpec((tile_h, wdt, cout), lambda i: (i, 0, 0)),
        compiler_params=pltpu.CompilerParams(
            dimension_semantics=("parallel",),
            vmem_limit_bytes=VMEM_LIMIT),
    )(xpad, w, b)


def conv3x3_relu_heads(xpad, w, b, wh, bh, *, tile_h=8):
    hp, wp, cin = xpad.shape
    h, wdt = hp - 2, wp - 2
    n_out = wh.shape[1]
    assert h % tile_h == 0
    kernel = functools.partial(conv_relu_heads_kernel,
                               tile_h=tile_h, width=wdt, cin=cin)
    return pl.pallas_call(
        kernel,
        out_shape=jax.ShapeDtypeStruct((h, wdt, n_out), jnp.float32),
        grid=(h // tile_h,),
        in_specs=[
            pl.BlockSpec((hp, wp, cin), lambda i: (0, 0, 0)),
            pl.BlockSpec(w.shape, lambda i: (0, 0, 0)),
            pl.BlockSpec(b.shape, lambda i: (0, 0)),
            pl.BlockSpec(wh.shape, lambda i: (0, 0)),
            pl.BlockSpec(bh.shape, lambda i: (0, 0)),
        ],
        out_specs=pl.BlockSpec((tile_h, wdt, n_out), lambda i: (i, 0, 0)),
        compiler_params=pltpu.CompilerParams(
            dimension_semantics=("parallel",),
            vmem_limit_bytes=VMEM_LIMIT),
    )(xpad, w, b, wh, bh)


# ------------------------------ full forward ----------------------------------
def pointpillars_forward(params, voxels, num_points_per_voxel, coors):
    # --- per-pillar scalars packed into ONE small tensor (single DMA per tile) ---
    npts_f = num_points_per_voxel.astype(jnp.float32)
    inv_n = 1.0 / jnp.maximum(npts_f, 1.0)          # guard empty pillars (no NaN)
    cx = coors[:, 0].astype(jnp.float32) * VX + X_OFFSET
    cy = coors[:, 1].astype(jnp.float32) * VY + Y_OFFSET
    meta = jnp.stack([inv_n, cx, cy, npts_f], axis=1)        # (P, 4)

    # --- PFN (Pallas): augment + mask + one matmul + ReLU + max over points ---
    pillar_feats = pfn_forward(voxels, meta,
                               params["pfn_w"], params["pfn_b"])   # (P, C_PFN) bf16

    # --- scatter into a zero-padded pseudo-image (HWC); the zero border doubles
    #     as conv1's halo so no extra pad pass is needed.
    # TODO(synk): coordinate-driven (data-dependent) scatter kept as a JAX
    # .at[].set(); a Pallas version needs a scalar-prefetch-driven output map.
    canvas_pad = jnp.zeros((NX + 2, NY + 2, C_PFN), jnp.bfloat16)
    canvas_pad = canvas_pad.at[coors[:, 0] + 1, coors[:, 1] + 1, :].set(pillar_feats)

    # --- RPN layer 1: 3x3 conv + BN(folded) + ReLU, im2col folded in-kernel ---
    x1 = conv3x3_relu(canvas_pad, params["rpn_w0"], params["rpn_b0"])  # (NX,NY,C_RPN)

    # --- RPN layer 2 fused with detection heads (1x1 convs, lane-padded) ---
    x1_pad = jnp.pad(x1, ((1, 1), (1, 1), (0, 0)))
    head_out = conv3x3_relu_heads(x1_pad, params["rpn_w1"], params["rpn_b1"],
                                  params["heads_w"], params["heads_b"])  # (NX,NY,128)

    hf = head_out.reshape(NX * NY, HEAD_PAD)
    cls = hf[:, :N_CLS].reshape(1, -1, 1)
    box = hf[:, N_CLS:N_CLS + N_BOX].reshape(1, -1, 7)
    dirp = hf[:, N_CLS + N_BOX:N_CLS + N_BOX + N_DIR].reshape(1, -1, 2)

    return {"cls_preds": cls, "box_preds": box, "dir_preds": dirp}


# ------------------------------ parameter init ---------------------------------
def init_params(key):
    keys = jax.random.split(key, 7)

    def w_init(k, shape, scale=0.05):
        return jax.random.normal(k, shape, jnp.float32) * scale

    # PFN weight: (C_AUG, C_PFN) zero-padded along K to 16.
    pfn_w = jnp.zeros((C_AUG_PAD, C_PFN), jnp.float32)
    pfn_w = pfn_w.at[:C_AUG, :].set(w_init(keys[0], (C_AUG, C_PFN)))

    # Conv weights as (9 taps, Cin, Cout), stored bf16 for the MXU; biases f32.
    rpn_w0 = w_init(keys[2], (9, C_PFN, C_RPN)).astype(jnp.bfloat16)
    rpn_w1 = w_init(keys[4], (9, C_RPN, C_RPN)).astype(jnp.bfloat16)

    # Heads fused: columns [cls(2) | box(14) | dir(4)] zero-padded to 128 lanes.
    n_head = N_CLS + N_BOX + N_DIR
    heads_w = jnp.zeros((C_RPN, HEAD_PAD), jnp.float32)
    heads_w = heads_w.at[:, :n_head].set(w_init(keys[6], (C_RPN, n_head)))

    return {
        "pfn_w": pfn_w,
        "pfn_b": w_init(keys[1], (1, C_PFN)),
        "rpn_w0": rpn_w0,
        "rpn_b0": w_init(keys[3], (1, C_RPN)),
        "rpn_w1": rpn_w1,
        "rpn_b1": w_init(keys[5], (1, C_RPN)),
        "heads_w": heads_w.astype(jnp.bfloat16),
        "heads_b": jnp.zeros((1, HEAD_PAD), jnp.float32),
    }


# ----------------------------------- main --------------------------------------
if __name__ == "__main__":
    key = jax.random.PRNGKey(0)
    kp, kv, kn = jax.random.split(key, 3)
    params = init_params(kp)

    voxels = jax.random.normal(kv, (P, NPOINT, C_RAW), jnp.float32)
    num_points_per_voxel = jax.random.randint(kn, (P,), 1, NPOINT + 1).astype(jnp.int32)
    # unique pillar coordinates (cx, cy, batch) inside the (NX, NY) grid
    flat_idx = jnp.arange(P, dtype=jnp.int32) * (NX * NY // P)
    coors = jnp.stack(
        [flat_idx // NY, flat_idx % NY, jnp.zeros(P, jnp.int32)], axis=1)

    fwd = jax.jit(pointpillars_forward)
    preds = fwd(params, voxels, num_points_per_voxel, coors)
    jax.block_until_ready(preds)

    assert preds["cls_preds"].shape == (1, NX * NY * NUM_ANCHORS, 1)
    assert preds["box_preds"].shape == (1, NX * NY * NUM_ANCHORS, 7)
    assert preds["dir_preds"].shape == (1, NX * NY * NUM_ANCHORS, 2)
    assert bool(jnp.all(jnp.isfinite(preds["box_preds"])))
    print("KERNEL_OK")
</pallas_src>

<mosaic_0001>
module attributes {stable_mosaic.version = 11 : i64} {
  func.func @pfn_kernel(%arg0: i32, %arg1: memref<64x8x4xf32, #tpu.memory_space<vmem>>, %arg2: memref<64x4xf32, #tpu.memory_space<vmem>>, %arg3: memref<16x64xf32, #tpu.memory_space<vmem>>, %arg4: memref<1x64xf32, #tpu.memory_space<vmem>>, %arg5: memref<64x64xbf16, #tpu.memory_space<vmem>>) attributes {dimension_semantics = [#tpu.dimension_semantics<parallel>], iteration_bounds = array<i64: 1>, scalar_prefetch = 0 : i64, scratch_operands = 0 : i64, tpu.core_type = #tpu.core_type<tc>, window_params = [{transform_indices = @transform_0, window_bounds = array<i64: 64, 8, 4>}, {transform_indices = @transform_1, window_bounds = array<i64: 64, 4>}, {pipeline_mode = #tpu.pipeline_mode<synchronous>, transform_indices = @transform_2, window_bounds = array<i64: 16, 64>}, {pipeline_mode = #tpu.pipeline_mode<synchronous>, transform_indices = @transform_3, window_bounds = array<i64: 1, 64>}, {transform_indices = @transform_4, window_bounds = array<i64: 64, 64>}]} {
    %c0 = arith.constant 0 : index
    %c0_0 = arith.constant 0 : index
    %c0_1 = arith.constant 0 : index
    %0 = vector.load %arg1[%c0, %c0_0, %c0_1] : memref<64x8x4xf32, #tpu.memory_space<vmem>>, vector<64x8x4xf32>
    %c0_2 = arith.constant 0 : index
    %c0_3 = arith.constant 0 : index
    %1 = vector.load %arg2[%c0_2, %c0_3] : memref<64x4xf32, #tpu.memory_space<vmem>>, vector<64x4xf32>
    %2 = vector.extract_strided_slice %1 {offsets = [0, 0], sizes = [64, 1], strides = [1, 1]} : vector<64x4xf32> to vector<64x1xf32>
    %3 = vector.extract_strided_slice %1 {offsets = [0, 1], sizes = [64, 1], strides = [1, 1]} : vector<64x4xf32> to vector<64x1xf32>
    %4 = vector.extract_strided_slice %1 {offsets = [0, 2], sizes = [64, 1], strides = [1, 1]} : vector<64x4xf32> to vector<64x1xf32>
    %5 = vector.extract_strided_slice %1 {offsets = [0, 3], sizes = [64, 1], strides = [1, 1]} : vector<64x4xf32> to vector<64x1xf32>
    %6 = vector.extract_strided_slice %0 {offsets = [0, 0, 0], sizes = [64, 8, 3], strides = [1, 1, 1]} : vector<64x8x4xf32> to vector<64x8x3xf32>
    %cst = arith.constant dense<0.000000e+00> : vector<64x3xf32>
    %7 = vector.multi_reduction <add>, %6, %cst [1] : vector<64x8x3xf32> to vector<64x3xf32>
    %8 = vector.broadcast %2 : vector<64x1xf32> to vector<64x3xf32>
    %9 = arith.mulf %7, %8 : vector<64x3xf32>
    %10 = tpu.iota {dimensions = array<i32: 1>} : vector<64x8xi32>
    %11 = arith.sitofp %10 : vector<64x8xi32> to vector<64x8xf32>
    %12 = vector.broadcast %5 : vector<64x1xf32> to vector<64x8xf32>
    %13 = arith.cmpf olt, %11, %12 : vector<64x8xf32>
    %14 = arith.extui %13 : vector<64x8xi1> to vector<64x8xi32>
    %15 = arith.sitofp %14 : vector<64x8xi32> to vector<64x8xf32>
    %16 = vector.shape_cast %15 : vector<64x8xf32> to vector<64x8x1xf32>
    %17 = vector.extract_strided_slice %0 {offsets = [0, 0, 0], sizes = [64, 8, 3], strides = [1, 1, 1]} : vector<64x8x4xf32> to vector<64x8x3xf32>
    %18 = vector.shape_cast %9 : vector<64x3xf32> to vector<64x1x3xf32>
    %19 = vector.broadcast %18 : vector<64x1x3xf32> to vector<64x8x3xf32>
    %20 = arith.subf %17, %19 : vector<64x8x3xf32>
    %21 = vector.extract_strided_slice %0 {offsets = [0, 0, 0], sizes = [64, 8, 1], strides = [1, 1, 1]} : vector<64x8x4xf32> to vector<64x8x1xf32>
    %22 = vector.shape_cast %3 : vector<64x1xf32> to vector<64x1x1xf32>
    %23 = vector.broadcast %22 : vector<64x1x1xf32> to vector<64x8x1xf32>
    %24 = arith.subf %21, %23 : vector<64x8x1xf32>
    %25 = vector.extract_strided_slice %0 {offsets = [0, 0, 1], sizes = [64, 8, 1], strides = [1, 1, 1]} : vector<64x8x4xf32> to vector<64x8x1xf32>
    %26 = vector.shape_cast %4 : vector<64x1xf32> to vector<64x1x1xf32>
    %27 = vector.broadcast %26 : vector<64x1x1xf32> to vector<64x8x1xf32>
    %28 = arith.subf %25, %27 : vector<64x8x1xf32>
    %cst_4 = arith.constant 0.000000e+00 : f32
    %29 = vector.broadcast %cst_4 : f32 to vector<64x8x7xf32>
    %30 = tpu.concatenate %0, %20, %24, %28, %29 in 2 : vector<64x8x4xf32>, vector<64x8x3xf32>, vector<64x8x1xf32>, vector<64x8x1xf32>, vector<64x8x7xf32> -> vector<64x8x16xf32>
    %31 = vector.broadcast %16 : vector<64x8x1xf32> to vector<64x8x16xf32>
    %32 = arith.mulf %30, %31 : vector<64x8x16xf32>
    %33 = vector.shape_cast %32 : vector<64x8x16xf32> to vector<512x16xf32>
    %c0_5 = arith.constant 0 : index
    %c0_6 = arith.constant 0 : index
    %34 = vector.load %arg3[%c0_5, %c0_6] : memref<16x64xf32, #tpu.memory_space<vmem>>, vector<16x64xf32>
    %cst_7 = arith.constant dense<0.000000e+00> : vector<512x64xf32>
    %35 = tpu.matmul %33, %34, %cst_7 {dimension_numbers = #tpu.dot_dimension_numbers<[1], [0], [0], [1], [0, 0, 1, 1], [], []>} : vector<512x16xf32>, vector<16x64xf32>, vector<512x64xf32> -> vector<512x64xf32>
    %c0_8 = arith.constant 0 : index
    %c0_9 = arith.constant 0 : index
    %36 = vector.load %arg4[%c0_8, %c0_9] : memref<1x64xf32, #tpu.memory_space<vmem>>, vector<1x64xf32>
    %37 = vector.broadcast %36 : vector<1x64xf32> to vector<512x64xf32>
    %38 = arith.addf %35, %37 : vector<512x64xf32>
    %cst_10 = arith.constant 0.000000e+00 : f32
    %39 = vector.broadcast %cst_10 : f32 to vector<512x64xf32>
    %40 = arith.maximumf %38, %39 : vector<512x64xf32>
    %41 = vector.shape_cast %40 : vector<512x64xf32> to vector<64x8x64xf32>
    %cst_11 = arith.constant dense<0xFF800000> : vector<64x64xf32>
    %42 = vector.multi_reduction <maximumf>, %41, %cst_11 [1] : vector<64x8x64xf32> to vector<64x64xf32>
    %43 = arith.truncf %42 : vector<64x64xf32> to vector<64x64xbf16>
    %c0_12 = arith.constant 0 : index
    %c0_13 = arith.constant 0 : index
    %44 = vector.load %arg5[%c0_12, %c0_13] : memref<64x64xbf16, #tpu.memory_space<vmem>>, vector<64x64xbf16>
    tpu.vector_store %arg5[%c0_12, %c0_13], %43 {strides = array<i32>} : memref<64x64xbf16, #tpu.memory_space<vmem>>, vector<64x64xbf16>,
    return
  }
  func.func @transform_0(%arg0: i32) -> (i32, i32, i32) {
    %c0_i32 = arith.constant 0 : i32
    %c0_i32_0 = arith.constant 0 : i32
    %c0_i32_1 = arith.constant 0 : i32
    return %arg0, %c0_i32, %c0_i32_0 : i32, i32, i32
  }
  func.func @transform_1(%arg0: i32) -> (i32, i32) {
    %c0_i32 = arith.constant 0 : i32
    %c0_i32_0 = arith.constant 0 : i32
    return %arg0, %c0_i32 : i32, i32
  }
  func.func @transform_2(%arg0: i32) -> (i32, i32) {
    %c0_i32 = arith.constant 0 : i32
    %c0_i32_0 = arith.constant 0 : i32
    %c0_i32_1 = arith.constant 0 : i32
    return %c0_i32, %c0_i32_0 : i32, i32
  }
  func.func @transform_3(%arg0: i32) -> (i32, i32) {
    %c0_i32 = arith.constant 0 : i32
    %c0_i32_0 = arith.constant 0 : i32
    %c0_i32_1 = arith.constant 0 : i32
    return %c0_i32, %c0_i32_0 : i32, i32
  }
  func.func @transform_4(%arg0: i32) -> (i32, i32) {
    %c0_i32 = arith.constant 0 : i32
    %c0_i32_0 = arith.constant 0 : i32
    return %arg0, %c0_i32 : i32, i32
  }
}

module attributes {stable_mosaic.version = 11 : i64} {
  func.func @conv_relu_kernel(%arg0: i32, %arg1: memref<18x18x64xbf16, #tpu.memory_space<vmem>>, %arg2: memref<9x64x64xbf16, #tpu.memory_space<vmem>>, %arg3: memref<1x64xf32, #tpu.memory_space<vmem>>, %arg4: memref<8x16x64xbf16, #tpu.memory_space<vmem>>) attributes {dimension_semantics = [#tpu.dimension_semantics<parallel>], iteration_bounds = array<i64: 2>, scalar_prefetch = 0 : i64, scratch_operands = 0 : i64, tpu.core_type = #tpu.core_type<tc>, window_params = [{pipeline_mode = #tpu.pipeline_mode<synchronous>, transform_indices = @transform_0, window_bounds = array<i64: 18, 18, 64>}, {pipeline_mode = #tpu.pipeline_mode<synchronous>, transform_indices = @transform_1, window_bounds = array<i64: 9, 64, 64>}, {pipeline_mode = #tpu.pipeline_mode<synchronous>, transform_indices = @transform_2, window_bounds = array<i64: 1, 64>}, {transform_indices = @transform_3, window_bounds = array<i64: 8, 16, 64>}]} {
    %c8_i32 = arith.constant 8 : i32
    %0 = arith.muli %arg0, %c8_i32 : i32
    %1 = tpu.assume_multiple %0, 8 : i32
    %2 = arith.index_cast %1 : i32 to index
    %c0 = arith.constant 0 : index
    %c0_0 = arith.constant 0 : index
    %3 = vector.load %arg1[%2, %c0, %c0_0] : memref<18x18x64xbf16, #tpu.memory_space<vmem>>, vector<10x18x64xbf16>
    %cst = arith.constant 0.000000e+00 : f32
    %4 = vector.broadcast %cst : f32 to vector<128x64xf32>
    %5 = vector.extract_strided_slice %3 {offsets = [0, 0, 0], sizes = [8, 16, 64], strides = [1, 1, 1]} : vector<10x18x64xbf16> to vector<8x16x64xbf16>
    %6 = vector.shape_cast %5 : vector<8x16x64xbf16> to vector<128x64xbf16>
    %c0_1 = arith.constant 0 : index
    %c0_2 = arith.constant 0 : index
    %c0_3 = arith.constant 0 : index
    %7 = vector.load %arg2[%c0_1, %c0_2, %c0_3] : memref<9x64x64xbf16, #tpu.memory_space<vmem>>, vector<1x64x64xbf16>
    %8 = vector.shape_cast %7 : vector<1x64x64xbf16> to vector<64x64xbf16>
    %cst_4 = arith.constant dense<0.000000e+00> : vector<128x64xf32>
    %9 = tpu.matmul %6, %8, %cst_4 {dimension_numbers = #tpu.dot_dimension_numbers<[1], [0], [0], [1], [0, 0, 1, 1], [], []>} : vector<128x64xbf16>, vector<64x64xbf16>, vector<128x64xf32> -> vector<128x64xf32>
    %10 = arith.addf %4, %9 : vector<128x64xf32>
    %11 = vector.extract_strided_slice %3 {offsets = [0, 1, 0], sizes = [8, 16, 64], strides = [1, 1, 1]} : vector<10x18x64xbf16> to vector<8x16x64xbf16>
    %12 = vector.shape_cast %11 : vector<8x16x64xbf16> to vector<128x64xbf16>
    %c1 = arith.constant 1 : index
    %c0_5 = arith.constant 0 : index
    %c0_6 = arith.constant 0 : index
    %13 = vector.load %arg2[%c1, %c0_5, %c0_6] : memref<9x64x64xbf16, #tpu.memory_space<vmem>>, vector<1x64x64xbf16>
    %14 = vector.shape_cast %13 : vector<1x64x64xbf16> to vector<64x64xbf16>
    %cst_7 = arith.constant dense<0.000000e+00> : vector<128x64xf32>
    %15 = tpu.matmul %12, %14, %cst_7 {dimension_numbers = #tpu.dot_dimension_numbers<[1], [0], [0], [1], [0, 0, 1, 1], [], []>} : vector<128x64xbf16>, vector<64x64xbf16>, vector<128x64xf32> -> vector<128x64xf32>
    %16 = arith.addf %10, %15 : vector<128x64xf32>
    %17 = vector.extract_strided_slice %3 {offsets = [0, 2, 0], sizes = [8, 16, 64], strides = [1, 1, 1]} : vector<10x18x64xbf16> to vector<8x16x64xbf16>
    %18 = vector.shape_cast %17 : vector<8x16x64xbf16> to vector<128x64xbf16>
    %c2 = arith.constant 2 : index
    %c0_8 = arith.constant 0 : index
    %c0_9 = arith.constant 0 : index
    %19 = vector.load %arg2[%c2, %c0_8, %c0_9] : memref<9x64x64xbf16, #tpu.memory_space<vmem>>, vector<1x64x64xbf16>
    %20 = vector.shape_cast %19 : vector<1x64x64xbf16> to vector<64x64xbf16>
    %cst_10 = arith.constant dense<0.000000e+00> : vector<128x64xf32>
    %21 = tpu.matmul %18, %20, %cst_10 {dimension_numbers = #tpu.dot_dimension_numbers<[1], [0], [0], [1], [0, 0, 1, 1], [], []>} : vector<128x64xbf16>, vector<64x64xbf16>, vector<128x64xf32> -> vector<128x64xf32>
    %22 = arith.addf %16, %21 : vector<128x64xf32>
    %23 = vector.extract_strided_slice %3 {offsets = [1, 0, 0], sizes = [8, 16, 64], strides = [1, 1, 1]} : vector<10x18x64xbf16> to vector<8x16x64xbf16>
    %24 = vector.shape_cast %23 : vector<8x16x64xbf16> to vector<128x64xbf16>
    %c3 = arith.constant 3 : index
    %c0_11 = arith.constant 0 : index
    %c0_12 = arith.constant 0 : index
    %25 = vector.load %arg2[%c3, %c0_11, %c0_12] : memref<9x64x64xbf16, #tpu.memory_space<vmem>>, vector<1x64x64xbf16>
    %26 = vector.shape_cast %25 : vector<1x64x64xbf16> to vector<64x64xbf16>
    %cst_13 = arith.constant dense<0.000000e+00> : vector<128x64xf32>
    %27 = tpu.matmul %24, %26, %cst_13 {dimension_numbers = #tpu.dot_dimension_numbers<[1], [0], [0], [1], [0, 0, 1, 1], [], []>} : vector<128x64xbf16>, vector<64x64xbf16>, vector<128x64xf32> -> vector<128x64xf32>
    %28 = arith.addf %22, %27 : vector<128x64xf32>
    %29 = vector.extract_strided_slice %3 {offsets = [1, 1, 0], sizes = [8, 16, 64], strides = [1, 1, 1]} : vector<10x18x64xbf16> to vector<8x16x64xbf16>
    %30 = vector.shape_cast %29 : vector<8x16x64xbf16> to vector<128x64xbf16>
    %c4 = arith.constant 4 : index
    %c0_14 = arith.constant 0 : index
    %c0_15 = arith.constant 0 : index
    %31 = vector.load %arg2[%c4, %c0_14, %c0_15] : memref<9x64x64xbf16, #tpu.memory_space<vmem>>, vector<1x64x64xbf16>
    %32 = vector.shape_cast %31 : vector<1x64x64xbf16> to vector<64x64xbf16>
    %cst_16 = arith.constant dense<0.000000e+00> : vector<128x64xf32>
    %33 = tpu.matmul %30, %32, %cst_16 {dimension_numbers = #tpu.dot_dimension_numbers<[1], [0], [0], [1], [0, 0, 1, 1], [], []>} : vector<128x64xbf16>, vector<64x64xbf16>, vector<128x64xf32> -> vector<128x64xf32>
    %34 = arith.addf %28, %33 : vector<128x64xf32>
    %35 = vector.extract_strided_slice %3 {offsets = [1, 2, 0], sizes = [8, 16, 64], strides = [1, 1, 1]} : vector<10x18x64xbf16> to vector<8x16x64xbf16>
    %36 = vector.shape_cast %35 : vector<8x16x64xbf16> to vector<128x64xbf16>
    %c5 = arith.constant 5 : index
    %c0_17 = arith.constant 0 : index
    %c0_18 = arith.constant 0 : index
    %37 = vector.load %arg2[%c5, %c0_17, %c0_18] : memref<9x64x64xbf16, #tpu.memory_space<vmem>>, vector<1x64x64xbf16>
    %38 = vector.shape_cast %37 : vector<1x64x64xbf16> to vector<64x64xbf16>
    %cst_19 = arith.constant dense<0.000000e+00> : vector<128x64xf32>
    %39 = tpu.matmul %36, %38, %cst_19 {dimension_numbers = #tpu.dot_dimension_numbers<[1], [0], [0], [1], [0, 0, 1, 1], [], []>} : vector<128x64xbf16>, vector<64x64xbf16>, vector<128x64xf32> -> vector<128x64xf32>
    %40 = arith.addf %34, %39 : vector<128x64xf32>
    %41 = vector.extract_strided_slice %3 {offsets = [2, 0, 0], sizes = [8, 16, 64], strides = [1, 1, 1]} : vector<10x18x64xbf16> to vector<8x16x64xbf16>
    %42 = vector.shape_cast %41 : vector<8x16x64xbf16> to vector<128x64xbf16>
    %c6 = arith.constant 6 : index
    %c0_20 = arith.constant 0 : index
    %c0_21 = arith.constant 0 : index
    %43 = vector.load %arg2[%c6, %c0_20, %c0_21] : memref<9x64x64xbf16, #tpu.memory_space<vmem>>, vector<1x64x64xbf16>
    %44 = vector.shape_cast %43 : vector<1x64x64xbf16> to vector<64x64xbf16>
    %cst_22 = arith.constant dense<0.000000e+00> : vector<128x64xf32>
    %45 = tpu.matmul %42, %44, %cst_22 {dimension_numbers = #tpu.dot_dimension_numbers<[1], [0], [0], [1], [0, 0, 1, 1], [], []>} : vector<128x64xbf16>, vector<64x64xbf16>, vector<128x64xf32> -> vector<128x64xf32>
    %46 = arith.addf %40, %45 : vector<128x64xf32>
    %47 = vector.extract_strided_slice %3 {offsets = [2, 1, 0], sizes = [8, 16, 64], strides = [1, 1, 1]} : vector<10x18x64xbf16> to vector<8x16x64xbf16>
    %48 = vector.shape_cast %47 : vector<8x16x64xbf16> to vector<128x64xbf16>
    %c7 = arith.constant 7 : index
    %c0_23 = arith.constant 0 : index
    %c0_24 = arith.constant 0 : index
    %49 = vector.load %arg2[%c7, %c0_23, %c0_24] : memref<9x64x64xbf16, #tpu.memory_space<vmem>>, vector<1x64x64xbf16>
    %50 = vector.shape_cast %49 : vector<1x64x64xbf16> to vector<64x64xbf16>
    %cst_25 = arith.constant dense<0.000000e+00> : vector<128x64xf32>
    %51 = tpu.matmul %48, %50, %cst_25 {dimension_numbers = #tpu.dot_dimension_numbers<[1], [0], [0], [1], [0, 0, 1, 1], [], []>} : vector<128x64xbf16>, vector<64x64xbf16>, vector<128x64xf32> -> vector<128x64xf32>
    %52 = arith.addf %46, %51 : vector<128x64xf32>
    %53 = vector.extract_strided_slice %3 {offsets = [2, 2, 0], sizes = [8, 16, 64], strides = [1, 1, 1]} : vector<10x18x64xbf16> to vector<8x16x64xbf16>
    %54 = vector.shape_cast %53 : vector<8x16x64xbf16> to vector<128x64xbf16>
    %c8 = arith.constant 8 : index
    %c0_26 = arith.constant 0 : index
    %c0_27 = arith.constant 0 : index
    %55 = vector.load %arg2[%c8, %c0_26, %c0_27] : memref<9x64x64xbf16, #tpu.memory_space<vmem>>, vector<1x64x64xbf16>
    %56 = vector.shape_cast %55 : vector<1x64x64xbf16> to vector<64x64xbf16>
    %cst_28 = arith.constant dense<0.000000e+00> : vector<128x64xf32>
    %57 = tpu.matmul %54, %56, %cst_28 {dimension_numbers = #tpu.dot_dimension_numbers<[1], [0], [0], [1], [0, 0, 1, 1], [], []>} : vector<128x64xbf16>, vector<64x64xbf16>, vector<128x64xf32> -> vector<128x64xf32>
    %58 = arith.addf %52, %57 : vector<128x64xf32>
    %c0_29 = arith.constant 0 : index
    %c0_30 = arith.constant 0 : index
    %59 = vector.load %arg3[%c0_29, %c0_30] : memref<1x64xf32, #tpu.memory_space<vmem>>, vector<1x64xf32>
    %60 = vector.broadcast %59 : vector<1x64xf32> to vector<128x64xf32>
    %61 = arith.addf %58, %60 : vector<128x64xf32>
    %cst_31 = arith.constant 0.000000e+00 : f32
    %62 = vector.broadcast %cst_31 : f32 to vector<128x64xf32>
    %63 = arith.maximumf %61, %62 : vector<128x64xf32>
    %64 = vector.shape_cast %63 : vector<128x64xf32> to vector<8x16x64xf32>
    %65 = arith.truncf %64 : vector<8x16x64xf32> to vector<8x16x64xbf16>
    %c0_32 = arith.constant 0 : index
    %c0_33 = arith.constant 0 : index
    %c0_34 = arith.constant 0 : index
    %66 = vector.load %arg4[%c0_32, %c0_33, %c0_34] : memref<8x16x64xbf16, #tpu.memory_space<vmem>>, vector<8x16x64xbf16>
    tpu.vector_store %arg4[%c0_32, %c0_33, %c0_34], %65 {strides = array<i32>} : memref<8x16x64xbf16, #tpu.memory_space<vmem>>, vector<8x16x64xbf16>,
    return
  }
  func.func @transform_0(%arg0: i32) -> (i32, i32, i32) {
    %c0_i32 = arith.constant 0 : i32
    %c0_i32_0 = arith.constant 0 : i32
    %c0_i32_1 = arith.constant 0 : i32
    %c0_i32_2 = arith.constant 0 : i32
    return %c0_i32, %c0_i32_0, %c0_i32_1 : i32, i32, i32
  }
  func.func @transform_1(%arg0: i32) -> (i32, i32, i32) {
    %c0_i32 = arith.constant 0 : i32
    %c0_i32_0 = arith.constant 0 : i32
    %c0_i32_1 = arith.constant 0 : i32
    %c0_i32_2 = arith.constant 0 : i32
    return %c0_i32, %c0_i32_0, %c0_i32_1 : i32, i32, i32
  }
  func.func @transform_2(%arg0: i32) -> (i32, i32) {
    %c0_i32 = arith.constant 0 : i32
    %c0_i32_0 = arith.constant 0 : i32
    %c0_i32_1 = arith.constant 0 : i32
    return %c0_i32, %c0_i32_0 : i32, i32
  }
  func.func @transform_3(%arg0: i32) -> (i32, i32, i32) {
    %c0_i32 = arith.constant 0 : i32
    %c0_i32_0 = arith.constant 0 : i32
    %c0_i32_1 = arith.constant 0 : i32
    return %arg0, %c0_i32, %c0_i32_0 : i32, i32, i32
  }
}

module attributes {stable_mosaic.version = 11 : i64} {
  func.func @conv_relu_heads_kernel(%arg0: i32, %arg1: memref<18x18x64xbf16, #tpu.memory_space<vmem>>, %arg2: memref<9x64x64xbf16, #tpu.memory_space<vmem>>, %arg3: memref<1x64xf32, #tpu.memory_space<vmem>>, %arg4: memref<64x128xbf16, #tpu.memory_space<vmem>>, %arg5: memref<1x128xf32, #tpu.memory_space<vmem>>, %arg6: memref<8x16x128xf32, #tpu.memory_space<vmem>>) attributes {dimension_semantics = [#tpu.dimension_semantics<parallel>], iteration_bounds = array<i64: 2>, scalar_prefetch = 0 : i64, scratch_operands = 0 : i64, tpu.core_type = #tpu.core_type<tc>, window_params = [{pipeline_mode = #tpu.pipeline_mode<synchronous>, transform_indices = @transform_0, window_bounds = array<i64: 18, 18, 64>}, {pipeline_mode = #tpu.pipeline_mode<synchronous>, transform_indices = @transform_1, window_bounds = array<i64: 9, 64, 64>}, {pipeline_mode = #tpu.pipeline_mode<synchronous>, transform_indices = @transform_2, window_bounds = array<i64: 1, 64>}, {pipeline_mode = #tpu.pipeline_mode<synchronous>, transform_indices = @transform_3, window_bounds = array<i64: 64, 128>}, {pipeline_mode = #tpu.pipeline_mode<synchronous>, transform_indices = @transform_4, window_bounds = array<i64: 1, 128>}, {transform_indices = @transform_5, window_bounds = array<i64: 8, 16, 128>}]} {
    %c8_i32 = arith.constant 8 : i32
    %0 = arith.muli %arg0, %c8_i32 : i32
    %1 = tpu.assume_multiple %0, 8 : i32
    %2 = arith.index_cast %1 : i32 to index
    %c0 = arith.constant 0 : index
    %c0_0 = arith.constant 0 : index
    %3 = vector.load %arg1[%2, %c0, %c0_0] : memref<18x18x64xbf16, #tpu.memory_space<vmem>>, vector<10x18x64xbf16>
    %cst = arith.constant 0.000000e+00 : f32
    %4 = vector.broadcast %cst : f32 to vector<128x64xf32>
    %5 = vector.extract_strided_slice %3 {offsets = [0, 0, 0], sizes = [8, 16, 64], strides = [1, 1, 1]} : vector<10x18x64xbf16> to vector<8x16x64xbf16>
    %6 = vector.shape_cast %5 : vector<8x16x64xbf16> to vector<128x64xbf16>
    %c0_1 = arith.constant 0 : index
    %c0_2 = arith.constant 0 : index
    %c0_3 = arith.constant 0 : index
    %7 = vector.load %arg2[%c0_1, %c0_2, %c0_3] : memref<9x64x64xbf16, #tpu.memory_space<vmem>>, vector<1x64x64xbf16>
    %8 = vector.shape_cast %7 : vector<1x64x64xbf16> to vector<64x64xbf16>
    %cst_4 = arith.constant dense<0.000000e+00> : vector<128x64xf32>
    %9 = tpu.matmul %6, %8, %cst_4 {dimension_numbers = #tpu.dot_dimension_numbers<[1], [0], [0], [1], [0, 0, 1, 1], [], []>} : vector<128x64xbf16>, vector<64x64xbf16>, vector<128x64xf32> -> vector<128x64xf32>
    %10 = arith.addf %4, %9 : vector<128x64xf32>
    %11 = vector.extract_strided_slice %3 {offsets = [0, 1, 0], sizes = [8, 16, 64], strides = [1, 1, 1]} : vector<10x18x64xbf16> to vector<8x16x64xbf16>
    %12 = vector.shape_cast %11 : vector<8x16x64xbf16> to vector<128x64xbf16>
    %c1 = arith.constant 1 : index
    %c0_5 = arith.constant 0 : index
    %c0_6 = arith.constant 0 : index
    %13 = vector.load %arg2[%c1, %c0_5, %c0_6] : memref<9x64x64xbf16, #tpu.memory_space<vmem>>, vector<1x64x64xbf16>
    %14 = vector.shape_cast %13 : vector<1x64x64xbf16> to vector<64x64xbf16>
    %cst_7 = arith.constant dense<0.000000e+00> : vector<128x64xf32>
    %15 = tpu.matmul %12, %14, %cst_7 {dimension_numbers = #tpu.dot_dimension_numbers<[1], [0], [0], [1], [0, 0, 1, 1], [], []>} : vector<128x64xbf16>, vector<64x64xbf16>, vector<128x64xf32> -> vector<128x64xf32>
    %16 = arith.addf %10, %15 : vector<128x64xf32>
    %17 = vector.extract_strided_slice %3 {offsets = [0, 2, 0], sizes = [8, 16, 64], strides = [1, 1, 1]} : vector<10x18x64xbf16> to vector<8x16x64xbf16>
    %18 = vector.shape_cast %17 : vector<8x16x64xbf16> to vector<128x64xbf16>
    %c2 = arith.constant 2 : index
    %c0_8 = arith.constant 0 : index
    %c0_9 = arith.constant 0 : index
    %19 = vector.load %arg2[%c2, %c0_8, %c0_9] : memref<9x64x64xbf16, #tpu.memory_space<vmem>>, vector<1x64x64xbf16>
    %20 = vector.shape_cast %19 : vector<1x64x64xbf16> to vector<64x64xbf16>
    %cst_10 = arith.constant dense<0.000000e+00> : vector<128x64xf32>
    %21 = tpu.matmul %18, %20, %cst_10 {dimension_numbers = #tpu.dot_dimension_numbers<[1], [0], [0], [1], [0, 0, 1, 1], [], []>} : vector<128x64xbf16>, vector<64x64xbf16>, vector<128x64xf32> -> vector<128x64xf32>
    %22 = arith.addf %16, %21 : vector<128x64xf32>
    %23 = vector.extract_strided_slice %3 {offsets = [1, 0, 0], sizes = [8, 16, 64], strides = [1, 1, 1]} : vector<10x18x64xbf16> to vector<8x16x64xbf16>
    %24 = vector.shape_cast %23 : vector<8x16x64xbf16> to vector<128x64xbf16>
    %c3 = arith.constant 3 : index
    %c0_11 = arith.constant 0 : index
    %c0_12 = arith.constant 0 : index
    %25 = vector.load %arg2[%c3, %c0_11, %c0_12] : memref<9x64x64xbf16, #tpu.memory_space<vmem>>, vector<1x64x64xbf16>
    %26 = vector.shape_cast %25 : vector<1x64x64xbf16> to vector<64x64xbf16>
    %cst_13 = arith.constant dense<0.000000e+00> : vector<128x64xf32>
    %27 = tpu.matmul %24, %26, %cst_13 {dimension_numbers = #tpu.dot_dimension_numbers<[1], [0], [0], [1], [0, 0, 1, 1], [], []>} : vector<128x64xbf16>, vector<64x64xbf16>, vector<128x64xf32> -> vector<128x64xf32>
    %28 = arith.addf %22, %27 : vector<128x64xf32>
    %29 = vector.extract_strided_slice %3 {offsets = [1, 1, 0], sizes = [8, 16, 64], strides = [1, 1, 1]} : vector<10x18x64xbf16> to vector<8x16x64xbf16>
    %30 = vector.shape_cast %29 : vector<8x16x64xbf16> to vector<128x64xbf16>
    %c4 = arith.constant 4 : index
    %c0_14 = arith.constant 0 : index
    %c0_15 = arith.constant 0 : index
    %31 = vector.load %arg2[%c4, %c0_14, %c0_15] : memref<9x64x64xbf16, #tpu.memory_space<vmem>>, vector<1x64x64xbf16>
    %32 = vector.shape_cast %31 : vector<1x64x64xbf16> to vector<64x64xbf16>
    %cst_16 = arith.constant dense<0.000000e+00> : vector<128x64xf32>
    %33 = tpu.matmul %30, %32, %cst_16 {dimension_numbers = #tpu.dot_dimension_numbers<[1], [0], [0], [1], [0, 0, 1, 1], [], []>} : vector<128x64xbf16>, vector<64x64xbf16>, vector<128x64xf32> -> vector<128x64xf32>
    %34 = arith.addf %28, %33 : vector<128x64xf32>
    %35 = vector.extract_strided_slice %3 {offsets = [1, 2, 0], sizes = [8, 16, 64], strides = [1, 1, 1]} : vector<10x18x64xbf16> to vector<8x16x64xbf16>
    %36 = vector.shape_cast %35 : vector<8x16x64xbf16> to vector<128x64xbf16>
    %c5 = arith.constant 5 : index
    %c0_17 = arith.constant 0 : index
    %c0_18 = arith.constant 0 : index
    %37 = vector.load %arg2[%c5, %c0_17, %c0_18] : memref<9x64x64xbf16, #tpu.memory_space<vmem>>, vector<1x64x64xbf16>
    %38 = vector.shape_cast %37 : vector<1x64x64xbf16> to vector<64x64xbf16>
    %cst_19 = arith.constant dense<0.000000e+00> : vector<128x64xf32>
    %39 = tpu.matmul %36, %38, %cst_19 {dimension_numbers = #tpu.dot_dimension_numbers<[1], [0], [0], [1], [0, 0, 1, 1], [], []>} : vector<128x64xbf16>, vector<64x64xbf16>, vector<128x64xf32> -> vector<128x64xf32>
    %40 = arith.addf %34, %39 : vector<128x64xf32>
    %41 = vector.extract_strided_slice %3 {offsets = [2, 0, 0], sizes = [8, 16, 64], strides = [1, 1, 1]} : vector<10x18x64xbf16> to vector<8x16x64xbf16>
    %42 = vector.shape_cast %41 : vector<8x16x64xbf16> to vector<128x64xbf16>
    %c6 = arith.constant 6 : index
    %c0_20 = arith.constant 0 : index
    %c0_21 = arith.constant 0 : index
    %43 = vector.load %arg2[%c6, %c0_20, %c0_21] : memref<9x64x64xbf16, #tpu.memory_space<vmem>>, vector<1x64x64xbf16>
    %44 = vector.shape_cast %43 : vector<1x64x64xbf16> to vector<64x64xbf16>
    %cst_22 = arith.constant dense<0.000000e+00> : vector<128x64xf32>
    %45 = tpu.matmul %42, %44, %cst_22 {dimension_numbers = #tpu.dot_dimension_numbers<[1], [0], [0], [1], [0, 0, 1, 1], [], []>} : vector<128x64xbf16>, vector<64x64xbf16>, vector<128x64xf32> -> vector<128x64xf32>
    %46 = arith.addf %40, %45 : vector<128x64xf32>
    %47 = vector.extract_strided_slice %3 {offsets = [2, 1, 0], sizes = [8, 16, 64], strides = [1, 1, 1]} : vector<10x18x64xbf16> to vector<8x16x64xbf16>
    %48 = vector.shape_cast %47 : vector<8x16x64xbf16> to vector<128x64xbf16>
    %c7 = arith.constant 7 : index
    %c0_23 = arith.constant 0 : index
    %c0_24 = arith.constant 0 : index
    %49 = vector.load %arg2[%c7, %c0_23, %c0_24] : memref<9x64x64xbf16, #tpu.memory_space<vmem>>, vector<1x64x64xbf16>
    %50 = vector.shape_cast %49 : vector<1x64x64xbf16> to vector<64x64xbf16>
    %cst_25 = arith.constant dense<0.000000e+00> : vector<128x64xf32>
    %51 = tpu.matmul %48, %50, %cst_25 {dimension_numbers = #tpu.dot_dimension_numbers<[1], [0], [0], [1], [0, 0, 1, 1], [], []>} : vector<128x64xbf16>, vector<64x64xbf16>, vector<128x64xf32> -> vector<128x64xf32>
    %52 = arith.addf %46, %51 : vector<128x64xf32>
    %53 = vector.extract_strided_slice %3 {offsets = [2, 2, 0], sizes = [8, 16, 64], strides = [1, 1, 1]} : vector<10x18x64xbf16> to vector<8x16x64xbf16>
    %54 = vector.shape_cast %53 : vector<8x16x64xbf16> to vector<128x64xbf16>
    %c8 = arith.constant 8 : index
    %c0_26 = arith.constant 0 : index
    %c0_27 = arith.constant 0 : index
    %55 = vector.load %arg2[%c8, %c0_26, %c0_27] : memref<9x64x64xbf16, #tpu.memory_space<vmem>>, vector<1x64x64xbf16>
    %56 = vector.shape_cast %55 : vector<1x64x64xbf16> to vector<64x64xbf16>
    %cst_28 = arith.constant dense<0.000000e+00> : vector<128x64xf32>
    %57 = tpu.matmul %54, %56, %cst_28 {dimension_numbers = #tpu.dot_dimension_numbers<[1], [0], [0], [1], [0, 0, 1, 1], [], []>} : vector<128x64xbf16>, vector<64x64xbf16>, vector<128x64xf32> -> vector<128x64xf32>
    %58 = arith.addf %52, %57 : vector<128x64xf32>
    %c0_29 = arith.constant 0 : index
    %c0_30 = arith.constant 0 : index
    %59 = vector.load %arg3[%c0_29, %c0_30] : memref<1x64xf32, #tpu.memory_space<vmem>>, vector<1x64xf32>
    %60 = vector.broadcast %59 : vector<1x64xf32> to vector<128x64xf32>
    %61 = arith.addf %58, %60 : vector<128x64xf32>
    %cst_31 = arith.constant 0.000000e+00 : f32
    %62 = vector.broadcast %cst_31 : f32 to vector<128x64xf32>
    %63 = arith.maximumf %61, %62 : vector<128x64xf32>
    %64 = arith.truncf %63 : vector<128x64xf32> to vector<128x64xbf16>
    %c0_32 = arith.constant 0 : index
    %c0_33 = arith.constant 0 : index
    %65 = vector.load %arg4[%c0_32, %c0_33] : memref<64x128xbf16, #tpu.memory_space<vmem>>, vector<64x128xbf16>
    %cst_34 = arith.constant dense<0.000000e+00> : vector<128x128xf32>
    %66 = tpu.matmul %64, %65, %cst_34 {dimension_numbers = #tpu.dot_dimension_numbers<[1], [0], [0], [1], [0, 0, 1, 1], [], []>} : vector<128x64xbf16>, vector<64x128xbf16>, vector<128x128xf32> -> vector<128x128xf32>
    %c0_35 = arith.constant 0 : index
    %c0_36 = arith.constant 0 : index
    %67 = vector.load %arg5[%c0_35, %c0_36] : memref<1x128xf32, #tpu.memory_space<vmem>>, vector<1x128xf32>
    %68 = vector.broadcast %67 : vector<1x128xf32> to vector<128x128xf32>
    %69 = arith.addf %66, %68 : vector<128x128xf32>
    %70 = vector.shape_cast %69 : vector<128x128xf32> to vector<8x16x128xf32>
    %c0_37 = arith.constant 0 : index
    %c0_38 = arith.constant 0 : index
    %c0_39 = arith.constant 0 : index
    %71 = vector.load %arg6[%c0_37, %c0_38, %c0_39] : memref<8x16x128xf32, #tpu.memory_space<vmem>>, vector<8x16x128xf32>
    tpu.vector_store %arg6[%c0_37, %c0_38, %c0_39], %70 {strides = array<i32>} : memref<8x16x128xf32, #tpu.memory_space<vmem>>, vector<8x16x128xf32>,
    return
  }
  func.func @transform_0(%arg0: i32) -> (i32, i32, i32) {
    %c0_i32 = arith.constant 0 : i32
    %c0_i32_0 = arith.constant 0 : i32
    %c0_i32_1 = arith.constant 0 : i32
    %c0_i32_2 = arith.constant 0 : i32
    return %c0_i32, %c0_i32_0, %c0_i32_1 : i32, i32, i32
  }
  func.func @transform_1(%arg0: i32) -> (i32, i32, i32) {
    %c0_i32 = arith.constant 0 : i32
    %c0_i32_0 = arith.constant 0 : i32
    %c0_i32_1 = arith.constant 0 : i32
    %c0_i32_2 = arith.constant 0 : i32
    return %c0_i32, %c0_i32_0, %c0_i32_1 : i32, i32, i32
  }
  func.func @transform_2(%arg0: i32) -> (i32, i32) {
    %c0_i32 = arith.constant 0 : i32
    %c0_i32_0 = arith.constant 0 : i32
    %c0_i32_1 = arith.constant 0 : i32
    return %c0_i32, %c0_i32_0 : i32, i32
  }
  func.func @transform_3(%arg0: i32) -> (i32, i32) {
    %c0_i32 = arith.constant 0 : i32
    %c0_i32_0 = arith.constant 0 : i32
    %c0_i32_1 = arith.constant 0 : i32
    return %c0_i32, %c0_i32_0 : i32, i32
  }
  func.func @transform_4(%arg0: i32) -> (i32, i32) {
    %c0_i32 = arith.constant 0 : i32
    %c0_i32_0 = arith.constant 0 : i32
    %c0_i32_1 = arith.constant 0 : i32
    return %c0_i32, %c0_i32_0 : i32, i32
  }
  func.func @transform_5(%arg0: i32) -> (i32, i32, i32) {
    %c0_i32 = arith.constant 0 : i32
    %c0_i32_0 = arith.constant 0 : i32
    %c0_i32_1 = arith.constant 0 : i32
    return %arg0, %c0_i32, %c0_i32_0 : i32, i32, i32
  }
}

</mosaic_0001>

<bundles_post_ra>
// kernel: pointpillars_forward.4
= control target key start
LH: loop header
LB: loop body
LE: loop exit
PB: predicated region body
PF: predicated region fallthrough
CT: control target
= control target key end

     0   :  { %s2967_s12 = smov 0   ;;  %s3677_s0 = inlined_call_operand.vmem [shape: bf16[18,18,64], index: 0, kind: input, shape index: {}]   ;;  %s3678_s1 = inlined_call_operand.vmem [shape: bf16[9,64,64], index: 1, kind: input, shape index: {}]   ;;  %s3679_s2 = inlined_call_operand.vmem [shape: f32[1,64], index: 2, kind: input, shape index: {}]   ;;  %s3680_s3 = inlined_call_operand.vmem [shape: bf16[16,16,64], index: 3, kind: output, shape index: {}]  }
   0x1 LB: > { %s2165_s13 = sadd.s32 4294967295, %s2945_s12   ;;  %p2168_p0 = scmp.ge.s32.totalorder %s2945_s12, 1  ;;  %s2945_s12 = sphi %s2967_s12, %s13_s12  }
   0x2   : > { %p127_p1 = scmp.lt.s32.totalorder %s2945_s12, 3 }
   0x4   : > { %p128_p2 = pnand %p2168_p0, %p127_p1 }
   0x5   : > { %v2892_v0 = vld [vmem:[%s3678_s1 + $0x20] sm:$0xff] (!%p128_p2)   ;;  %s2407_s18 = smul.u32 (!%p128_p2), 96, %s2165_s13  ;;  %v2894_v2 = vld [vmem:[%s3678_s1 + $0x28] sm:$0xff] (!%p128_p2)   ;;  %v2896_v4 = vld [vmem:[%s3678_s1 + $0x30] sm:$0xff] (!%p128_p2)   ;;  %vm197_vm0 = vsmask.f32 (!%p128_p2), 3328 }
   0x6   : > { %131 = sbr.rel (%p128_p2) target bundleno = 391 (0x187), region = 32  ;;  %v2981_v1 = vld [vmem:[%s3678_s1 + $0x80] sm:$0xff] (!%p128_p2)   ;;  %2532 = vmatprep.subr.bf16.mxu1 (!%p128_p2), %v2892_v0  ;;  %v2992_v3 = vld [vmem:[%s3678_s1 + $0x88] sm:$0xff] (!%p128_p2)   ;;  %v3002_v5 = vld [vmem:[%s3678_s1 + $0x90] sm:$0xff] (!%p128_p2)   ;;  %vm198_vm1 = vsmask.f32 (!%p128_p2), 7440 }
   0x7   : > { %2628 = vmatprep.subr.bf16.mxu0 (!%p128_p2), %v2981_v1  ;;  %2533 = vmatpush3.bf16.msra.mxu1 (!%p128_p2), %v2892_v0  ;;  %s3007_s29 = scalar_lea.vmem (!%p128_p2), %s3677_s0, %s2407_s18  ;;  %v2898_v6 = vld [vmem:[%s3678_s1 + $0x38] sm:$0xff] (!%p128_p2)   ;;  %vm449_vm2 = vcmask (!%p128_p2), 523264   ;;  %v3051_v29 = vld [vmem:[%s3678_s1] sm:$0xff] (!%p128_p2)   ;;  %vm3055_vm3 = vmor (!%p128_p2), %vm197_vm0, %vm198_vm1  ;;  %vm764_vm4 = vcmask (!%p128_p2), 1042432   ;;  %vm765_vm5 = vcmask (!%p128_p2), 1046532   ;;  %s2169_s17 = sshll.u32 (!%p128_p2), %s2165_s13, 3 }
   0x8   : > { %2629 = vmatpush3.bf16.msra.mxu0 (!%p128_p2), %v2981_v1  ;;  %2534 = vmatprep.subr.bf16.mxu1 (!%p128_p2), %v2894_v2  ;;  %v3015_v7 = vld [vmem:[%s3678_s1 + $0x98] sm:$0xff] (!%p128_p2)   ;;  %v3019_v8 = vld [vmem:[%s3007_s29] sm:$0xf] (!%p128_p2)  ;;  %v3022_v9 = vld [vmem:[%s3007_s29 + $0x4] sm:$0xf] (!%p128_p2)  ;;  %p148_p3 = scmp.lt.s32.totalorder (!%p128_p2), %s2169_s17, 15 }
   0x9   : > { %2630 = vmatprep.subr.bf16.mxu0 (!%p128_p2), %v2992_v3  ;;  %v3025_v10 = vld [vmem:[%s3007_s29 + $0x8] sm:$0x1] (!%p128_p2)  ;;  %v201_v11 = vshrl.u32 (!%p128_p2), %v3019_v8, 16  ;;  %v204_v12 = vshll.u32 (!%p128_p2), %v3019_v8, 16  ;;  %v210_v13 = vshll.u32 (!%p128_p2), %v3022_v9, 16  ;;  %v214_v14 = vshrl.u32 (!%p128_p2), %v3022_v9, 16  ;;  %vm3142_vm6 = vmor (!%p128_p2), %vm764_vm4, %vm765_vm5 }
   0xa   : > { %v220_v15 = vshll.u32 (!%p128_p2), %v3025_v10, 16  ;;  %v3034_v16 = vld [vmem:[%s3007_s29 + $0xc] sm:$0xf] (!%p128_p2)  ;;  %v3037_v19 = vld [vmem:[%s3007_s29 + $0x10] sm:$0xf] (!%p128_p2)  ;;  %v3079_v49 = vld [vmem:[%s3678_s1 + $0xa0] sm:$0xff] (!%p128_p2)  }
   0xb   : > { %2535 = vmatpush3.bf16.msra.mxu1 (!%p128_p2), %v2894_v2  ;;  %v203_v17 = vrot.slane (!%p128_p2), %v201_v11, 4  ;;  %v206_v18 = vrot.slane (!%p128_p2), %v204_v12, 5  ;;  %v3040_v20 = vld [vmem:[%s3007_s29 + $0x14] sm:$0x1] (!%p128_p2)  ;;  %v212_v21 = vrot.slane (!%p128_p2), %v210_v13, 5  ;;  %v216_v22 = vrot.slane (!%p128_p2), %v214_v14, 4 }
   0xc   : > { %2631 = vmatpush3.bf16.msra.mxu0 (!%p128_p2), %v2992_v3  ;;  %2536 = vmatprep.subr.bf16.mxu1 (!%p128_p2), %v2896_v4  ;;  %v222_v23 = vrot.slane (!%p128_p2), %v220_v15, 5  ;;  %v225_v24 = vshrl.u32 (!%p128_p2), %v3034_v16, 16  ;;  %v228_v26 = vshll.u32 (!%p128_p2), %v3034_v16, 16  ;;  %v234_v27 = vshll.u32 (!%p128_p2), %v3037_v19, 16  ;;  %v3061_v34 = vld [vmem:[%s3007_s29 + $0x18] sm:$0xf] (!%p128_p2) }
   0xd   : > { %2632 = vmatprep.subr.bf16.mxu0 %v3002_v5  ;;  %v207_v25 = vor.u32 %v206_v18, %v203_v17  ;;  %v238_v28 = vshrl.u32 %v3037_v19, 16  ;;  %v217_v31 = vor.u32 %v216_v22, %v212_v21  ;;  %v244_v33 = vshll.u32 %v3040_v20, 16  ;;  %v3064_v35 = vld [vmem:[%s3007_s29 + $0x1c] sm:$0xf]  ;;  %v3067_v40 = vld [vmem:[%s3007_s29 + $0x20] sm:$0x1] }
   0xe   : > { %v227_v32 = vrot.slane %v225_v24, 4  ;;  %v230_v37 = vrot.slane %v228_v26, 5  ;;  %v236_v38 = vrot.slane %v234_v27, 5  ;;  %v779_v43 = vrot.slane %v3040_v20, 5  ;;  %v3087_v58 = vld [vmem:[%s3007_s29 + $0x24] sm:$0xf] }
   0xf   : > { %2537 = vmatpush3.bf16.msra.mxu1 %v2896_v4  ;;  %v208_v36 = vrot.slane %v207_v25, 4  ;;  %v240_v39 = vrot.slane %v238_v28, 4  ;;  %v218_v41 = vrot.slane %v217_v31, 4  ;;  %v246_v42 = vrot.slane %v244_v33, 5  ;;  %v3092_v63 = vld [vmem:[%s3007_s29 + $0x28] sm:$0xf] }
  0x10   : > { %2633 = vmatpush3.bf16.msra.mxu0 %v3002_v5  ;;  %2538 = vmatprep.subr.bf16.mxu1 %v2898_v6  ;;  %v249_v44 = vshrl.u32 %v3061_v34, 16  ;;  %v231_v46 = vor.u32 %v230_v37, %v227_v32  ;;  %v252_v48 = vshll.u32 %v3061_v34, 16  ;;  %v258_v52 = vshll.u32 %v3064_v35, 16  ;;  %v3101_v11 = vld [vmem:[%s3007_s29 + $0x2c] sm:$0x1]  ;;  %s3686_s17 = smov (!%p148_p3, %s2169_s17), 15 }
  0x11   : > { %2634 = vmatprep.subr.bf16.mxu0 %v3015_v7  ;;  %v213_v45 = vsel %vm3055_vm3, %v208_v36, %v212_v21  ;;  %v241_v47 = vor.u32 %v240_v39, %v236_v38  ;;  %v223_v50 = vsel %vm3055_vm3, %v218_v41, %v222_v23  ;;  %v262_v53 = vshrl.u32 %v3064_v35, 16  ;;  %v2904_v12 = vld [vmem:[%s3678_s1 + $0x8] sm:$0xff]   ;;  %v3108_v18 = vld [vmem:[%s3007_s29 + $0x30] sm:$0xf]  ;;  %v3114_v25 = vld [vmem:[%s3007_s29 + $0x34] sm:$0xf] }
  0x12   : > { %v251_v51 = vrot.slane %v249_v44, 4  ;;  %v2183_v54 = vcombine.low %v213_v45, %v223_v50  ;;  %v232_v55 = vrot.slane %v231_v46, 4  ;;  %v254_v57 = vrot.slane %v252_v48, 5  ;;  %v3120_v31 = vld [vmem:[%s3007_s29 + $0x38] sm:$0x1]  ;;  %v2903_v41 = vld [vmem:[%s3678_s1 + $0xa8] sm:$0xff]  }
  0x13   : > { %2539 = vmatpush3.bf16.msra.mxu1 %v2898_v6  ;;  %v242_v56 = vrot.slane %v241_v47, 4  ;;  %v260_v59 = vrot.slane %v258_v52, 5  ;;  %v264_v60 = vrot.slane %v262_v53, 4  ;;  %v268_v61 = vshll.u32 %v3067_v40, 16  ;;  %v2907_v50 = vld [vmem:[%s3678_s1 + $0x10] sm:$0xff]   ;;  %s2406_s20 = sshll.u32 %s3686_s17, 3 }
  0x14   : > { %2635 = vmatpush3.bf16.msra.mxu0 %v3015_v7  ;;  %2556 = vmatprep.subr.bf16.mxu1 %v3051_v29  ;;  %v783_v62 = vrot.slane %v3064_v35, 5  ;;  %v237_v0 = vsel %vm3055_vm3, %v232_v55, %v236_v38  ;;  %v255_v4 = vor.u32 %v254_v57, %v251_v51  ;;  %v786_v6 = vrot.slane %v3067_v40, 5  ;;  %s3627_s22 = scalar_lea.vmem %s3680_s3, %s2406_s20 }
  0x15   : > { %2652 = vmatprep.subr.bf16.mxu0 %v3079_v49  ;;  %2540 = vmatprep.mubr.msk.bf16.mxu1 %vm449_vm2, %v2183_v54  ;;  %v247_v2 = vsel %vm3055_vm3, %v242_v56, %v246_v42  ;;  %v265_v14 = vor.u32 %v264_v60, %v260_v59  ;;  %v270_v15 = vrot.slane %v268_v61, 5  ;;  %v273_v17 = vshrl.u32 %v3087_v58, 16  ;;  %v3148_v56 = vld [vmem:[%s3007_s29 + $0x3c] sm:$0xf] }
  0x16   : > { %v2184_v13 = vcombine.low %v237_v0, %v247_v2  ;;  %v256_v21 = vrot.slane %v255_v4, 4  ;;  %v276_v22 = vshll.u32 %v3087_v58, 16  ;;  %v282_v23 = vshll.u32 %v3092_v63, 16  ;;  %v3156_v0 = vld [vmem:[%s3007_s29 + $0x40] sm:$0xf] }
  0x17   : > { %v286_v24 = vshrl.u32 %v3092_v63, 16  ;;  %v266_v26 = vrot.slane %v265_v14, 4  ;;  %v275_v27 = vrot.slane %v273_v17, 4  ;;  %v292_v28 = vshll.u32 %v3101_v11, 16  ;;  %v3160_v14 = vld [vmem:[%s3007_s29 + $0x44] sm:$0x1] }
  0x18   : > { %2636 = vmatprep.mubr.msk.bf16.mxu0 %vm449_vm2, %v2184_v13  ;;  %2541 = vmatmul.mubr.msk.bf16.vlgmr.msra.gmra.mrb[0].mxu1 %vm449_vm2, %v2184_v13  ;;  %v297_v32 = vshrl.u32 %v3108_v18, 16  ;;  %v261_v33 = vsel %vm3055_vm3, %v256_v21, %v260_v59  ;;  %v278_v36 = vrot.slane %v276_v22, 5  ;;  %v284_v37 = vrot.slane %v282_v23, 5 }
  0x19   : > { %2557 = vmatpush3.bf16.msra.mxu1 %v3051_v29  ;;  %v288_v38 = vrot.slane %v286_v24, 4  ;;  %v271_v39 = vsel %vm3055_vm3, %v266_v26, %v270_v15  ;;  %v294_v42 = vrot.slane %v292_v28, 5  ;;  %v300_v45 = vshll.u32 %v3108_v18, 16 }
  0x1a   : > { %2558 = vmatprep.subr.bf16.mxu1 %v2904_v12  ;;  %v299_v44 = vrot.slane %v297_v32, 4  ;;  %v3132_v46 = vcombine.low %v261_v33, %v271_v39  ;;  %v279_v47 = vor.u32 %v278_v36, %v275_v27  ;;  %v306_v48 = vshll.u32 %v3114_v25, 16  ;;  %v2906_v39 = vld [vmem:[%s3678_s1 + $0xb8] sm:$0xff]  }
  0x1b   : > { %v289_v29 = vor.u32 %v288_v38, %v284_v37  ;;  %v302_v51 = vrot.slane %v300_v45, 5  ;;  %v310_v52 = vshrl.u32 %v3114_v25, 16  ;;  %v316_v53 = vshll.u32 %v3120_v31, 16  ;;  %v2909_v38 = vld [vmem:[%s3678_s1 + $0x18] sm:$0xff]  }
  0x1c   : > { %v2224_v55 = vrot.slane %v3034_v16, 9  ;;  %2637 = vmatmul.mubr.msk.bf16.vlgmr.msra.gmra.mrb[0].mxu0 %vm449_vm2, %v3132_v46  ;;  %2544 = vmatprep.mubr.msk.bf16.mxu1 %vm449_vm2, %v3132_v46  ;;  %v280_v57 = vrot.slane %v279_v47, 4  ;;  %v308_v60 = vrot.slane %v306_v48, 5  ;;  %v776_v61 = vrot.slane %v3037_v19, 5  ;;  %v3201_v48 = vld [vmem:[%s3007_s29 + $0x4c] sm:$0xf] }
  0x1d   : > { %v290_v59 = vrot.slane %v289_v29, 4  ;;  %2653 = vmatpush3.bf16.msra.mxu0 %v3079_v49  ;;  %v303_v2 = vor.u32 %v302_v51, %v299_v44  ;;  %v312_v4 = vrot.slane %v310_v52, 4  ;;  %v318_v13 = vrot.slane %v316_v53, 5  ;;  %2559 = vmatpush3.bf16.msra.mxu1 %v2904_v12  ;;  %v2905_v49 = vld [vmem:[%s3678_s1 + $0xb0] sm:$0xff]  }
  0x1e   : > { %v321_v15 = vshrl.u32 %v3148_v56, 16  ;;  %2654 = vmatprep.subr.bf16.mxu0 %v2903_v41  ;;  %v285_v17 = vsel %vm3055_vm3, %v280_v57, %v284_v37  ;;  %v777_v22 = vsel %vm3142_vm6, %v2224_v55, %v776_v61  ;;  %v778_v12 = vrot.slane %v776_v61, 4  ;;  %2560 = vmatprep.subr.bf16.mxu1 %v2907_v50  ;;  %v3182_v37 = vld [vmem:[%s3007_s29 + $0x48] sm:$0xf] }
  0x1f   : > { %v295_v21 = vsel %vm3055_vm3, %v290_v59, %v294_v42  ;;  %v304_v24 = vrot.slane %v303_v2, 4  ;;  %v313_v26 = vor.u32 %v312_v4, %v308_v60  ;;  %v324_v32 = vshll.u32 %v3148_v56, 16  ;;  %v3215_v2 = vld [vmem:[%s3007_s29 + $0x50] sm:$0x1] }
  0x20   : > { %v3172_v23 = vcombine.low %v285_v17, %v295_v21  ;;  %v323_v27 = vrot.slane %v321_v15, 4  ;;  %v780_v28 = vsel %vm3142_vm6, %v778_v12, %v779_v43  ;;  %v330_v33 = vshll.u32 %v3156_v0, 16  ;;  %v3224_v17 = vld [vmem:[%s3007_s29 + $0x54] sm:$0xf]  ;;  %v3240_v12 = vld [vmem:[%s3007_s29 + $0x58] sm:$0xf] }
  0x21   : > { %v334_v36 = vshrl.u32 %v3156_v0, 16  ;;  %2655 = vmatpush3.bf16.msra.mxu0 %v2903_v41  ;;  %v309_v20 = vsel %vm3055_vm3, %v304_v24, %v308_v60  ;;  %v314_v43 = vrot.slane %v313_v26, 4  ;;  %v3194_v42 = vcombine.low %v777_v22, %v780_v28  ;;  %2561 = vmatpush3.bf16.msra.mxu1 %v2907_v50 }
  0x22   : > { %2640 = vmatprep.mubr.msk.bf16.mxu0 %vm449_vm2, %v3172_v23  ;;  %v340_v44 = vshll.u32 %v3160_v14, 16  ;;  %2545 = vmatmul.mubr.msk.bf16.gmra.mrb[4].mxu1 %vm449_vm2, %v3172_v23  ;;  %v326_v41 = vrot.slane %v324_v32, 5  ;;  %v332_v45 = vrot.slane %v330_v33, 5  ;;  %v2225_v29 = vrot.slane %v3061_v34, 9  ;;  %v3249_v32 = vld [vmem:[%s3007_s29 + $0x5c] sm:$0x1] }
  0x23   : > { %2656 = vmatprep.subr.bf16.mxu0 %v2905_v49  ;;  %v336_v47 = vrot.slane %v334_v36, 4  ;;  %v319_v51 = vsel %vm3055_vm3, %v314_v43, %v318_v13  ;;  %v785_v53 = vrot.slane %v783_v62, 4  ;;  %v345_v55 = vshrl.u32 %v3182_v37, 16  ;;  %2562 = vmatprep.subr.bf16.mxu1 %v2909_v38 }
  0x24   : > { %v342_v52 = vrot.slane %v340_v44, 5  ;;  %v3208_v57 = vcombine.low %v309_v20, %v319_v51  ;;  %v327_v59 = vor.u32 %v326_v41, %v323_v27  ;;  %v784_v61 = vsel %vm3142_vm6, %v2225_v29, %v783_v62  ;;  %v3229_v62 = vld [vmem:[%s3678_s1 + $0x40] sm:$0xff]  }
  0x25   : > { %v337_v60 = vor.u32 %v336_v47, %v332_v45  ;;  %2657 = vmatpush3.bf16.msra.mxu0 %v2905_v49  ;;  %v787_v50 = vsel %vm3142_vm6, %v785_v53, %v786_v6  ;;  %v347_v4 = vrot.slane %v345_v55, 4  ;;  %v348_v13 = vshll.u32 %v3182_v37, 16  ;;  %v2908_v49 = vld [vmem:[%s3678_s1 + $0xc0] sm:$0xff]   ;;  %2563 = vmatpush3.bf16.msra.mxu1 %v2909_v38 }
  0x26   : > { %v354_v15 = vshll.u32 %v3201_v48, 16  ;;  %2641 = vmatmul.mubr.msk.bf16.gmra.mrb[4].mxu0 %vm449_vm2, %v3208_v57  ;;  %2658 = vmatprep.subr.bf16.mxu0 %v2906_v39  ;;  %v328_v40 = vrot.slane %v327_v59, 4  ;;  %v3233_v6 = vcombine.low %v784_v61, %v787_v50  ;;  %v358_v22 = vshrl.u32 %v3201_v48, 16 }
  0x27   : > { %v338_v21 = vrot.slane %v337_v60, 4  ;;  %2548 = vmatprep.mubr.msk.bf16.mxu1 %vm449_vm2, %v3208_v57  ;;  %2660 = vmatprep.mubr.msk.bf16.mxu0 %vm449_vm2, %v3194_v42  ;;  %v350_v24 = vrot.slane %v348_v13, 5  ;;  %v364_v27 = vshll.u32 %v3215_v2, 16  ;;  %v2226_v28 = vrot.slane %v3087_v58, 9 }
  0x28   : > { %v356_v26 = vrot.slane %v354_v15, 5  ;;  %v333_v33 = vsel %vm3055_vm3, %v328_v40, %v332_v45  ;;  %v360_v20 = vrot.slane %v358_v22, 4  ;;  %v790_v43 = vrot.slane %v3092_v63, 5  ;;  %2580 = vmatprep.subr.bf16.mxu1 %v3229_v62 }
  0x29   : > { %v343_v36 = vsel %vm3055_vm3, %v338_v21, %v342_v52  ;;  %2659 = vmatpush3.bf16.msra.mxu0 %v2906_v39  ;;  %v351_v41 = vor.u32 %v350_v24, %v347_v4  ;;  %v366_v47 = vrot.slane %v364_v27, 5  ;;  %v793_v29 = vrot.slane %v3101_v11, 5  ;;  %v2910_v4 = vld [vmem:[%s3678_s1 + $0xc8] sm:$0xff]  }
  0x2a   : > { %v3256_v44 = vcombine.low %v333_v33, %v343_v36  ;;  %2676 = vmatprep.subr.bf16.mxu0 %v2908_v49  ;;  %v361_v51 = vor.u32 %v360_v20, %v356_v26  ;;  %v791_v45 = vsel %vm3142_vm6, %v2226_v28, %v790_v43  ;;  %v792_v53 = vrot.slane %v790_v43, 4 }
  0x2b   : > { %v369_v52 = vshrl.u32 %v3224_v17, 16  ;;  %v352_v38 = vrot.slane %v351_v41, 4  ;;  %v372_v39 = vshll.u32 %v3224_v17, 16  ;;  %v378_v55 = vshll.u32 %v3240_v12, 16 }
  0x2c   : > { %2549 = vmatmul.mubr.msk.bf16.gmra.mrb[8].mxu1 %vm449_vm2, %v3256_v44  ;;  %v382_v11 = vshrl.u32 %v3240_v12, 16  ;;  %v362_v59 = vrot.slane %v361_v51, 4  ;;  %v794_v60 = vsel %vm3142_vm6, %v792_v53, %v793_v29  ;;  %v388_v50 = vshll.u32 %v3249_v32, 16  ;;  %v2913_v29 = vld [vmem:[%s3678_s1 + $0xd0] sm:$0xff]  }
  0x2d   : > { %v371_v61 = vrot.slane %v369_v52, 4  ;;  %v357_v13 = vsel %vm3055_vm3, %v352_v38, %v356_v26  ;;  %v3276_v15 = vcombine.low %v791_v45, %v794_v60  ;;  %v374_v40 = vrot.slane %v372_v39, 5  ;;  %v3303_v39 = vld [vmem:[%s3007_s29 + $0x60] sm:$0xf] }
  0x2e   : > { %v380_v21 = vrot.slane %v378_v55, 5  ;;  %2661 = vmatmul.mubr.msk.bf16.vlgmr.msra.gmra.mrb[0].mxu0 %vm449_vm2, %v3233_v6  ;;  %v367_v22 = vsel %vm3055_vm3, %v362_v59, %v366_v47  ;;  %v384_v24 = vrot.slane %v382_v11, 4  ;;  %v390_v27 = vrot.slane %v388_v50, 5  ;;  %v3306_v55 = vld [vmem:[%s3007_s29 + $0x64] sm:$0xf] }
  0x2f   : > { %v2227_v28 = vrot.slane %v3108_v18, 9  ;;  %2677 = vmatpush3.bf16.msra.mxu0 %v2908_v49  ;;  %v3283_v33 = vcombine.low %v357_v13, %v367_v22  ;;  %2664 = vmatprep.mubr.msk.bf16.mxu0 %vm449_vm2, %v3276_v15  ;;  %v375_v26 = vor.u32 %v374_v40, %v371_v61  ;;  %v797_v36 = vrot.slane %v3114_v25, 5  ;;  %v3315_v50 = vld [vmem:[%s3007_s29 + $0x68] sm:$0x1]  ;;  %v2917_v13 = vld [vmem:[%s3678_s1 + $0xd8] sm:$0xff]  }
  0x30   : > { %v800_v20 = vrot.slane %v3120_v31, 5  ;;  %v385_v43 = vor.u32 %v384_v24, %v380_v21  ;;  %2678 = vmatprep.subr.bf16.mxu0 %v2910_v4  ;;  %v2228_v41 = vrot.slane %v3148_v56, 9  ;;  %v804_v47 = vrot.slane %v3156_v0, 5 }
  0x31   : > { %v807_v49 = vrot.slane %v3160_v14, 5  ;;  %2552 = vmatprep.mubr.msk.bf16.mxu1 %vm449_vm2, %v3283_v33  ;;  %v376_v51 = vrot.slane %v375_v26, 4  ;;  %v798_v31 = vsel %vm3142_vm6, %v2227_v28, %v797_v36  ;;  %v799_v45 = vrot.slane %v797_v36, 4 }
  0x32   : > { %v386_v53 = vrot.slane %v385_v43, 4  ;;  %v805_v52 = vsel %vm3142_vm6, %v2228_v41, %v804_v47  ;;  %v806_v38 = vrot.slane %v804_v47, 4  ;;  %v811_v14 = vrot.slane %v3201_v48, 5 }
  0x33   : > { %v381_v11 = vsel %vm3055_vm3, %v376_v51, %v380_v21  ;;  %v801_v59 = vsel %vm3142_vm6, %v799_v45, %v800_v20  ;;  %2679 = vmatpush3.bf16.msra.mxu0 %v2910_v4  ;;  %v2229_v60 = vrot.slane %v3182_v37, 9  ;;  %v814_v61 = vrot.slane %v3215_v2, 5  ;;  %v3358_v45 = vld [vmem:[%s3007_s29 + $0x6c] sm:$0xf] }
  0x34   : > { %v391_v40 = vsel %vm3055_vm3, %v386_v53, %v390_v27  ;;  %v3322_v22 = vcombine.low %v798_v31, %v801_v59  ;;  %v2203_v21 = vcombine.low %v3019_v8, %v3022_v9  ;;  %v808_v4 = vsel %vm3142_vm6, %v806_v38, %v807_v49  ;;  %2680 = vmatprep.subr.bf16.mxu0 %v2913_v29 }
  0x35   : > { %v3328_v24 = vcombine.low %v381_v11, %v391_v40  ;;  %v3330_v2 = vcombine.low %v805_v52, %v808_v4  ;;  %v813_v28 = vrot.slane %v811_v14, 4  ;;  %v2230_v26 = vrot.slane %v3224_v17, 9  ;;  %v3382_v40 = vld [vmem:[%s3007_s29 + $0x70] sm:$0xf] }
  0x36   : > { %v772_v36 = vrot.slane %v3025_v10, 5  ;;  %2665 = vmatmul.mubr.msk.bf16.gmra.mrb[4].mxu0 %vm449_vm2, %v3322_v22  ;;  %v818_v27 = vrot.slane %v3240_v12, 5  ;;  %v821_v20 = vrot.slane %v3249_v32, 5  ;;  %v812_v43 = vsel %vm3142_vm6, %v2229_v60, %v811_v14  ;;  %v3351_v32 = vld [vmem:[%s3678_s1 + $0xe0] sm:$0xff]  }
  0x37   : > { %2553 = vmatmul.mubr.msk.bf16.gmra.mrb[12].mxu1 %vm449_vm2, %v3328_v24  ;;  %2668 = vmatprep.mubr.msk.bf16.mxu0 %vm449_vm2, %v3330_v2  ;;  %v815_v10 = vsel %vm3142_vm6, %v813_v28, %v814_v61  ;;  %v2301_v41 = vrot.slane %v3303_v39, 9  ;;  %v1350_v47 = vrot.slane %v3306_v55, 5  ;;  %v1353_v31 = vrot.slane %v3315_v50, 5  ;;  %v188_v28 = vld [vmem:[%s3007_s29 + $0x74] sm:$0x1] }
  0x38   : > { %2564 = vmatprep.mubr.msk.bf16.mxu1 %vm449_vm2, %v2203_v21  ;;  %2681 = vmatpush3.bf16.msra.mxu0 %v2913_v29  ;;  %v819_v49 = vsel %vm3142_vm6, %v2230_v26, %v818_v27  ;;  %v820_v51 = vrot.slane %v818_v27, 4  ;;  %v3360_v53 = vcombine.low %v812_v43, %v815_v10  ;;  %v2223_v38 = vrot.slane %v3019_v8, 9  ;;  %v2920_v27 = vld [vmem:[%s3678_s1 + $0x50] sm:$0xff]  }
  0x39   : > { %2682 = vmatprep.subr.bf16.mxu0 %v2917_v13  ;;  %v769_v14 = vrot.slane %v3022_v9, 5  ;;  %v3368_v29 = vcombine.low %v3034_v16, %v3037_v19  ;;  %v1352_v59 = vrot.slane %v1350_v47, 4  ;;  %v1662_v60 = vshrl.u32 %v3358_v45, 16  ;;  %v2916_v19 = vld [vmem:[%s3678_s1 + $0x48] sm:$0xff]  }
  0x3a   : > { %v822_v52 = vsel %vm3142_vm6, %v820_v51, %v821_v20  ;;  %v3375_v61 = vcombine.low %v3061_v34, %v3064_v35  ;;  %v1665_v16 = vshll.u32 %v3358_v45, 16  ;;  %v1675_v34 = vshrl.u32 %v3382_v40, 16 }
  0x3b   : > { %v3370_v11 = vcombine.low %v819_v49, %v822_v52  ;;  %v3379_v8 = vsel %vm3142_vm6, %v2223_v38, %v769_v14  ;;  %v771_v9 = vrot.slane %v769_v14, 4  ;;  %v1354_v21 = vsel %vm3142_vm6, %v1352_v59, %v1353_v31  ;;  %v2924_v59 = vld [vmem:[%s3678_s1 + $0x58] sm:$0xff]  }
  0x3c   : > { %2683 = vmatpush3.bf16.msra.mxu0 %v2917_v13  ;;  %v1351_v13 = vsel %vm3142_vm6, %v2301_v41, %v1350_v47  ;;  %v1664_v26 = vrot.slane %v1662_v60, 4  ;;  %v1671_v20 = vshll.u32 %v3382_v40, 16  ;;  %v1677_v43 = vrot.slane %v1675_v34, 4 }
  0x3d   : > { %2700 = vmatprep.subr.bf16.mxu0 %v3351_v32  ;;  %v3394_v35 = vsel %vm3142_vm6, %v771_v9, %v772_v36  ;;  %v1667_v36 = vrot.slane %v1665_v16, 5  ;;  %v3414_v10 = vcombine.low %v1351_v13, %v1354_v21  ;;  %v1681_v47 = vshll.u32 %v188_v28, 16  ;;  %v2925_v21 = vld [vmem:[%s3678_s1 + $0xe8] sm:$0xff]  }
  0x3e   : > { %2669 = vmatmul.mubr.msk.bf16.gmra.mrb[8].mxu0 %vm449_vm2, %v3360_v53  ;;  %v2239_v4 = vcombine.low %v3379_v8, %v3394_v35  ;;  %v2365_v49 = vrot.slane %v3358_v45, 9  ;;  %v1673_v51 = vrot.slane %v1671_v20, 5  ;;  %v1840_v31 = vrot.slane %v3382_v40, 5 }
  0x3f   : > { %2565 = vmatmul.mubr.msk.bf16.vlgmr.msra.gmra.mrb[0].mxu1 %vm449_vm2, %v3368_v29  ;;  %2672 = vmatprep.mubr.msk.bf16.mxu0 %vm449_vm2, %v3370_v11  ;;  %v1668_v41 = vor.u32 %v1667_v36, %v1664_v26  ;;  %v1843_v52 = vrot.slane %v188_v28, 5  ;;  %v3424_v38 = vcombine.low %v3108_v18, %v3114_v25  ;;  %v1683_v8 = vrot.slane %v1681_v47, 5 }
  0x40   : > { %2581 = vmatpush3.bf16.msra.mxu1 %v3229_v62  ;;  %2568 = vmatprep.mubr.msk.bf16.mxu1 %vm449_vm2, %v3375_v61  ;;  %v3419_v62 = vcombine.low %v3087_v58, %v3092_v63  ;;  %v1678_v60 = vor.u32 %v1677_v43, %v1673_v51  ;;  %v3431_v58 = vsel %vm3142_vm6, %v2365_v49, %v1840_v31  ;;  %v1842_v63 = vrot.slane %v1840_v31, 4 }
  0x41   : > { %2582 = vmatprep.subr.bf16.mxu1 %v2916_v19  ;;  %v1669_v14 = vrot.slane %v1668_v41, 4  ;;  %v3458_v54 = vcombine.low %v3148_v56, %v3156_v0  ;;  %v3462_v13 = vcombine.low %v3182_v37, %v3201_v48  ;;  %v2927_v56 = vld [vmem:[%s3678_s1 + $0xf0] sm:$0xff]   ;;  %v3481_v0 = vcombine.low %v3224_v17, %v3240_v12  ;;  %v2931_v37 = vld [vmem:[%s3678_s1 + $0xf8] sm:$0xff]   ;;  %v2933_v48 = vld [vmem:[%s3678_s1 + $0x100] sm:$0xff]  }
  0x42   : > { %v1679_v25 = vrot.slane %v1678_v60, 4  ;;  %v3443_v9 = vsel %vm3142_vm6, %v1842_v63, %v1843_v52  ;;  %v3498_v17 = vcombine.low %v3303_v39, %v3306_v55  ;;  %v2929_v12 = vld [vmem:[%s3678_s1 + $0x68] sm:$0xff]   ;;  %v1181_v28 = vshll.u32 %v3306_v55, 16 }
  0x43   : > { %v1674_v18 = vsel %vm3055_vm3, %v1669_v14, %v1673_v51  ;;  %v2374_v16 = vcombine.low %v3431_v58, %v3443_v9  ;;  %v1185_v26 = vshrl.u32 %v3306_v55, 16  ;;  %v2937_v51 = vld [vmem:[%s3678_s1 + $0x118] sm:$0xff]   ;;  %vm2100_vm7 = vcmask 519168  }
  0x44   : > { %2583 = vmatpush3.bf16.msra.mxu1 %v2916_v19  ;;  %v2926_v19 = vld [vmem:[%s3678_s1 + $0x60] sm:$0xff]   ;;  %v1684_v34 = vsel %vm3055_vm3, %v1679_v25, %v1683_v8  ;;  %v1183_v20 = vrot.slane %v1181_v28, 5 }
  0x45   : > { %2584 = vmatprep.subr.bf16.mxu1 %v2920_v27  ;;  %v3454_v35 = vcombine.low %v1674_v18, %v1684_v34  ;;  %v1187_v43 = vrot.slane %v1185_v26, 4 }
  0x46   : > { %2673 = vmatmul.mubr.msk.bf16.gmra.mrb[12].mxu0 %vm449_vm2, %v3414_v10 }
  0x47   : > { %2569 = vmatmul.mubr.msk.bf16.gmra.mrb[4].mxu1 %vm449_vm2, %v3419_v62  ;;  %2684 = vmatprep.mubr.msk.bf16.mxu0 %vm449_vm2, %v3375_v61  ;;  %v1188_v41 = vor.u32 %v1187_v43, %v1183_v20 }
  0x48   : > { %2572 = vmatprep.mubr.msk.bf16.mxu1 %vm449_vm2, %v3424_v38  ;;  %2585 = vmatpush3.bf16.msra.mxu1 %v2920_v27 }
  0x49   : > { %2586 = vmatprep.subr.bf16.mxu1 %v2924_v59  ;;  %v1189_v47 = vrot.slane %v1188_v41, 4 }
  0x4c   : > { %2587 = vmatpush3.bf16.msra.mxu1 %v2924_v59 }
  0x4d   : > { %2604 = vmatprep.subr.bf16.mxu1 %v2926_v19 }
  0x4e   : > { %2685 = vmatmul.mubr.msk.bf16.vlgmr.msra.gmra.mrb[0].mxu0 %vm449_vm2, %v3419_v62 }
  0x4f   : > { %2573 = vmatmul.mubr.msk.bf16.gmra.mrb[8].mxu1 %vm449_vm2, %v3458_v54  ;;  %2701 = vmatpush3.bf16.msra.mxu0 %v3351_v32  ;;  %v2932_v32 = vld [vmem:[%s3678_s1 + $0x70] sm:$0xff]  }
  0x50   : > { %2576 = vmatprep.mubr.msk.bf16.mxu1 %vm449_vm2, %v3462_v13  ;;  %2688 = vmatprep.mubr.msk.bf16.mxu0 %vm449_vm2, %v3424_v38 }
  0x51   : > { %2702 = vmatprep.subr.bf16.mxu0 %v2925_v21 }
  0x53   : > { %2703 = vmatpush3.bf16.msra.mxu0 %v2925_v21 }
  0x54   : > { %2704 = vmatprep.subr.bf16.mxu0 %v2927_v56 }
  0x56   : > { %2689 = vmatmul.mubr.msk.bf16.gmra.mrb[4].mxu0 %vm449_vm2, %v3458_v54 }
  0x57   : > { %2577 = vmatmul.mubr.msk.bf16.gmra.mrb[12].mxu1 %vm449_vm2, %v3481_v0  ;;  %2692 = vmatprep.mubr.msk.bf16.mxu0 %vm449_vm2, %v3462_v13 }
  0x58   : > { %2588 = vmatprep.mubr.msk.bf16.mxu1 %vm449_vm2, %v2239_v4  ;;  %2705 = vmatpush3.bf16.msra.mxu0 %v2927_v56  ;;  %v2331_v4 = vcombine.low %v3358_v45, %v3382_v40  ;;  %v1172_v45 = vshrl.u32 %v3303_v39, 16  ;;  %v1175_v40 = vshll.u32 %v3303_v39, 16  ;;  %v2936_v39 = vld [vmem:[%s3678_s1 + $0x110] sm:$0xff]  }
  0x59   : > { %2706 = vmatprep.subr.bf16.mxu0 %v2931_v37 }
  0x5a   : > { %v1174_v36 = vrot.slane %v1172_v45, 4  ;;  %v1177_v27 = vrot.slane %v1175_v40, 5 }
  0x5c   : > { %2707 = vmatpush3.bf16.msra.mxu0 %v2931_v37  ;;  %v1178_v55 = vor.u32 %v1177_v27, %v1174_v36 }
  0x5d   : > { %2724 = vmatprep.subr.bf16.mxu0 %v2933_v48 }
  0x5e   : > { %2693 = vmatmul.mubr.msk.bf16.gmra.mrb[8].mxu0 %vm449_vm2, %v3481_v0 }
  0x5f   : > { %2589 = vmatmul.mubr.msk.bf16.vlgmr.msra.gmra.mrb[0].mxu1 %vm449_vm2, %v3194_v42  ;;  %2696 = vmatprep.mubr.msk.bf16.mxu0 %vm449_vm2, %v3498_v17  ;;  %v2934_v42 = vld [vmem:[%s3678_s1 + $0x78] sm:$0xff]  }
  0x60   : > { %2605 = vmatpush3.bf16.msra.mxu1 %v2926_v19  ;;  %2592 = vmatprep.mubr.msk.bf16.mxu1 %vm449_vm2, %v3233_v6 }
  0x61   : > { %2606 = vmatprep.subr.bf16.mxu1 %v2929_v12 }
  0x64   : > { %2607 = vmatpush3.bf16.msra.mxu1 %v2929_v12 }
  0x65   : > { %2608 = vmatprep.subr.bf16.mxu1 %v2932_v32 }
  0x66   : > { %2697 = vmatmul.mubr.msk.bf16.gmra.mrb[12].mxu0 %vm449_vm2, %v2331_v4 }
  0x67   : > { %2593 = vmatmul.mubr.msk.bf16.gmra.mrb[4].mxu1 %vm449_vm2, %v3276_v15  ;;  %2708 = vmatprep.mubr.msk.bf16.mxu0 %vm449_vm2, %v3132_v46  ;;  %v2935_v46 = vld [vmem:[%s3678_s1 + $0x108] sm:$0xff]  }
  0x68   : > { %2596 = vmatprep.mubr.msk.bf16.mxu1 %vm449_vm2, %v3322_v22  ;;  %2609 = vmatpush3.bf16.msra.mxu1 %v2932_v32 }
  0x69   : > { %2610 = vmatprep.subr.bf16.mxu1 %v2934_v42 }
  0x6c   : > { %2611 = vmatpush3.bf16.msra.mxu1 %v2934_v42 }
  0x6d   : > { %2748 = vmatprep.subr.bf16.mxu1 %v2981_v1  ;;  %v1191_v1 = vshll.u32 %v3315_v50, 16 }
  0x6e   : > { %2709 = vmatmul.mubr.msk.bf16.vlgmr.msra.gmra.mrb[0].mxu0 %vm449_vm2, %v3172_v23  ;;  %v1179_v23 = vrot.slane %v1178_v55, 4 }
  0x6f   : > { %2597 = vmatmul.mubr.msk.bf16.gmra.mrb[8].mxu1 %vm449_vm2, %v3330_v2  ;;  %2725 = vmatpush3.bf16.msra.mxu0 %v2933_v48  ;;  %v1193_v49 = vrot.slane %v1191_v1, 5 }
  0x70   : > { %2600 = vmatprep.mubr.msk.bf16.mxu1 %vm449_vm2, %v3360_v53  ;;  %2712 = vmatprep.mubr.msk.bf16.mxu0 %vm449_vm2, %v3208_v57  ;;  %v1184_v57 = vsel %vm3055_vm3, %v1179_v23, %v1183_v20 }
  0x71   : > { %2726 = vmatprep.subr.bf16.mxu0 %v2935_v46  ;;  %v1194_v50 = vsel %vm3055_vm3, %v1189_v47, %v1193_v49 }
  0x72   : > { %v2288_v31 = vcombine.low %v1184_v57, %v1194_v50 }
  0x73   : > { %2727 = vmatpush3.bf16.msra.mxu0 %v2935_v46 }
  0x74   : > { %2728 = vmatprep.subr.bf16.mxu0 %v2936_v39 }
  0x76   : > { %2713 = vmatmul.mubr.msk.bf16.gmra.mrb[4].mxu0 %vm449_vm2, %v3256_v44 }
  0x77   : > { %2601 = vmatmul.mubr.msk.bf16.gmra.mrb[12].mxu1 %vm449_vm2, %v3370_v11  ;;  %2716 = vmatprep.mubr.msk.bf16.mxu0 %vm449_vm2, %v3283_v33 }
  0x78   : > { %2612 = vmatprep.mubr.msk.bf16.mxu1 %vm449_vm2, %v3368_v29  ;;  %2729 = vmatpush3.bf16.msra.mxu0 %v2936_v39  ;;  %v2938_v29 = vld [vmem:[%s3678_s1 + $0x80] sm:$0xff]  }
  0x79   : > { %2730 = vmatprep.subr.bf16.mxu0 %v2937_v51 }
  0x7c   : > { %2731 = vmatpush3.bf16.msra.mxu0 %v2937_v51 }
  0x7e   : > { %2717 = vmatmul.mubr.msk.bf16.gmra.mrb[8].mxu0 %vm449_vm2, %v3328_v24 }
  0x7f   : > { %2613 = vmatmul.mubr.msk.bf16.vlgmr.msra.gmra.mrb[0].mxu1 %vm449_vm2, %v3375_v61  ;;  %2720 = vmatprep.mubr.msk.bf16.mxu0 %vm449_vm2, %v2288_v31 }
  0x80   : > { %2752 = vmatpush3.bf16.msra.mxu1 %v2938_v29  ;;  %2616 = vmatprep.mubr.msk.bf16.mxu1 %vm449_vm2, %v3419_v62 }
  0x81   : > { %2749 = vmatprep.subr.bf16.mxu1 %v2992_v3 }
  0x84   : > { %2753 = vmatpush3.bf16.msra.mxu1 %v2992_v3 }
  0x85   : > { %2750 = vmatprep.subr.bf16.mxu1 %v3002_v5 }
  0x86   : > { %2721 = vmatmul.mubr.msk.bf16.gmra.mrb[12].mxu0 %vm449_vm2, %v3454_v35 }
  0x87   : > { %2617 = vmatmul.mubr.msk.bf16.gmra.mrb[4].mxu1 %vm449_vm2, %v3424_v38  ;;  %2732 = vmatprep.mubr.msk.bf16.mxu0 %vm449_vm2, %v3233_v6 }
  0x88   : > { %2620 = vmatprep.mubr.msk.bf16.mxu1 %vm449_vm2, %v3458_v54  ;;  %2754 = vmatpush3.bf16.msra.mxu1 %v3002_v5 }
  0x89   : > { %2751 = vmatprep.subr.bf16.mxu1 %v3015_v7 }
  0x8c   : > { %2755 = vmatpush3.bf16.msra.mxu1 %v3015_v7 }
  0x8e   : > { %2733 = vmatmul.mubr.msk.bf16.vlgmr.msra.gmra.mrb[0].mxu0 %vm449_vm2, %v3276_v15 }
  0x8f   : > { %2621 = vmatmul.mubr.msk.bf16.gmra.mrb[8].mxu1 %vm449_vm2, %v3462_v13  ;;  %2736 = vmatprep.mubr.msk.bf16.mxu0 %vm449_vm2, %v3322_v22 }
  0x90   : > { %2624 = vmatprep.mubr.msk.bf16.mxu1 %vm449_vm2, %v3481_v0 }
  0x96   : > { %2737 = vmatmul.mubr.msk.bf16.gmra.mrb[4].mxu0 %vm449_vm2, %v3330_v2 }
  0x97   : > { %2625 = vmatmul.mubr.msk.bf16.gmra.mrb[12].mxu1 %vm449_vm2, %v3498_v17  ;;  %2740 = vmatprep.mubr.msk.bf16.mxu0 %vm449_vm2, %v3360_v53 }
  0x98   : > { %2644 = vmatprep.mubr.msk.bf16.mxu1 %vm449_vm2, %v3256_v44 }
  0x9e   : > { %2741 = vmatmul.mubr.msk.bf16.gmra.mrb[8].mxu0 %vm449_vm2, %v3370_v11 }
  0x9f   : > { %2645 = vmatmul.mubr.msk.bf16.vlgmr.msra.gmra.mrb[8].mxu1 %vm449_vm2, %v3283_v33  ;;  %2744 = vmatprep.mubr.msk.bf16.mxu0 %vm449_vm2, %v3414_v10 }
  0xa0   : > { %2648 = vmatprep.mubr.msk.bf16.mxu1 %vm449_vm2, %v3328_v24  ;;  %v3619_v24 = vld [vmem:[%s3679_s2] ss:$0 sm:$0xff] }
  0xa6   : > { %2745 = vmatmul.mubr.msk.bf16.gmra.mrb[12].mxu0 %vm449_vm2, %v2374_v16 }
  0xa7   : > { %2649 = vmatmul.mubr.msk.bf16.gmra.mrb[12].mxu1 %vm449_vm2, %v2288_v31 }
 0x152   : > { %v2614_v3 = vpop.f32.mrb[0].mxu1 }
 0x153   : > { %v1092_v5 = vpop.f32.mrb[1].mxu1 }
 0x154   : > { %v2615_v7 = vpop.f32.mrb[2].mxu1 }
 0x155   : > { %v1095_v30 = vpop.f32.mrb[3].mxu1 }
 0x15a   : > { %v2618_v6 = vpop.f32.mrb[4].mxu1 }
 0x15b   : > { %v1108_v44 = vpop.f32.mrb[5].mxu1 }
 0x15c   : > { %v2619_v15 = vpop.f32.mrb[6].mxu1 }
 0x15d   : > { %v1111_v33 = vpop.f32.mrb[7].mxu1 }
 0x161   : > { %v2734_v22 = vpop.f32.mrb[0].mxu0 }
 0x162   : > { %v2756_v2 = vadd.f32 %v2734_v22, %v2614_v3  ;;  %v1918_v53 = vpop.f32.mrb[1].mxu0 }
 0x163   : > { %v2757_v11 = vadd.f32 %v1918_v53, %v1092_v5  ;;  %v2735_v61 = vpop.f32.mrb[2].mxu0 }
 0x164   : > { %v2006_v10 = vadd.f32 %v2756_v2, %v3619_v24  ;;  %v2758_v62 = vadd.f32 %v2735_v61, %v2615_v7  ;;  %v1921_v52 = vpop.f32.mrb[3].mxu0 }
 0x165   : > { %v2004_v38 = vadd.f32 %v2757_v11, %v3619_v24  ;;  %v2759_v14 = vadd.f32 %v1921_v52, %v1095_v30 }
 0x166   : > { %v2022_v59 = vmax.f32 %v2006_v10, 0.0  ;;  %v2007_v60 = vadd.f32 %v2758_v62, %v3619_v24 }
 0x167   : > { %v2020_v8 = vmax.f32 %v2004_v38, 0.0  ;;  %v2005_v58 = vadd.f32 %v2759_v14, %v3619_v24 }
 0x168   : > { %v2410_v63 = vpack.c.bf16 %v2022_v59, %v2022_v59  ;;  %v2023_v18 = vmax.f32 %v2007_v60, 0.0 }
 0x169   : > { %v2408_v25 = vpack.c.bf16 %v2020_v8, %v2020_v8  ;;  %v2021_v9 = vmax.f32 %v2005_v58, 0.0  ;;  %v2738_v16 = vpop.f32.mrb[4].mxu0 }
 0x16a   : > { %2103 = vst.msk [vmem:[%s3627_s22 + $0x8] sm:$0xf] %vm2100_vm7, %v2410_v63  ;;  %v2411_v19 = vpack.c.bf16 %v2023_v18, %v2023_v18  ;;  %v2760_v34 = vadd.f32 %v2738_v16, %v2618_v6  ;;  %v1934_v35 = vpop.f32.mrb[5].mxu0 }
 0x16b   : > { %2101 = vst.msk [vmem:[%s3627_s22] sm:$0xf] %vm2100_vm7, %v2408_v25  ;;  %v2409_v54 = vpack.c.bf16 %v2021_v9, %v2021_v9  ;;  %v2761_v13 = vadd.f32 %v1934_v35, %v1108_v44  ;;  %v2739_v21 = vpop.f32.mrb[6].mxu0 }
 0x16c   : > { %2104 = vst.msk [vmem:[%s3627_s22 + $0xc] sm:$0xf] %vm2100_vm7, %v2411_v19  ;;  %v2010_v56 = vadd.f32 %v2760_v34, %v3619_v24  ;;  %v2762_v0 = vadd.f32 %v2739_v21, %v2619_v15  ;;  %v1937_v37 = vpop.f32.mrb[7].mxu0 }
 0x16d   : > { %2102 = vst.msk [vmem:[%s3627_s22 + $0x4] sm:$0xf] %vm2100_vm7, %v2409_v54  ;;  %v2008_v48 = vadd.f32 %v2761_v13, %v3619_v24  ;;  %v2763_v17 = vadd.f32 %v1937_v37, %v1111_v33 }
 0x16e   : > { %v2026_v12 = vmax.f32 %v2010_v56, 0.0  ;;  %v2011_v32 = vadd.f32 %v2762_v0, %v3619_v24 }
 0x16f   : > { %v2024_v4 = vmax.f32 %v2008_v48, 0.0  ;;  %v2009_v42 = vadd.f32 %v2763_v17, %v3619_v24 }
 0x170   : > { %v2414_v45 = vpack.c.bf16 %v2026_v12, %v2026_v12  ;;  %v2027_v40 = vmax.f32 %v2011_v32, 0.0 }
 0x171   : > { %v2412_v28 = vpack.c.bf16 %v2024_v4, %v2024_v4  ;;  %v2025_v26 = vmax.f32 %v2009_v42, 0.0  ;;  %v2742_v36 = vpop.f32.mrb[8].mxu0 }
 0x172   : > { %2107 = vst.msk [vmem:[%s3627_s22 + $0x18] sm:$0xf] %vm2100_vm7, %v2414_v45  ;;  %v2415_v27 = vpack.c.bf16 %v2027_v40, %v2027_v40  ;;  %v2646_v20 = vpop.f32.mrb[8].mxu1  ;;  %v1950_v43 = vpop.f32.mrb[9].mxu0 }
 0x173   : > { %2105 = vst.msk [vmem:[%s3627_s22 + $0x10] sm:$0xf] %vm2100_vm7, %v2412_v28  ;;  %v2413_v46 = vpack.c.bf16 %v2025_v26, %v2025_v26  ;;  %v2764_v39 = vadd.f32 %v2742_v36, %v2646_v20  ;;  %v1300_v55 = vpop.f32.mrb[9].mxu1  ;;  %v2743_v41 = vpop.f32.mrb[10].mxu0 }
 0x174   : > { %2108 = vst.msk [vmem:[%s3627_s22 + $0x1c] sm:$0xf] %vm2100_vm7, %v2415_v27  ;;  %v2765_v1 = vadd.f32 %v1950_v43, %v1300_v55  ;;  %v2647_v23 = vpop.f32.mrb[10].mxu1  ;;  %v1953_v47 = vpop.f32.mrb[11].mxu0 }
 0x175   : > { %2106 = vst.msk [vmem:[%s3627_s22 + $0x14] sm:$0xf] %vm2100_vm7, %v2413_v46  ;;  %v2014_v49 = vadd.f32 %v2764_v39, %v3619_v24  ;;  %v2766_v51 = vadd.f32 %v2743_v41, %v2647_v23  ;;  %v1303_v57 = vpop.f32.mrb[11].mxu1 }
 0x176   : > { %v2012_v50 = vadd.f32 %v2765_v1, %v3619_v24  ;;  %v2767_v31 = vadd.f32 %v1953_v47, %v1303_v57 }
 0x177   : > { %v2030_v29 = vmax.f32 %v2014_v49, 0.0  ;;  %v2015_v3 = vadd.f32 %v2766_v51, %v3619_v24 }
 0x178   : > { %v2028_v5 = vmax.f32 %v2012_v50, 0.0  ;;  %v2013_v7 = vadd.f32 %v2767_v31, %v3619_v24 }
 0x179   : > { %v2418_v30 = vpack.c.bf16 %v2030_v29, %v2030_v29  ;;  %v2031_v6 = vmax.f32 %v2015_v3, 0.0  ;;  %v2746_v44 = vpop.f32.mrb[12].mxu0 }
 0x17a   : > { %v2416_v15 = vpack.c.bf16 %v2028_v5, %v2028_v5  ;;  %v2029_v33 = vmax.f32 %v2013_v7, 0.0  ;;  %v2650_v22 = vpop.f32.mrb[12].mxu1  ;;  %v1966_v2 = vpop.f32.mrb[13].mxu0 }
 0x17b   : > { %2111 = vst.msk [vmem:[%s3627_s22 + $0x28] sm:$0xf] %vm2100_vm7, %v2418_v30  ;;  %v2419_v53 = vpack.c.bf16 %v2031_v6, %v2031_v6  ;;  %v2768_v11 = vadd.f32 %v2746_v44, %v2650_v22  ;;  %v1316_v61 = vpop.f32.mrb[13].mxu1  ;;  %v2747_v10 = vpop.f32.mrb[14].mxu0 }
 0x17c   : > { %2109 = vst.msk [vmem:[%s3627_s22 + $0x20] sm:$0xf] %vm2100_vm7, %v2416_v15  ;;  %v2417_v62 = vpack.c.bf16 %v2029_v33, %v2029_v33  ;;  %v2769_v52 = vadd.f32 %v1966_v2, %v1316_v61  ;;  %v2651_v38 = vpop.f32.mrb[14].mxu1  ;;  %v1969_v14 = vpop.f32.mrb[15].mxu0 }
 0x17d   : > { %2112 = vst.msk [vmem:[%s3627_s22 + $0x2c] sm:$0xf] %vm2100_vm7, %v2419_v53  ;;  %v2018_v59 = vadd.f32 %v2768_v11, %v3619_v24  ;;  %v2770_v60 = vadd.f32 %v2747_v10, %v2651_v38  ;;  %v1319_v8 = vpop.f32.mrb[15].mxu1 }
 0x17e   : > { %2110 = vst.msk [vmem:[%s3627_s22 + $0x24] sm:$0xf] %vm2100_vm7, %v2417_v62  ;;  %v2016_v58 = vadd.f32 %v2769_v52, %v3619_v24  ;;  %v2771_v63 = vadd.f32 %v1969_v14, %v1319_v8 }
 0x17f   : > { %v2034_v18 = vmax.f32 %v2018_v59, 0.0  ;;  %v2019_v25 = vadd.f32 %v2770_v60, %v3619_v24 }
 0x180   : > { %v2032_v9 = vmax.f32 %v2016_v58, 0.0  ;;  %v2017_v16 = vadd.f32 %v2771_v63, %v3619_v24 }
 0x181   : > { %v2422_v19 = vpack.c.bf16 %v2034_v18, %v2034_v18  ;;  %v2035_v34 = vmax.f32 %v2019_v25, 0.0 }
 0x182   : > { %v2420_v35 = vpack.c.bf16 %v2032_v9, %v2032_v9  ;;  %v2033_v54 = vmax.f32 %v2017_v16, 0.0 }
 0x183   : > { %2115 = vst.msk [vmem:[%s3627_s22 + $0x38] sm:$0xf] %vm2100_vm7, %v2422_v19  ;;  %v2423_v13 = vpack.c.bf16 %v2035_v34, %v2035_v34 }
 0x184   : > { %2113 = vst.msk [vmem:[%s3627_s22 + $0x30] sm:$0xf] %vm2100_vm7, %v2420_v35  ;;  %v2421_v21 = vpack.c.bf16 %v2033_v54, %v2033_v54 }
 0x185   : > { %2116 = vst.msk [vmem:[%s3627_s22 + $0x3c] sm:$0xf] %vm2100_vm7, %v2423_v13 }
 0x186   : > { %2114 = vst.msk [vmem:[%s3627_s22 + $0x34] sm:$0xf] %vm2100_vm7, %v2421_v21 }
 0x187 PF: > { %s13_s12 = sadd.s32 1, %s2945_s12  }
 0x188   : > { %p10_p4 = scmp.ge.s32.totalorder %s13_s12, 4  }
 0x18a   :  { %12 = sbr.rel (!%p10_p4) target bundleno = 1 (0x1), region = 68 }

// kernel: pointpillars_forward.5
= control target key start
LH: loop header
LB: loop body
LE: loop exit
PB: predicated region body
PF: predicated region fallthrough
CT: control target
= control target key end

     0   :  { %s3146_s18 = smov 0   ;;  %s3851_s0 = inlined_call_operand.vmem [shape: bf16[18,18,64], index: 0, kind: input, shape index: {}]   ;;  %s3852_s1 = inlined_call_operand.vmem [shape: bf16[9,64,64], index: 1, kind: input, shape index: {}]   ;;  %s3853_s2 = inlined_call_operand.vmem [shape: f32[1,64], index: 2, kind: input, shape index: {}]   ;;  %s3854_s3 = inlined_call_operand.vmem [shape: bf16[64,128], index: 3, kind: input, shape index: {}]   ;;  %s3855_s4 = inlined_call_operand.vmem [shape: f32[1,128], index: 4, kind: input, shape index: {}]   ;;  %s3856_s5 = inlined_call_operand.vmem [shape: f32[16,16,128], index: 5, kind: output, shape index: {}]  }
   0x1 LB: > { %s2322_s19 = sadd.s32 4294967295, %s3114_s18   ;;  %p2325_p0 = scmp.ge.s32.totalorder %s3114_s18, 1  ;;  %s3114_s18 = sphi %s3146_s18, %s15_s18  }
   0x2   : > { %p177_p1 = scmp.lt.s32.totalorder %s3114_s18, 3 }
   0x4   : > { %p178_p2 = pnand %p2325_p0, %p177_p1 }
   0x5   : > { %v3058_v0 = vld [vmem:[%s3852_s1 + $0x20] sm:$0xff] (!%p178_p2)   ;;  %s2561_s24 = smul.u32 (!%p178_p2), 96, %s2322_s19  ;;  %v3060_v2 = vld [vmem:[%s3852_s1 + $0x28] sm:$0xff] (!%p178_p2)   ;;  %v3062_v4 = vld [vmem:[%s3852_s1 + $0x30] sm:$0xff] (!%p178_p2)   ;;  %vm251_vm0 = vsmask.f32 (!%p178_p2), 3328 }
   0x6   : > { %181 = sbr.rel (%p178_p2) target bundleno = 624 (0x270), region = 40  ;;  %v3059_v1 = vld [vmem:[%s3852_s1 + $0x80] sm:$0xff] (!%p178_p2)   ;;  %2682 = vmatprep.subr.bf16.mxu1 (!%p178_p2), %v3058_v0  ;;  %v3061_v3 = vld [vmem:[%s3852_s1 + $0x88] sm:$0xff] (!%p178_p2)   ;;  %v3063_v5 = vld [vmem:[%s3852_s1 + $0x90] sm:$0xff] (!%p178_p2)   ;;  %vm252_vm1 = vsmask.f32 (!%p178_p2), 7440 }
   0x7   : > { %2778 = vmatprep.subr.bf16.mxu0 (!%p178_p2), %v3059_v1  ;;  %2683 = vmatpush3.bf16.msra.mxu1 (!%p178_p2), %v3058_v0  ;;  %s3177_s10 = scalar_lea.vmem (!%p178_p2), %s3851_s0, %s2561_s24  ;;  %v3064_v6 = vld [vmem:[%s3852_s1 + $0x38] sm:$0xff] (!%p178_p2)   ;;  %v3218_v30 = vld [vmem:[%s3852_s1 + $0xa0] sm:$0xff] (!%p178_p2)   ;;  %vm3222_vm2 = vmor (!%p178_p2), %vm251_vm0, %vm252_vm1  ;;  %vm503_vm3 = vcmask (!%p178_p2), 523264   ;;  %vm818_vm4 = vcmask (!%p178_p2), 1042432   ;;  %vm819_vm5 = vcmask (!%p178_p2), 1046532   ;;  %s2326_s13 = sshll.u32 (!%p178_p2), %s2322_s19, 3 }
   0x8   : > { %2779 = vmatpush3.bf16.msra.mxu0 (!%p178_p2), %v3059_v1  ;;  %2684 = vmatprep.subr.bf16.mxu1 (!%p178_p2), %v3060_v2  ;;  %v3065_v7 = vld [vmem:[%s3852_s1 + $0x98] sm:$0xff] (!%p178_p2)   ;;  %v3186_v8 = vld [vmem:[%s3177_s10] sm:$0xf] (!%p178_p2)  ;;  %v3189_v9 = vld [vmem:[%s3177_s10 + $0x4] sm:$0xf] (!%p178_p2)  ;;  %p202_p3 = scmp.lt.s32.totalorder (!%p178_p2), %s2326_s13, 15 }
   0x9   : > { %2780 = vmatprep.subr.bf16.mxu0 (!%p178_p2), %v3061_v3  ;;  %v3192_v10 = vld [vmem:[%s3177_s10 + $0x8] sm:$0x1] (!%p178_p2)  ;;  %v255_v11 = vshrl.u32 (!%p178_p2), %v3186_v8, 16  ;;  %v258_v12 = vshll.u32 (!%p178_p2), %v3186_v8, 16  ;;  %v264_v13 = vshll.u32 (!%p178_p2), %v3189_v9, 16  ;;  %v268_v14 = vshrl.u32 (!%p178_p2), %v3189_v9, 16  ;;  %vm3419_vm6 = vmor (!%p178_p2), %vm818_vm4, %vm819_vm5 }
   0xa   : > { %v274_v15 = vshll.u32 (!%p178_p2), %v3192_v10, 16  ;;  %v3200_v16 = vld [vmem:[%s3177_s10 + $0xc] sm:$0xf] (!%p178_p2)  ;;  %v3203_v19 = vld [vmem:[%s3177_s10 + $0x10] sm:$0xf] (!%p178_p2)  ;;  %v3069_v53 = vld [vmem:[%s3852_s1] sm:$0xff] (!%p178_p2)  }
   0xb   : > { %2685 = vmatpush3.bf16.msra.mxu1 (!%p178_p2), %v3060_v2  ;;  %v257_v17 = vrot.slane (!%p178_p2), %v255_v11, 4  ;;  %v260_v18 = vrot.slane (!%p178_p2), %v258_v12, 5  ;;  %v3206_v20 = vld [vmem:[%s3177_s10 + $0x14] sm:$0x1] (!%p178_p2)  ;;  %v266_v21 = vrot.slane (!%p178_p2), %v264_v13, 5  ;;  %v270_v22 = vrot.slane (!%p178_p2), %v268_v14, 4 }
   0xc   : > { %2781 = vmatpush3.bf16.msra.mxu0 (!%p178_p2), %v3061_v3  ;;  %2686 = vmatprep.subr.bf16.mxu1 (!%p178_p2), %v3062_v4  ;;  %v276_v23 = vrot.slane (!%p178_p2), %v274_v15, 5  ;;  %v279_v24 = vshrl.u32 (!%p178_p2), %v3200_v16, 16  ;;  %v282_v26 = vshll.u32 (!%p178_p2), %v3200_v16, 16  ;;  %v288_v27 = vshll.u32 (!%p178_p2), %v3203_v19, 16  ;;  %v3213_v29 = vld [vmem:[%s3177_s10 + $0x18] sm:$0xf] (!%p178_p2) }
   0xd   : > { %2782 = vmatprep.subr.bf16.mxu0 %v3063_v5  ;;  %v261_v25 = vor.u32 %v260_v18, %v257_v17  ;;  %v292_v28 = vshrl.u32 %v3203_v19, 16  ;;  %v271_v32 = vor.u32 %v270_v22, %v266_v21  ;;  %v298_v34 = vshll.u32 %v3206_v20, 16  ;;  %v3228_v35 = vld [vmem:[%s3177_s10 + $0x1c] sm:$0xf]  ;;  %v3234_v46 = vld [vmem:[%s3177_s10 + $0x20] sm:$0x1] }
   0xe   : > { %v281_v33 = vrot.slane %v279_v24, 4  ;;  %v284_v37 = vrot.slane %v282_v26, 5  ;;  %v290_v38 = vrot.slane %v288_v27, 5  ;;  %v303_v42 = vshrl.u32 %v3213_v29, 16  ;;  %v3243_v52 = vld [vmem:[%s3177_s10 + $0x24] sm:$0xf] }
   0xf   : > { %2687 = vmatpush3.bf16.msra.mxu1 %v3062_v4  ;;  %v262_v36 = vrot.slane %v261_v25, 4  ;;  %v294_v39 = vrot.slane %v292_v28, 4  ;;  %v272_v40 = vrot.slane %v271_v32, 4  ;;  %v300_v41 = vrot.slane %v298_v34, 5  ;;  %v3249_v58 = vld [vmem:[%s3177_s10 + $0x28] sm:$0xf] }
  0x10   : > { %2783 = vmatpush3.bf16.msra.mxu0 %v3063_v5  ;;  %2688 = vmatprep.subr.bf16.mxu1 %v3064_v6  ;;  %v285_v44 = vor.u32 %v284_v37, %v281_v33  ;;  %v306_v47 = vshll.u32 %v3213_v29, 16  ;;  %v305_v49 = vrot.slane %v303_v42, 4  ;;  %v312_v50 = vshll.u32 %v3228_v35, 16  ;;  %v3254_v63 = vld [vmem:[%s3177_s10 + $0x2c] sm:$0x1]  ;;  %s3862_s13 = smov (!%p202_p3, %s2326_s13), 15 }
  0x11   : > { %2784 = vmatprep.subr.bf16.mxu0 %v3065_v7  ;;  %v267_v43 = vsel %vm3222_vm2, %v262_v36, %v266_v21  ;;  %v295_v45 = vor.u32 %v294_v39, %v290_v38  ;;  %v277_v48 = vsel %vm3222_vm2, %v272_v40, %v276_v23  ;;  %v316_v51 = vshrl.u32 %v3228_v35, 16  ;;  %v3262_v3 = vld [vmem:[%s3177_s10 + $0x30] sm:$0xf]  ;;  %v3268_v12 = vld [vmem:[%s3177_s10 + $0x34] sm:$0xf]  ;;  %v3071_v13 = vld [vmem:[%s3852_s1 + $0x8] sm:$0xff]  }
  0x12   : > { %v2340_v54 = vcombine.low %v267_v43, %v277_v48  ;;  %v286_v55 = vrot.slane %v285_v44, 4  ;;  %v308_v57 = vrot.slane %v306_v47, 5  ;;  %v833_v59 = vrot.slane %v3206_v20, 5  ;;  %v3277_v21 = vld [vmem:[%s3177_s10 + $0x38] sm:$0x1]  ;;  %v3068_v43 = vld [vmem:[%s3852_s1 + $0xa8] sm:$0xff]  }
  0x13   : > { %2689 = vmatpush3.bf16.msra.mxu1 %v3064_v6  ;;  %v296_v56 = vrot.slane %v295_v45, 4  ;;  %v314_v60 = vrot.slane %v312_v50, 5  ;;  %v318_v61 = vrot.slane %v316_v51, 4  ;;  %v322_v62 = vshll.u32 %v3234_v46, 16  ;;  %v3280_v22 = vld [vmem:[%s3177_s10 + $0x3c] sm:$0xf] }
  0x14   : > { %2785 = vmatpush3.bf16.msra.mxu0 %v3065_v7  ;;  %2706 = vmatprep.subr.bf16.mxu1 %v3069_v53  ;;  %v291_v0 = vsel %vm3222_vm2, %v286_v55, %v290_v38  ;;  %v309_v2 = vor.u32 %v308_v57, %v305_v49  ;;  %v2360_v4 = vcombine.low %v3186_v8, %v3189_v9  ;;  %v327_v11 = vshrl.u32 %v3243_v52, 16  ;;  %v3298_v44 = vld [vmem:[%s3177_s10 + $0x40] sm:$0xf]  ;;  %v3072_v45 = vld [vmem:[%s3852_s1 + $0x10] sm:$0xff]   ;;  %v3306_v50 = vld [vmem:[%s3177_s10 + $0x44] sm:$0x1] }
  0x15   : > { %2802 = vmatprep.subr.bf16.mxu0 %v3218_v30  ;;  %2690 = vmatprep.mubr.msk.bf16.mxu1 %vm503_vm3, %v2340_v54  ;;  %v301_v1 = vsel %vm3222_vm2, %v296_v56, %v300_v41  ;;  %v319_v6 = vor.u32 %v318_v61, %v314_v60  ;;  %v324_v7 = vrot.slane %v322_v62, 5  ;;  %v330_v15 = vshll.u32 %v3243_v52, 16  ;;  %s2560_s14 = sshll.u32 %s3862_s13, 4 }
  0x16   : > { %v2341_v5 = vcombine.low %v291_v0, %v301_v1  ;;  %v310_v14 = vrot.slane %v309_v2, 4  ;;  %v336_v17 = vshll.u32 %v3249_v58, 16  ;;  %v340_v18 = vshrl.u32 %v3249_v58, 16  ;;  %s3830_s21 = scalar_lea.vmem %s3856_s5, %s2560_s14 }
  0x17   : > { %v320_v23 = vrot.slane %v319_v6, 4  ;;  %v329_v24 = vrot.slane %v327_v11, 4  ;;  %v346_v25 = vshll.u32 %v3254_v63, 16  ;;  %v351_v26 = vshrl.u32 %v3262_v3, 16 }
  0x18   : > { %2786 = vmatprep.mubr.msk.bf16.mxu0 %vm503_vm3, %v2341_v5  ;;  %2691 = vmatmul.mubr.msk.bf16.vlgmr.msra.gmra.mrb[0].mxu1 %vm503_vm3, %v2341_v5  ;;  %v315_v27 = vsel %vm3222_vm2, %v310_v14, %v314_v60  ;;  %v332_v28 = vrot.slane %v330_v15, 5  ;;  %v338_v32 = vrot.slane %v336_v17, 5  ;;  %v342_v33 = vrot.slane %v340_v18, 4  ;;  %v3070_v17 = vld [vmem:[%s3852_s1 + $0xb0] sm:$0xff]   ;;  %v3074_v18 = vld [vmem:[%s3852_s1 + $0x18] sm:$0xff]  }
  0x19   : > { %2707 = vmatpush3.bf16.msra.mxu1 %v3069_v53  ;;  %v325_v34 = vsel %vm3222_vm2, %v320_v23, %v324_v7  ;;  %v348_v36 = vrot.slane %v346_v25, 5  ;;  %v353_v37 = vrot.slane %v351_v26, 4  ;;  %v354_v38 = vshll.u32 %v3262_v3, 16  ;;  %v3310_v53 = vld [vmem:[%s3177_s10 + $0x48] sm:$0xf] }
  0x1a   : > { %2708 = vmatprep.subr.bf16.mxu1 %v3071_v13  ;;  %v3291_v39 = vcombine.low %v315_v27, %v325_v34  ;;  %v333_v40 = vor.u32 %v332_v28, %v329_v24  ;;  %v343_v41 = vor.u32 %v342_v33, %v338_v32  ;;  %v360_v42 = vshll.u32 %v3268_v12, 16  ;;  %v3324_v7 = vld [vmem:[%s3177_s10 + $0x4c] sm:$0xf] }
  0x1b   : > { %v356_v47 = vrot.slane %v354_v38, 5  ;;  %v364_v48 = vshrl.u32 %v3268_v12, 16  ;;  %v370_v49 = vshll.u32 %v3277_v21, 16  ;;  %v375_v51 = vshrl.u32 %v3280_v22, 16 }
  0x1c   : > { %2787 = vmatmul.mubr.msk.bf16.vlgmr.msra.gmra.mrb[0].mxu0 %vm503_vm3, %v3291_v39  ;;  %2694 = vmatprep.mubr.msk.bf16.mxu1 %vm503_vm3, %v3291_v39  ;;  %v334_v54 = vrot.slane %v333_v40, 4  ;;  %v344_v55 = vrot.slane %v343_v41, 4  ;;  %v362_v56 = vrot.slane %v360_v42, 5  ;;  %v378_v57 = vshll.u32 %v3280_v22, 16  ;;  %v3349_v40 = vld [vmem:[%s3177_s10 + $0x54] sm:$0xf] }
  0x1d   : > { %2803 = vmatpush3.bf16.msra.mxu0 %v3218_v30  ;;  %v357_v60 = vor.u32 %v356_v47, %v353_v37  ;;  %v366_v61 = vrot.slane %v364_v48, 4  ;;  %v372_v62 = vrot.slane %v370_v49, 5  ;;  %v377_v0 = vrot.slane %v375_v51, 4  ;;  %2709 = vmatpush3.bf16.msra.mxu1 %v3071_v13  ;;  %v3330_v13 = vld [vmem:[%s3177_s10 + $0x50] sm:$0x1]  ;;  %v3073_v49 = vld [vmem:[%s3852_s1 + $0xb8] sm:$0xff]  }
  0x1e   : > { %v339_v1 = vsel %vm3222_vm2, %v334_v54, %v338_v32  ;;  %v349_v2 = vsel %vm3222_vm2, %v344_v55, %v348_v36  ;;  %2804 = vmatprep.subr.bf16.mxu0 %v3068_v43  ;;  %v380_v5 = vrot.slane %v378_v57, 5  ;;  %v384_v6 = vshll.u32 %v3298_v44, 16  ;;  %2710 = vmatprep.subr.bf16.mxu1 %v3072_v45  ;;  %v3371_v57 = vld [vmem:[%s3177_s10 + $0x5c] sm:$0x1] }
  0x1f   : > { %v3326_v30 = vcombine.low %v339_v1, %v349_v2  ;;  %v358_v11 = vrot.slane %v357_v60, 4  ;;  %v367_v14 = vor.u32 %v366_v61, %v362_v56  ;;  %v388_v15 = vshrl.u32 %v3298_v44, 16  ;;  %v3374_v60 = vld [vmem:[%s3177_s10 + $0x60] sm:$0xf]  ;;  %v3378_v2 = vld [vmem:[%s3177_s10 + $0x64] sm:$0xf] }
  0x20   : > { %v381_v23 = vor.u32 %v380_v5, %v377_v0  ;;  %v386_v24 = vrot.slane %v384_v6, 5  ;;  %v394_v25 = vshll.u32 %v3306_v50, 16  ;;  %v399_v26 = vshrl.u32 %v3310_v53, 16 }
  0x21   : > { %2790 = vmatprep.mubr.msk.bf16.mxu0 %vm503_vm3, %v3326_v30  ;;  %2695 = vmatmul.mubr.msk.bf16.gmra.mrb[4].mxu1 %vm503_vm3, %v3326_v30  ;;  %v363_v27 = vsel %vm3222_vm2, %v358_v11, %v362_v56  ;;  %v368_v28 = vrot.slane %v367_v14, 4  ;;  %v390_v32 = vrot.slane %v388_v15, 4  ;;  %v402_v33 = vshll.u32 %v3310_v53, 16 }
  0x22   : > { %2805 = vmatpush3.bf16.msra.mxu0 %v3068_v43  ;;  %v382_v34 = vrot.slane %v381_v23, 4  ;;  %v396_v36 = vrot.slane %v394_v25, 5  ;;  %v401_v37 = vrot.slane %v399_v26, 4  ;;  %v408_v38 = vshll.u32 %v3324_v7, 16  ;;  %2711 = vmatpush3.bf16.msra.mxu1 %v3072_v45  ;;  %v3355_v43 = vld [vmem:[%s3177_s10 + $0x58] sm:$0xf] }
  0x23   : > { %v373_v41 = vsel %vm3222_vm2, %v368_v28, %v372_v62  ;;  %v391_v42 = vor.u32 %v390_v32, %v386_v24  ;;  %v404_v47 = vrot.slane %v402_v33, 5  ;;  %v412_v48 = vshrl.u32 %v3324_v7, 16  ;;  %2806 = vmatprep.subr.bf16.mxu0 %v3070_v17  ;;  %2712 = vmatprep.subr.bf16.mxu1 %v3074_v18  ;;  %v3363_v45 = vld [vmem:[%s3852_s1 + $0x40] sm:$0xff]   ;;  %v3392_v33 = vld [vmem:[%s3177_s10 + $0x68] sm:$0x1] }
  0x24   : > { %v3365_v51 = vcombine.low %v363_v27, %v373_v41  ;;  %v387_v54 = vsel %vm3222_vm2, %v382_v34, %v386_v24  ;;  %v410_v55 = vrot.slane %v408_v38, 5  ;;  %v418_v56 = vshll.u32 %v3330_v13, 16  ;;  %v3397_v34 = vld [vmem:[%s3852_s1 + $0xc0] sm:$0xff]  }
  0x25   : > { %v392_v61 = vrot.slane %v391_v42, 4  ;;  %v405_v62 = vor.u32 %v404_v47, %v401_v37  ;;  %v414_v0 = vrot.slane %v412_v48, 4  ;;  %v423_v1 = vshrl.u32 %v3349_v40, 16 }
  0x26   : > { %2791 = vmatmul.mubr.msk.bf16.gmra.mrb[4].mxu0 %vm503_vm3, %v3365_v51  ;;  %2698 = vmatprep.mubr.msk.bf16.mxu1 %vm503_vm3, %v3365_v51  ;;  %v420_v5 = vrot.slane %v418_v56, 5  ;;  %v426_v6 = vshll.u32 %v3349_v40, 16  ;;  %v432_v11 = vshll.u32 %v3355_v43, 16  ;;  %v436_v14 = vshrl.u32 %v3355_v43, 16 }
  0x27   : > { %v397_v15 = vsel %vm3222_vm2, %v392_v61, %v396_v36  ;;  %v406_v23 = vrot.slane %v405_v62, 4  ;;  %v415_v24 = vor.u32 %v414_v0, %v410_v55  ;;  %2807 = vmatpush3.bf16.msra.mxu0 %v3070_v17  ;;  %v425_v25 = vrot.slane %v423_v1, 4  ;;  %2713 = vmatpush3.bf16.msra.mxu1 %v3074_v18 }
  0x28   : > { %v3389_v26 = vcombine.low %v387_v54, %v397_v15  ;;  %v428_v27 = vrot.slane %v426_v6, 5  ;;  %v434_v28 = vrot.slane %v432_v11, 5  ;;  %v438_v32 = vrot.slane %v436_v14, 4  ;;  %2808 = vmatprep.subr.bf16.mxu0 %v3073_v49  ;;  %2730 = vmatprep.subr.bf16.mxu1 %v3363_v45 }
  0x29   : > { %v411_v17 = vsel %vm3222_vm2, %v406_v23, %v410_v55  ;;  %v416_v36 = vrot.slane %v415_v24, 4  ;;  %v442_v18 = vshll.u32 %v3371_v57, 16  ;;  %v1226_v37 = vshrl.u32 %v3374_v60, 16 }
  0x2a   : > { %2794 = vmatprep.mubr.msk.bf16.mxu0 %vm503_vm3, %v3389_v26  ;;  %2699 = vmatmul.mubr.msk.bf16.gmra.mrb[8].mxu1 %vm503_vm3, %v3389_v26  ;;  %v429_v38 = vor.u32 %v428_v27, %v425_v25  ;;  %v439_v41 = vor.u32 %v438_v32, %v434_v28  ;;  %v1229_v42 = vshll.u32 %v3374_v60, 16  ;;  %v1235_v47 = vshll.u32 %v3378_v2, 16 }
  0x2b   : > { %v421_v48 = vsel %vm3222_vm2, %v416_v36, %v420_v5  ;;  %v444_v54 = vrot.slane %v442_v18, 5  ;;  %v1228_v55 = vrot.slane %v1226_v37, 4  ;;  %v1239_v56 = vshrl.u32 %v3378_v2, 16  ;;  %2809 = vmatpush3.bf16.msra.mxu0 %v3073_v49  ;;  %v3096_v5 = vld [vmem:[%s3852_s1 + $0x70] sm:$0xff]  }
  0x2c   : > { %v3413_v61 = vcombine.low %v411_v17, %v421_v48  ;;  %v430_v62 = vrot.slane %v429_v38, 4  ;;  %v440_v0 = vrot.slane %v439_v41, 4  ;;  %v1231_v1 = vrot.slane %v1229_v42, 5  ;;  %2826 = vmatprep.subr.bf16.mxu0 %v3397_v34 }
  0x2d   : > { %v1237_v6 = vrot.slane %v1235_v47, 5  ;;  %v1241_v11 = vrot.slane %v1239_v56, 4  ;;  %v1245_v14 = vshll.u32 %v3392_v33, 16  ;;  %v2381_v15 = vrot.slane %v3200_v16, 9 }
  0x2e   : > { %2795 = vmatmul.mubr.msk.bf16.gmra.mrb[8].mxu0 %vm503_vm3, %v3413_v61  ;;  %2702 = vmatprep.mubr.msk.bf16.mxu1 %vm503_vm3, %v3413_v61  ;;  %v435_v49 = vsel %vm3222_vm2, %v430_v62, %v434_v28  ;;  %v445_v23 = vsel %vm3222_vm2, %v440_v0, %v444_v54  ;;  %v1232_v24 = vor.u32 %v1231_v1, %v1228_v55  ;;  %v830_v25 = vrot.slane %v3203_v19, 5 }
  0x2f   : > { %v837_v27 = vrot.slane %v3228_v35, 5  ;;  %v3434_v32 = vcombine.low %v435_v49, %v445_v23  ;;  %v1242_v17 = vor.u32 %v1241_v11, %v1237_v6  ;;  %v1247_v36 = vrot.slane %v1245_v14, 5  ;;  %v3084_v49 = vld [vmem:[%s3852_s1 + $0x48] sm:$0xff]  }
  0x30   : > { %v1233_v18 = vrot.slane %v1232_v24, 4  ;;  %v831_v37 = vsel %vm3419_vm6, %v2381_v15, %v830_v25  ;;  %v832_v38 = vrot.slane %v830_v25, 4  ;;  %v840_v41 = vrot.slane %v3234_v46, 5 }
  0x31   : > { %2798 = vmatprep.mubr.msk.bf16.mxu0 %vm503_vm3, %v3434_v32  ;;  %v1243_v28 = vrot.slane %v1242_v17, 4  ;;  %v2382_v48 = vrot.slane %v3213_v29, 9  ;;  %v844_v54 = vrot.slane %v3249_v58, 5  ;;  %v839_v56 = vrot.slane %v837_v27, 4 }
  0x32   : > { %2703 = vmatmul.mubr.msk.bf16.gmra.mrb[12].mxu1 %vm503_vm3, %v3434_v32  ;;  %v1238_v42 = vsel %vm3222_vm2, %v1233_v18, %v1237_v6  ;;  %v834_v47 = vsel %vm3419_vm6, %v832_v38, %v833_v59  ;;  %v2383_v20 = vrot.slane %v3243_v52, 9  ;;  %v847_v0 = vrot.slane %v3254_v63, 5 }
  0x33   : > { %v1248_v46 = vsel %vm3222_vm2, %v1243_v28, %v1247_v36  ;;  %2714 = vmatprep.mubr.msk.bf16.mxu1 %vm503_vm3, %v2360_v4  ;;  %v3457_v55 = vcombine.low %v831_v37, %v834_v47  ;;  %v846_v59 = vrot.slane %v844_v54, 4  ;;  %v851_v1 = vrot.slane %v3268_v12, 5  ;;  %v3087_v37 = vld [vmem:[%s3852_s1 + $0x50] sm:$0xff]   ;;  %v3518_v28 = vld [vmem:[%s3177_s10 + $0x6c] sm:$0xf] }
  0x34   : > { %v3460_v62 = vcombine.low %v1238_v42, %v1248_v46  ;;  %v3466_v6 = vcombine.low %v3200_v16, %v3203_v19  ;;  %v858_v4 = vrot.slane %v3298_v44, 5  ;;  %v838_v11 = vsel %vm3419_vm6, %v2382_v48, %v837_v27 }
  0x35   : > { %v841_v63 = vsel %vm3419_vm6, %v839_v56, %v840_v41  ;;  %v3479_v14 = vcombine.low %v3213_v29, %v3228_v35  ;;  %v845_v16 = vsel %vm3419_vm6, %v2383_v20, %v844_v54  ;;  %v848_v19 = vsel %vm3419_vm6, %v846_v59, %v847_v0  ;;  %v3079_v35 = vld [vmem:[%s3852_s1 + $0xc8] sm:$0xff]   ;;  %v3083_v54 = vld [vmem:[%s3852_s1 + $0xd0] sm:$0xff]  }
  0x36   : > { %2799 = vmatmul.mubr.msk.bf16.gmra.mrb[12].mxu0 %vm503_vm3, %v3460_v62  ;;  %v2384_v15 = vrot.slane %v3262_v3, 9  ;;  %v853_v23 = vrot.slane %v851_v1, 4  ;;  %v854_v24 = vrot.slane %v3277_v21, 5  ;;  %v2385_v25 = vrot.slane %v3280_v22, 9 }
  0x37   : > { %2810 = vmatprep.mubr.msk.bf16.mxu0 %vm503_vm3, %v3457_v55  ;;  %v3493_v29 = vcombine.low %v838_v11, %v841_v63  ;;  %v860_v27 = vrot.slane %v858_v4, 4  ;;  %v861_v17 = vrot.slane %v3306_v50, 5  ;;  %v865_v36 = vrot.slane %v3324_v7, 5  ;;  %v242_v11 = vld [vmem:[%s3177_s10 + $0x74] sm:$0x1] }
  0x38   : > { %v826_v18 = vrot.slane %v3192_v10, 5  ;;  %v3503_v21 = vcombine.low %v845_v16, %v848_v19  ;;  %v3511_v38 = vcombine.low %v3243_v52, %v3249_v58  ;;  %v852_v50 = vsel %vm3419_vm6, %v2384_v15, %v851_v1  ;;  %v3088_v15 = vld [vmem:[%s3852_s1 + $0xd8] sm:$0xff]  }
  0x39   : > { %v2386_v10 = vrot.slane %v3310_v53, 9  ;;  %v868_v41 = vrot.slane %v3330_v13, 5  ;;  %v859_v42 = vsel %vm3419_vm6, %v2385_v25, %v858_v4  ;;  %v2387_v52 = vrot.slane %v3349_v40, 9 }
  0x3a   : > { %2715 = vmatmul.mubr.msk.bf16.vlgmr.msra.gmra.mrb[0].mxu1 %vm503_vm3, %v3466_v6  ;;  %v2380_v58 = vrot.slane %v3186_v8, 9  ;;  %v862_v47 = vsel %vm3419_vm6, %v860_v27, %v861_v17  ;;  %v867_v48 = vrot.slane %v865_v36, 4  ;;  %v823_v46 = vrot.slane %v3189_v9, 5  ;;  %v3541_v8 = vld [vmem:[%s3177_s10 + $0x70] sm:$0xf]  ;;  %v3092_v17 = vld [vmem:[%s3852_s1 + $0x60] sm:$0xff]  }
  0x3b   : > { %2718 = vmatprep.mubr.msk.bf16.mxu1 %vm503_vm3, %v3479_v14  ;;  %2731 = vmatpush3.bf16.msra.mxu1 %v3363_v45  ;;  %v855_v45 = vsel %vm3419_vm6, %v853_v23, %v854_v24  ;;  %v3538_v56 = vcombine.low %v3374_v60, %v3378_v2  ;;  %v3548_v20 = vcombine.low %v3262_v3, %v3268_v12  ;;  %v1716_v59 = vshrl.u32 %v3518_v28, 16  ;;  %v3089_v3 = vld [vmem:[%s3852_s1 + $0x58] sm:$0xff]  }
  0x3c   : > { %2732 = vmatprep.subr.bf16.mxu1 %v3084_v49  ;;  %v1719_v0 = vshll.u32 %v3518_v28, 16  ;;  %v3552_v9 = vcombine.low %v852_v50, %v855_v45  ;;  %v872_v1 = vrot.slane %v3355_v43, 5  ;;  %v825_v4 = vrot.slane %v823_v46, 4 }
  0x3d   : > { %v3560_v63 = vcombine.low %v859_v42, %v862_v47  ;;  %v1729_v12 = vshrl.u32 %v3541_v8, 16  ;;  %v1718_v16 = vrot.slane %v1716_v59, 4  ;;  %v1725_v23 = vshll.u32 %v3541_v8, 16 }
  0x3e   : > { %2811 = vmatmul.mubr.msk.bf16.vlgmr.msra.gmra.mrb[0].mxu0 %vm503_vm3, %v3493_v29  ;;  %v1721_v19 = vrot.slane %v1719_v0, 5  ;;  %v1735_v24 = vshll.u32 %v242_v11, 16  ;;  %v2522_v25 = vrot.slane %v3518_v28, 9  ;;  %v1894_v42 = vrot.slane %v3541_v8, 5 }
  0x3f   : > { %2827 = vmatpush3.bf16.msra.mxu0 %v3397_v34  ;;  %2814 = vmatprep.mubr.msk.bf16.mxu0 %vm503_vm3, %v3503_v21  ;;  %v3557_v34 = vsel %vm3419_vm6, %v2380_v58, %v823_v46  ;;  %v1731_v45 = vrot.slane %v1729_v12, 4  ;;  %v875_v58 = vrot.slane %v3371_v57, 5  ;;  %v1727_v47 = vrot.slane %v1725_v23, 5  ;;  %v3100_v23 = vld [vmem:[%s3852_s1 + $0x100] sm:$0xff]  }
  0x40   : > { %2828 = vmatprep.subr.bf16.mxu0 %v3079_v35  ;;  %2733 = vmatpush3.bf16.msra.mxu1 %v3084_v49  ;;  %v827_v49 = vsel %vm3419_vm6, %v825_v4, %v826_v18  ;;  %v1722_v50 = vor.u32 %v1721_v19, %v1718_v16  ;;  %v874_v18 = vrot.slane %v872_v1, 4  ;;  %v3585_v46 = vcombine.low %v3280_v22, %v3298_v44 }
  0x41   : > { %2734 = vmatprep.subr.bf16.mxu1 %v3087_v37  ;;  %v2396_v27 = vcombine.low %v3557_v34, %v827_v49  ;;  %v3589_v0 = vsel %vm3419_vm6, %v2522_v25, %v1894_v42  ;;  %v1896_v34 = vrot.slane %v1894_v42, 4  ;;  %v866_v57 = vsel %vm3419_vm6, %v2386_v10, %v865_v36  ;;  %v3098_v49 = vld [vmem:[%s3852_s1 + $0xf8] sm:$0xff]   ;;  %v3101_v25 = vld [vmem:[%s3852_s1 + $0x108] sm:$0xff]  }
  0x42   : > { %2719 = vmatmul.mubr.msk.bf16.gmra.mrb[4].mxu1 %vm503_vm3, %v3511_v38  ;;  %v1723_v59 = vrot.slane %v1722_v50, 4  ;;  %v1732_v22 = vor.u32 %v1731_v45, %v1727_v47  ;;  %v1737_v44 = vrot.slane %v1735_v24, 5  ;;  %v869_v4 = vsel %vm3419_vm6, %v867_v48, %v868_v41 }
  0x43   : > { %2829 = vmatpush3.bf16.msra.mxu0 %v3079_v35  ;;  %2722 = vmatprep.mubr.msk.bf16.mxu1 %vm503_vm3, %v3548_v20  ;;  %v1897_v35 = vrot.slane %v242_v11, 5  ;;  %v1404_v11 = vrot.slane %v3378_v2, 5  ;;  %v876_v13 = vsel %vm3419_vm6, %v874_v18, %v875_v58  ;;  %v3090_v2 = vld [vmem:[%s3852_s1 + $0xe0] sm:$0xff]   ;;  %v3627_v48 = vcombine.low %v866_v57, %v869_v4 }
  0x44   : > { %2830 = vmatprep.subr.bf16.mxu0 %v3083_v54  ;;  %2735 = vmatpush3.bf16.msra.mxu1 %v3087_v37  ;;  %v3599_v37 = vcombine.low %v3310_v53, %v3324_v7  ;;  %v1728_v36 = vsel %vm3222_vm2, %v1723_v59, %v1727_v47  ;;  %v873_v7 = vsel %vm3419_vm6, %v2387_v52, %v872_v1  ;;  %v1733_v10 = vrot.slane %v1732_v22, 4  ;;  %v3792_v18 = vld [vmem:[%s3853_s2] ss:$0 sm:$0xff] }
  0x45   : > { %2736 = vmatprep.subr.bf16.mxu1 %v3089_v3  ;;  %v3612_v53 = vsel %vm3419_vm6, %v1896_v34, %v1897_v35  ;;  %v2458_v52 = vrot.slane %v3374_v60, 9  ;;  %v3634_v1 = vcombine.low %v873_v7, %v876_v13  ;;  %v1407_v12 = vrot.slane %v3392_v33, 5 }
  0x46   : > { %2815 = vmatmul.mubr.msk.bf16.gmra.mrb[4].mxu0 %vm503_vm3, %v3552_v9  ;;  %v2531_v41 = vcombine.low %v3589_v0, %v3612_v53  ;;  %v3643_v60 = vcombine.low %v3349_v40, %v3355_v43  ;;  %v3094_v40 = vld [vmem:[%s3852_s1 + $0x68] sm:$0xff]   ;;  %v2488_v24 = vcombine.low %v3518_v28, %v3541_v8 }
  0x47   : > { %2818 = vmatprep.mubr.msk.bf16.mxu0 %vm503_vm3, %v3560_v63  ;;  %2831 = vmatpush3.bf16.msra.mxu0 %v3083_v54  ;;  %v1738_v54 = vsel %vm3222_vm2, %v1733_v10, %v1737_v44  ;;  %v1405_v31 = vsel %vm3419_vm6, %v2458_v52, %v1404_v11  ;;  %v3091_v43 = vld [vmem:[%s3852_s1 + $0xe8] sm:$0xff]  }
  0x48   : > { %2832 = vmatprep.subr.bf16.mxu0 %v3088_v15  ;;  %2737 = vmatpush3.bf16.msra.mxu1 %v3089_v3  ;;  %v1406_v3 = vrot.slane %v1404_v11, 4  ;;  %v3637_v16 = vcombine.low %v1728_v36, %v1738_v54 }
  0x49   : > { %2754 = vmatprep.subr.bf16.mxu1 %v3092_v17 }
  0x4a   : > { %2723 = vmatmul.mubr.msk.bf16.gmra.mrb[8].mxu1 %vm503_vm3, %v3585_v46  ;;  %v1408_v33 = vsel %vm3419_vm6, %v1406_v3, %v1407_v12 }
  0x4b   : > { %2726 = vmatprep.mubr.msk.bf16.mxu1 %vm503_vm3, %v3599_v37  ;;  %2833 = vmatpush3.bf16.msra.mxu0 %v3088_v15  ;;  %v3653_v19 = vcombine.low %v1405_v31, %v1408_v33  ;;  %v3099_v15 = vld [vmem:[%s3852_s1 + $0x78] sm:$0xff]  }
  0x4c   : > { %2850 = vmatprep.subr.bf16.mxu0 %v3090_v2 }
  0x4e   : > { %2819 = vmatmul.mubr.msk.bf16.gmra.mrb[8].mxu0 %vm503_vm3, %v3627_v48 }
  0x4f   : > { %2822 = vmatprep.mubr.msk.bf16.mxu0 %vm503_vm3, %v3634_v1 }
  0x52   : > { %2727 = vmatmul.mubr.msk.bf16.gmra.mrb[12].mxu1 %vm503_vm3, %v3643_v60 }
  0x53   : > { %2738 = vmatprep.mubr.msk.bf16.mxu1 %vm503_vm3, %v2396_v27 }
  0x56   : > { %2823 = vmatmul.mubr.msk.bf16.gmra.mrb[12].mxu0 %vm503_vm3, %v3653_v19 }
  0x57   : > { %2834 = vmatprep.mubr.msk.bf16.mxu0 %vm503_vm3, %v3479_v14 }
  0x5a   : > { %2739 = vmatmul.mubr.msk.bf16.vlgmr.msra.gmra.mrb[0].mxu1 %vm503_vm3, %v3457_v55  ;;  %v3093_v55 = vld [vmem:[%s3852_s1 + $0xf0] sm:$0xff]  }
  0x5b   : > { %2742 = vmatprep.mubr.msk.bf16.mxu1 %vm503_vm3, %v3493_v29  ;;  %2755 = vmatpush3.bf16.msra.mxu1 %v3092_v17 }
  0x5c   : > { %2756 = vmatprep.subr.bf16.mxu1 %v3094_v40 }
  0x5e   : > { %2835 = vmatmul.mubr.msk.bf16.vlgmr.msra.gmra.mrb[0].mxu0 %vm503_vm3, %v3511_v38 }
  0x5f   : > { %2851 = vmatpush3.bf16.msra.mxu0 %v3090_v2  ;;  %2838 = vmatprep.mubr.msk.bf16.mxu0 %vm503_vm3, %v3548_v20 }
  0x60   : > { %2852 = vmatprep.subr.bf16.mxu0 %v3091_v43  ;;  %2757 = vmatpush3.bf16.msra.mxu1 %v3094_v40 }
  0x61   : > { %2758 = vmatprep.subr.bf16.mxu1 %v3096_v5 }
  0x62   : > { %2743 = vmatmul.mubr.msk.bf16.gmra.mrb[4].mxu1 %vm503_vm3, %v3503_v21 }
  0x63   : > { %2853 = vmatpush3.bf16.msra.mxu0 %v3091_v43  ;;  %2746 = vmatprep.mubr.msk.bf16.mxu1 %vm503_vm3, %v3552_v9 }
  0x64   : > { %2854 = vmatprep.subr.bf16.mxu0 %v3093_v55  ;;  %2759 = vmatpush3.bf16.msra.mxu1 %v3096_v5 }
  0x65   : > { %2760 = vmatprep.subr.bf16.mxu1 %v3099_v15 }
  0x66   : > { %2839 = vmatmul.mubr.msk.bf16.gmra.mrb[4].mxu0 %vm503_vm3, %v3585_v46 }
  0x67   : > { %2842 = vmatprep.mubr.msk.bf16.mxu0 %vm503_vm3, %v3599_v37  ;;  %2855 = vmatpush3.bf16.msra.mxu0 %v3093_v55 }
  0x68   : > { %2856 = vmatprep.subr.bf16.mxu0 %v3098_v49  ;;  %2761 = vmatpush3.bf16.msra.mxu1 %v3099_v15 }
  0x6a   : > { %2747 = vmatmul.mubr.msk.bf16.gmra.mrb[8].mxu1 %vm503_vm3, %v3560_v63 }
  0x6b   : > { %2750 = vmatprep.mubr.msk.bf16.mxu1 %vm503_vm3, %v3627_v48  ;;  %2857 = vmatpush3.bf16.msra.mxu0 %v3098_v49 }
  0x6c   : > { %2874 = vmatprep.subr.bf16.mxu0 %v3100_v23 }
  0x6e   : > { %2843 = vmatmul.mubr.msk.bf16.gmra.mrb[8].mxu0 %vm503_vm3, %v3643_v60 }
  0x6f   : > { %2846 = vmatprep.mubr.msk.bf16.mxu0 %vm503_vm3, %v3538_v56 }
  0x72   : > { %2751 = vmatmul.mubr.msk.bf16.gmra.mrb[12].mxu1 %vm503_vm3, %v3634_v1 }
  0x73   : > { %2762 = vmatprep.mubr.msk.bf16.mxu1 %vm503_vm3, %v3466_v6 }
  0x76   : > { %2847 = vmatmul.mubr.msk.bf16.gmra.mrb[12].mxu0 %vm503_vm3, %v2488_v24 }
  0x77   : > { %2858 = vmatprep.mubr.msk.bf16.mxu0 %vm503_vm3, %v3291_v39  ;;  %v3102_v39 = vld [vmem:[%s3852_s1 + $0x110] sm:$0xff]  }
  0x7a   : > { %2763 = vmatmul.mubr.msk.bf16.vlgmr.msra.gmra.mrb[0].mxu1 %vm503_vm3, %v3479_v14 }
  0x7b   : > { %2766 = vmatprep.mubr.msk.bf16.mxu1 %vm503_vm3, %v3511_v38 }
  0x7e   : > { %2859 = vmatmul.mubr.msk.bf16.vlgmr.msra.gmra.mrb[0].mxu0 %vm503_vm3, %v3326_v30  ;;  %v3103_v30 = vld [vmem:[%s3852_s1 + $0x118] sm:$0xff]  }
  0x7f   : > { %2875 = vmatpush3.bf16.msra.mxu0 %v3100_v23  ;;  %2862 = vmatprep.mubr.msk.bf16.mxu0 %vm503_vm3, %v3365_v51  ;;  %v3104_v51 = vld [vmem:[%s3854_s3] sm:$0xff]  }
  0x80   : > { %2876 = vmatprep.subr.bf16.mxu0 %v3101_v25  ;;  %2898 = vmatprep.subr.bf16.mxu1 %v3104_v51 }
  0x81   : > { %2899 = vmatpush3.bf16.msra.mxu1 %v3104_v51 }
  0x82   : > { %2767 = vmatmul.mubr.msk.bf16.gmra.mrb[4].mxu1 %vm503_vm3, %v3548_v20 }
  0x83   : > { %2877 = vmatpush3.bf16.msra.mxu0 %v3101_v25  ;;  %2770 = vmatprep.mubr.msk.bf16.mxu1 %vm503_vm3, %v3585_v46 }
  0x84   : > { %2878 = vmatprep.subr.bf16.mxu0 %v3102_v39 }
  0x86   : > { %2863 = vmatmul.mubr.msk.bf16.gmra.mrb[4].mxu0 %vm503_vm3, %v3389_v26  ;;  %v3105_v26 = vld [vmem:[%s3854_s3 + $0x8] sm:$0xff]  }
  0x87   : > { %2866 = vmatprep.mubr.msk.bf16.mxu0 %vm503_vm3, %v3413_v61  ;;  %2879 = vmatpush3.bf16.msra.mxu0 %v3102_v39  ;;  %v3106_v61 = vld [vmem:[%s3854_s3 + $0x10] sm:$0xff]  }
  0x88   : > { %2880 = vmatprep.subr.bf16.mxu0 %v3103_v30  ;;  %2900 = vmatprep.subr.bf16.mxu1 %v3105_v26 }
  0x89   : > { %2901 = vmatpush3.bf16.msra.mxu1 %v3105_v26 }
  0x8a   : > { %2771 = vmatmul.mubr.msk.bf16.gmra.mrb[8].mxu1 %vm503_vm3, %v3599_v37  ;;  %2902 = vmatprep.subr.bf16.mxu1 %v3106_v61 }
  0x8b   : > { %2774 = vmatprep.mubr.msk.bf16.mxu1 %vm503_vm3, %v3643_v60  ;;  %2881 = vmatpush3.bf16.msra.mxu0 %v3103_v30 }
  0x8d   : > { %2903 = vmatpush3.bf16.msra.mxu1 %v3106_v61 }
  0x8e   : > { %2867 = vmatmul.mubr.msk.bf16.gmra.mrb[8].mxu0 %vm503_vm3, %v3434_v32  ;;  %v3107_v32 = vld [vmem:[%s3854_s3 + $0x18] sm:$0xff]  }
  0x8f   : > { %2870 = vmatprep.mubr.msk.bf16.mxu0 %vm503_vm3, %v3460_v62  ;;  %2904 = vmatprep.subr.bf16.mxu1 %v3107_v32 }
  0x91   : > { %2905 = vmatpush3.bf16.msra.mxu1 %v3107_v32 }
  0x92   : > { %2775 = vmatmul.mubr.msk.bf16.gmra.mrb[12].mxu1 %vm503_vm3, %v3538_v56 }
  0x96   : > { %2871 = vmatmul.mubr.msk.bf16.gmra.mrb[12].mxu0 %vm503_vm3, %v3637_v16 }
  0x97   : > { %2882 = vmatprep.mubr.msk.bf16.mxu0 %vm503_vm3, %v3493_v29 }
  0x9e   : > { %2883 = vmatmul.mubr.msk.bf16.vlgmr.msra.gmra.mrb[0].mxu0 %vm503_vm3, %v3503_v21 }
  0x9f   : > { %2886 = vmatprep.mubr.msk.bf16.mxu0 %vm503_vm3, %v3552_v9 }
  0xa6   : > { %2887 = vmatmul.mubr.msk.bf16.gmra.mrb[4].mxu0 %vm503_vm3, %v3560_v63 }
  0xa7   : > { %2890 = vmatprep.mubr.msk.bf16.mxu0 %vm503_vm3, %v3627_v48 }
  0xae   : > { %2891 = vmatmul.mubr.msk.bf16.gmra.mrb[8].mxu0 %vm503_vm3, %v3634_v1 }
  0xaf   : > { %2894 = vmatprep.mubr.msk.bf16.mxu0 %vm503_vm3, %v3653_v19 }
  0xb6   : > { %2895 = vmatmul.mubr.msk.bf16.gmra.mrb[12].mxu0 %vm503_vm3, %v2531_v41 }
 0x14d   : > { %v2764_v62 = vpop.f32.mrb[0].mxu1 }
 0x14e   : > { %v1146_v6 = vpop.f32.mrb[1].mxu1 }
 0x14f   : > { %v2765_v14 = vpop.f32.mrb[2].mxu1 }
 0x150   : > { %v1149_v29 = vpop.f32.mrb[3].mxu1 }
 0x155   : > { %v2768_v21 = vpop.f32.mrb[4].mxu1 }
 0x156   : > { %v1162_v38 = vpop.f32.mrb[5].mxu1 }
 0x157   : > { %v2769_v28 = vpop.f32.mrb[6].mxu1 }
 0x158   : > { %v1165_v56 = vpop.f32.mrb[7].mxu1 }
 0x15d   : > { %v2772_v8 = vpop.f32.mrb[8].mxu1 }
 0x15e   : > { %v1178_v20 = vpop.f32.mrb[9].mxu1 }
 0x15f   : > { %v2773_v9 = vpop.f32.mrb[10].mxu1 }
 0x160   : > { %v1181_v63 = vpop.f32.mrb[11].mxu1 }
 0x165   : > { %v3781_v27 = vpop.f32.mrb[12].mxu1 }
 0x166   : > { %v3783_v17 = vpop.f32.mrb[13].mxu1 }
 0x167   : > { %v3785_v50 = vpop.f32.mrb[14].mxu1 }
 0x168   : > { %v3787_v45 = vpop.f32.mrb[15].mxu1 }
 0x171   : > { %v2884_v42 = vpop.f32.mrb[0].mxu0 }
 0x172   : > { %v2922_v58 = vadd.f32 %v2884_v42, %v2764_v62  ;;  %v1972_v47 = vpop.f32.mrb[1].mxu0 }
 0x173   : > { %v2923_v35 = vadd.f32 %v1972_v47, %v1146_v6  ;;  %v2885_v46 = vpop.f32.mrb[2].mxu0 }
 0x174   : > { %v2060_v59 = vadd.f32 %v2922_v58, %v3792_v18  ;;  %v2924_v0 = vadd.f32 %v2885_v46, %v2765_v14  ;;  %v1975_v34 = vpop.f32.mrb[3].mxu0 }
 0x175   : > { %v2058_v57 = vadd.f32 %v2923_v35, %v3792_v18  ;;  %v2925_v37 = vadd.f32 %v1975_v34, %v1149_v29 }
 0x176   : > { %v2061_v22 = vadd.f32 %v2924_v0, %v3792_v18  ;;  %v2076_v4 = vmax.f32 %v2060_v59, 0.0 }
 0x177   : > { %v2059_v44 = vadd.f32 %v2925_v37, %v3792_v18  ;;  %v2074_v36 = vmax.f32 %v2058_v57, 0.0 }
 0x178   : > { %v2077_v11 = vmax.f32 %v2061_v22, 0.0 }
 0x179   : > { %v2075_v53 = vmax.f32 %v2059_v44, 0.0  ;;  %v2888_v7 = vpop.f32.mrb[4].mxu0 }
 0x17a   : > { %v2091_v13 = vpack.c.bf16 %v2077_v11, %v2076_v4  ;;  %v2926_v2 = vadd.f32 %v2888_v7, %v2768_v21  ;;  %v1988_v10 = vpop.f32.mrb[5].mxu0 }
 0x17b   : > { %v2090_v41 = vpack.c.bf16 %v2075_v53, %v2074_v36  ;;  %v2927_v48 = vadd.f32 %v1988_v10, %v1162_v38  ;;  %v2889_v52 = vpop.f32.mrb[6].mxu0 }
 0x17c   : > { %v2064_v54 = vadd.f32 %v2926_v2, %v3792_v18  ;;  %v2928_v1 = vadd.f32 %v2889_v52, %v2769_v28  ;;  %v1991_v3 = vpop.f32.mrb[7].mxu0 }
 0x17d   : > { %v2062_v12 = vadd.f32 %v2927_v48, %v3792_v18  ;;  %v2929_v16 = vadd.f32 %v1991_v3, %v1165_v56  ;;  %2906 = vmatprep.mubr.msk.bf16.mxu1 %vm503_vm3, %v2090_v41 }
 0x17e   : > { %v2065_v60 = vadd.f32 %v2928_v1, %v3792_v18  ;;  %2907 = vmatmul.mubr.msk.bf16.vlgmr.msra.gmra.mrb[16].mxu1 %vm503_vm3, %v2091_v13  ;;  %v2080_v33 = vmax.f32 %v2064_v54, 0.0 }
 0x17f   : > { %v2063_v31 = vadd.f32 %v2929_v16, %v3792_v18  ;;  %v2078_v40 = vmax.f32 %v2062_v12, 0.0 }
 0x180   : > { %v2081_v19 = vmax.f32 %v2065_v60, 0.0 }
 0x181   : > { %v2079_v43 = vmax.f32 %v2063_v31, 0.0  ;;  %v2892_v5 = vpop.f32.mrb[8].mxu0 }
 0x182   : > { %v2093_v55 = vpack.c.bf16 %v2081_v19, %v2080_v33  ;;  %v2930_v15 = vadd.f32 %v2892_v5, %v2772_v8  ;;  %v2004_v49 = vpop.f32.mrb[9].mxu0 }
 0x183   : > { %v2092_v23 = vpack.c.bf16 %v2079_v43, %v2078_v40  ;;  %v2931_v24 = vadd.f32 %v2004_v49, %v1178_v20  ;;  %v2893_v25 = vpop.f32.mrb[10].mxu0 }
 0x184   : > { %v2068_v39 = vadd.f32 %v2930_v15, %v3792_v18  ;;  %v2932_v30 = vadd.f32 %v2893_v25, %v2773_v9  ;;  %v2007_v51 = vpop.f32.mrb[11].mxu0 }
 0x185   : > { %v2066_v26 = vadd.f32 %v2931_v24, %v3792_v18  ;;  %v2933_v61 = vadd.f32 %v2007_v51, %v1181_v63  ;;  %2910 = vmatprep.mubr.msk.bf16.mxu1 %vm503_vm3, %v2092_v23 }
 0x186   : > { %v2069_v32 = vadd.f32 %v2932_v30, %v3792_v18  ;;  %2911 = vmatmul.mubr.msk.bf16.gmra.mrb[20].mxu1 %vm503_vm3, %v2093_v55  ;;  %v2084_v6 = vmax.f32 %v2068_v39, 0.0 }
 0x187   : > { %v2067_v62 = vadd.f32 %v2933_v61, %v3792_v18  ;;  %v2082_v29 = vmax.f32 %v2066_v26, 0.0 }
 0x188   : > { %v2085_v14 = vmax.f32 %v2069_v32, 0.0 }
 0x189   : > { %v2083_v21 = vmax.f32 %v2067_v62, 0.0  ;;  %v2896_v38 = vpop.f32.mrb[12].mxu0 }
 0x18a   : > { %v2095_v28 = vpack.c.bf16 %v2085_v14, %v2084_v6  ;;  %v2934_v56 = vadd.f32 %v2896_v38, %v3781_v27  ;;  %v2020_v8 = vpop.f32.mrb[13].mxu0 }
 0x18b   : > { %v2094_v20 = vpack.c.bf16 %v2083_v21, %v2082_v29  ;;  %v2935_v9 = vadd.f32 %v2020_v8, %v3783_v17  ;;  %v2897_v63 = vpop.f32.mrb[14].mxu0 }
 0x18c   : > { %v2072_v42 = vadd.f32 %v2934_v56, %v3792_v18  ;;  %v2936_v58 = vadd.f32 %v2897_v63, %v3785_v50  ;;  %v2023_v47 = vpop.f32.mrb[15].mxu0 }
 0x18d   : > { %v2070_v35 = vadd.f32 %v2935_v9, %v3792_v18  ;;  %v2937_v46 = vadd.f32 %v2023_v47, %v3787_v45  ;;  %2914 = vmatprep.mubr.msk.bf16.mxu1 %vm503_vm3, %v2094_v20  ;;  %v2545_v45 = vld [vmem:[%s3855_s4] ss:$0 sm:$0xff] }
 0x18e   : > { %v2073_v59 = vadd.f32 %v2936_v58, %v3792_v18  ;;  %2915 = vmatmul.mubr.msk.bf16.gmra.mrb[24].mxu1 %vm503_vm3, %v2095_v28  ;;  %v2088_v17 = vmax.f32 %v2072_v42, 0.0 }
 0x18f   : > { %v2071_v27 = vadd.f32 %v2937_v46, %v3792_v18  ;;  %v2086_v34 = vmax.f32 %v2070_v35, 0.0 }
 0x190   : > { %v2089_v0 = vmax.f32 %v2073_v59, 0.0 }
 0x191   : > { %v2087_v57 = vmax.f32 %v2071_v27, 0.0 }
 0x192   : > { %v2097_v37 = vpack.c.bf16 %v2089_v0, %v2088_v17 }
 0x193   : > { %v2096_v50 = vpack.c.bf16 %v2087_v57, %v2086_v34 }
 0x195   : > { %2918 = vmatprep.mubr.msk.bf16.mxu1 %vm503_vm3, %v2096_v50 }
 0x196   : > { %2919 = vmatmul.mubr.msk.bf16.gmra.mrb[28].mxu1 %vm503_vm3, %v2097_v37 }
 0x251   : > { %v2908_v18 = vpop.f32.mrb[16].mxu1 }
 0x252   : > { %v2204_v22 = vadd.f32 %v2908_v18, %v2545_v45  ;;  %v2195_v44 = vpop.f32.mrb[17].mxu1 }
 0x253   : > { %v2196_v4 = vadd.f32 %v2545_v45, %v2195_v44  ;;  %v2909_v11 = vpop.f32.mrb[18].mxu1 }
 0x254   : > { %2260 = vst [vmem:[%s3830_s21 + $0x10] sm:$0xff] %v2204_v22  ;;  %v2207_v36 = vadd.f32 %v2909_v11, %v2545_v45  ;;  %v2198_v53 = vpop.f32.mrb[19].mxu1 }
 0x255   : > { %2258 = vst [vmem:[%s3830_s21] sm:$0xff] %v2196_v4  ;;  %v2199_v7 = vadd.f32 %v2545_v45, %v2198_v53 }
 0x256   : > { %2261 = vst [vmem:[%s3830_s21 + $0x18] sm:$0xff] %v2207_v36 }
 0x257   : > { %2259 = vst [vmem:[%s3830_s21 + $0x8] sm:$0xff] %v2199_v7 }
 0x259   : > { %v2912_v13 = vpop.f32.mrb[20].mxu1 }
 0x25a   : > { %v2220_v2 = vadd.f32 %v2912_v13, %v2545_v45  ;;  %v2211_v10 = vpop.f32.mrb[21].mxu1 }
 0x25b   : > { %v2212_v41 = vadd.f32 %v2545_v45, %v2211_v10  ;;  %v2913_v48 = vpop.f32.mrb[22].mxu1 }
 0x25c   : > { %2264 = vst [vmem:[%s3830_s21 + $0x30] sm:$0xff] %v2220_v2  ;;  %v2223_v52 = vadd.f32 %v2913_v48, %v2545_v45  ;;  %v2214_v54 = vpop.f32.mrb[23].mxu1 }
 0x25d   : > { %2262 = vst [vmem:[%s3830_s21 + $0x20] sm:$0xff] %v2212_v41  ;;  %v2215_v1 = vadd.f32 %v2545_v45, %v2214_v54 }
 0x25e   : > { %2265 = vst [vmem:[%s3830_s21 + $0x38] sm:$0xff] %v2223_v52 }
 0x25f   : > { %2263 = vst [vmem:[%s3830_s21 + $0x28] sm:$0xff] %v2215_v1 }
 0x261   : > { %v2916_v3 = vpop.f32.mrb[24].mxu1 }
 0x262   : > { %v2236_v12 = vadd.f32 %v2916_v3, %v2545_v45  ;;  %v2227_v16 = vpop.f32.mrb[25].mxu1 }
 0x263   : > { %v2228_v60 = vadd.f32 %v2545_v45, %v2227_v16  ;;  %v2917_v31 = vpop.f32.mrb[26].mxu1 }
 0x264   : > { %2268 = vst [vmem:[%s3830_s21 + $0x50] sm:$0xff] %v2236_v12  ;;  %v2239_v33 = vadd.f32 %v2917_v31, %v2545_v45  ;;  %v2230_v19 = vpop.f32.mrb[27].mxu1 }
 0x265   : > { %2266 = vst [vmem:[%s3830_s21 + $0x40] sm:$0xff] %v2228_v60  ;;  %v2231_v40 = vadd.f32 %v2545_v45, %v2230_v19 }
 0x266   : > { %2269 = vst [vmem:[%s3830_s21 + $0x58] sm:$0xff] %v2239_v33 }
 0x267   : > { %2267 = vst [vmem:[%s3830_s21 + $0x48] sm:$0xff] %v2231_v40 }
 0x269   : > { %v2920_v43 = vpop.f32.mrb[28].mxu1 }
 0x26a   : > { %v2252_v5 = vadd.f32 %v2920_v43, %v2545_v45  ;;  %v2243_v55 = vpop.f32.mrb[29].mxu1 }
 0x26b   : > { %v2244_v15 = vadd.f32 %v2545_v45, %v2243_v55  ;;  %v2921_v49 = vpop.f32.mrb[30].mxu1 }
 0x26c   : > { %2272 = vst [vmem:[%s3830_s21 + $0x70] sm:$0xff] %v2252_v5  ;;  %v2255_v23 = vadd.f32 %v2921_v49, %v2545_v45  ;;  %v2246_v24 = vpop.f32.mrb[31].mxu1 }
 0x26d   : > { %2270 = vst [vmem:[%s3830_s21 + $0x60] sm:$0xff] %v2244_v15  ;;  %v2247_v25 = vadd.f32 %v2545_v45, %v2246_v24 }
 0x26e   : > { %2273 = vst [vmem:[%s3830_s21 + $0x78] sm:$0xff] %v2255_v23 }
 0x26f   : > { %2271 = vst [vmem:[%s3830_s21 + $0x68] sm:$0xff] %v2247_v25 }
 0x270 PF: > { %s15_s18 = sadd.s32 1, %s3114_s18  }
 0x271   : > { %p12_p4 = scmp.ge.s32.totalorder %s15_s18, 4  }
 0x273   :  { %14 = sbr.rel (!%p12_p4) target bundleno = 1 (0x1), region = 76 }

// kernel: pointpillars_forward.3
= control target key start
LH: loop header
LB: loop body
LE: loop exit
PB: predicated region body
PF: predicated region fallthrough
CT: control target
= control target key end

     0   :  { %v5290_v0 = vmov 0   ;;  %v754_v7 = vlaneseq  ;;  %v5291_v8 = vmov 1966171168   ;;  %v5292_v14 = vmov 3   ;;  %s5295_s23 = smov 4   ;;  %s5296_s8 = smov 7   ;;  %s7813_s1 = inlined_call_operand.vmem [shape: f32[64,4], index: 1, kind: input, shape index: {}]   ;;  %s7814_s0 = inlined_call_operand.vmem [shape: f32[64,8,4], index: 0, kind: input, shape index: {}]   ;;  %s7815_s2 = inlined_call_operand.vmem [shape: f32[16,64], index: 2, kind: input, shape index: {}]   ;;  %s7816_s3 = inlined_call_operand.vmem [shape: f32[1,64], index: 3, kind: input, shape index: {}]   ;;  %s7817_s4 = inlined_call_operand.vmem [shape: bf16[64,64], index: 4, kind: output, shape index: {}]  }
   0x1   :  { %5213 = vset.pattern.permute.xlu0 %v5290_v0  ;;  %v5325_v1 = vld [vmem:[%s7813_s1] sm:$0xff]  ;;  %5214 = vset.pattern.permute.xlu1 %v5290_v0  ;;  %v5330_v2 = vld [vmem:[%s7813_s1 + $0x10] sm:$0xff]  ;;  %v5337_v3 = vld [vmem:[%s7813_s1 + $0x8] sm:$0xff]  ;;  %v1583_v9 = vunpack.c.l.s4 %v5291_v8  ;;  %v5294_v46 = vmov 0.0   ;;  %vm89_vm8 = vcmask 23552   ;;  %vm2997_vm9 = vcmask 31744  }
   0x2   :  { %540 = vperm.xlu0 %5213, %v5325_v1   ;;  %548 = vperm.xlu1 %5214, %v5330_v2   ;;  %v5342_v4 = vld [vmem:[%s7813_s1 + $0x18] sm:$0xff]  ;;  %v5349_v5 = vld [vmem:[%s7813_s1 + $0x20] sm:$0xff]  ;;  %v5354_v6 = vld [vmem:[%s7813_s1 + $0x28] sm:$0xff]  ;;  %v5370_v12 = vshrl.u32 %v754_v7, 7  ;;  %v755_v39 = vand.u32 127, %v754_v7  ;;  %vm3062_vm10 = vcmask 56320  }
   0x3   :  { %v5361_v10 = vld [vmem:[%s7813_s1 + $0x30] sm:$0xff]  ;;  %v5366_v11 = vld [vmem:[%s7813_s1 + $0x38] sm:$0xff]  ;;  %v1584_v13 = vunpack.c.0.s8 %v1583_v9  ;;  %s5293_s1 = smov 127   ;;  %vm3127_vm11 = vcmask 64512   ;;  %vm3192_vm12 = vcmask 72704   ;;  %vm3330_vm13 = vcmask 130048  }
   0x4   :  { %v5388_v22 = vsub.s32 0, %v5370_v12  ;;  %v5428_v42 = vcvt.s32.f32 %v755_v39  ;;  %v5431_v43 = vsub.s32 1, %v5370_v12  ;;  %v5438_v50 = vsub.s32 2, %v5370_v12 }
   0x5   :  { %v5373_v15 = vsub.s32 %v1584_v13, %v5370_v12  ;;  %v5441_v51 = vsub.s32 3, %v5370_v12  ;;  %v5448_v56 = vsub.s32 4, %v5370_v12  ;;  %v5451_v57 = vsub.s32 5, %v5370_v12 }
   0x6   :  { %544 = vperm.xlu0 %5213, %v5337_v3   ;;  %552 = vperm.xlu1 %5214, %v5342_v4   ;;  %7840 = vst [vmem:[#allocation6_spill] sm:$0xff] %v5431_v43  ;;  %7841 = vst [vmem:[#allocation7_spill] sm:$0xff] %v5438_v50  ;;  %v5462_v62 = vsub.s32 6, %v5370_v12  ;;  %v5468_v7 = vsub.s32 7, %v5370_v12  ;;  %vm3972_vm14 = vcmask 523264   ;;  %vm4741_vm15 = vcmask 1041409  }
   0x7   :  { %v1588_v16 = vrot.slane %v5325_v1, %v5373_v15  ;;  %v1784_v17 = vrot.slane %v5349_v5, %v5373_v15  ;;  %7842 = vst [vmem:[#allocation8_spill] sm:$0xff] %v5441_v51  ;;  %7843 = vst [vmem:[#allocation9_spill] sm:$0xff] %v5448_v56 }
   0x8   :  { %7844 = vst [vmem:[#allocation10_spill] sm:$0xff] %v5462_v62  ;;  %7845 = vst [vmem:[#allocation11_spill] sm:$0xff] %v5468_v7 }
   0x9   :  { %v1792_v18 = vcombine.high %v1784_v17, %v1784_v17  ;;  %v1800_v19 = vrot.slane %v1784_v17, %v5373_v15  ;;  %v1604_v20 = vrot.slane %v1588_v16, %v5373_v15  ;;  %v1596_v21 = vcombine.high %v1588_v16, %v1588_v16 }
   0xa   :  { %556 = vperm.xlu0 %5213, %v5349_v5   ;;  %560 = vperm.xlu1 %5214, %v5354_v6  }
   0xb   :  { %v5391_v23 = vrot.slane %v1792_v18, %v5373_v15  ;;  %v2104_v24 = vrot.slane %v1800_v19, %v5388_v22  ;;  %v1976_v25 = vrot.slane %v1604_v20, %v5388_v22  ;;  %v5398_v26 = vrot.slane %v1596_v21, %v5373_v15 }
   0xc   :  { %v1822_v29 = vcombine.high %v1800_v19, %v1800_v19  ;;  %v1626_v30 = vcombine.high %v1604_v20, %v1604_v20 }
   0xd   :  { %v2108_v27 = vrot.slane %v5391_v23, %v5388_v22  ;;  %v1980_v28 = vrot.slane %v5398_v26, %v5388_v22 }
   0xe   :  { %564 = vperm.xlu0 %5213, %v5361_v10   ;;  %568 = vperm.xlu1 %5214, %v5366_v11   ;;  %v2112_v31 = vrot.slane %v1822_v29, %v5388_v22  ;;  %v1984_v32 = vrot.slane %v1626_v30, %v5388_v22 }
  0x12   :  { %5215 = vset.pattern.permute.xlu0 %v5292_v14  ;;  %5216 = vset.pattern.permute.xlu1 %v5292_v14 }
  0x13   :  { %758 = vperm.xlu0 %5215, %v5325_v1   ;;  %762 = vperm.xlu1 %5216, %v5337_v3  }
  0x17   :  { %770 = vperm.xlu0 %5215, %v5342_v4   ;;  %766 = vperm.xlu1 %5216, %v5330_v2  }
  0x1b   :  { %778 = vperm.xlu0 %5215, %v5354_v6   ;;  %774 = vperm.xlu1 %5216, %v5349_v5  }
  0x1f   :  { %786 = vperm.xlu0 %5215, %v5366_v11   ;;  %782 = vperm.xlu1 %5216, %v5361_v10  }
  0x23   :  { %2293 = vrot.lane.b32.xlu1 %v2104_v24, %s5293_s1  ;;  %2229 = vrot.lane.b32.xlu0 %v1976_v25, %s5293_s1 }
  0x27   :  { %2295 = vrot.lane.b32.xlu1 %v2108_v27, %s5293_s1  ;;  %2231 = vrot.lane.b32.xlu0 %v1980_v28, %s5293_s1 }
  0x2b   :  { %2297 = vrot.lane.b32.xlu1 %v2112_v31, %s5293_s1  ;;  %2233 = vrot.lane.b32.xlu0 %v1984_v32, %s5293_s1 }
  0x81   :  { %v5412_v33 = vpop.permute.xlu0 %540  ;;  %v5414_v34 = vpop.permute.xlu1 %548 }
  0x82   :  { %7836 = vst [vmem:[#allocation2_spill] sm:$0xff] %v5414_v34 }
  0x85   :  { %v5416_v35 = vpop.permute.xlu0 %544  ;;  %v5418_v36 = vpop.permute.xlu1 %552 }
  0x86   :  { %7837 = vst [vmem:[#allocation3_spill] sm:$0xff] %v5418_v36 }
  0x89   :  { %v5420_v37 = vpop.permute.xlu0 %556  ;;  %v5422_v38 = vpop.permute.xlu1 %560 }
  0x8d   :  { %v5424_v40 = vpop.permute.xlu0 %564  ;;  %v5426_v41 = vpop.permute.xlu1 %568 }
  0x8e   :  { %7838 = vst [vmem:[#allocation4_spill] sm:$0xff] %v5424_v40  ;;  %7839 = vst [vmem:[#allocation5_spill] sm:$0xff] %v5426_v41  ;;  %v575_v40 = vrot.slane %v5412_v33, 6 }
  0x92   :  { %v759_v44 = vpop.permute.xlu0 %758  ;;  %v763_v45 = vpop.permute.xlu1 %762 }
  0x93   :  { %vm789_vm0 = vcmp.lt.f32.partialorder %v5428_v42, %v759_v44  ;;  %vm790_vm3 = vcmp.lt.f32.partialorder %v5428_v42, %v763_v45 }
  0x94   :  { %v4833_v47 = vsel %vm789_vm0, 1.0, %v5294_v46  ;;  %v4834_v13 = vsel %vm790_vm3, 1.0, %v5294_v46  ;;  %vm4743_vm0 = vcmask 1042434   ;;  %vm4749_vm3 = vcmask 1045509  }
  0x95   :  { %v816_v48 = vrot.slane %v4833_v47, %v5388_v22  ;;  %v823_v49 = vrot.slane %v4833_v47, %v5431_v43  ;;  %v830_v54 = vrot.slane %v4833_v47, %v5438_v50  ;;  %v837_v55 = vrot.slane %v4833_v47, %v5441_v51 }
  0x96   :  { %v5443_v52 = vpop.permute.xlu0 %770  ;;  %v767_v53 = vpop.permute.xlu1 %766  ;;  %v844_v63 = vrot.slane %v4833_v47, %v5448_v56  ;;  %v851_v0 = vrot.slane %v4833_v47, %v5451_v57  ;;  %v858_v17 = vrot.slane %v4833_v47, %v5462_v62  ;;  %v865_v12 = vrot.slane %v4833_v47, %v5468_v7 }
  0x97   :  { %818 = vbcast.lane.b32.xlu1 %v816_v48, 256  ;;  %825 = vbcast.lane.b32.xlu0 %v823_v49, 256  ;;  %v872_v18 = vrot.slane %v4834_v13, %v5388_v22  ;;  %v879_v19 = vrot.slane %v4834_v13, %v5431_v43  ;;  %v886_v20 = vrot.slane %v4834_v13, %v5438_v50 }
  0x98   :  { %v893_v21 = vrot.slane %v4834_v13, %v5441_v51  ;;  %v900_v24 = vrot.slane %v4834_v13, %v5448_v56  ;;  %v907_v25 = vrot.slane %v4834_v13, %v5451_v57  ;;  %vm791_vm6 = vcmp.lt.f32.partialorder %v5428_v42, %v767_v53 }
  0x99   :  { %v914_v27 = vrot.slane %v4834_v13, %v5462_v62  ;;  %v921_v28 = vrot.slane %v4834_v13, %v5468_v7  ;;  %v4835_v29 = vsel %vm791_vm6, 1.0, %v5294_v46  ;;  %vm792_vm7 = vcmp.lt.f32.partialorder %v5428_v42, %v5443_v52 }
  0x9a   :  { %v779_v58 = vpop.permute.xlu0 %778  ;;  %v775_v59 = vpop.permute.xlu1 %774  ;;  %v928_v30 = vrot.slane %v4835_v29, %v5388_v22  ;;  %v935_v31 = vrot.slane %v4835_v29, %v5431_v43  ;;  %v942_v32 = vrot.slane %v4835_v29, %v5438_v50  ;;  %v949_v39 = vrot.slane %v4835_v29, %v5441_v51 }
  0x9b   :  { %vm794_vm1 = vcmp.lt.f32.partialorder %v5428_v42, %v779_v58  ;;  %832 = vbcast.lane.b32.xlu1 %v830_v54, 256  ;;  %839 = vbcast.lane.b32.xlu0 %v837_v55, 256  ;;  %vm793_vm2 = vcmp.lt.f32.partialorder %v5428_v42, %v775_v59  ;;  %v956_v44 = vrot.slane %v4835_v29, %v5448_v56  ;;  %v4836_v49 = vsel %vm792_vm7, 1.0, %v5294_v46 }
  0x9c   :  { %v5456_v60 = vsel %vm794_vm1, 1.0, %v5294_v46  ;;  %v5459_v61 = vsel %vm793_vm2, 1.0, %v5294_v46  ;;  %v963_v45 = vrot.slane %v4835_v29, %v5451_v57  ;;  %v970_v47 = vrot.slane %v4835_v29, %v5462_v62 }
  0x9d   :  { %v977_v48 = vrot.slane %v4835_v29, %v5468_v7  ;;  %v984_v53 = vrot.slane %v4836_v49, %v5388_v22  ;;  %v991_v54 = vrot.slane %v4836_v49, %v5431_v43  ;;  %v998_v55 = vrot.slane %v4836_v49, %v5438_v50 }
  0x9e   :  { %v787_v8 = vpop.permute.xlu0 %786  ;;  %v783_v9 = vpop.permute.xlu1 %782  ;;  %v1012_v52 = vrot.slane %v4836_v49, %v5448_v56  ;;  %v1019_v58 = vrot.slane %v4836_v49, %v5451_v57  ;;  %v1033_v59 = vrot.slane %v4836_v49, %v5468_v7  ;;  %v1068_v13 = vrot.slane %v5459_v61, %v5448_v56 }
  0x9f   :  { %vm796_vm4 = vcmp.lt.f32.partialorder %v5428_v42, %v787_v8  ;;  %846 = vbcast.lane.b32.xlu1 %v844_v63, 256  ;;  %853 = vbcast.lane.b32.xlu0 %v851_v0, 256  ;;  %vm795_vm5 = vcmp.lt.f32.partialorder %v5428_v42, %v783_v9  ;;  %v1005_v42 = vrot.slane %v4836_v49, %v5441_v51  ;;  %vm4745_vm1 = vcmask 1043459  }
  0xa0   :  { %v5474_v14 = vsel %vm796_vm4, 1.0, %v5294_v46  ;;  %v5477_v16 = vsel %vm795_vm5, 1.0, %v5294_v46  ;;  %v1026_v46 = vrot.slane %v4836_v49, %v5462_v62  ;;  %v1040_v63 = vrot.slane %v5459_v61, %v5388_v22 }
  0xa1   :  { %7846 = vst [vmem:[#allocation12_spill] sm:$0xff] %v5474_v14  ;;  %7847 = vst [vmem:[#allocation13_spill] sm:$0xff] %v5477_v16  ;;  %v1047_v0 = vrot.slane %v5459_v61, %v5431_v43  ;;  %v1054_v8 = vrot.slane %v5459_v61, %v5438_v50  ;;  %v1061_v9 = vrot.slane %v5459_v61, %v5441_v51  ;;  %v5761_v14 = vld [vmem:[%s7814_s0 + $0x108] sm:$0xff]  ;;  %vm4747_vm2 = vcmask 1044484  }
  0xa2   :  { %vm4751_vm4 = vcmask 1046534   ;;  %vm4753_vm5 = vcmask 1047559   ;;  %vm4820_vm6 = vcmask 519168  }
  0xa3   :  { %860 = vbcast.lane.b32.xlu1 %v858_v17, 256  ;;  %867 = vbcast.lane.b32.xlu0 %v865_v12, 256  ;;  %v1075_v17 = vrot.slane %v5459_v61, %v5451_v57  ;;  %v1082_v12 = vrot.slane %v5459_v61, %v5462_v62 }
  0xa7   :  { %874 = vbcast.lane.b32.xlu1 %v872_v18, 256  ;;  %881 = vbcast.lane.b32.xlu0 %v879_v19, 256  ;;  %v1089_v18 = vrot.slane %v5459_v61, %v5468_v7  ;;  %v1581_v19 = vcombine.high %v5325_v1, %v5325_v1  ;;  %v1110_v1 = vrot.slane %v5456_v60, %v5438_v50 }
  0xa9   :  { %v1595_v61 = vrot.slane %v1581_v19, %v5373_v15 }
  0xab   :  { %888 = vbcast.lane.b32.xlu1 %v886_v20, 256  ;;  %895 = vbcast.lane.b32.xlu0 %v893_v21, 256  ;;  %v1096_v20 = vrot.slane %v5456_v60, %v5388_v22  ;;  %v1103_v21 = vrot.slane %v5456_v60, %v5431_v43 }
  0xaf   :  { %902 = vbcast.lane.b32.xlu1 %v900_v24, 256  ;;  %909 = vbcast.lane.b32.xlu0 %v907_v25, 256  ;;  %v1777_v24 = vcombine.high %v5349_v5, %v5349_v5  ;;  %v1628_v25 = vcombine.high %v5398_v26, %v5398_v26  ;;  %v1597_v26 = vcombine.high %v1595_v61, %v1595_v61 }
  0xb1   :  { %v1791_v29 = vrot.slane %v1777_v24, %v5373_v15  ;;  %v1988_v5 = vrot.slane %v1628_v25, %v5388_v22 }
  0xb3   :  { %916 = vbcast.lane.b32.xlu1 %v914_v27, 256  ;;  %923 = vbcast.lane.b32.xlu0 %v921_v28, 256  ;;  %v1117_v27 = vrot.slane %v5456_v60, %v5441_v51  ;;  %v1824_v28 = vcombine.high %v5391_v23, %v5391_v23 }
  0xb7   :  { %930 = vbcast.lane.b32.xlu1 %v928_v30, 256  ;;  %937 = vbcast.lane.b32.xlu0 %v935_v31, 256  ;;  %v1611_v30 = vrot.slane %v1595_v61, %v5373_v15  ;;  %v1124_v31 = vrot.slane %v5456_v60, %v5448_v56  ;;  %v1630_v61 = vcombine.high %v5337_v3, %v5337_v3 }
  0xb9   :  { %v1992_v23 = vrot.slane %v1611_v30, %v5388_v22 }
  0xbb   :  { %944 = vbcast.lane.b32.xlu1 %v942_v32, 256  ;;  %951 = vbcast.lane.b32.xlu0 %v949_v39, 256  ;;  %v2116_v32 = vrot.slane %v1824_v28, %v5388_v22  ;;  %v1807_v39 = vrot.slane %v1791_v29, %v5373_v15 }
  0xbf   :  { %958 = vbcast.lane.b32.xlu1 %v956_v44, 256  ;;  %965 = vbcast.lane.b32.xlu0 %v963_v45, 256  ;;  %v1625_v44 = vrot.slane %v1597_v26, %v5373_v15  ;;  %v1793_v45 = vcombine.high %v1791_v29, %v1791_v29  ;;  %v1826_v26 = vcombine.high %v5354_v6, %v5354_v6 }
  0xc1   :  { %v1821_v49 = vrot.slane %v1793_v45, %v5373_v15 }
  0xc3   :  { %972 = vbcast.lane.b32.xlu1 %v970_v47, 256  ;;  %979 = vbcast.lane.b32.xlu0 %v977_v48, 256  ;;  %v2120_v47 = vrot.slane %v1807_v39, %v5388_v22  ;;  %v1996_v48 = vrot.slane %v1625_v44, %v5388_v22 }
  0xc7   :  { %986 = vbcast.lane.b32.xlu1 %v984_v53, 256  ;;  %993 = vbcast.lane.b32.xlu0 %v991_v54, 256  ;;  %v1627_v53 = vcombine.high %v1611_v30, %v1611_v30  ;;  %v1637_v54 = vrot.slane %v5337_v3, %v5373_v15  ;;  %v1644_v3 = vrot.slane %v1630_v61, %v5373_v15 }
  0xc8   :  { %v1686_v61 = vrot.slane %v5330_v2, %v5373_v15 }
  0xcb   :  { %1000 = vbcast.lane.b32.xlu1 %v998_v55, 256  ;;  %1007 = vbcast.lane.b32.xlu0 %v1005_v42, 256  ;;  %v1823_v55 = vcombine.high %v1807_v39, %v1807_v39  ;;  %v2124_v42 = vrot.slane %v1821_v49, %v5388_v22 }
  0xcf   :  { %1014 = vbcast.lane.b32.xlu1 %v1012_v52, 256  ;;  %1021 = vbcast.lane.b32.xlu0 %v1019_v58, 256  ;;  %v2000_v52 = vrot.slane %v1627_v53, %v5388_v22  ;;  %v5564_v58 = vpop.permute.xlu1 %2293  ;;  %v1840_v53 = vrot.slane %v1826_v26, %v5373_v15 }
  0xd3   :  { %1028 = vbcast.lane.b32.xlu1 %v1026_v46, 256  ;;  %1035 = vbcast.lane.b32.xlu0 %v1033_v59, 256  ;;  %v5566_v46 = vpop.permute.xlu0 %2229  ;;  %v1629_v59 = vcombine.high %v1625_v44, %v1625_v44 }
  0xd7   :  { %1042 = vbcast.lane.b32.xlu1 %v1040_v63, 256  ;;  %1049 = vbcast.lane.b32.xlu0 %v1047_v0, 256  ;;  %v1833_v63 = vrot.slane %v5354_v6, %v5373_v15  ;;  %v2128_v0 = vrot.slane %v1823_v55, %v5388_v22  ;;  %v1660_v6 = vrot.slane %v1644_v3, %v5373_v15 }
  0xd9   :  { %v1841_v25 = vcombine.high %v1833_v63, %v1833_v63 }
  0xdb   :  { %1056 = vbcast.lane.b32.xlu1 %v1054_v8, 256  ;;  %1063 = vbcast.lane.b32.xlu0 %v1061_v9, 256  ;;  %v1825_v8 = vcombine.high %v1821_v49, %v1821_v49  ;;  %v2004_v9 = vrot.slane %v1629_v59, %v5388_v22  ;;  %v2024_v59 = vrot.slane %v1660_v6, %v5388_v22 }
  0xdd   :  { %v2132_v19 = vrot.slane %v1825_v8, %v5388_v22  ;;  %v1842_v8 = vcombine.high %v1840_v53, %v1840_v53 }
  0xdf   :  { %1070 = vbcast.lane.b32.xlu1 %v1068_v13, 256  ;;  %1077 = vbcast.lane.b32.xlu0 %v1075_v17, 256  ;;  %v1653_v13 = vrot.slane %v1637_v54, %v5373_v15  ;;  %v1645_v17 = vcombine.high %v1637_v54, %v1637_v54  ;;  %v1646_v54 = vcombine.high %v1644_v3, %v1644_v3 }
  0xe0   :  { %v1882_v3 = vrot.slane %v5361_v10, %v5373_v15 }
  0xe1   :  { %v1667_v24 = vrot.slane %v1645_v17, %v5373_v15  ;;  %v1675_v30 = vcombine.high %v1653_v13, %v1653_v13  ;;  %v1676_v17 = vcombine.high %v1660_v6, %v1660_v6 }
  0xe3   :  { %1084 = vbcast.lane.b32.xlu1 %v1082_v12, 256  ;;  %1091 = vbcast.lane.b32.xlu0 %v1089_v18, 256  ;;  %v5575_v12 = vpop.permute.xlu1 %2295  ;;  %v5577_v18 = vpop.permute.xlu0 %2231  ;;  %v2012_v29 = vrot.slane %v1667_v24, %v5388_v22  ;;  %v2016_v39 = vrot.slane %v1675_v30, %v5388_v22 }
  0xe7   :  { %1098 = vbcast.lane.b32.xlu1 %v1096_v20, 256  ;;  %1105 = vbcast.lane.b32.xlu0 %v1103_v21, 256  ;;  %v1849_v20 = vrot.slane %v1833_v63, %v5373_v15  ;;  %v2008_v21 = vrot.slane %v1653_v13, %v5388_v22  ;;  %v5592_v28 = vpop.permute.xlu0 %2233  ;;  %v1856_v63 = vrot.slane %v1840_v53, %v5373_v15 }
  0xeb   :  { %1112 = vbcast.lane.b32.xlu1 %v1110_v1, 256  ;;  %1119 = vbcast.lane.b32.xlu0 %v1117_v27, 256  ;;  %v2136_v1 = vrot.slane %v1849_v20, %v5388_v22  ;;  %v5590_v27 = vpop.permute.xlu1 %2297 }
  0xef   :  { %1126 = vbcast.lane.b32.xlu1 %v1124_v31, 256  ;;  %2235 = vrot.lane.b32.xlu0 %v1988_v5, %s5293_s1  ;;  %v1863_v5 = vrot.slane %v1841_v25, %v5373_v15  ;;  %v1871_v31 = vcombine.high %v1849_v20, %v1849_v20 }
  0xf3   :  { %2299 = vrot.lane.b32.xlu1 %v2116_v32, %s5293_s1  ;;  %2237 = vrot.lane.b32.xlu0 %v1992_v23, %s5293_s1  ;;  %v2140_v32 = vrot.slane %v1863_v5, %v5388_v22  ;;  %v1677_v23 = vcombine.high %v1667_v24, %v1667_v24 }
  0xf5   :  { %v2020_v49 = vrot.slane %v1677_v23, %v5388_v22 }
  0xf7   :  { %2301 = vrot.lane.b32.xlu1 %v2120_v47, %s5293_s1  ;;  %2239 = vrot.lane.b32.xlu0 %v1996_v48, %s5293_s1  ;;  %v2144_v47 = vrot.slane %v1871_v31, %v5388_v22  ;;  %v1873_v48 = vcombine.high %v1863_v5, %v1863_v5  ;;  %v1872_v5 = vcombine.high %v1856_v63, %v1856_v63 }
  0xf9   :  { %v2160_v23 = vrot.slane %v1872_v5, %v5388_v22 }
  0xfb   :  { %2303 = vrot.lane.b32.xlu1 %v2124_v42, %s5293_s1  ;;  %2241 = vrot.lane.b32.xlu0 %v2000_v52, %s5293_s1  ;;  %v2148_v52 = vrot.slane %v1873_v48, %v5388_v22 }
  0xff   :  { %2305 = vrot.lane.b32.xlu1 %v2128_v0, %s5293_s1  ;;  %2243 = vrot.lane.b32.xlu0 %v2004_v9, %s5293_s1  ;;  %v1674_v0 = vrot.slane %v1646_v54, %v5373_v15  ;;  %v1898_v54 = vrot.slane %v1882_v3, %v5373_v15 }
 0x101   :  { %v2028_v20 = vrot.slane %v1674_v0, %v5388_v22  ;;  %v1678_v30 = vcombine.high %v1674_v0, %v1674_v0 }
 0x103   :  { %2307 = vrot.lane.b32.xlu1 %v2132_v19, %s5293_s1  ;;  %2245 = vrot.lane.b32.xlu0 %v2008_v21, %s5293_s1  ;;  %v2152_v19 = vrot.slane %v1856_v63, %v5388_v22  ;;  %v1870_v21 = vrot.slane %v1842_v8, %v5373_v15  ;;  %v1890_v63 = vcombine.high %v1882_v3, %v1882_v3 }
 0x105   :  { %v1874_v48 = vcombine.high %v1870_v21, %v1870_v21 }
 0x107   :  { %2309 = vrot.lane.b32.xlu1 %v2136_v1, %s5293_s1  ;;  %2247 = vrot.lane.b32.xlu0 %v2012_v29, %s5293_s1  ;;  %v2032_v1 = vrot.slane %v1676_v17, %v5388_v22  ;;  %v2156_v29 = vrot.slane %v1870_v21, %v5388_v22  ;;  %v1679_v17 = vcombine.high %v5330_v2, %v5330_v2 }
 0x108   :  { %v1912_v21 = vrot.slane %v1890_v63, %v5373_v15  ;;  %v1875_v2 = vcombine.high %v5361_v10, %v5361_v10 }
 0x109   :  { %v5603_v44 = vpop.permute.xlu1 %818  ;;  %v5605_v45 = vpop.permute.xlu0 %825  ;;  %v1693_v5 = vrot.slane %v1679_v17, %v5373_v15 }
 0x10a   :  { %7848 = vst [vmem:[#allocation14_spill] sm:$0xff] %v5603_v44  ;;  %7849 = vst [vmem:[#allocation15_spill] sm:$0xff] %v5605_v45 }
 0x10b   :  { %2311 = vrot.lane.b32.xlu1 %v2140_v32, %s5293_s1  ;;  %2249 = vrot.lane.b32.xlu0 %v2016_v39, %s5293_s1  ;;  %v1702_v32 = vrot.slane %v1686_v61, %v5373_v15  ;;  %v1694_v39 = vcombine.high %v1686_v61, %v1686_v61 }
 0x10d   :  { %v5613_v55 = vpop.permute.xlu1 %832  ;;  %v5615_v42 = vpop.permute.xlu0 %839  ;;  %v2040_v53 = vrot.slane %v1702_v32, %v5388_v22  ;;  %v1724_v61 = vcombine.high %v1702_v32, %v1702_v32 }
 0x10e   :  { %7850 = vst [vmem:[#allocation16_spill] sm:$0xff] %v5613_v55  ;;  %7851 = vst [vmem:[#allocation17_spill] sm:$0xff] %v5615_v42 }
 0x10f   :  { %2313 = vrot.lane.b32.xlu1 %v2144_v47, %s5293_s1  ;;  %2251 = vrot.lane.b32.xlu0 %v2020_v49, %s5293_s1  ;;  %v2036_v47 = vrot.slane %v1678_v30, %v5388_v22  ;;  %v1920_v30 = vcombine.high %v1898_v54, %v1898_v54 }
 0x111   :  { %v5623_v9 = vpop.permute.xlu1 %846  ;;  %v5625_v13 = vpop.permute.xlu0 %853 }
 0x112   :  { %7852 = vst [vmem:[#allocation18_spill] sm:$0xff] %v5623_v9  ;;  %7853 = vst [vmem:[#allocation19_spill] sm:$0xff] %v5625_v13 }
 0x113   :  { %2315 = vrot.lane.b32.xlu1 %v2148_v52, %s5293_s1  ;;  %2253 = vrot.lane.b32.xlu0 %v2024_v59, %s5293_s1  ;;  %v2164_v52 = vrot.slane %v1874_v48, %v5388_v22  ;;  %v1716_v59 = vrot.slane %v1694_v39, %v5373_v15  ;;  %v2172_v39 = vrot.slane %v1912_v21, %v5388_v22 }
 0x114   :  { %v1889_v48 = vrot.slane %v1875_v2, %v5373_v15 }
 0x115   :  { %v5632_v24 = vpop.permute.xlu1 %860  ;;  %v5634_v25 = vpop.permute.xlu0 %867  ;;  %v1726_v3 = vcombine.high %v1716_v59, %v1716_v59 }
 0x116   :  { %7854 = vst [vmem:[#allocation20_spill] sm:$0xff] %v5632_v24  ;;  %7855 = vst [vmem:[#allocation21_spill] sm:$0xff] %v5634_v25 }
 0x117   :  { %2317 = vrot.lane.b32.xlu1 %v2152_v19, %s5293_s1  ;;  %2255 = vrot.lane.b32.xlu0 %v2028_v20, %s5293_s1  ;;  %v2168_v19 = vrot.slane %v1898_v54, %v5388_v22  ;;  %v2044_v20 = vrot.slane %v1716_v59, %v5388_v22  ;;  %v2052_v10 = vrot.slane %v1726_v3, %v5388_v22 }
 0x118   :  { %v1709_v54 = vrot.slane %v1693_v5, %v5373_v15  ;;  %v1695_v59 = vcombine.high %v1693_v5, %v1693_v5 }
 0x119   :  { %v5642_v26 = vpop.permute.xlu1 %874  ;;  %v5644_v31 = vpop.permute.xlu0 %881 }
 0x11a   :  { %7856 = vst [vmem:[#allocation22_spill] sm:$0xff] %v5642_v26  ;;  %7857 = vst [vmem:[#allocation23_spill] sm:$0xff] %v5644_v31  ;;  %v1723_v2 = vrot.slane %v1695_v59, %v5373_v15  ;;  %v1735_v59 = vrot.slane %v5342_v4, %v5373_v15 }
 0x11b   :  { %2319 = vrot.lane.b32.xlu1 %v2156_v29, %s5293_s1  ;;  %2257 = vrot.lane.b32.xlu0 %v2032_v1, %s5293_s1 }
 0x11d   :  { %v5653_v6 = vpop.permute.xlu1 %888  ;;  %v5655_v49 = vpop.permute.xlu0 %895 }
 0x11e   :  { %7858 = vst [vmem:[#allocation24_spill] sm:$0xff] %v5653_v6  ;;  %7859 = vst [vmem:[#allocation25_spill] sm:$0xff] %v5655_v49 }
 0x11f   :  { %2321 = vrot.lane.b32.xlu1 %v2160_v23, %s5293_s1  ;;  %2259 = vrot.lane.b32.xlu0 %v2036_v47, %s5293_s1  ;;  %v2048_v23 = vrot.slane %v1724_v61, %v5388_v22  ;;  %v1905_v61 = vrot.slane %v1889_v48, %v5373_v15 }
 0x121   :  { %v5663_v0 = vpop.permute.xlu1 %902  ;;  %v5665_v8 = vpop.permute.xlu0 %909 }
 0x122   :  { %7860 = vst [vmem:[#allocation26_spill] sm:$0xff] %v5663_v0  ;;  %7861 = vst [vmem:[#allocation27_spill] sm:$0xff] %v5665_v8 }
 0x123   :  { %2323 = vrot.lane.b32.xlu1 %v2164_v52, %s5293_s1  ;;  %2261 = vrot.lane.b32.xlu0 %v2040_v53, %s5293_s1  ;;  %v1922_v53 = vcombine.high %v1912_v21, %v1912_v21  ;;  %v2176_v52 = vrot.slane %v1920_v30, %v5388_v22  ;;  %v2056_v21 = vrot.slane %v1709_v54, %v5388_v22 }
 0x125   :  { %v5674_v1 = vpop.permute.xlu1 %916  ;;  %v5676_v29 = vpop.permute.xlu0 %923 }
 0x126   :  { %7862 = vst [vmem:[#allocation28_spill] sm:$0xff] %v5674_v1  ;;  %7863 = vst [vmem:[#allocation29_spill] sm:$0xff] %v5676_v29 }
 0x127   :  { %2325 = vrot.lane.b32.xlu1 %v2168_v19, %s5293_s1  ;;  %2263 = vrot.lane.b32.xlu0 %v2044_v20, %s5293_s1  ;;  %v2180_v19 = vrot.slane %v1922_v53, %v5388_v22  ;;  %v1891_v20 = vcombine.high %v1889_v48, %v1889_v48  ;;  %v2060_v48 = vrot.slane %v1723_v2, %v5388_v22 }
 0x128   :  { %v1725_v53 = vcombine.high %v1709_v54, %v1709_v54 }
 0x129   :  { %v5685_v32 = vpop.permute.xlu1 %930  ;;  %v5687_v47 = vpop.permute.xlu0 %937  ;;  %v1919_v3 = vrot.slane %v1891_v20, %v5373_v15 }
 0x12a   :  { %7864 = vst [vmem:[#allocation30_spill] sm:$0xff] %v5685_v32  ;;  %7865 = vst [vmem:[#allocation31_spill] sm:$0xff] %v5687_v47  ;;  %v2064_v54 = vrot.slane %v1725_v53, %v5388_v22  ;;  %v1931_v47 = vrot.slane %v5366_v11, %v5373_v15 }
 0x12b   :  { %2327 = vrot.lane.b32.xlu1 %v2172_v39, %s5293_s1  ;;  %2265 = vrot.lane.b32.xlu0 %v2048_v23, %s5293_s1  ;;  %v5713_v39 = vld [vmem:[%s7814_s0] sm:$0xff]  ;;  %v2184_v23 = vrot.slane %v1905_v61, %v5388_v22  ;;  %v1923_v29 = vcombine.high %v1919_v3, %v1919_v3 }
 0x12c   :  { %v90_v20 = vsel %vm89_vm8, %v5713_v39, 0.0  ;;  %v1939_v1 = vcombine.high %v1931_v47, %v1931_v47 }
 0x12d   :  { %v5695_v63 = vpop.permute.xlu1 %944  ;;  %v5697_v17 = vpop.permute.xlu0 %951 }
 0x12e   :  { %7866 = vst [vmem:[#allocation32_spill] sm:$0xff] %v5695_v63  ;;  %7867 = vst [vmem:[#allocation33_spill] sm:$0xff] %v5697_v17  ;;  %v1743_v63 = vcombine.high %v1735_v59, %v1735_v59 }
 0x12f   :  { %2329 = vrot.lane.b32.xlu1 %v2176_v52, %s5293_s1  ;;  %2267 = vrot.lane.b32.xlu0 %v2052_v10, %s5293_s1 }
 0x131   :  { %v5705_v30 = vpop.permute.xlu1 %958  ;;  %v5707_v5 = vpop.permute.xlu0 %965 }
 0x132   :  { %7868 = vst [vmem:[#allocation34_spill] sm:$0xff] %v5705_v30  ;;  %7869 = vst [vmem:[#allocation35_spill] sm:$0xff] %v5707_v5  ;;  %v2188_v5 = vrot.slane %v1919_v3, %v5388_v22 }
 0x133   :  { %2331 = vrot.lane.b32.xlu1 %v2180_v19, %s5293_s1  ;;  %2269 = vrot.lane.b32.xlu0 %v2056_v21, %s5293_s1  ;;  %v5731_v19 = vld [vmem:[%s7814_s0 + $0x100] sm:$0xff]  ;;  %v1921_v21 = vcombine.high %v1905_v61, %v1905_v61 }
 0x134   :  { %v314_v32 = vsel %vm89_vm8, %v5731_v19, 0.0 }
 0x135   :  { %v5719_v52 = vpop.permute.xlu1 %972  ;;  %v5721_v10 = vpop.permute.xlu0 %979  ;;  %v2192_v61 = vrot.slane %v1921_v21, %v5388_v22  ;;  %v315_v53 = vrot.slane %v314_v32, 4 }
 0x136   :  { %7870 = vst [vmem:[#allocation36_spill] sm:$0xff] %v5719_v52  ;;  %7871 = vst [vmem:[#allocation37_spill] sm:$0xff] %v5721_v10  ;;  %v1727_v10 = vcombine.high %v1723_v2, %v1723_v2  ;;  %v91_v52 = vrot.slane %v90_v20, 4 }
 0x137   :  { %2333 = vrot.lane.b32.xlu1 %v2184_v23, %s5293_s1  ;;  %2271 = vrot.lane.b32.xlu0 %v2060_v48, %s5293_s1  ;;  %v5747_v23 = vld [vmem:[%s7814_s0 + $0x8] sm:$0xff]  ;;  %v1751_v48 = vrot.slane %v1735_v59, %v5373_v15  ;;  %v1765_v59 = vrot.slane %v1743_v63, %v5373_v15 }
 0x138   :  { %v2068_v2 = vrot.slane %v1727_v10, %v5388_v22  ;;  %v1947_v10 = vrot.slane %v1931_v47, %v5373_v15 }
 0x139   :  { %v5736_v30 = vpop.permute.xlu1 %986  ;;  %v5738_v17 = vpop.permute.xlu0 %993  ;;  %v2076_v47 = vrot.slane %v1765_v59, %v5388_v22  ;;  %v1773_v63 = vcombine.high %v1751_v48, %v1751_v48 }
 0x13a   :  { %7872 = vst [vmem:[#allocation38_spill] sm:$0xff] %v5736_v30  ;;  %7873 = vst [vmem:[#allocation39_spill] sm:$0xff] %v5738_v17  ;;  %v92_v17 = vadd.f32 %v91_v52, %v90_v20  ;;  %v2072_v52 = vrot.slane %v1751_v48, %v5388_v22  ;;  %v316_v20 = vadd.f32 %v315_v53, %v314_v32 }
 0x13b   :  { %2335 = vrot.lane.b32.xlu1 %v2188_v5, %s5293_s1  ;;  %2273 = vrot.lane.b32.xlu0 %v2064_v54, %s5293_s1  ;;  %v97_v5 = vsel %vm89_vm8, %v5747_v23, 0.0  ;;  %v2196_v54 = vrot.slane %v1923_v29, %v5388_v22  ;;  %v1728_v29 = vcombine.high %v5342_v4, %v5342_v4  ;;  %v2200_v32 = vrot.slane %v1947_v10, %v5388_v22 }
 0x13c   :  { %v93_v21 = vrot.slane %v92_v17, 2  ;;  %v317_v53 = vrot.slane %v316_v20, 2  ;;  %v2080_v48 = vrot.slane %v1773_v63, %v5388_v22 }
 0x13d   :  { %v5754_v30 = vpop.permute.xlu1 %1000  ;;  %v5756_v3 = vpop.permute.xlu0 %1007  ;;  %v1742_v4 = vrot.slane %v1728_v29, %v5373_v15 }
 0x13e   :  { %7874 = vst [vmem:[#allocation40_spill] sm:$0xff] %v5754_v30  ;;  %7875 = vst [vmem:[#allocation41_spill] sm:$0xff] %v5756_v3  ;;  %v321_v3 = vsel %vm89_vm8, %v5761_v14, 0.0  ;;  %v98_v30 = vrot.slane %v97_v5, 4  ;;  %v94_v49 = vadd.f32 %v93_v21, %v92_v17  ;;  %v1775_v17 = vcombine.high %v1765_v59, %v1765_v59 }
 0x13f   :  { %2337 = vrot.lane.b32.xlu1 %v2192_v61, %s5293_s1  ;;  %2275 = vrot.lane.b32.xlu0 %v2068_v2, %s5293_s1  ;;  %v1961_v61 = vrot.slane %v1939_v1, %v5373_v15  ;;  %v322_v2 = vrot.slane %v321_v3, 4  ;;  %v1924_v1 = vcombine.high %v5366_v11, %v5366_v11  ;;  %v5806_v63 = vrot.slane %v1742_v4, %v5373_v15 }
 0x140   :  { %v95_v21 = vrot.slane %v94_v49, 1  ;;  %v1744_v59 = vcombine.high %v1742_v4, %v1742_v4 }
 0x141   :  { %v5773_v8 = vpop.permute.xlu1 %1014  ;;  %v5775_v0 = vpop.permute.xlu0 %1021  ;;  %v1938_v11 = vrot.slane %v1924_v1, %v5373_v15  ;;  %v5815_v1 = vld [vmem:[%s7814_s0 + $0x110] sm:$0xff]  ;;  %v2088_v4 = vrot.slane %v5806_v63, %v5388_v22 }
 0x142   :  { %7876 = vst [vmem:[#allocation42_spill] sm:$0xff] %v5773_v8  ;;  %7877 = vst [vmem:[#allocation43_spill] sm:$0xff] %v5775_v0  ;;  %v99_v8 = vadd.f32 %v98_v30, %v97_v5  ;;  %v323_v30 = vadd.f32 %v322_v2, %v321_v3  ;;  %v318_v5 = vadd.f32 %v317_v53, %v316_v20 }
 0x143   :  { %2339 = vrot.lane.b32.xlu1 %v2196_v54, %s5293_s1  ;;  %2277 = vrot.lane.b32.xlu0 %v2072_v52, %s5293_s1  ;;  %v2204_v54 = vrot.slane %v1961_v61, %v5388_v22  ;;  %v1969_v52 = vcombine.high %v1947_v10, %v1947_v10  ;;  %v2084_v10 = vrot.slane %v1775_v17, %v5388_v22 }
 0x144   :  { %v324_v20 = vrot.slane %v323_v30, 2  ;;  %v319_v2 = vrot.slane %v318_v5, 1  ;;  %v5837_v17 = vrot.slane %v1744_v59, %v5373_v15 }
 0x145   :  { %v5784_v6 = vpop.permute.xlu1 %1028  ;;  %v5786_v0 = vpop.permute.xlu0 %1035  ;;  %v2208_v3 = vrot.slane %v1969_v52, %v5388_v22 }
 0x146   :  { %7878 = vst [vmem:[#allocation44_spill] sm:$0xff] %v5784_v6  ;;  %7879 = vst [vmem:[#allocation45_spill] sm:$0xff] %v5786_v0  ;;  %v100_v6 = vrot.slane %v99_v8, 2 }
 0x147   :  { %2341 = vrot.lane.b32.xlu1 %v2200_v32, %s5293_s1  ;;  %2279 = vrot.lane.b32.xlu0 %v2076_v47, %s5293_s1  ;;  %v5803_v32 = vld [vmem:[%s7814_s0 + $0x10] sm:$0xff]  ;;  %v1971_v47 = vcombine.high %v1961_v61, %v1961_v61 }
 0x148   :  { %v101_v53 = vadd.f32 %v100_v6, %v99_v8  ;;  %v104_v61 = vsel %vm89_vm8, %v5803_v32, 0.0  ;;  %v5829_v6 = vld [vmem:[%s7814_s0 + $0x18] sm:$0xff]  ;;  %v5834_v8 = vrot.slane %v1938_v11, %v5373_v15 }
 0x149   :  { %v5795_v0 = vpop.permute.xlu1 %1042  ;;  %v5797_v29 = vpop.permute.xlu0 %1049  ;;  %v2212_v52 = vrot.slane %v1971_v47, %v5388_v22  ;;  %v328_v47 = vsel %vm89_vm8, %v5815_v1, 0.0  ;;  %v105_v36 = vrot.slane %v104_v61, 4  ;;  %v111_v25 = vsel %vm89_vm8, %v5829_v6, 0.0 }
 0x14a   :  { %7880 = vst [vmem:[#allocation46_spill] sm:$0xff] %v5795_v0  ;;  %7881 = vst [vmem:[#allocation47_spill] sm:$0xff] %v5797_v29  ;;  %v102_v31 = vrot.slane %v101_v53, 1  ;;  %v2216_v59 = vrot.slane %v5834_v8, %v5388_v22  ;;  %v112_v51 = vrot.slane %v111_v25, 4 }
 0x14b   :  { %2343 = vrot.lane.b32.xlu1 %v2204_v54, %s5293_s1  ;;  %2281 = vrot.lane.b32.xlu0 %v2080_v48, %s5293_s1  ;;  %v96_v48 = vadd.f32 %v95_v21, %v94_v49  ;;  %v1940_v49 = vcombine.high %v1938_v11, %v1938_v11  ;;  %v325_v21 = vadd.f32 %v324_v20, %v323_v30  ;;  %v5851_v11 = vld [vmem:[%s7814_s0 + $0x118] sm:$0xff]  ;;  %v329_v30 = vrot.slane %v328_v47, 4 }
 0x14c   :  { %v2092_v20 = vrot.slane %v5837_v17, %v5388_v22  ;;  %v335_v24 = vsel %vm89_vm8, %v5851_v11, 0.0  ;;  %v103_v13 = vadd.f32 %v102_v31, %v101_v53  ;;  %v5880_v31 = vld [vmem:[%s7814_s0 + $0x20] sm:$0xff] }
 0x14d   :  { %v5819_v41 = vpop.permute.xlu1 %1056  ;;  %v5821_v54 = vpop.permute.xlu0 %1063  ;;  %v330_v9 = vadd.f32 %v329_v30, %v328_v47 }
 0x14e   :  { %7882 = vst [vmem:[#allocation48_spill] sm:$0xff] %v5819_v41  ;;  %7883 = vst [vmem:[#allocation49_spill] sm:$0xff] %v5821_v54  ;;  %v3321_v54 = vld [vmem:[%s7815_s2] sm:$0xff] }
 0x14f   :  { %2345 = vrot.lane.b32.xlu1 %v2208_v3, %s5293_s1  ;;  %2283 = vrot.lane.b32.xlu0 %v2084_v10, %s5293_s1  ;;  %v690_v3 = vmul.f32 %v5412_v33, %v96_v48  ;;  %v320_v10 = vadd.f32 %v319_v2, %v318_v5  ;;  %v5860_v5 = vrot.slane %v1940_v49, %v5373_v15  ;;  %v326_v2 = vrot.slane %v325_v21, 1 }
 0x150   :  { %v106_v48 = vadd.f32 %v105_v36, %v104_v61  ;;  %v1774_v36 = vcombine.high %v5806_v63, %v5806_v63  ;;  %v113_v49 = vadd.f32 %v112_v51, %v111_v25  ;;  %v598_v63 = vrot.slane %v5420_v37, 1 }
 0x151   :  { %v5841_v26 = vpop.permute.xlu1 %1070  ;;  %v5843_v56 = vpop.permute.xlu0 %1077  ;;  %v2220_v15 = vrot.slane %v5860_v5, %v5388_v22  ;;  %v327_v53 = vadd.f32 %v326_v2, %v325_v21  ;;  %v1970_v25 = vcombine.high %v5834_v8, %v5834_v8  ;;  %v118_v21 = vsel %vm89_vm8, %v5880_v31, 0.0 }
 0x152   :  { %7884 = vst [vmem:[#allocation50_spill] sm:$0xff] %v5841_v26  ;;  %7885 = vst [vmem:[#allocation51_spill] sm:$0xff] %v5843_v56  ;;  %v722_v56 = vmul.f32 %v5420_v37, %v320_v10  ;;  %v570_v26 = vrot.slane %v5412_v33, 1  ;;  %v107_v61 = vrot.slane %v106_v48, 2  ;;  %v2096_v51 = vrot.slane %v1774_v36, %v5388_v22 }
 0x153   :  { %2347 = vrot.lane.b32.xlu1 %v2212_v52, %s5293_s1  ;;  %2285 = vrot.lane.b32.xlu0 %v2088_v4, %s5293_s1  ;;  %v1264_v4 = vrot.slane %v690_v3, %v5388_v22  ;;  %v114_v2 = vrot.slane %v113_v49, 2 }
 0x154   :  { %v1392_v30 = vrot.slane %v722_v56, %v5388_v22  ;;  %v5899_v56 = vld [vmem:[%s7814_s0 + $0x120] sm:$0xff] }
 0x155   :  { %v5864_v50 = vpop.permute.xlu1 %1084  ;;  %v5866_v52 = vpop.permute.xlu0 %1091  ;;  %v1517_v10 = vsub.f32 %v5713_v39, %v1264_v4 }
 0x156   :  { %7886 = vst [vmem:[#allocation52_spill] sm:$0xff] %v5864_v50  ;;  %7887 = vst [vmem:[#allocation53_spill] sm:$0xff] %v5866_v52  ;;  %v336_v52 = vrot.slane %v335_v24, 4  ;;  %v1549_v36 = vsub.f32 %v5731_v19, %v1392_v30  ;;  %v115_v30 = vadd.f32 %v114_v2, %v113_v49 }
 0x157   :  { %2349 = vrot.lane.b32.xlu1 %v2216_v59, %s5293_s1  ;;  %2287 = vrot.lane.b32.xlu0 %v2092_v20, %s5293_s1  ;;  %v691_v59 = vmul.f32 %v570_v26, %v103_v13  ;;  %v331_v20 = vrot.slane %v330_v9, 2  ;;  %v108_v13 = vadd.f32 %v107_v61, %v106_v48  ;;  %v2224_v48 = vrot.slane %v1970_v25, %v5388_v22 }
 0x158   :  { %v337_v4 = vadd.f32 %v336_v52, %v335_v24  ;;  %v5910_v24 = vld [vmem:[%s7814_s0 + $0x28] sm:$0xff]  ;;  %v342_v52 = vsel %vm89_vm8, %v5899_v56, 0.0 }
 0x159   :  { %v5882_v47 = vpop.permute.xlu1 %1098  ;;  %v5884_v3 = vpop.permute.xlu0 %1105  ;;  %v1268_v8 = vrot.slane %v691_v59, %v5388_v22  ;;  %v332_v61 = vadd.f32 %v331_v20, %v330_v9  ;;  %v109_v59 = vrot.slane %v108_v13, 1  ;;  %v343_v49 = vrot.slane %v342_v52, 4 }
 0x15a   :  { %7888 = vst [vmem:[#allocation54_spill] sm:$0xff] %v5882_v47  ;;  %7889 = vst [vmem:[#allocation55_spill] sm:$0xff] %v5884_v3  ;;  %v119_v3 = vrot.slane %v118_v21, 4  ;;  %v1776_v20 = vcombine.high %v5837_v17, %v5837_v17  ;;  %v116_v47 = vrot.slane %v115_v30, 1 }
 0x15b   :  { %2351 = vrot.lane.b32.xlu1 %v2220_v15, %s5293_s1  ;;  %2549 = vrot.lane.b32.xlu0 %v1517_v10, %s5295_s23  ;;  %v723_v10 = vmul.f32 %v598_v63, %v327_v53  ;;  %v5920_v53 = vld [vmem:[%s7814_s0 + $0x128] sm:$0xff]  ;;  %v344_v16 = vadd.f32 %v343_v49, %v342_v52 }
 0x15c   :  { %v120_v9 = vadd.f32 %v119_v3, %v118_v21  ;;  %v349_v2 = vsel %vm89_vm8, %v5920_v53, 0.0  ;;  %v117_v49 = vadd.f32 %v116_v47, %v115_v30 }
 0x15d   :  { %v5901_v26 = vpop.permute.xlu1 %1112  ;;  %v5903_v15 = vpop.permute.xlu0 %1119  ;;  %v1396_v25 = vrot.slane %v723_v10, %v5388_v22  ;;  %v2421_v10 = vsub.f32 %v5713_v39, %v5566_v46  ;;  %v2100_v46 = vrot.slane %v1776_v20, %v5388_v22  ;;  %v350_v39 = vrot.slane %v349_v2, 4 }
 0x15e   :  { %7890 = vst [vmem:[#allocation56_spill] sm:$0xff] %v5901_v26  ;;  %7891 = vst [vmem:[#allocation57_spill] sm:$0xff] %v5903_v15  ;;  %v338_v15 = vrot.slane %v337_v4, 2  ;;  %v121_v17 = vrot.slane %v120_v9, 2  ;;  %v345_v30 = vrot.slane %v344_v16, 2 }
 0x15f   :  { %2613 = vrot.lane.b32.xlu1 %v1549_v36, %s5295_s23  ;;  %2289 = vrot.lane.b32.xlu0 %v2096_v51, %s5293_s1  ;;  %v1518_v51 = vsub.f32 %v5747_v23, %v1268_v8  ;;  %v125_v36 = vsel %vm89_vm8, %v5910_v24, 0.0  ;;  %v1550_v21 = vsub.f32 %v5761_v14, %v1396_v25  ;;  %v5958_v25 = vld [vmem:[%s7814_s0 + $0x30] sm:$0xff]  ;;  %v351_v47 = vadd.f32 %v350_v39, %v349_v2 }
 0x160   :  { %v339_v8 = vadd.f32 %v338_v15, %v337_v4  ;;  %v126_v50 = vrot.slane %v125_v36, 4  ;;  %v3322_v4 = vld [vmem:[%s7815_s2 + $0x8] sm:$0xff]  ;;  %v600_v39 = vrot.slane %v5420_v37, 3 }
 0x161   :  { %v5922_v63 = vpop.permute.xlu1 %1126  ;;  %v5924_v26 = vpop.permute.xlu0 %2235  ;;  %v5200_v15 = vpack.c.bf16 %v3322_v4, %v3321_v54  ;;  %v599_v54 = vrot.slane %v5420_v37, 2 }
 0x162   :  { %7892 = vst [vmem:[#allocation58_spill] sm:$0xff] %v5922_v63  ;;  %v333_v63 = vrot.slane %v332_v61, 1  ;;  %v340_v52 = vrot.slane %v339_v8, 1 }
 0x163   :  { %2353 = vrot.lane.b32.xlu1 %v2224_v48, %s5293_s1  ;;  %2551 = vrot.lane.b32.xlu0 %v1518_v51, %s5295_s23  ;;  %v110_v48 = vadd.f32 %v109_v59, %v108_v13  ;;  %v571_v51 = vrot.slane %v5412_v33, 2  ;;  %v1972_v13 = vcombine.high %v5860_v5, %v5860_v5  ;;  %v127_v59 = vadd.f32 %v126_v50, %v125_v36 }
 0x164   :  { %v334_v5 = vadd.f32 %v333_v63, %v332_v61  ;;  %5201 = vmatprep.subr.bf16.mxu0 %v5200_v15  ;;  %5204 = vmatprep.subr.bf16.mxu1 %v5200_v15  ;;  %v122_v50 = vadd.f32 %v121_v17, %v120_v9  ;;  %v5976_v61 = vld [vmem:[%s7814_s0 + $0x130] sm:$0xff]  ;;  %v2422_v9 = vsub.f32 %v5747_v23, %v5577_v18  ;;  %v5987_v17 = vld [vmem:[%s7814_s0 + $0x38] sm:$0xff] }
 0x165   :  { %v5938_v43 = vpop.permute.xlu1 %2299  ;;  %v5940_v3 = vpop.permute.xlu0 %2237  ;;  %v692_v41 = vmul.f32 %v571_v51, %v110_v48  ;;  %5203 = vmatpush3.bf16.msra.mxu0 %v5200_v15  ;;  %5205 = vmatpush3.bf16.msra.mxu1 %v5200_v15  ;;  %v128_v36 = vrot.slane %v127_v59, 2  ;;  %v341_v48 = vadd.f32 %v340_v52, %v339_v8  ;;  %v352_v15 = vrot.slane %v351_v47, 2 }
 0x166   :  { %v356_v18 = vsel %vm89_vm8, %v5976_v61, 0.0  ;;  %v346_v23 = vadd.f32 %v345_v30, %v344_v16  ;;  %v6009_v16 = vld [vmem:[%s7814_s0 + $0x138] sm:$0xff] }
 0x167   :  { %2615 = vrot.lane.b32.xlu1 %v1550_v21, %s5295_s23  ;;  %2805 = vrot.lane.b32.xlu0 %v2421_v10, %s5296_s8  ;;  %v572_v21 = vrot.slane %v5412_v33, 3  ;;  %v2453_v10 = vsub.f32 %v5731_v19, %v5564_v58  ;;  %v132_v58 = vsel %vm89_vm8, %v5958_v25, 0.0  ;;  %v2228_v19 = vrot.slane %v1972_v13, %v5388_v22 }
 0x168   :  { %v1272_v4 = vrot.slane %v692_v41, %v5388_v22  ;;  %v123_v13 = vrot.slane %v122_v50, 1  ;;  %v133_v8 = vrot.slane %v132_v58, 4  ;;  %v129_v52 = vadd.f32 %v128_v36, %v127_v59 }
 0x169   :  { %v5963_v42 = vpop.permute.xlu1 %2301  ;;  %v5965_v20 = vpop.permute.xlu0 %2239  ;;  %v693_v63 = vmul.f32 %v572_v21, %v117_v49  ;;  %v139_v49 = vsel %vm89_vm8, %v5987_v17, 0.0  ;;  %v2454_v21 = vsub.f32 %v5761_v14, %v5575_v12  ;;  %v353_v59 = vadd.f32 %v352_v15, %v351_v47 }
 0x16a   :  { %v134_v30 = vadd.f32 %v133_v8, %v132_v58  ;;  %v357_v36 = vrot.slane %v356_v18, 4  ;;  %v347_v14 = vrot.slane %v346_v23, 1  ;;  %v130_v12 = vrot.slane %v129_v52, 1 }
 0x16b   :  { %2869 = vrot.lane.b32.xlu1 %v2453_v10, %s5296_s8  ;;  %2291 = vrot.lane.b32.xlu0 %v2100_v46, %s5293_s1  ;;  %v724_v46 = vmul.f32 %v599_v54, %v334_v5  ;;  %v1276_v41 = vrot.slane %v693_v63, %v5388_v22  ;;  %v1519_v54 = vsub.f32 %v5803_v32, %v1272_v4  ;;  %v140_v63 = vrot.slane %v139_v49, 4 }
 0x16c   :  { %v124_v55 = vadd.f32 %v123_v13, %v122_v50  ;;  %v573_v4 = vrot.slane %v5412_v33, 4  ;;  %v354_v8 = vrot.slane %v353_v59, 1  ;;  %v6028_v13 = vld [vmem:[%s7814_s0 + $0x40] sm:$0xff] }
 0x16d   :  { %v5980_v51 = vpop.permute.xlu1 %2303  ;;  %v5982_v2 = vpop.permute.xlu0 %2241  ;;  %v1520_v58 = vsub.f32 %v5829_v6, %v1276_v41  ;;  %v141_v7 = vadd.f32 %v140_v63, %v139_v49  ;;  %v574_v41 = vrot.slane %v5412_v33, 5  ;;  %v601_v63 = vrot.slane %v5420_v37, 4 }
 0x16e   :  { %v694_v29 = vmul.f32 %v573_v4, %v124_v55  ;;  %v146_v55 = vsel %vm89_vm8, %v6028_v13, 0.0  ;;  %v6056_v4 = vld [vmem:[%s7814_s0 + $0x48] sm:$0xff] }
 0x16f   :  { %2355 = vrot.lane.b32.xlu1 %v2228_v19, %s5293_s1  ;;  %2807 = vrot.lane.b32.xlu0 %v2422_v9, %s5296_s8  ;;  %v1400_v19 = vrot.slane %v724_v46, %v5388_v22  ;;  %v725_v9 = vmul.f32 %v600_v39, %v341_v48  ;;  %v363_v48 = vsel %vm89_vm8, %v6009_v16, 0.0  ;;  %v142_v62 = vrot.slane %v141_v7, 2 }
 0x170   :  { %v364_v50 = vrot.slane %v363_v48, 4 }
 0x171   :  { %v6000_v10 = vpop.permute.xlu1 %2305  ;;  %v6002_v5 = vpop.permute.xlu0 %2243  ;;  %v1551_v47 = vsub.f32 %v5815_v1, %v1400_v19  ;;  %v1404_v15 = vrot.slane %v725_v9, %v5388_v22  ;;  %v131_v19 = vadd.f32 %v130_v12, %v129_v52  ;;  %v2423_v9 = vsub.f32 %v5803_v32, %v5592_v28  ;;  %v6046_v32 = vld [vmem:[%s7814_s0 + $0x140] sm:$0xff] }
 0x172   :  { %v365_v28 = vadd.f32 %v364_v50, %v363_v48  ;;  %v2424_v12 = vsub.f32 %v5829_v6, %v5924_v26  ;;  %v153_v26 = vsel %vm89_vm8, %v6056_v4, 0.0 }
 0x173   :  { %2871 = vrot.lane.b32.xlu1 %v2454_v21, %s5296_s8  ;;  %2553 = vrot.lane.b32.xlu0 %v1519_v54, %s5295_s23  ;;  %v135_v21 = vrot.slane %v134_v30, 2  ;;  %v358_v54 = vadd.f32 %v357_v36, %v356_v18  ;;  %v1552_v49 = vsub.f32 %v5851_v11, %v1404_v15  ;;  %v348_v36 = vadd.f32 %v347_v14, %v346_v23 }
 0x174   :  { %v1280_v23 = vrot.slane %v694_v29, %v5388_v22  ;;  %v695_v52 = vmul.f32 %v574_v41, %v131_v19  ;;  %v355_v14 = vadd.f32 %v354_v8, %v353_v59  ;;  %v602_v29 = vrot.slane %v5420_v37, 5 }
 0x175   :  { %v6014_v46 = vpop.permute.xlu1 %2307  ;;  %v6018_v39 = vpop.permute.xlu0 %2245  ;;  %v143_v59 = vadd.f32 %v142_v62, %v141_v7  ;;  %v147_v8 = vrot.slane %v146_v55, 4  ;;  %v366_v6 = vrot.slane %v365_v28, 2  ;;  %v2456_v41 = vsub.f32 %v5851_v11, %v5938_v43  ;;  %v6075_v62 = vld [vmem:[%s7814_s0 + $0x148] sm:$0xff] }
 0x176   :  { %v1284_v19 = vrot.slane %v695_v52, %v5388_v22  ;;  %v377_v11 = vsel %vm89_vm8, %v6075_v62, 0.0 }
 0x177   :  { %2617 = vrot.lane.b32.xlu1 %v1551_v47, %s5295_s23  ;;  %2555 = vrot.lane.b32.xlu0 %v1520_v58, %s5295_s23  ;;  %v136_v47 = vadd.f32 %v135_v21, %v134_v30  ;;  %v359_v58 = vrot.slane %v358_v54, 2  ;;  %v2455_v30 = vsub.f32 %v5815_v1, %v5590_v27  ;;  %v726_v21 = vmul.f32 %v601_v63, %v348_v36 }
 0x178   :  { %v370_v27 = vsel %vm89_vm8, %v6046_v32, 0.0  ;;  %v727_v36 = vmul.f32 %v602_v29, %v355_v14  ;;  %v144_v63 = vrot.slane %v143_v59, 1  ;;  %v367_v43 = vadd.f32 %v366_v6, %v365_v28 }
 0x179   :  { %v6033_v45 = vpop.permute.xlu1 %2309  ;;  %v6035_v18 = vpop.permute.xlu0 %2247  ;;  %v137_v50 = vrot.slane %v136_v47, 1  ;;  %v360_v1 = vadd.f32 %v359_v58, %v358_v54  ;;  %v1521_v54 = vsub.f32 %v5880_v31, %v1280_v23  ;;  %v148_v58 = vadd.f32 %v147_v8, %v146_v55 }
 0x17a   :  { %v371_v52 = vrot.slane %v370_v27, 4  ;;  %v1522_v14 = vsub.f32 %v5910_v24, %v1284_v19  ;;  %v1412_v29 = vrot.slane %v727_v36, %v5388_v22  ;;  %v378_v6 = vrot.slane %v377_v11, 4 }
 0x17b   :  { %2619 = vrot.lane.b32.xlu1 %v1552_v49, %s5295_s23  ;;  %2809 = vrot.lane.b32.xlu0 %v2423_v9, %s5296_s8  ;;  %v1408_v49 = vrot.slane %v726_v21, %v5388_v22  ;;  %v361_v0 = vrot.slane %v360_v1, 1  ;;  %v149_v8 = vrot.slane %v148_v58, 2  ;;  %v576_v19 = vrot.slane %v5412_v33, 7 }
 0x17c   :  { %v2425_v36 = vsub.f32 %v5880_v31, %v5940_v3  ;;  %v379_v33 = vadd.f32 %v378_v6, %v377_v11  ;;  %v6118_v31 = vld [vmem:[%s7814_s0 + $0x150] sm:$0xff] }
 0x17d   :  { %v6058_v48 = vpop.permute.xlu1 %2311  ;;  %v6060_v15 = vpop.permute.xlu0 %2249  ;;  %v1553_v55 = vsub.f32 %v5899_v56, %v1408_v49  ;;  %v145_v49 = vadd.f32 %v144_v63, %v143_v59  ;;  %v2457_v63 = vsub.f32 %v5899_v56, %v5963_v42 }
 0x17f   :  { %2873 = vrot.lane.b32.xlu1 %v2455_v30, %s5296_s8  ;;  %2811 = vrot.lane.b32.xlu0 %v2424_v12, %s5296_s8  ;;  %v154_v30 = vrot.slane %v153_v26, 4  ;;  %v138_v12 = vadd.f32 %v137_v50, %v136_v47  ;;  %v368_v47 = vrot.slane %v367_v43, 1  ;;  %v6100_v50 = vld [vmem:[%s7814_s0 + $0x50] sm:$0xff]  ;;  %v697_v59 = vmul.f32 %v576_v19, %v145_v49 }
 0x181   :  { %v6077_v7 = vpop.permute.xlu1 %2313  ;;  %v6079_v9 = vpop.permute.xlu0 %2251  ;;  %v155_v28 = vadd.f32 %v154_v30, %v153_v26  ;;  %v362_v30 = vadd.f32 %v361_v0, %v360_v1  ;;  %v6123_v0 = vld [vmem:[%s7814_s0 + $0x58] sm:$0xff]  ;;  %v369_v1 = vadd.f32 %v368_v47, %v367_v43 }
 0x182   :  { %v167_v43 = vsel %vm89_vm8, %v6123_v0, 0.0  ;;  %v6147_v47 = vld [vmem:[%s7814_s0 + $0x158] sm:$0xff] }
 0x183   :  { %2875 = vrot.lane.b32.xlu1 %v2456_v41, %s5296_s8  ;;  %2557 = vrot.lane.b32.xlu0 %v1521_v54, %s5295_s23  ;;  %v372_v41 = vadd.f32 %v371_v52, %v370_v27  ;;  %v696_v54 = vmul.f32 %v575_v40, %v138_v12  ;;  %v1554_v52 = vsub.f32 %v5920_v53, %v1412_v29  ;;  %v156_v44 = vrot.slane %v155_v28, 2 }
 0x184   :  { %v160_v40 = vsel %vm89_vm8, %v6100_v50, 0.0 }
 0x185   :  { %v6088_v23 = vpop.permute.xlu1 %2315  ;;  %v6090_v21 = vpop.permute.xlu0 %2253  ;;  %v373_v34 = vrot.slane %v372_v41, 2  ;;  %v1288_v3 = vrot.slane %v696_v54, %v5388_v22  ;;  %v384_v54 = vsel %vm89_vm8, %v6118_v31, 0.0  ;;  %v157_v56 = vadd.f32 %v156_v44, %v155_v28 }
 0x186   :  { %v385_v28 = vrot.slane %v384_v54, 4 }
 0x187   :  { %2621 = vrot.lane.b32.xlu1 %v1553_v55, %s5295_s23  ;;  %2559 = vrot.lane.b32.xlu0 %v1522_v14, %s5295_s23  ;;  %v603_v55 = vrot.slane %v5420_v37, 6  ;;  %v150_v14 = vadd.f32 %v149_v8, %v148_v58  ;;  %v2426_v58 = vsub.f32 %v5910_v24, %v5965_v20  ;;  %v604_v8 = vrot.slane %v5420_v37, 7 }
 0x188   :  { %v374_v42 = vadd.f32 %v373_v34, %v372_v41  ;;  %v380_v24 = vrot.slane %v379_v33, 2  ;;  %v1523_v20 = vsub.f32 %v5958_v25, %v1288_v3  ;;  %v2458_v37 = vsub.f32 %v5920_v53, %v5980_v51 }
 0x189   :  { %v6105_v27 = vpop.permute.xlu1 %2317  ;;  %v6107_v26 = vpop.permute.xlu0 %2255  ;;  %v728_v29 = vmul.f32 %v603_v55, %v362_v30  ;;  %v151_v6 = vrot.slane %v150_v14, 1  ;;  %v1292_v34 = vrot.slane %v697_v59, %v5388_v22  ;;  %v729_v44 = vmul.f32 %v604_v8, %v369_v1 }
 0x18a   :  { %v168_v30 = vrot.slane %v167_v43, 4  ;;  %v375_v53 = vrot.slane %v374_v42, 1  ;;  %v158_v51 = vrot.slane %v157_v56, 1  ;;  %v381_v55 = vadd.f32 %v380_v24, %v379_v33 }
 0x18b   :  { %2623 = vrot.lane.b32.xlu1 %v1554_v52, %s5295_s23  ;;  %2813 = vrot.lane.b32.xlu0 %v2425_v36, %s5296_s8  ;;  %v161_v36 = vrot.slane %v160_v40, 4  ;;  %v1416_v52 = vrot.slane %v728_v29, %v5388_v22  ;;  %v391_v3 = vsel %vm89_vm8, %v6147_v47, 0.0  ;;  %v1420_v1 = vrot.slane %v729_v44, %v5388_v22 }
 0x18c   :  { %v152_v29 = vadd.f32 %v151_v6, %v150_v14  ;;  %v382_v33 = vrot.slane %v381_v55, 1  ;;  %v169_v24 = vadd.f32 %v168_v30, %v167_v43  ;;  %v577_v43 = vrot.slane %v5416_v35, 1 }
 0x18d   :  { %v6130_v11 = vpop.permute.xlu1 %2319  ;;  %v6132_v12 = vpop.permute.xlu0 %2257  ;;  %v162_v41 = vadd.f32 %v161_v36, %v160_v40  ;;  %v1555_v59 = vsub.f32 %v5976_v61, %v1416_v52  ;;  %v1524_v40 = vsub.f32 %v5987_v17, %v1292_v34  ;;  %v386_v36 = vadd.f32 %v385_v28, %v384_v54 }
 0x18e   :  { %v376_v52 = vadd.f32 %v375_v53, %v374_v42  ;;  %v2427_v34 = vsub.f32 %v5958_v25, %v5982_v2  ;;  %v1556_v54 = vsub.f32 %v6009_v16, %v1420_v1  ;;  %v698_v44 = vmul.f32 %v5416_v35, %v152_v29  ;;  %v6189_v2 = vld [vmem:[%s7814_s0 + $0x160] sm:$0xff] }
 0x18f   :  { %2877 = vrot.lane.b32.xlu1 %v2457_v63, %s5296_s8  ;;  %2815 = vrot.lane.b32.xlu0 %v2426_v58, %s5296_s8  ;;  %v163_v8 = vrot.slane %v162_v41, 2  ;;  %v387_v30 = vrot.slane %v386_v36, 2  ;;  %v170_v25 = vrot.slane %v169_v24, 2  ;;  %v383_v53 = vadd.f32 %v382_v33, %v381_v55 }
 0x191   :  { %v6149_v49 = vpop.permute.xlu1 %2321  ;;  %v6151_v19 = vpop.permute.xlu0 %2259  ;;  %v164_v28 = vadd.f32 %v163_v8, %v162_v41  ;;  %v605_v41 = vrot.slane %v5422_v38, 1  ;;  %v1296_v8 = vrot.slane %v698_v44, %v5388_v22 }
 0x193   :  { %2879 = vrot.lane.b32.xlu1 %v2458_v37, %s5296_s8  ;;  %2561 = vrot.lane.b32.xlu0 %v1523_v20, %s5295_s23  ;;  %v392_v20 = vrot.slane %v391_v3, 4  ;;  %v6171_v37 = vld [vmem:[%s7814_s0 + $0x60] sm:$0xff] }
 0x194   :  { %v174_v42 = vsel %vm89_vm8, %v6171_v37, 0.0 }
 0x195   :  { %v6159_v63 = vpop.permute.xlu1 %2323  ;;  %v6161_v58 = vpop.permute.xlu0 %2261 }
 0x196   :  { %7893 = vst [vmem:[#allocation59_spill] sm:$0xff] %v6161_v58  ;;  %v159_v58 = vadd.f32 %v158_v51, %v157_v56  ;;  %v730_v56 = vmul.f32 %v5422_v38, %v376_v52  ;;  %v2459_v51 = vsub.f32 %v5976_v61, %v6000_v10  ;;  %v175_v52 = vrot.slane %v174_v42, 4 }
 0x197   :  { %2625 = vrot.lane.b32.xlu1 %v1555_v59, %s5295_s23  ;;  %2563 = vrot.lane.b32.xlu0 %v1524_v40, %s5295_s23  ;;  %v393_v59 = vadd.f32 %v392_v20, %v391_v3  ;;  %v2428_v3 = vsub.f32 %v5987_v17, %v6002_v5  ;;  %v6200_v40 = vld [vmem:[%s7814_s0 + $0x68] sm:$0xff]  ;;  %v165_v20 = vrot.slane %v164_v28, 1  ;;  %v398_v61 = vsel %vm89_vm8, %v6189_v2, 0.0 }
 0x198   :  { %v699_v55 = vmul.f32 %v577_v43, %v159_v58  ;;  %v388_v17 = vadd.f32 %v387_v30, %v386_v36  ;;  %v171_v10 = vadd.f32 %v170_v25, %v169_v24  ;;  %v181_v5 = vsel %vm89_vm8, %v6200_v40, 0.0  ;;  %v6225_v36 = vld [vmem:[%s7814_s0 + $0x168] sm:$0xff] }
 0x199   :  { %v6175_v14 = vpop.permute.xlu1 %2325  ;;  %v6177_v6 = vpop.permute.xlu0 %2263  ;;  %v394_v33 = vrot.slane %v393_v59, 2  ;;  %v1525_v43 = vsub.f32 %v6028_v13, %v1296_v8  ;;  %v176_v30 = vadd.f32 %v175_v52, %v174_v42  ;;  %v399_v25 = vrot.slane %v398_v61, 4 }
 0x19b   :  { %2627 = vrot.lane.b32.xlu1 %v1556_v54, %s5295_s23  ;;  %2817 = vrot.lane.b32.xlu0 %v2427_v34, %s5296_s8  ;;  %v731_v34 = vmul.f32 %v605_v41, %v383_v53  ;;  %v2460_v54 = vsub.f32 %v6009_v16, %v6014_v46  ;;  %v395_v24 = vadd.f32 %v394_v33, %v393_v59  ;;  %v182_v53 = vrot.slane %v181_v5, 4 }
 0x19c   :  { %v389_v16 = vrot.slane %v388_v17, 1  ;;  %v172_v46 = vrot.slane %v171_v10, 1  ;;  %v166_v41 = vadd.f32 %v165_v20, %v164_v28  ;;  %v6244_v20 = vld [vmem:[%s7814_s0 + $0x70] sm:$0xff] }
 0x19d   :  { %v6202_v1 = vpop.permute.xlu1 %2327  ;;  %v6204_v29 = vpop.permute.xlu0 %2265  ;;  %v1428_v33 = vrot.slane %v731_v34, %v5388_v22  ;;  %v396_v52 = vrot.slane %v395_v24, 1  ;;  %v2429_v34 = vsub.f32 %v6028_v13, %v6018_v39  ;;  %v6262_v13 = vld [vmem:[%s7814_s0 + $0x170] sm:$0xff] }
 0x19e   :  { %7894 = vst [vmem:[#allocation60_spill] sm:$0xff] %v6204_v29  ;;  %v1424_v29 = vrot.slane %v730_v56, %v5388_v22  ;;  %v578_v56 = vrot.slane %v5416_v35, 2 }
 0x19f   :  { %2881 = vrot.lane.b32.xlu1 %v2459_v51, %s5296_s8  ;;  %2819 = vrot.lane.b32.xlu0 %v2428_v3, %s5296_s8  ;;  %v1300_v51 = vrot.slane %v699_v55, %v5388_v22  ;;  %v405_v3 = vsel %vm89_vm8, %v6225_v36, 0.0 }
 0x1a0   :  { %v1557_v59 = vsub.f32 %v6046_v32, %v1424_v29  ;;  %v406_v28 = vrot.slane %v405_v3, 4  ;;  %v390_v29 = vadd.f32 %v389_v16, %v388_v17  ;;  %v188_v17 = vsel %vm89_vm8, %v6244_v20, 0.0 }
 0x1a1   :  { %v6215_v58 = vpop.permute.xlu1 %2329  ;;  %v6217_v44 = vpop.permute.xlu0 %2267  ;;  %v1526_v42 = vsub.f32 %v6056_v4, %v1300_v51  ;;  %v397_v16 = vadd.f32 %v396_v52, %v395_v24  ;;  %v6289_v52 = vld [vmem:[%s7814_s0 + $0x178] sm:$0xff] }
 0x1a2   :  { %7895 = vst [vmem:[#allocation61_spill] sm:$0xff] %v6215_v58  ;;  %7896 = vst [vmem:[#allocation62_spill] sm:$0xff] %v6217_v44  ;;  %v183_v44 = vadd.f32 %v182_v53, %v181_v5  ;;  %v1558_v5 = vsub.f32 %v6075_v62, %v1428_v33  ;;  %v579_v53 = vrot.slane %v5416_v35, 3  ;;  %v407_v39 = vadd.f32 %v406_v28, %v405_v3 }
 0x1a3   :  { %2883 = vrot.lane.b32.xlu1 %v2460_v54, %s5296_s8  ;;  %2565 = vrot.lane.b32.xlu0 %v1525_v43, %s5295_s23  ;;  %v177_v54 = vrot.slane %v176_v30, 2  ;;  %v400_v43 = vadd.f32 %v399_v25, %v398_v61  ;;  %v606_v25 = vrot.slane %v5422_v38, 2 }
 0x1a4   :  { %v184_v58 = vrot.slane %v183_v44, 2 }
 0x1a5   :  { %v6232_v8 = vpop.permute.xlu1 %2331  ;;  %v6234_v55 = vpop.permute.xlu0 %2269  ;;  %v732_v3 = vmul.f32 %v606_v25, %v390_v29 }
 0x1a6   :  { %7897 = vst [vmem:[#allocation63_spill] sm:$0xff] %v6232_v8  ;;  %7898 = vst [vmem:[#allocation64_spill] sm:$0xff] %v6234_v55  ;;  %v700_v55 = vmul.f32 %v578_v56, %v166_v41  ;;  %v173_v8 = vadd.f32 %v172_v46, %v171_v10  ;;  %v2461_v46 = vsub.f32 %v6046_v32, %v6033_v45  ;;  %v408_v32 = vrot.slane %v407_v39, 2 }
 0x1a7   :  { %2629 = vrot.lane.b32.xlu1 %v1557_v59, %s5295_s23  ;;  %2567 = vrot.lane.b32.xlu0 %v1526_v42, %s5295_s23  ;;  %v178_v59 = vadd.f32 %v177_v54, %v176_v30  ;;  %v401_v42 = vrot.slane %v400_v43, 2  ;;  %v607_v30 = vrot.slane %v5422_v38, 3  ;;  %v2430_v41 = vsub.f32 %v6056_v4, %v6035_v18  ;;  %v6281_v18 = vld [vmem:[%s7814_s0 + $0x78] sm:$0xff] }
 0x1a8   :  { %v1304_v10 = vrot.slane %v700_v55, %v5388_v22  ;;  %v701_v54 = vmul.f32 %v579_v53, %v173_v8  ;;  %v412_v55 = vsel %vm89_vm8, %v6262_v13, 0.0  ;;  %v185_v45 = vadd.f32 %v184_v58, %v183_v44 }
 0x1a9   :  { %v6248_v51 = vpop.permute.xlu1 %2333  ;;  %v6250_v61 = vpop.permute.xlu0 %2271  ;;  %v402_v28 = vadd.f32 %v401_v42, %v400_v43  ;;  %v179_v24 = vrot.slane %v178_v59, 1  ;;  %v2462_v8 = vsub.f32 %v6075_v62, %v6058_v48  ;;  %v1432_v58 = vrot.slane %v732_v3, %v5388_v22 }
 0x1aa   :  { %v1527_v4 = vsub.f32 %v6100_v50, %v1304_v10  ;;  %v1308_v44 = vrot.slane %v701_v54, %v5388_v22  ;;  %v413_v42 = vrot.slane %v412_v55, 4  ;;  %v195_v48 = vsel %vm89_vm8, %v6281_v18, 0.0 }
 0x1ab   :  { %2631 = vrot.lane.b32.xlu1 %v1558_v5, %s5295_s23  ;;  %2821 = vrot.lane.b32.xlu0 %v2429_v34, %s5296_s8  ;;  %v189_v34 = vrot.slane %v188_v17, 4  ;;  %v733_v5 = vmul.f32 %v607_v30, %v397_v16  ;;  %v403_v25 = vrot.slane %v402_v28, 1  ;;  %v409_v62 = vadd.f32 %v408_v32, %v407_v39 }
 0x1ac   :  { %v419_v10 = vsel %vm89_vm8, %v6289_v52, 0.0  ;;  %v186_v3 = vrot.slane %v185_v45, 1  ;;  %v1528_v30 = vsub.f32 %v6123_v0, %v1308_v44  ;;  %v196_v39 = vrot.slane %v195_v48, 4 }
 0x1ad   :  { %v6270_v56 = vpop.permute.xlu1 %2335  ;;  %v6272_v33 = vpop.permute.xlu0 %2273  ;;  %v190_v53 = vadd.f32 %v189_v34, %v188_v17  ;;  %v1559_v17 = vsub.f32 %v6118_v31, %v1432_v58  ;;  %v1436_v34 = vrot.slane %v733_v5, %v5388_v22  ;;  %v420_v32 = vrot.slane %v419_v10, 4 }
 0x1ae   :  { %v2431_v58 = vsub.f32 %v6100_v50, %v6060_v15  ;;  %v187_v5 = vadd.f32 %v186_v3, %v185_v45  ;;  %v2432_v45 = vsub.f32 %v6123_v0, %v6079_v9  ;;  %v609_v3 = vrot.slane %v5422_v38, 5  ;;  %v6347_v0 = vld [vmem:[%s7814_s0 + $0x180] sm:$0xff] }
 0x1af   :  { %2885 = vrot.lane.b32.xlu1 %v2461_v46, %s5296_s8  ;;  %2823 = vrot.lane.b32.xlu0 %v2430_v41, %s5296_s8  ;;  %v180_v46 = vadd.f32 %v179_v24, %v178_v59  ;;  %v580_v41 = vrot.slane %v5416_v35, 4  ;;  %v410_v59 = vrot.slane %v409_v62, 1 }
 0x1b1   :  { %v6291_v43 = vpop.permute.xlu1 %2337  ;;  %v6293_v29 = vpop.permute.xlu0 %2275  ;;  %v702_v24 = vmul.f32 %v580_v41, %v180_v46  ;;  %v411_v50 = vadd.f32 %v410_v59, %v409_v62  ;;  %v2463_v46 = vsub.f32 %v6118_v31, %v6077_v7  ;;  %v6339_v7 = vld [vmem:[%s7814_s0 + $0x80] sm:$0xff]  ;;  %v2464_v31 = vsub.f32 %v6147_v47, %v6088_v23 }
 0x1b2   :  { %7899 = vst [vmem:[#allocation65_spill] sm:$0xff] %v6291_v43  ;;  %7900 = vst [vmem:[#allocation66_spill] sm:$0xff] %v6293_v29  ;;  %v404_v29 = vadd.f32 %v403_v25, %v402_v28  ;;  %v421_v28 = vadd.f32 %v420_v32, %v419_v10  ;;  %v202_v59 = vsel %vm89_vm8, %v6339_v7, 0.0 }
 0x1b3   :  { %2887 = vrot.lane.b32.xlu1 %v2462_v8, %s5296_s8  ;;  %2569 = vrot.lane.b32.xlu0 %v1527_v4, %s5295_s23  ;;  %v191_v8 = vrot.slane %v190_v53, 2  ;;  %v414_v4 = vadd.f32 %v413_v42, %v412_v55  ;;  %v1560_v55 = vsub.f32 %v6147_v47, %v1436_v34  ;;  %v581_v42 = vrot.slane %v5416_v35, 5 }
 0x1b4   :  { %v1312_v25 = vrot.slane %v702_v24, %v5388_v22  ;;  %v422_v10 = vrot.slane %v421_v28, 2  ;;  %v426_v24 = vsel %vm89_vm8, %v6347_v0, 0.0 }
 0x1b5   :  { %v6304_v54 = vpop.permute.xlu1 %2339  ;;  %v6306_v16 = vpop.permute.xlu0 %2277  ;;  %v415_v43 = vrot.slane %v414_v4, 2 }
 0x1b6   :  { %7901 = vst [vmem:[#allocation67_spill] sm:$0xff] %v6304_v54  ;;  %7902 = vst [vmem:[#allocation68_spill] sm:$0xff] %v6306_v16  ;;  %v608_v54 = vrot.slane %v5422_v38, 4  ;;  %v1529_v9 = vsub.f32 %v6171_v37, %v1312_v25  ;;  %v423_v47 = vadd.f32 %v422_v10, %v421_v28  ;;  %v610_v10 = vrot.slane %v5422_v38, 6 }
 0x1b7   :  { %2633 = vrot.lane.b32.xlu1 %v1559_v17, %s5295_s23  ;;  %2571 = vrot.lane.b32.xlu0 %v1528_v30, %s5295_s23  ;;  %v192_v17 = vadd.f32 %v191_v8, %v190_v53  ;;  %v197_v30 = vadd.f32 %v196_v39, %v195_v48  ;;  %v703_v48 = vmul.f32 %v581_v42, %v187_v5  ;;  %v6369_v5 = vld [vmem:[%s7814_s0 + $0x188] sm:$0xff] }
 0x1b8   :  { %v734_v15 = vmul.f32 %v608_v54, %v404_v29  ;;  %v416_v62 = vadd.f32 %v415_v43, %v414_v4  ;;  %v735_v39 = vmul.f32 %v609_v3, %v411_v50  ;;  %v582_v50 = vrot.slane %v5416_v35, 6 }
 0x1b9   :  { %v6316_v16 = vpop.permute.xlu1 %2341  ;;  %v6318_v44 = vpop.permute.xlu0 %2279  ;;  %v198_v34 = vrot.slane %v197_v30, 2  ;;  %v193_v29 = vrot.slane %v192_v17, 1  ;;  %v1316_v4 = vrot.slane %v703_v48, %v5388_v22  ;;  %v424_v3 = vrot.slane %v423_v47, 1 }
 0x1ba   :  { %v1440_v43 = vrot.slane %v734_v15, %v5388_v22  ;;  %v417_v23 = vrot.slane %v416_v62, 1  ;;  %v1444_v15 = vrot.slane %v735_v39, %v5388_v22 }
 0x1bb   :  { %2635 = vrot.lane.b32.xlu1 %v1560_v55, %s5295_s23  ;;  %2825 = vrot.lane.b32.xlu0 %v2431_v58, %s5296_s8  ;;  %v199_v32 = vadd.f32 %v198_v34, %v197_v30  ;;  %v6364_v58 = vld [vmem:[%s7814_s0 + $0x88] sm:$0xff]  ;;  %v194_v55 = vadd.f32 %v193_v29, %v192_v17  ;;  %v1530_v25 = vsub.f32 %v6200_v40, %v1316_v4  ;;  %v427_v17 = vrot.slane %v426_v24, 4 }
 0x1bc   :  { %v1561_v28 = vsub.f32 %v6189_v2, %v1440_v43  ;;  %v209_v48 = vsel %vm89_vm8, %v6364_v58, 0.0  ;;  %v433_v34 = vsel %vm89_vm8, %v6369_v5, 0.0  ;;  %v418_v29 = vadd.f32 %v417_v23, %v416_v62 }
 0x1bd   :  { %v6329_v41 = vpop.permute.xlu1 %2343  ;;  %v6331_v53 = vpop.permute.xlu0 %2281  ;;  %v1562_v4 = vsub.f32 %v6225_v36, %v1444_v15  ;;  %v704_v39 = vmul.f32 %v582_v50, %v194_v55  ;;  %v2434_v15 = vsub.f32 %v6200_v40, %v6107_v26  ;;  %v611_v50 = vrot.slane %v5422_v38, 7 }
 0x1be   :  { %v736_v62 = vmul.f32 %v610_v10, %v418_v29 }
 0x1bf   :  { %2889 = vrot.lane.b32.xlu1 %v2463_v46, %s5296_s8  ;;  %2827 = vrot.lane.b32.xlu0 %v2432_v45, %s5296_s8  ;;  %v203_v46 = vrot.slane %v202_v59, 4  ;;  %v200_v45 = vrot.slane %v199_v32, 1 }
 0x1c1   :  { %v6349_v54 = vpop.permute.xlu1 %2345  ;;  %v6351_v8 = vpop.permute.xlu0 %2283  ;;  %v201_v23 = vadd.f32 %v200_v45, %v199_v32  ;;  %v1448_v45 = vrot.slane %v736_v62, %v5388_v22 }
 0x1c2   :  { %7903 = vst [vmem:[#allocation69_spill] sm:$0xff] %v6351_v8  ;;  %v583_v8 = vrot.slane %v5416_v35, 7 }
 0x1c3   :  { %2891 = vrot.lane.b32.xlu1 %v2464_v31, %s5296_s8  ;;  %2573 = vrot.lane.b32.xlu0 %v1529_v9, %s5295_s23  ;;  %v2433_v9 = vsub.f32 %v6171_v37, %v6090_v21  ;;  %v425_v21 = vadd.f32 %v424_v3, %v423_v47  ;;  %v2465_v37 = vsub.f32 %v6189_v2, %v6105_v27  ;;  %v6409_v27 = vld [vmem:[%s7814_s0 + $0x90] sm:$0xff] }
 0x1c4   :  { %v705_v26 = vmul.f32 %v583_v8, %v201_v23  ;;  %v2466_v2 = vsub.f32 %v6225_v36, %v6130_v11  ;;  %v6424_v11 = vld [vmem:[%s7814_s0 + $0x190] sm:$0xff]  ;;  %v6429_v36 = vld [vmem:[%s7814_s0 + $0x98] sm:$0xff] }
 0x1c5   :  { %v6371_v42 = vpop.permute.xlu1 %2347  ;;  %v6373_v30 = vpop.permute.xlu0 %2285 }
 0x1c6   :  { %7904 = vst [vmem:[#allocation70_spill] sm:$0xff] %v6371_v42  ;;  %7905 = vst [vmem:[#allocation71_spill] sm:$0xff] %v6373_v30  ;;  %v428_v30 = vadd.f32 %v427_v17, %v426_v24  ;;  %v434_v42 = vrot.slane %v433_v34, 4  ;;  %v1320_v24 = vrot.slane %v704_v39, %v5388_v22  ;;  %v1324_v39 = vrot.slane %v705_v26, %v5388_v22 }
 0x1c7   :  { %2637 = vrot.lane.b32.xlu1 %v1561_v28, %s5295_s23  ;;  %2575 = vrot.lane.b32.xlu0 %v1530_v25, %s5295_s23  ;;  %v204_v28 = vadd.f32 %v203_v46, %v202_v59  ;;  %v210_v25 = vrot.slane %v209_v48, 4 }
 0x1c8   :  { %v429_v35 = vrot.slane %v428_v30, 2  ;;  %v435_v32 = vadd.f32 %v434_v42, %v433_v34  ;;  %v1531_v38 = vsub.f32 %v6244_v20, %v1320_v24  ;;  %v216_v42 = vsel %vm89_vm8, %v6409_v27, 0.0 }
 0x1c9   :  { %v6388_v31 = vpop.permute.xlu1 %2349  ;;  %v6390_v43 = vpop.permute.xlu0 %2287  ;;  %v205_v46 = vrot.slane %v204_v28, 2  ;;  %v211_v17 = vadd.f32 %v210_v25, %v209_v48  ;;  %v737_v48 = vmul.f32 %v611_v50, %v425_v21  ;;  %v217_v62 = vrot.slane %v216_v42, 4  ;;  %v6448_v50 = vld [vmem:[%s7814_s0 + $0x198] sm:$0xff] }
 0x1ca   :  { %7906 = vst [vmem:[#allocation72_spill] sm:$0xff] %v6388_v31  ;;  %7907 = vst [vmem:[#allocation73_spill] sm:$0xff] %v6390_v43  ;;  %v430_v8 = vadd.f32 %v429_v35, %v428_v30  ;;  %v436_v34 = vrot.slane %v435_v32, 2  ;;  %v1131_v30 = vrot.slane %v5456_v60, %v5451_v57  ;;  %v440_v21 = vsel %vm89_vm8, %v6424_v11, 0.0 }
 0x1cb   :  { %2639 = vrot.lane.b32.xlu1 %v1562_v4, %s5295_s23  ;;  %2829 = vrot.lane.b32.xlu0 %v2433_v9, %s5296_s8  ;;  %v206_v3 = vadd.f32 %v205_v46, %v204_v28  ;;  %v212_v29 = vrot.slane %v211_v17, 2  ;;  %v1563_v4 = vsub.f32 %v6262_v13, %v1448_v45  ;;  %v1452_v28 = vrot.slane %v737_v48, %v5388_v22  ;;  %v5225_v46 = vld [vmem:[%s7814_s0] sm:$0xff] }
 0x1cc   :  { %v223_v24 = vsel %vm89_vm8, %v6429_v36, 0.0  ;;  %v441_v45 = vrot.slane %v440_v21, 4 }
 0x1cd   :  { %v6400_v55 = vpop.permute.xlu1 %2351  ;;  %v2550_v59 = vpop.permute.xlu0 %2549  ;;  %v207_v25 = vrot.slane %v206_v3, 1  ;;  %v213_v23 = vadd.f32 %v212_v29, %v211_v17 }
 0x1ce   :  { %7908 = vst [vmem:[#allocation74_spill] sm:$0xff] %v6400_v55  ;;  %v2998_v17 = vsel %vm2997_vm9, %v5225_v46, %v2550_v59  ;;  %v5226_v46 = vld [vmem:[%s7814_s0 + $0x100] sm:$0xff] }
 0x1cf   :  { %2893 = vrot.lane.b32.xlu1 %v2465_v37, %s5296_s8  ;;  %2831 = vrot.lane.b32.xlu0 %v2434_v15, %s5296_s8  ;;  %v431_v37 = vrot.slane %v430_v8, 1  ;;  %v437_v15 = vadd.f32 %v436_v34, %v435_v32  ;;  %v1532_v32 = vsub.f32 %v6281_v18, %v1324_v39  ;;  %v208_v29 = vadd.f32 %v207_v25, %v206_v3 }
 0x1d0   :  { %v214_v34 = vrot.slane %v213_v23, 1  ;;  %v2435_v25 = vsub.f32 %v6244_v20, %v6132_v12  ;;  %v7913_v12 = vld [vmem:[#allocation2_spill] sm:$0xff] }
 0x1d1   :  { %v2614_v40 = vpop.permute.xlu1 %2613  ;;  %v6413_v47 = vpop.permute.xlu0 %2289  ;;  %v438_v39 = vrot.slane %v437_v15, 1  ;;  %v432_v3 = vadd.f32 %v431_v37, %v430_v8  ;;  %v442_v8 = vadd.f32 %v441_v45, %v440_v21  ;;  %v706_v20 = vmul.f32 %v7913_v12, %v208_v29  ;;  %v5227_v29 = vld [vmem:[%s7814_s0 + $0x8] sm:$0xff] }
 0x1d2   :  { %7909 = vst [vmem:[#allocation75_spill] sm:$0xff] %v6413_v47  ;;  %v215_v21 = vadd.f32 %v214_v34, %v213_v23  ;;  %v584_v45 = vrot.slane %v7913_v12, 1 }
 0x1d3   :  { %2895 = vrot.lane.b32.xlu1 %v2466_v2, %s5296_s8  ;;  %2577 = vrot.lane.b32.xlu0 %v1531_v38, %s5295_s23  ;;  %v1564_v2 = vsub.f32 %v6289_v52, %v1452_v28  ;;  %v6458_v38 = vadd.f32 %v217_v62, %v216_v42  ;;  %v6469_v42 = vld [vmem:[%s7814_s0 + $0xa0] sm:$0xff]  ;;  %v2467_v62 = vsub.f32 %v6262_v13, %v6149_v49 }
 0x1d4   :  { %v230_v13 = vsel %vm89_vm8, %v6469_v42, 0.0 }
 0x1d5   :  { %v6431_v10 = vpop.permute.xlu1 %2353  ;;  %v6433_v9 = vpop.permute.xlu0 %2551 }
 0x1d6   :  { %7910 = vst [vmem:[#allocation76_spill] sm:$0xff] %v6431_v10 }
 0x1d7   :  { %2641 = vrot.lane.b32.xlu1 %v1563_v4, %s5295_s23  ;;  %1133 = vbcast.lane.b32.xlu0 %v1131_v30, 256  ;;  %v224_v4 = vrot.slane %v223_v24, 4  ;;  %v447_v30 = vsel %vm89_vm8, %v6448_v50, 0.0 }
 0x1d8   :  { %v448_v49 = vrot.slane %v447_v30, 4 }
 0x1d9   :  { %v6454_v35 = vpop.permute.xlu1 %2615  ;;  %v2806_v26 = vpop.permute.xlu0 %2805  ;;  %v225_v10 = vadd.f32 %v224_v4, %v223_v24  ;;  %v2436_v24 = vsub.f32 %v6281_v18, %v6151_v19  ;;  %v2999_v4 = vsel %vm2997_vm9, %v5227_v29, %v6433_v9  ;;  %v1328_v19 = vrot.slane %v706_v20, %v5388_v22  ;;  %v6520_v20 = vld [vmem:[%s7814_s0 + $0x1a0] sm:$0xff] }
 0x1da   :  { %v3063_v48 = vsel %vm3062_vm10, %v2998_v17, %v2806_v26  ;;  %v3030_v17 = vsel %vm2997_vm9, %v5226_v46, %v2614_v40  ;;  %v439_v46 = vadd.f32 %v438_v39, %v437_v15  ;;  %v2468_v15 = vsub.f32 %v6289_v52, %v6159_v63  ;;  %v7917_v63 = vld [vmem:[#allocation10_spill] sm:$0xff] }
 0x1db   :  { %2579 = vrot.lane.b32.xlu1 %v1532_v32, %s5295_s23  ;;  %2643 = vrot.lane.b32.xlu0 %v1564_v2, %s5295_s23  ;;  %v3128_v59 = vsel %vm3127_vm11, %v3063_v48, %v2806_v26  ;;  %v7912_v2 = vld [vmem:[#allocation14_spill] sm:$0xff]  ;;  %v443_v39 = vrot.slane %v442_v8, 2  ;;  %v1138_v52 = vrot.slane %v5456_v60, %v7917_v63 }
 0x1dc   :  { %v3193_v28 = vsel %vm3192_vm12, %v3128_v59, 0.0  ;;  %v219_v59 = vrot.slane %v6458_v38, 2 }
 0x1dd   :  { %v2870_v26 = vpop.permute.xlu1 %2869  ;;  %v6480_v32 = vpop.permute.xlu0 %2291  ;;  %v3257_v48 = vmul.f32 %v3193_v28, %v7912_v2  ;;  %v7916_v2 = vld [vmem:[#allocation4_spill] sm:$0xff] }
 0x1de   :  { %7911 = vst [vmem:[#allocation77_spill] sm:$0xff] %v6480_v32  ;;  %v3095_v37 = vsel %vm3062_vm10, %v3030_v17, %v2870_v26  ;;  %v7915_v17 = vld [vmem:[#allocation46_spill] sm:$0xff]  ;;  %v738_v23 = vmul.f32 %v7916_v2, %v432_v3  ;;  %v612_v18 = vrot.slane %v7916_v2, 1 }
 0x1df   :  { %2833 = vrot.lane.b32.xlu1 %v2435_v25, %s5296_s8  ;;  %2897 = vrot.lane.b32.xlu0 %v2467_v62, %s5296_s8  ;;  %v3160_v40 = vsel %vm3127_vm11, %v3095_v37, %v2870_v26  ;;  %v226_v37 = vrot.slane %v225_v10, 2 }
 0x1e0   :  { %5104 = vmatprep.mubr.msk.f32.mxu0 %vm3330_vm13, %v3257_v48  ;;  %v3225_v28 = vsel %vm3192_vm12, %v3160_v40, 0.0  ;;  %v449_v48 = vadd.f32 %v448_v49, %v447_v30  ;;  %v231_v40 = vrot.slane %v230_v13, 4  ;;  %v5228_v30 = vld [vmem:[%s7814_s0 + $0x108] sm:$0xff] }
 0x1e1   :  { %v6501_v25 = vpop.permute.xlu1 %2355  ;;  %v2808_v62 = vpop.permute.xlu0 %2807  ;;  %v3289_v26 = vmul.f32 %v3225_v28, %v7915_v17  ;;  %v3031_v49 = vsel %vm2997_vm9, %v5228_v30, %v6454_v35  ;;  %v7918_v28 = vld [vmem:[#allocation15_spill] sm:$0xff]  ;;  %v707_v17 = vmul.f32 %v584_v45, %v215_v21  ;;  %v227_v21 = vadd.f32 %v226_v37, %v225_v10 }
 0x1e2   :  { %7914 = vst [vmem:[#allocation14_spill] sm:$0xff] %v6501_v25  ;;  %v3064_v34 = vsel %vm3062_vm10, %v2999_v4, %v2808_v62  ;;  %v444_v25 = vadd.f32 %v443_v39, %v442_v8  ;;  %v450_v32 = vrot.slane %v449_v48, 2  ;;  %v6535_v35 = vld [vmem:[%s7814_s0 + $0xa8] sm:$0xff]  ;;  %v6539_v45 = vadd.f32 %v231_v40, %v230_v13 }
 0x1e3   :  { %v3129_v9 = vsel %vm3127_vm11, %v3064_v34, %v2808_v62  ;;  %5152 = vmatprep.mubr.msk.f32.mxu1 %vm3330_vm13, %v3289_v26  ;;  %2835 = vrot.lane.b32.xlu1 %v2436_v24, %s5296_s8  ;;  %v1456_v62 = vrot.slane %v738_v23, %v5388_v22  ;;  %v220_v26 = vadd.f32 %v219_v59, %v6458_v38  ;;  %v454_v38 = vsel %vm89_vm8, %v6520_v20, 0.0  ;;  %v7919_v8 = vld [vmem:[#allocation47_spill] sm:$0xff] }
 0x1e4   :  { %v3194_v3 = vsel %vm3192_vm12, %v3129_v9, 0.0  ;;  %2899 = vrot.lane.b32.xlu0 %v2468_v15, %s5296_s8  ;;  %v1533_v34 = vsub.f32 %v6339_v7, %v1328_v19  ;;  %v739_v9 = vmul.f32 %v612_v18, %v439_v46  ;;  %v1332_v39 = vrot.slane %v707_v17, %v5388_v22  ;;  %v6555_v13 = vld [vmem:[%s7814_s0 + $0x1a8] sm:$0xff]  ;;  %v6566_v17 = vld [vmem:[%s7814_s0 + $0xb0] sm:$0xff] }
 0x1e5   :  { %v3258_v24 = vmul.f32 %v3194_v3, %v7918_v28  ;;  %v2872_v29 = vpop.permute.xlu1 %2871  ;;  %v2554_v4 = vpop.permute.xlu0 %2553  ;;  %v1565_v18 = vsub.f32 %v6347_v0, %v1456_v62  ;;  %v6550_v10 = vsel %vm89_vm8, %v6535_v35, 0.0  ;;  %v7920_v37 = vld [vmem:[#allocation11_spill] sm:$0xff]  ;;  %v455_v28 = vrot.slane %v454_v38, 4 }
 0x1e6   :  { %v3096_v15 = vsel %vm3062_vm10, %v3031_v49, %v2872_v29  ;;  %v1145_v40 = vrot.slane %v5456_v60, %v7920_v37  ;;  %v1460_v30 = vrot.slane %v739_v9, %v5388_v22  ;;  %v451_v49 = vadd.f32 %v450_v32, %v449_v48  ;;  %v5229_v48 = vld [vmem:[%s7814_s0 + $0x10] sm:$0xff] }
 0x1e7   :  { %v3161_v3 = vsel %vm3127_vm11, %v3096_v15, %v2872_v29  ;;  %1140 = vbcast.lane.b32.xlu1 %v1138_v52, 256  ;;  %5105 = vmatmul.mubr.msk.f32.vlgmr.msra.gmra.mrb[0].mxu0 %vm3330_vm13, %v3258_v24  ;;  %v221_v52 = vrot.slane %v220_v26, 1  ;;  %v445_v24 = vrot.slane %v444_v25, 1  ;;  %v228_v29 = vrot.slane %v227_v21, 1 }
 0x1e8   :  { %v3226_v59 = vsel %vm3192_vm12, %v3161_v3, 0.0  ;;  %2581 = vrot.lane.b32.xlu0 %v1533_v34, %s5295_s23  ;;  %v233_v62 = vrot.slane %v6539_v45, 2  ;;  %v238_v60 = vrot.slane %v6550_v10, 4  ;;  %v461_v32 = vsel %vm89_vm8, %v6555_v13, 0.0 }
 0x1e9   :  { %v3290_v46 = vmul.f32 %v3226_v59, %v7919_v8  ;;  %v2618_v23 = vpop.permute.xlu1 %2617  ;;  %v2556_v19 = vpop.permute.xlu0 %2555  ;;  %v3000_v15 = vsel %vm2997_vm9, %v5229_v48, %v2554_v4  ;;  %v1534_v3 = vsub.f32 %v6364_v58, %v1332_v39  ;;  %v1566_v8 = vsub.f32 %v6369_v5, %v1460_v30  ;;  %v7921_v30 = vld [vmem:[#allocation59_spill] sm:$0xff] }
 0x1ea   :  { %v6579_v47 = vadd.f32 %v455_v28, %v454_v38  ;;  %v6583_v55 = vsel %vm89_vm8, %v6566_v17, 0.0  ;;  %v446_v48 = vadd.f32 %v445_v24, %v444_v25  ;;  %v2437_v38 = vsub.f32 %v6339_v7, %v7921_v30  ;;  %v5230_v28 = vld [vmem:[%s7814_s0 + $0x110] sm:$0xff] }
 0x1eb   :  { %5153 = vmatmul.mubr.msk.f32.vlgmr.msra.gmra.mrb[0].mxu1 %vm3330_vm13, %v3290_v46  ;;  %2645 = vrot.lane.b32.xlu1 %v1565_v18, %s5295_s23  ;;  %v222_v46 = vadd.f32 %v221_v52, %v220_v26  ;;  %v585_v18 = vrot.slane %v7913_v12, 2  ;;  %v613_v26 = vrot.slane %v7916_v2, 2  ;;  %v229_v52 = vadd.f32 %v228_v29, %v227_v21 }
 0x1ec   :  { %1147 = vbcast.lane.b32.xlu0 %v1145_v40, 256  ;;  %v452_v40 = vrot.slane %v451_v49, 1  ;;  %v2469_v21 = vsub.f32 %v6347_v0, %v6175_v14  ;;  %v462_v30 = vrot.slane %v461_v32, 4 }
 0x1ed   :  { %v2620_v34 = vpop.permute.xlu1 %2619  ;;  %v2810_v9 = vpop.permute.xlu0 %2809 }
 0x1ee   :  { %v3065_v59 = vsel %vm3062_vm10, %v3000_v15, %v2810_v9  ;;  %v3032_v15 = vsel %vm2997_vm9, %v5230_v28, %v2618_v23 }
 0x1ef   :  { %v3130_v4 = vsel %vm3127_vm11, %v3065_v59, %v2810_v9  ;;  %2583 = vrot.lane.b32.xlu1 %v1534_v3, %s5295_s23  ;;  %v5231_v9 = vld [vmem:[%s7814_s0 + $0x18] sm:$0xff]  ;;  %v7922_v59 = vld [vmem:[#allocation16_spill] sm:$0xff] }
 0x1f0   :  { %v3195_v39 = vsel %vm3192_vm12, %v3130_v4, 0.0  ;;  %2647 = vrot.lane.b32.xlu0 %v1566_v8, %s5295_s23  ;;  %v3001_v3 = vsel %vm2997_vm9, %v5231_v9, %v2556_v19  ;;  %v708_v4 = vmul.f32 %v585_v18, %v222_v46  ;;  %v453_v19 = vadd.f32 %v452_v40, %v451_v49  ;;  %v5232_v49 = vld [vmem:[%s7814_s0 + $0x118] sm:$0xff] }
 0x1f1   :  { %v3259_v25 = vmul.f32 %v3195_v39, %v7922_v59  ;;  %v2874_v24 = vpop.permute.xlu1 %2873  ;;  %v2812_v8 = vpop.permute.xlu0 %2811  ;;  %v6612_v39 = vld [vmem:[%s7814_s0 + $0x1b0] sm:$0xff]  ;;  %v740_v46 = vmul.f32 %v613_v26, %v446_v48  ;;  %v586_v18 = vrot.slane %v7913_v12, 3  ;;  %v3033_v40 = vsel %vm2997_vm9, %v5232_v49, %v2620_v34 }
 0x1f2   :  { %v3097_v7 = vsel %vm3062_vm10, %v3032_v15, %v2874_v24  ;;  %v3066_v29 = vsel %vm3062_vm10, %v3001_v3, %v2812_v8  ;;  %v7923_v15 = vld [vmem:[#allocation48_spill] sm:$0xff]  ;;  %v7924_v3 = vld [vmem:[#allocation17_spill] sm:$0xff]  ;;  %v2470_v48 = vsub.f32 %v6369_v5, %v6202_v1  ;;  %v468_v34 = vsel %vm89_vm8, %v6612_v39, 0.0 }
 0x1f3   :  { %v3162_v23 = vsel %vm3127_vm11, %v3097_v7, %v2874_v24  ;;  %v3131_v28 = vsel %vm3127_vm11, %v3066_v29, %v2812_v8  ;;  %2837 = vrot.lane.b32.xlu1 %v2437_v38, %s5296_s8  ;;  %5107 = vmatprep.mubr.msk.f32.mxu0 %vm3330_vm13, %v3259_v25  ;;  %v2438_v38 = vsub.f32 %v6364_v58, %v6177_v6  ;;  %v614_v6 = vrot.slane %v7916_v2, 3 }
 0x1f4   :  { %v3227_v14 = vsel %vm3192_vm12, %v3162_v23, 0.0  ;;  %v3196_v0 = vsel %vm3192_vm12, %v3131_v28, 0.0  ;;  %2901 = vrot.lane.b32.xlu0 %v2469_v21, %s5296_s8  ;;  %v1336_v8 = vrot.slane %v708_v4, %v5388_v22  ;;  %v234_v58 = vadd.f32 %v233_v62, %v6539_v45  ;;  %v6646_v45 = vld [vmem:[%s7814_s0 + $0xb8] sm:$0xff] }
 0x1f5   :  { %v3291_v9 = vmul.f32 %v3227_v14, %v7923_v15  ;;  %v3260_v59 = vmul.f32 %v3196_v0, %v7924_v3  ;;  %v2876_v25 = vpop.permute.xlu1 %2875  ;;  %v2558_v24 = vpop.permute.xlu0 %2557  ;;  %v239_v21 = vadd.f32 %v238_v60, %v6550_v10  ;;  %v457_v1 = vrot.slane %v6579_v47, 2  ;;  %v7925_v10 = vld [vmem:[#allocation49_spill] sm:$0xff] }
 0x1f6   :  { %v3098_v26 = vsel %vm3062_vm10, %v3033_v40, %v2876_v25  ;;  %v463_v5 = vadd.f32 %v462_v30, %v461_v32  ;;  %v245_v29 = vrot.slane %v6583_v55, 4  ;;  %v7926_v28 = vld [vmem:[#allocation13_spill] sm:$0xff]  ;;  %v1464_v30 = vrot.slane %v740_v46, %v5388_v22 }
 0x1f7   :  { %v3163_v7 = vsel %vm3127_vm11, %v3098_v26, %v2876_v25  ;;  %5155 = vmatprep.mubr.msk.f32.mxu1 %vm3330_vm13, %v3291_v9  ;;  %2839 = vrot.lane.b32.xlu1 %v2438_v38, %s5296_s8  ;;  %v1152_v32 = vrot.slane %v7926_v28, %v5388_v22  ;;  %v709_v14 = vmul.f32 %v586_v18, %v229_v52  ;;  %v469_v0 = vrot.slane %v468_v34, 4  ;;  %v6660_v46 = vld [vmem:[%s7814_s0 + $0x1b8] sm:$0xff] }
 0x1f8   :  { %v3228_v4 = vsel %vm3192_vm12, %v3163_v7, 0.0  ;;  %2903 = vrot.lane.b32.xlu0 %v2470_v48, %s5296_s8  ;;  %5108 = vmatmul.mubr.msk.f32.gmra.mrb[2].mxu0 %vm3330_vm13, %v3260_v59  ;;  %v1535_v38 = vsub.f32 %v6409_v27, %v1336_v8  ;;  %v741_v49 = vmul.f32 %v614_v6, %v453_v19  ;;  %v240_v40 = vrot.slane %v239_v21, 2  ;;  %v5233_v19 = vld [vmem:[%s7814_s0 + $0x20] sm:$0xff] }
 0x1f9   :  { %v3292_v62 = vmul.f32 %v3228_v4, %v7925_v10  ;;  %v2622_v60 = vpop.permute.xlu1 %2621  ;;  %v2560_v23 = vpop.permute.xlu0 %2559  ;;  %v235_v15 = vrot.slane %v234_v58, 1  ;;  %v458_v9 = vadd.f32 %v457_v1, %v6579_v47  ;;  %v464_v3 = vrot.slane %v463_v5, 2  ;;  %v7927_v7 = vld [vmem:[#allocation6_spill] sm:$0xff] }
 0x1fa   :  { %v251_v59 = vsel %vm89_vm8, %v6646_v45, 0.0  ;;  %v246_v52 = vadd.f32 %v245_v29, %v6583_v55  ;;  %v3002_v18 = vsel %vm2997_vm9, %v5233_v19, %v2558_v24  ;;  %v1567_v48 = vsub.f32 %v6424_v11, %v1464_v30 }
 0x1fb   :  { %5156 = vmatmul.mubr.msk.f32.gmra.mrb[2].mxu1 %vm3330_vm13, %v3292_v62  ;;  %1154 = vbcast.lane.b32.xlu1 %v1152_v32, 256  ;;  %v1340_v26 = vrot.slane %v709_v14, %v5388_v22  ;;  %v6670_v8 = vadd.f32 %v469_v0, %v468_v34  ;;  %v1159_v1 = vrot.slane %v7926_v28, %v7927_v7  ;;  %v252_v4 = vrot.slane %v251_v59, 4  ;;  %v5234_v14 = vld [vmem:[%s7814_s0 + $0x120] sm:$0xff]  ;;  %v5235_v0 = vld [vmem:[%s7814_s0 + $0x28] sm:$0xff] }
 0x1fc   :  { %2585 = vrot.lane.b32.xlu0 %v1535_v38, %s5295_s23  ;;  %v1468_v55 = vrot.slane %v741_v49, %v5388_v22  ;;  %v241_v29 = vadd.f32 %v240_v40, %v239_v21  ;;  %v6678_v24 = vsel %vm89_vm8, %v6660_v46, 0.0  ;;  %v459_v62 = vrot.slane %v458_v9, 1  ;;  %v7928_v49 = vld [vmem:[#allocation18_spill] sm:$0xff] }
 0x1fd   :  { %v2624_v47 = vpop.permute.xlu1 %2623  ;;  %v2814_v25 = vpop.permute.xlu0 %2813  ;;  %v465_v34 = vadd.f32 %v464_v3, %v463_v5  ;;  %v236_v30 = vadd.f32 %v235_v15, %v234_v58  ;;  %v3034_v21 = vsel %vm2997_vm9, %v5234_v14, %v2622_v60  ;;  %v3003_v38 = vsel %vm2997_vm9, %v5235_v0, %v2560_v23  ;;  %v5236_v0 = vld [vmem:[%s7814_s0 + $0x128] sm:$0xff] }
 0x1fe   :  { %v3067_v6 = vsel %vm3062_vm10, %v3002_v18, %v2814_v25  ;;  %v1536_v3 = vsub.f32 %v6429_v36, %v1340_v26  ;;  %v1568_v18 = vsub.f32 %v6448_v50, %v1468_v55  ;;  %v587_v60 = vrot.slane %v7913_v12, 4 }
 0x1ff   :  { %v3132_v10 = vsel %vm3127_vm11, %v3067_v6, %v2814_v25  ;;  %2649 = vrot.lane.b32.xlu1 %v1567_v48, %s5295_s23  ;;  %v242_v25 = vrot.slane %v241_v29, 1  ;;  %v247_v48 = vrot.slane %v246_v52, 2  ;;  %v615_v55 = vrot.slane %v7916_v2, 4 }
 0x200   :  { %v3197_v32 = vsel %vm3192_vm12, %v3132_v10, 0.0  ;;  %1161 = vbcast.lane.b32.xlu0 %v1159_v1, 256  ;;  %v460_v10 = vadd.f32 %v459_v62, %v458_v9 }
 0x201   :  { %v3261_v40 = vmul.f32 %v3197_v32, %v7928_v49  ;;  %v2878_v19 = vpop.permute.xlu1 %2877  ;;  %v2816_v5 = vpop.permute.xlu0 %2815  ;;  %v7929_v32 = vld [vmem:[#allocation60_spill] sm:$0xff]  ;;  %v7930_v49 = vld [vmem:[#allocation50_spill] sm:$0xff] }
 0x202   :  { %v3099_v58 = vsel %vm3062_vm10, %v3034_v21, %v2878_v19  ;;  %v3068_v15 = vsel %vm3062_vm10, %v3003_v38, %v2816_v5  ;;  %v2439_v14 = vsub.f32 %v6409_v27, %v7929_v32  ;;  %v6710_v21 = vld [vmem:[%s7814_s0 + $0xc0] sm:$0xff]  ;;  %v3035_v38 = vsel %vm2997_vm9, %v5236_v0, %v2624_v47 }
 0x203   :  { %v3164_v6 = vsel %vm3127_vm11, %v3099_v58, %v2878_v19  ;;  %v3133_v23 = vsel %vm3127_vm11, %v3068_v15, %v2816_v5  ;;  %2587 = vrot.lane.b32.xlu1 %v1536_v3, %s5295_s23  ;;  %5110 = vmatprep.mubr.msk.f32.mxu0 %vm3330_vm13, %v3261_v40  ;;  %v7931_v19 = vld [vmem:[#allocation19_spill] sm:$0xff]  ;;  %v7932_v3 = vld [vmem:[#allocation61_spill] sm:$0xff]  ;;  %v466_v58 = vrot.slane %v465_v34, 1  ;;  %v476_v32 = vrot.slane %v6678_v24, 4 }
 0x204   :  { %v3229_v26 = vsel %vm3192_vm12, %v3164_v6, 0.0  ;;  %v3198_v1 = vsel %vm3192_vm12, %v3133_v23, 0.0  ;;  %2651 = vrot.lane.b32.xlu0 %v1568_v18, %s5295_s23  ;;  %v2471_v27 = vsub.f32 %v6424_v11, %v7932_v3  ;;  %v710_v18 = vmul.f32 %v587_v60, %v236_v30  ;;  %v7934_v60 = vld [vmem:[#allocation51_spill] sm:$0xff] }
 0x205   :  { %v3293_v40 = vmul.f32 %v3229_v26, %v7930_v49  ;;  %v3262_v9 = vmul.f32 %v3198_v1, %v7931_v19  ;;  %v2880_v62 = vpop.permute.xlu1 %2879  ;;  %v2562_v5 = vpop.permute.xlu0 %2561  ;;  %v471_v6 = vrot.slane %v6670_v8, 2  ;;  %v253_v23 = vadd.f32 %v252_v4, %v251_v59  ;;  %v7933_v4 = vld [vmem:[#allocation62_spill] sm:$0xff] }
 0x206   :  { %v3100_v15 = vsel %vm3062_vm10, %v3035_v38, %v2880_v62  ;;  %v6726_v26 = vadd.f32 %v247_v48, %v246_v52  ;;  %v258_v11 = vsel %vm89_vm8, %v6710_v21, 0.0  ;;  %v742_v59 = vmul.f32 %v615_v55, %v460_v10  ;;  %v7935_v48 = vld [vmem:[#allocation63_spill] sm:$0xff] }
 0x207   :  { %v3165_v47 = vsel %vm3127_vm11, %v3100_v15, %v2880_v62  ;;  %5158 = vmatprep.mubr.msk.f32.mxu1 %vm3330_vm13, %v3293_v40  ;;  %2841 = vrot.lane.b32.xlu1 %v2439_v14, %s5296_s8  ;;  %v2440_v30 = vsub.f32 %v6429_v36, %v7933_v4  ;;  %v243_v14 = vadd.f32 %v242_v25, %v241_v29  ;;  %v588_v52 = vrot.slane %v7913_v12, 5 }
 0x208   :  { %v3230_v1 = vsel %vm3192_vm12, %v3165_v47, 0.0  ;;  %2905 = vrot.lane.b32.xlu0 %v2471_v27, %s5296_s8  ;;  %5111 = vmatmul.mubr.msk.f32.gmra.mrb[4].mxu0 %vm3330_vm13, %v3262_v9  ;;  %v2472_v40 = vsub.f32 %v6448_v50, %v7935_v48  ;;  %v1344_v19 = vrot.slane %v710_v18, %v5388_v22  ;;  %v467_v62 = vadd.f32 %v466_v58, %v465_v34  ;;  %v6752_v34 = vld [vmem:[%s7814_s0 + $0x1c0] sm:$0xff]  ;;  %v7936_v27 = vld [vmem:[#allocation7_spill] sm:$0xff]  ;;  %v5239_v48 = vld [vmem:[%s7814_s0 + $0x38] sm:$0xff] }
 0x209   :  { %v3294_v0 = vmul.f32 %v3230_v1, %v7934_v60  ;;  %v2626_v38 = vpop.permute.xlu1 %2625  ;;  %v2564_v49 = vpop.permute.xlu0 %2563  ;;  %v616_v3 = vrot.slane %v7916_v2, 5  ;;  %v6742_v10 = vadd.f32 %v471_v6, %v6670_v8  ;;  %v254_v55 = vrot.slane %v253_v23, 2  ;;  %v5237_v8 = vld [vmem:[%s7814_s0 + $0x30] sm:$0xff] }
 0x20a   :  { %v477_v36 = vadd.f32 %v476_v32, %v6678_v24  ;;  %v259_v29 = vrot.slane %v258_v11, 4  ;;  %v1472_v50 = vrot.slane %v742_v59, %v5388_v22  ;;  %v3004_v24 = vsel %vm2997_vm9, %v5237_v8, %v2562_v5 }
 0x20b   :  { %5159 = vmatmul.mubr.msk.f32.gmra.mrb[4].mxu1 %vm3330_vm13, %v3294_v0  ;;  %2843 = vrot.lane.b32.xlu1 %v2440_v30, %s5296_s8  ;;  %v1166_v58 = vrot.slane %v7926_v28, %v7936_v27  ;;  %v711_v15 = vmul.f32 %v588_v52, %v243_v14  ;;  %v249_v18 = vrot.slane %v6726_v26, 1  ;;  %v1537_v32 = vsub.f32 %v6469_v42, %v1344_v19  ;;  %v6774_v0 = vld [vmem:[%s7814_s0 + $0xc8] sm:$0xff]  ;;  %v5238_v52 = vld [vmem:[%s7814_s0 + $0x130] sm:$0xff] }
 0x20c   :  { %2907 = vrot.lane.b32.xlu0 %v2472_v40, %s5296_s8  ;;  %v743_v47 = vmul.f32 %v616_v3, %v467_v62  ;;  %v6764_v59 = vadd.f32 %v254_v55, %v253_v23  ;;  %v478_v4 = vrot.slane %v477_v36, 2  ;;  %v6767_v30 = vadd.f32 %v259_v29, %v258_v11  ;;  %v7937_v19 = vld [vmem:[#allocation20_spill] sm:$0xff] }
 0x20d   :  { %v2628_v25 = vpop.permute.xlu1 %2627  ;;  %v2818_v9 = vpop.permute.xlu0 %2817  ;;  %v482_v60 = vsel %vm89_vm8, %v6752_v34, 0.0  ;;  %v1569_v23 = vsub.f32 %v6520_v20, %v1472_v50  ;;  %v3036_v11 = vsel %vm2997_vm9, %v5238_v52, %v2626_v38  ;;  %v3005_v40 = vsel %vm2997_vm9, %v5239_v48, %v2564_v49  ;;  %v7939_v48 = vld [vmem:[#allocation52_spill] sm:$0xff] }
 0x20e   :  { %v3069_v6 = vsel %vm3062_vm10, %v3004_v24, %v2818_v9  ;;  %v1348_v29 = vrot.slane %v711_v15, %v5388_v22  ;;  %v7938_v24 = vld [vmem:[#allocation8_spill] sm:$0xff]  ;;  %v1476_v38 = vrot.slane %v743_v47, %v5388_v22  ;;  %v265_v49 = vsel %vm89_vm8, %v6774_v0, 0.0 }
 0x20f   :  { %v3134_v5 = vsel %vm3127_vm11, %v3069_v6, %v2818_v9  ;;  %1168 = vbcast.lane.b32.xlu1 %v1166_v58, 256  ;;  %v1173_v9 = vrot.slane %v7926_v28, %v7938_v24  ;;  %v256_v58 = vrot.slane %v6764_v59, 1  ;;  %v479_v15 = vadd.f32 %v478_v4, %v477_v36  ;;  %v6816_v36 = vld [vmem:[%s7814_s0 + $0x1d0] sm:$0xff]  ;;  %v5240_v4 = vld [vmem:[%s7814_s0 + $0x138] sm:$0xff] }
 0x210   :  { %v3199_v14 = vsel %vm3192_vm12, %v3134_v5, 0.0  ;;  %2589 = vrot.lane.b32.xlu0 %v1537_v32, %s5295_s23  ;;  %v483_v5 = vrot.slane %v482_v60, 4  ;;  %v261_v1 = vrot.slane %v6767_v30, 2  ;;  %v266_v43 = vrot.slane %v265_v49, 4 }
 0x211   :  { %v3263_v62 = vmul.f32 %v3199_v14, %v7937_v19  ;;  %v2882_v3 = vpop.permute.xlu1 %2881  ;;  %v2820_v55 = vpop.permute.xlu0 %2819  ;;  %v6804_v14 = vld [vmem:[%s7814_s0 + $0x1c8] sm:$0xff]  ;;  %v7940_v19 = vld [vmem:[#allocation21_spill] sm:$0xff] }
 0x212   :  { %v3101_v50 = vsel %vm3062_vm10, %v3036_v11, %v2882_v3  ;;  %v3070_v8 = vsel %vm3062_vm10, %v3005_v40, %v2820_v55  ;;  %v6811_v11 = vld [vmem:[%s7814_s0 + $0xd0] sm:$0xff]  ;;  %v6863_v31 = vadd.f32 %v266_v43, %v265_v49  ;;  %v590_v43 = vrot.slane %v7913_v12, 7 }
 0x213   :  { %v3166_v6 = vsel %vm3127_vm11, %v3101_v50, %v2882_v3  ;;  %v3135_v32 = vsel %vm3127_vm11, %v3070_v8, %v2820_v55  ;;  %2653 = vrot.lane.b32.xlu1 %v1569_v23, %s5295_s23  ;;  %5113 = vmatprep.mubr.msk.f32.mxu0 %vm3330_vm13, %v3263_v62  ;;  %v3037_v23 = vsel %vm2997_vm9, %v5240_v4, %v2628_v25  ;;  %v489_v25 = vsel %vm89_vm8, %v6804_v14, 0.0 }
 0x214   :  { %v3231_v47 = vsel %vm3192_vm12, %v3166_v6, 0.0  ;;  %v3200_v52 = vsel %vm3192_vm12, %v3135_v32, 0.0  ;;  %1175 = vbcast.lane.b32.xlu0 %v1173_v9, 256  ;;  %v1538_v50 = vsub.f32 %v6535_v35, %v1348_v29  ;;  %v1570_v9 = vsub.f32 %v6555_v13, %v1476_v38 }
 0x215   :  { %v3295_v40 = vmul.f32 %v3231_v47, %v7939_v48  ;;  %v3264_v62 = vmul.f32 %v3200_v52, %v7940_v19  ;;  %v2884_v3 = vpop.permute.xlu1 %2883  ;;  %v2566_v55 = vpop.permute.xlu0 %2565  ;;  %v250_v6 = vadd.f32 %v249_v18, %v6726_v26  ;;  %v589_v32 = vrot.slane %v7913_v12, 6  ;;  %v7941_v52 = vld [vmem:[#allocation64_spill] sm:$0xff]  ;;  %v7942_v48 = vld [vmem:[#allocation53_spill] sm:$0xff] }
 0x216   :  { %v3102_v8 = vsel %vm3062_vm10, %v3037_v23, %v2884_v3  ;;  %v480_v29 = vrot.slane %v479_v15, 1  ;;  %v6837_v38 = vsel %vm89_vm8, %v6811_v11, 0.0  ;;  %v6841_v26 = vsel %vm89_vm8, %v6816_v36, 0.0  ;;  %v6851_v23 = vld [vmem:[%s7814_s0 + $0xd8] sm:$0xff] }
 0x217   :  { %v3167_v47 = vsel %vm3127_vm11, %v3102_v8, %v2884_v3  ;;  %5161 = vmatprep.mubr.msk.f32.mxu1 %vm3330_vm13, %v3295_v40  ;;  %2591 = vrot.lane.b32.xlu1 %v1538_v50, %s5295_s23  ;;  %v2441_v4 = vsub.f32 %v6469_v42, %v7941_v52  ;;  %v7943_v50 = vrot.slane %v6742_v10, 1  ;;  %v712_v42 = vmul.f32 %v589_v32, %v250_v6 }
 0x218   :  { %v3232_v18 = vsel %vm3192_vm12, %v3167_v47, 0.0  ;;  %2655 = vrot.lane.b32.xlu0 %v1570_v9, %s5295_s23  ;;  %5114 = vmatmul.mubr.msk.f32.gmra.mrb[6].mxu0 %vm3330_vm13, %v3264_v62  ;;  %v617_v9 = vrot.slane %v7916_v2, 6  ;;  %v2473_v62 = vsub.f32 %v6520_v20, %v6248_v51  ;;  %v484_v47 = vadd.f32 %v483_v5, %v482_v60 }
 0x219   :  { %v3296_v40 = vmul.f32 %v3232_v18, %v7942_v48  ;;  %v2630_v19 = vpop.permute.xlu1 %2629  ;;  %v2568_v3 = vpop.permute.xlu0 %2567  ;;  %v474_v8 = vadd.f32 %v7943_v50, %v6742_v10  ;;  %v6861_v52 = vadd.f32 %v261_v1, %v6767_v30  ;;  %v490_v24 = vrot.slane %v489_v25, 4  ;;  %v5241_v1 = vld [vmem:[%s7814_s0 + $0x40] sm:$0xff] }
 0x21a   :  { %v273_v18 = vrot.slane %v6837_v38, 4  ;;  %v497_v10 = vrot.slane %v6841_v26, 4  ;;  %v6871_v48 = vsel %vm89_vm8, %v6851_v23, 0.0  ;;  %v257_v51 = vadd.f32 %v256_v58, %v6764_v59 }
 0x21b   :  { %5162 = vmatmul.mubr.msk.f32.gmra.mrb[6].mxu1 %vm3330_vm13, %v3296_v40  ;;  %2845 = vrot.lane.b32.xlu1 %v2441_v4, %s5296_s8  ;;  %v2442_v20 = vsub.f32 %v6535_v35, %v6250_v61  ;;  %v3006_v30 = vsel %vm2997_vm9, %v5241_v1, %v2566_v55  ;;  %v744_v5 = vmul.f32 %v617_v9, %v474_v8  ;;  %v618_v58 = vrot.slane %v7916_v2, 7  ;;  %v5242_v2 = vld [vmem:[%s7814_s0 + $0x140] sm:$0xff] }
 0x21c   :  { %2909 = vrot.lane.b32.xlu0 %v2473_v62, %s5296_s8  ;;  %v481_v6 = vadd.f32 %v480_v29, %v479_v15  ;;  %v2474_v32 = vsub.f32 %v6555_v13, %v6270_v56  ;;  %v1352_v12 = vrot.slane %v712_v42, %v5388_v22  ;;  %v485_v61 = vrot.slane %v484_v47, 2  ;;  %v7944_v56 = vld [vmem:[#allocation9_spill] sm:$0xff]  ;;  %v7945_v8 = vld [vmem:[#allocation22_spill] sm:$0xff] }
 0x21d   :  { %v2632_v60 = vpop.permute.xlu1 %2631  ;;  %v2822_v49 = vpop.permute.xlu0 %2821  ;;  %v268_v35 = vrot.slane %v6863_v31, 2  ;;  %v491_v4 = vadd.f32 %v490_v24, %v489_v25  ;;  %v280_v55 = vrot.slane %v6871_v48, 4  ;;  %v1180_v13 = vrot.slane %v7926_v28, %v7944_v56  ;;  %v5243_v25 = vld [vmem:[%s7814_s0 + $0x48] sm:$0xff] }
 0x21e   :  { %v3071_v59 = vsel %vm3062_vm10, %v3006_v30, %v2822_v49  ;;  %v713_v29 = vmul.f32 %v590_v43, %v257_v51  ;;  %v3038_v24 = vsel %vm2997_vm9, %v5242_v2, %v2630_v19  ;;  %v3007_v50 = vsel %vm2997_vm9, %v5243_v25, %v2568_v3 }
 0x21f   :  { %v3136_v40 = vsel %vm3127_vm11, %v3071_v59, %v2822_v49  ;;  %2847 = vrot.lane.b32.xlu1 %v2442_v20, %s5296_s8  ;;  %v1480_v20 = vrot.slane %v744_v5, %v5388_v22  ;;  %v1539_v1 = vsub.f32 %v6566_v17, %v1352_v12  ;;  %v745_v30 = vmul.f32 %v618_v58, %v481_v6  ;;  %v5244_v6 = vld [vmem:[%s7814_s0 + $0x148] sm:$0xff] }
 0x220   :  { %v3201_v15 = vsel %vm3192_vm12, %v3136_v40, 0.0  ;;  %2911 = vrot.lane.b32.xlu0 %v2474_v32, %s5296_s8  ;;  %v263_v19 = vrot.slane %v6861_v52, 1  ;;  %v492_v49 = vrot.slane %v491_v4, 2  ;;  %v486_v59 = vadd.f32 %v485_v61, %v484_v47 }
 0x221   :  { %v3265_v9 = vmul.f32 %v3201_v15, %v7945_v8  ;;  %v2886_v62 = vpop.permute.xlu1 %2885  ;;  %v2824_v42 = vpop.permute.xlu0 %2823  ;;  %v1356_v12 = vrot.slane %v713_v29, %v5388_v22  ;;  %v3039_v58 = vsel %vm2997_vm9, %v5244_v6, %v2632_v60  ;;  %v7946_v15 = vld [vmem:[#allocation54_spill] sm:$0xff]  ;;  %v1571_v61 = vsub.f32 %v6612_v39, %v1480_v20 }
 0x222   :  { %v3103_v51 = vsel %vm3062_vm10, %v3038_v24, %v2886_v62  ;;  %v3072_v43 = vsel %vm3062_vm10, %v3007_v50, %v2824_v42  ;;  %v274_v50 = vadd.f32 %v273_v18, %v6837_v38  ;;  %v1187_v29 = vrot.slane %v7926_v28, %v5451_v57 }
 0x223   :  { %v3168_v32 = vsel %vm3127_vm11, %v3103_v51, %v2886_v62  ;;  %v3137_v3 = vsel %vm3127_vm11, %v3072_v43, %v2824_v42  ;;  %1182 = vbcast.lane.b32.xlu1 %v1180_v13, 256  ;;  %5116 = vmatprep.mubr.msk.f32.mxu0 %vm3330_vm13, %v3265_v9  ;;  %v7947_v13 = vld [vmem:[#allocation23_spill] sm:$0xff]  ;;  %v1484_v9 = vrot.slane %v745_v30, %v5388_v22  ;;  %v487_v51 = vrot.slane %v486_v59, 1 }
 0x224   :  { %v3233_v5 = vsel %vm3192_vm12, %v3168_v32, 0.0  ;;  %v3202_v40 = vsel %vm3192_vm12, %v3137_v3, 0.0  ;;  %2593 = vrot.lane.b32.xlu0 %v1539_v1, %s5295_s23  ;;  %v269_v62 = vadd.f32 %v268_v35, %v6863_v31  ;;  %v493_v60 = vadd.f32 %v492_v49, %v491_v4  ;;  %v6943_v31 = vld [vmem:[%s7814_s0 + $0x1d8] sm:$0xff]  ;;  %v7948_v35 = vld [vmem:[#allocation55_spill] sm:$0xff] }
 0x225   :  { %v3297_v2 = vmul.f32 %v3233_v5, %v7946_v15  ;;  %v3266_v24 = vmul.f32 %v3202_v40, %v7947_v13  ;;  %v2888_v25 = vpop.permute.xlu1 %2887  ;;  %v2570_v47 = vpop.permute.xlu0 %2569  ;;  %v264_v38 = vadd.f32 %v263_v19, %v6861_v52  ;;  %v6938_v18 = vadd.f32 %v497_v10, %v6841_v26  ;;  %v6953_v26 = vld [vmem:[%s7814_s0 + $0xe0] sm:$0xff] }
 0x226   :  { %v3104_v8 = vsel %vm3062_vm10, %v3039_v58, %v2888_v25  ;;  %v1540_v30 = vsub.f32 %v6646_v45, %v1356_v12  ;;  %v275_v49 = vrot.slane %v274_v50, 2  ;;  %v6948_v32 = vadd.f32 %v280_v55, %v6871_v48  ;;  %v7949_v48 = vld [vmem:[#allocation3_spill] sm:$0xff]  ;;  %v5245_v58 = vld [vmem:[%s7814_s0 + $0x50] sm:$0xff] }
 0x227   :  { %v3169_v42 = vsel %vm3127_vm11, %v3104_v8, %v2888_v25  ;;  %5164 = vmatprep.mubr.msk.f32.mxu1 %vm3330_vm13, %v3297_v2  ;;  %2657 = vrot.lane.b32.xlu1 %v1571_v61, %s5295_s23  ;;  %v1572_v52 = vsub.f32 %v6660_v46, %v1484_v9  ;;  %v270_v10 = vrot.slane %v269_v62, 1  ;;  %v494_v19 = vrot.slane %v493_v60, 1 }
 0x228   :  { %v3234_v20 = vsel %vm3192_vm12, %v3169_v42, 0.0  ;;  %1189 = vbcast.lane.b32.xlu0 %v1187_v29, 256  ;;  %5117 = vmatmul.mubr.msk.f32.gmra.mrb[8].mxu0 %vm3330_vm13, %v3266_v24  ;;  %v503_v3 = vsel %vm89_vm8, %v6943_v31, 0.0  ;;  %v714_v55 = vmul.f32 %v7949_v48, %v264_v38  ;;  %v488_v5 = vadd.f32 %v487_v51, %v486_v59  ;;  %v7950_v24 = vld [vmem:[#allocation65_spill] sm:$0xff] }
 0x229   :  { %v3298_v4 = vmul.f32 %v3234_v20, %v7948_v35  ;;  %v2634_v43 = vpop.permute.xlu1 %2633  ;;  %v2572_v1 = vpop.permute.xlu0 %2571  ;;  %v2443_v40 = vsub.f32 %v6566_v17, %v6272_v33  ;;  %v499_v12 = vrot.slane %v6938_v18, 2  ;;  %v286_v6 = vsel %vm89_vm8, %v6953_v26, 0.0  ;;  %v7952_v20 = vld [vmem:[#allocation66_spill] sm:$0xff]  ;;  %v5246_v35 = vld [vmem:[%s7814_s0 + $0x150] sm:$0xff] }
 0x22a   :  { %v3008_v15 = vsel %vm2997_vm9, %v5245_v58, %v2570_v47  ;;  %v2475_v25 = vsub.f32 %v6612_v39, %v7950_v24  ;;  %v6973_v59 = vadd.f32 %v275_v49, %v274_v50  ;;  %v282_v33 = vrot.slane %v6948_v32, 2  ;;  %v7951_v39 = vld [vmem:[#allocation5_spill] sm:$0xff] }
 0x22b   :  { %5165 = vmatmul.mubr.msk.f32.gmra.mrb[8].mxu1 %vm3330_vm13, %v3298_v4  ;;  %2595 = vrot.lane.b32.xlu1 %v1540_v30, %s5295_s23  ;;  %v504_v61 = vrot.slane %v503_v3, 4  ;;  %v271_v29 = vadd.f32 %v270_v10, %v269_v62  ;;  %v495_v9 = vadd.f32 %v494_v19, %v493_v60  ;;  %v1360_v42 = vrot.slane %v714_v55, %v5388_v22  ;;  %v5247_v60 = vld [vmem:[%s7814_s0 + $0x58] sm:$0xff]  ;;  %v7953_v30 = vld [vmem:[#allocation24_spill] sm:$0xff]  ;;  %v7954_v19 = vld [vmem:[#allocation67_spill] sm:$0xff] }
 0x22c   :  { %2659 = vrot.lane.b32.xlu0 %v1572_v52, %s5295_s23  ;;  %v746_v50 = vmul.f32 %v7951_v39, %v488_v5  ;;  %v591_v51 = vrot.slane %v7949_v48, 1  ;;  %v2444_v38 = vsub.f32 %v6646_v45, %v7952_v20  ;;  %v3040_v62 = vsel %vm2997_vm9, %v5246_v35, %v2634_v43 }
 0x22d   :  { %v2636_v2 = vpop.permute.xlu1 %2635  ;;  %v2826_v13 = vpop.permute.xlu0 %2825  ;;  %v3009_v4 = vsel %vm2997_vm9, %v5247_v60, %v2572_v1  ;;  %v2476_v55 = vsub.f32 %v6660_v46, %v7954_v19  ;;  %v505_v43 = vadd.f32 %v504_v61, %v503_v3  ;;  %v287_v58 = vrot.slane %v286_v6, 4  ;;  %v5248_v3 = vld [vmem:[%s7814_s0 + $0x158] sm:$0xff]  ;;  %v7955_v61 = vld [vmem:[#allocation56_spill] sm:$0xff]  ;;  %v7019_v60 = vld [vmem:[%s7814_s0 + $0x1e0] sm:$0xff] }
 0x22e   :  { %v3073_v17 = vsel %vm3062_vm10, %v3008_v15, %v2826_v13  ;;  %v1194_v24 = vrot.slane %v7926_v28, %v7917_v63 }
 0x22f   :  { %v3138_v8 = vsel %vm3127_vm11, %v3073_v17, %v2826_v13  ;;  %2849 = vrot.lane.b32.xlu1 %v2443_v40, %s5296_s8  ;;  %v619_v40 = vrot.slane %v7951_v39, 1  ;;  %v3041_v17 = vsel %vm2997_vm9, %v5248_v3, %v2636_v2  ;;  %v500_v2 = vadd.f32 %v499_v12, %v6938_v18  ;;  %v7957_v12 = vld [vmem:[#allocation57_spill] sm:$0xff] }
 0x230   :  { %v3203_v47 = vsel %vm3192_vm12, %v3138_v8, 0.0  ;;  %2913 = vrot.lane.b32.xlu0 %v2475_v25, %s5296_s8  ;;  %v715_v25 = vmul.f32 %v591_v51, %v271_v29  ;;  %v1541_v51 = vsub.f32 %v6710_v21, %v1360_v42  ;;  %v7035_v42 = vld [vmem:[%s7814_s0 + $0xe8] sm:$0xff] }
 0x231   :  { %v3267_v49 = vmul.f32 %v3203_v47, %v7953_v30  ;;  %v2890_v52 = vpop.permute.xlu1 %2889  ;;  %v2828_v10 = vpop.permute.xlu0 %2827  ;;  %v7956_v47 = vld [vmem:[#allocation25_spill] sm:$0xff]  ;;  %v7025_v30 = vadd.f32 %v282_v33, %v6948_v32  ;;  %v510_v32 = vsel %vm89_vm8, %v7019_v60, 0.0 }
 0x232   :  { %v3105_v45 = vsel %vm3062_vm10, %v3040_v62, %v2890_v52  ;;  %v3074_v5 = vsel %vm3062_vm10, %v3009_v4, %v2828_v10  ;;  %v1488_v62 = vrot.slane %v746_v50, %v5388_v22  ;;  %v747_v4 = vmul.f32 %v619_v40, %v495_v9 }
 0x233   :  { %v3170_v15 = vsel %vm3127_vm11, %v3105_v45, %v2890_v52  ;;  %v3139_v13 = vsel %vm3127_vm11, %v3074_v5, %v2828_v10  ;;  %2851 = vrot.lane.b32.xlu1 %v2444_v38, %s5296_s8  ;;  %5119 = vmatprep.mubr.msk.f32.mxu0 %vm3330_vm13, %v3267_v49  ;;  %v277_v50 = vrot.slane %v6973_v59, 1  ;;  %v506_v52 = vrot.slane %v505_v43, 2 }
 0x234   :  { %v3235_v1 = vsel %vm3192_vm12, %v3170_v15, 0.0  ;;  %v3204_v46 = vsel %vm3192_vm12, %v3139_v13, 0.0  ;;  %2915 = vrot.lane.b32.xlu0 %v2476_v55, %s5296_s8  ;;  %v7030_v10 = vadd.f32 %v287_v58, %v286_v6  ;;  %v1573_v6 = vsub.f32 %v6752_v34, %v1488_v62  ;;  %v7055_v15 = vld [vmem:[%s7814_s0 + $0x1e8] sm:$0xff] }
 0x235   :  { %v3299_v8 = vmul.f32 %v3235_v1, %v7955_v61  ;;  %v3268_v20 = vmul.f32 %v3204_v46, %v7956_v47  ;;  %v2892_v38 = vpop.permute.xlu1 %2891  ;;  %v2574_v35 = vpop.permute.xlu0 %2573  ;;  %v1364_v55 = vrot.slane %v715_v25, %v5388_v22  ;;  %v1201_v45 = vrot.slane %v7926_v28, %v7920_v37  ;;  %v7062_v28 = vld [vmem:[%s7814_s0 + $0xf0] sm:$0xff] }
 0x236   :  { %v3106_v29 = vsel %vm3062_vm10, %v3041_v17, %v2892_v38  ;;  %v1492_v5 = vrot.slane %v747_v4, %v5388_v22  ;;  %v501_v40 = vrot.slane %v500_v2, 1  ;;  %v7050_v58 = vsel %vm89_vm8, %v7035_v42, 0.0  ;;  %v5249_v17 = vld [vmem:[%s7814_s0 + $0x60] sm:$0xff] }
 0x237   :  { %v3171_v49 = vsel %vm3127_vm11, %v3106_v29, %v2892_v38  ;;  %5167 = vmatprep.mubr.msk.f32.mxu1 %vm3330_vm13, %v3299_v8  ;;  %1196 = vbcast.lane.b32.xlu1 %v1194_v24, 256  ;;  %v507_v13 = vadd.f32 %v506_v52, %v505_v43  ;;  %v511_v1 = vrot.slane %v510_v32, 4  ;;  %v278_v46 = vadd.f32 %v277_v50, %v6973_v59 }
 0x238   :  { %v3236_v18 = vsel %vm3192_vm12, %v3171_v49, 0.0  ;;  %2597 = vrot.lane.b32.xlu0 %v1541_v51, %s5295_s23  ;;  %5120 = vmatmul.mubr.msk.f32.gmra.mrb[10].mxu0 %vm3330_vm13, %v3268_v20  ;;  %v592_v24 = vrot.slane %v7949_v48, 2  ;;  %v284_v25 = vrot.slane %v7025_v30, 1  ;;  %v289_v3 = vrot.slane %v7030_v10, 2 }
 0x239   :  { %v3300_v33 = vmul.f32 %v3236_v18, %v7957_v12  ;;  %v2638_v9 = vpop.permute.xlu1 %2637  ;;  %v2576_v19 = vpop.permute.xlu0 %2575  ;;  %v3010_v43 = vsel %vm2997_vm9, %v5249_v17, %v2574_v35  ;;  %v1542_v47 = vsub.f32 %v6774_v0, %v1364_v55  ;;  %v294_v20 = vrot.slane %v7050_v58, 4  ;;  %v7958_v12 = vld [vmem:[#allocation68_spill] sm:$0xff] }
 0x23a   :  { %v517_v59 = vsel %vm89_vm8, %v7055_v15, 0.0  ;;  %v1574_v62 = vsub.f32 %v6804_v14, %v1492_v5  ;;  %v7080_v29 = vsel %vm89_vm8, %v7062_v28, 0.0  ;;  %v502_v35 = vadd.f32 %v501_v40, %v500_v2  ;;  %v5251_v2 = vld [vmem:[%s7814_s0 + $0x68] sm:$0xff] }
 0x23b   :  { %5168 = vmatmul.mubr.msk.f32.gmra.mrb[10].mxu1 %vm3330_vm13, %v3300_v33  ;;  %2661 = vrot.lane.b32.xlu1 %v1573_v6, %s5295_s23  ;;  %v620_v4 = vrot.slane %v7951_v39, 2  ;;  %v508_v49 = vrot.slane %v507_v13, 1  ;;  %v512_v50 = vadd.f32 %v511_v1, %v510_v32  ;;  %v716_v18 = vmul.f32 %v592_v24, %v278_v46  ;;  %v5250_v6 = vld [vmem:[%s7814_s0 + $0x160] sm:$0xff] }
 0x23c   :  { %1203 = vbcast.lane.b32.xlu0 %v1201_v45, 256  ;;  %v2445_v33 = vsub.f32 %v6710_v21, %v7958_v12  ;;  %v3042_v55 = vsel %vm2997_vm9, %v5250_v6, %v2638_v9  ;;  %v3011_v32 = vsel %vm2997_vm9, %v5251_v2, %v2576_v19  ;;  %v7959_v45 = vld [vmem:[#allocation26_spill] sm:$0xff]  ;;  %v2477_v46 = vsub.f32 %v6752_v34, %v6316_v16  ;;  %v7110_v16 = vld [vmem:[%s7814_s0 + $0x1f0] sm:$0xff] }
 0x23d   :  { %v2640_v61 = vpop.permute.xlu1 %2639  ;;  %v2830_v8 = vpop.permute.xlu0 %2829  ;;  %v285_v17 = vadd.f32 %v284_v25, %v7025_v30  ;;  %v518_v9 = vrot.slane %v517_v59, 4  ;;  %v748_v19 = vmul.f32 %v620_v4, %v502_v35  ;;  %v1368_v30 = vrot.slane %v716_v18, %v5388_v22  ;;  %v7960_v35 = vld [vmem:[#allocation58_spill] sm:$0xff] }
 0x23e   :  { %v3075_v38 = vsel %vm3062_vm10, %v3010_v43, %v2830_v8  ;;  %v593_v25 = vrot.slane %v7949_v48, 3  ;;  %v2478_v18 = vsub.f32 %v6804_v14, %v6329_v41  ;;  %v509_v2 = vadd.f32 %v508_v49, %v507_v13  ;;  %v7962_v49 = vld [vmem:[#allocation12_spill] sm:$0xff] }
 0x23f   :  { %v3140_v51 = vsel %vm3127_vm11, %v3075_v38, %v2830_v8  ;;  %2599 = vrot.lane.b32.xlu1 %v1542_v47, %s5295_s23  ;;  %v2446_v38 = vsub.f32 %v6774_v0, %v6318_v44  ;;  %v621_v44 = vrot.slane %v7951_v39, 3  ;;  %v295_v0 = vadd.f32 %v294_v20, %v7050_v58 }
 0x240   :  { %v3205_v52 = vsel %vm3192_vm12, %v3140_v51, 0.0  ;;  %2663 = vrot.lane.b32.xlu0 %v1574_v62, %s5295_s23  ;;  %v5252_v62 = vld [vmem:[%s7814_s0 + $0x168] sm:$0xff]  ;;  %v301_v41 = vrot.slane %v7080_v29, 4  ;;  %v290_v58 = vadd.f32 %v289_v3, %v7030_v10 }
 0x241   :  { %v3269_v5 = vmul.f32 %v3205_v52, %v7959_v45  ;;  %v2894_v40 = vpop.permute.xlu1 %2893  ;;  %v2832_v1 = vpop.permute.xlu0 %2831  ;;  %v3043_v51 = vsel %vm2997_vm9, %v5252_v62, %v2640_v61  ;;  %v7961_v52 = vld [vmem:[#allocation27_spill] sm:$0xff]  ;;  %v513_v45 = vrot.slane %v512_v50, 2 }
 0x242   :  { %v3107_v21 = vsel %vm3062_vm10, %v3042_v55, %v2894_v40  ;;  %v3076_v24 = vsel %vm3062_vm10, %v3011_v32, %v2832_v1  ;;  %v524_v32 = vsel %vm89_vm8, %v7110_v16, 0.0  ;;  %v291_v3 = vrot.slane %v290_v58, 1 }
 0x243   :  { %v3172_v43 = vsel %vm3127_vm11, %v3107_v21, %v2894_v40  ;;  %v3141_v8 = vsel %vm3127_vm11, %v3076_v24, %v2832_v1  ;;  %2853 = vrot.lane.b32.xlu1 %v2445_v33, %s5296_s8  ;;  %5122 = vmatprep.mubr.msk.f32.mxu0 %vm3330_vm13, %v3269_v5  ;;  %v519_v5 = vadd.f32 %v518_v9, %v517_v59  ;;  %v296_v9 = vrot.slane %v295_v0, 2 }
 0x244   :  { %v3237_v34 = vsel %vm3192_vm12, %v3172_v43, 0.0  ;;  %v3206_v47 = vsel %vm3192_vm12, %v3141_v8, 0.0  ;;  %2917 = vrot.lane.b32.xlu0 %v2477_v46, %s5296_s8  ;;  %v1208_v40 = vrot.slane %v7962_v49, %v5388_v22  ;;  %v1496_v1 = vrot.slane %v748_v19, %v5388_v22 }
 0x245   :  { %v3301_v4 = vmul.f32 %v3237_v34, %v7960_v35  ;;  %v3270_v12 = vmul.f32 %v3206_v47, %v7961_v52  ;;  %v2896_v33 = vpop.permute.xlu1 %2895  ;;  %v2578_v6 = vpop.permute.xlu0 %2577  ;;  %v717_v59 = vmul.f32 %v593_v25, %v285_v17  ;;  %v1543_v21 = vsub.f32 %v6811_v11, %v1368_v30  ;;  %v7168_v52 = vld [vmem:[%s7814_s0 + $0x1f8] sm:$0xff] }
 0x246   :  { %v3108_v55 = vsel %vm3062_vm10, %v3043_v51, %v2896_v33  ;;  %v749_v24 = vmul.f32 %v621_v44, %v509_v2  ;;  %v514_v43 = vadd.f32 %v513_v45, %v512_v50  ;;  %v520_v8 = vrot.slane %v519_v5, 2  ;;  %v7156_v50 = vld [vmem:[%s7814_s0 + $0xf8] sm:$0xff] }
 0x247   :  { %v3173_v61 = vsel %vm3127_vm11, %v3108_v55, %v2896_v33  ;;  %5170 = vmatprep.mubr.msk.f32.mxu1 %vm3330_vm13, %v3301_v4  ;;  %2855 = vrot.lane.b32.xlu1 %v2446_v38, %s5296_s8  ;;  %v7147_v34 = vadd.f32 %v301_v41, %v7080_v29  ;;  %v525_v10 = vrot.slane %v524_v32, 4  ;;  %v1575_v17 = vsub.f32 %v6816_v36, %v1496_v1 }
 0x248   :  { %2919 = vrot.lane.b32.xlu0 %v2478_v18, %s5296_s8  ;;  %5123 = vmatmul.mubr.msk.f32.gmra.mrb[12].mxu0 %vm3330_vm13, %v3270_v12  ;;  %v3238_v14 = vsel %vm3192_vm12, %v3173_v61, 0.0  ;;  %v1372_v30 = vrot.slane %v717_v59, %v5388_v22  ;;  %v1215_v29 = vrot.slane %v7962_v49, %v7927_v7  ;;  %v1500_v25 = vrot.slane %v749_v24, %v5388_v22  ;;  %v5253_v12 = vld [vmem:[%s7814_s0 + $0x70] sm:$0xff] }
 0x249   :  { %v2642_v13 = vpop.permute.xlu1 %2641  ;;  %v1134_v20 = vpop.permute.xlu0 %1133  ;;  %v297_v38 = vadd.f32 %v296_v9, %v295_v0  ;;  %v515_v62 = vrot.slane %v514_v43, 1  ;;  %v521_v51 = vadd.f32 %v520_v8, %v519_v5  ;;  %v303_v35 = vrot.slane %v7147_v34, 2  ;;  %v5254_v0 = vld [vmem:[%s7814_s0 + $0x170] sm:$0xff] }
 0x24a   :  { %v3302_v46 = vmul.f32 %v3238_v14, %v1134_v20  ;;  %v7163_v4 = vadd.f32 %v525_v10, %v524_v32  ;;  %v307_v7 = vsel %vm89_vm8, %v7156_v50, 0.0  ;;  %v3012_v33 = vsel %vm2997_vm9, %v5253_v12, %v2578_v6  ;;  %v7963_v9 = vld [vmem:[#allocation28_spill] sm:$0xff] }
 0x24b   :  { %1210 = vbcast.lane.b32.xlu1 %v1208_v40, 256  ;;  %v1544_v2 = vsub.f32 %v6851_v23, %v1372_v30  ;;  %v292_v44 = vadd.f32 %v291_v3, %v290_v58  ;;  %v3044_v32 = vsel %vm2997_vm9, %v5254_v0, %v2642_v13  ;;  %v1576_v45 = vsub.f32 %v6943_v31, %v1500_v25 }
 0x24c   :  { %2601 = vrot.lane.b32.xlu0 %v1543_v21, %s5295_s23  ;;  %5171 = vmatmul.mubr.msk.f32.gmra.mrb[12].mxu1 %vm3330_vm13, %v3302_v46  ;;  %v594_v5 = vrot.slane %v7949_v48, 4  ;;  %v298_v41 = vrot.slane %v297_v38, 1  ;;  %v531_v6 = vsel %vm89_vm8, %v7168_v52, 0.0  ;;  %v522_v20 = vrot.slane %v521_v51, 1  ;;  %v5255_v21 = vld [vmem:[%s7814_s0 + $0x78] sm:$0xff] }
 0x24d   :  { %v2580_v47 = vpop.permute.xlu1 %2579  ;;  %v2644_v19 = vpop.permute.xlu0 %2643  ;;  %v516_v13 = vadd.f32 %v515_v62, %v514_v43  ;;  %v622_v1 = vrot.slane %v7951_v39, 4  ;;  %v2447_v59 = vsub.f32 %v6811_v11, %v6331_v53  ;;  %v308_v46 = vrot.slane %v307_v7, 4  ;;  %v5256_v11 = vld [vmem:[%s7814_s0 + $0x178] sm:$0xff] }
 0x24e   :  { %v3013_v24 = vsel %vm2997_vm9, %v5255_v21, %v2580_v47  ;;  %v2479_v3 = vsub.f32 %v6816_v36, %v6349_v54  ;;  %v532_v53 = vrot.slane %v531_v6, 4  ;;  %v3045_v25 = vsel %vm2997_vm9, %v5256_v11, %v2644_v19  ;;  %v7965_v19 = vld [vmem:[#allocation29_spill] sm:$0xff] }
 0x24f   :  { %2665 = vrot.lane.b32.xlu1 %v1575_v17, %s5295_s23  ;;  %v595_v54 = vrot.slane %v7949_v48, 5  ;;  %v750_v12 = vmul.f32 %v622_v1, %v516_v13  ;;  %v309_v13 = vadd.f32 %v308_v46, %v307_v7  ;;  %v1222_v7 = vrot.slane %v7962_v49, %v7936_v27 }
 0x250   :  { %1217 = vbcast.lane.b32.xlu0 %v1215_v29, 256  ;;  %v718_v29 = vmul.f32 %v594_v5, %v292_v44  ;;  %v533_v1 = vadd.f32 %v532_v53, %v531_v6 }
 0x251   :  { %v2834_v18 = vpop.permute.xlu1 %2833  ;;  %v2898_v55 = vpop.permute.xlu0 %2897 }
 0x252   :  { %v3077_v61 = vsel %vm3062_vm10, %v3012_v33, %v2834_v18  ;;  %v3109_v58 = vsel %vm3062_vm10, %v3044_v32, %v2898_v55  ;;  %v299_v33 = vadd.f32 %v298_v41, %v297_v38  ;;  %v523_v32 = vadd.f32 %v522_v20, %v521_v51 }
 0x253   :  { %v3142_v14 = vsel %vm3127_vm11, %v3077_v61, %v2834_v18  ;;  %2603 = vrot.lane.b32.xlu1 %v1544_v2, %s5295_s23  ;;  %v3174_v43 = vsel %vm3127_vm11, %v3109_v58, %v2898_v55  ;;  %v7964_v18 = vld [vmem:[#allocation69_spill] sm:$0xff]  ;;  %v7966_v61 = vld [vmem:[#allocation70_spill] sm:$0xff]  ;;  %v1376_v58 = vrot.slane %v718_v29, %v5388_v22  ;;  %v527_v51 = vrot.slane %v7163_v4, 2 }
 0x254   :  { %v3207_v40 = vsel %vm3192_vm12, %v3142_v14, 0.0  ;;  %2667 = vrot.lane.b32.xlu0 %v1576_v45, %s5295_s23  ;;  %v2448_v55 = vsub.f32 %v6851_v23, %v7964_v18  ;;  %v3239_v0 = vsel %vm3192_vm12, %v3174_v43, 0.0  ;;  %v2480_v45 = vsub.f32 %v6943_v31, %v7966_v61 }
 0x255   :  { %v3271_v8 = vmul.f32 %v3207_v40, %v7963_v9  ;;  %v2836_v10 = vpop.permute.xlu1 %2835  ;;  %v623_v40 = vrot.slane %v7951_v39, 5  ;;  %v304_v23 = vadd.f32 %v303_v35, %v7147_v34  ;;  %v1504_v41 = vrot.slane %v750_v12, %v5388_v22 }
 0x256   :  { %v3078_v17 = vsel %vm3062_vm10, %v3013_v24, %v2836_v10  ;;  %v2900_v30 = vpop.permute.xlu0 %2899  ;;  %v719_v20 = vmul.f32 %v595_v54, %v299_v33  ;;  %v1545_v21 = vsub.f32 %v6953_v26, %v1376_v58  ;;  %v310_v35 = vrot.slane %v309_v13, 2  ;;  %v5258_v33 = vld [vmem:[%s7814_s0 + $0x180] sm:$0xff]  ;;  %v7968_v58 = vld [vmem:[#allocation71_spill] sm:$0xff] }
 0x257   :  { %v3143_v47 = vsel %vm3127_vm11, %v3078_v17, %v2836_v10  ;;  %2857 = vrot.lane.b32.xlu1 %v2447_v59, %s5296_s8  ;;  %5125 = vmatprep.mubr.msk.f32.mxu0 %vm3330_vm13, %v3271_v8  ;;  %v3110_v62 = vsel %vm3062_vm10, %v3045_v25, %v2900_v30  ;;  %v751_v34 = vmul.f32 %v623_v40, %v523_v32  ;;  %v305_v9 = vrot.slane %v304_v23, 1  ;;  %v7967_v17 = vld [vmem:[#allocation8_spill] sm:$0xff] }
 0x258   :  { %v3208_v36 = vsel %vm3192_vm12, %v3143_v47, 0.0  ;;  %2921 = vrot.lane.b32.xlu0 %v2479_v3, %s5296_s8  ;;  %v3175_v38 = vsel %vm3127_vm11, %v3110_v62, %v2900_v30  ;;  %v528_v8 = vadd.f32 %v527_v51, %v7163_v4  ;;  %v1577_v10 = vsub.f32 %v7019_v60, %v1504_v41  ;;  %v5257_v47 = vld [vmem:[%s7814_s0 + $0x80] sm:$0xff] }
 0x259   :  { %v3272_v2 = vmul.f32 %v3208_v36, %v7965_v19  ;;  %v1141_v44 = vpop.permute.xlu1 %1140  ;;  %v3240_v59 = vsel %vm3192_vm12, %v3175_v38, 0.0  ;;  %v1380_v6 = vrot.slane %v719_v20, %v5388_v22  ;;  %v534_v3 = vrot.slane %v533_v1, 2 }
 0x25a   :  { %v3303_v5 = vmul.f32 %v3239_v0, %v1141_v44  ;;  %v2582_v14 = vpop.permute.xlu0 %2581  ;;  %v1229_v30 = vrot.slane %v7962_v49, %v7967_v17  ;;  %v1508_v29 = vrot.slane %v751_v34, %v5388_v22  ;;  %v311_v53 = vadd.f32 %v310_v35, %v309_v13  ;;  %v5259_v13 = vld [vmem:[%s7814_s0 + $0x88] sm:$0xff] }
 0x25b   :  { %2859 = vrot.lane.b32.xlu1 %v2448_v55, %s5296_s8  ;;  %5126 = vmatmul.mubr.msk.f32.gmra.mrb[14].mxu0 %vm3330_vm13, %v3272_v2  ;;  %v529_v4 = vrot.slane %v528_v8, 1  ;;  %v306_v11 = vadd.f32 %v305_v9, %v304_v23  ;;  %v596_v25 = vrot.slane %v7949_v48, 6  ;;  %v3014_v54 = vsel %vm2997_vm9, %v5257_v47, %v2582_v14  ;;  %v7969_v23 = vld [vmem:[#allocation30_spill] sm:$0xff] }
 0x25c   :  { %2923 = vrot.lane.b32.xlu0 %v2480_v45, %s5296_s8  ;;  %5173 = vmatprep.mubr.msk.f32.mxu1 %vm3330_vm13, %v3303_v5  ;;  %v1546_v62 = vsub.f32 %v7035_v42, %v1380_v6  ;;  %v535_v12 = vadd.f32 %v534_v3, %v533_v1  ;;  %v1578_v2 = vsub.f32 %v7055_v15, %v1508_v29  ;;  %v312_v44 = vrot.slane %v311_v53, 1  ;;  %v7972_v6 = vld [vmem:[#allocation31_spill] sm:$0xff]  ;;  %v7973_v29 = vld [vmem:[#allocation74_spill] sm:$0xff] }
 0x25d   :  { %v2646_v31 = vpop.permute.xlu1 %2645  ;;  %v720_v45 = vmul.f32 %v596_v25, %v306_v11  ;;  %v530_v5 = vadd.f32 %v529_v4, %v528_v8  ;;  %v624_v14 = vrot.slane %v7951_v39, 6  ;;  %v2449_v40 = vsub.f32 %v6953_v26, %v7968_v58  ;;  %v5260_v26 = vld [vmem:[%s7814_s0 + $0x188] sm:$0xff] }
 0x25e   :  { %v1148_v46 = vpop.permute.xlu0 %1147  ;;  %v3046_v18 = vsel %vm2997_vm9, %v5258_v33, %v2646_v31  ;;  %v536_v20 = vrot.slane %v535_v12, 1  ;;  %v313_v35 = vadd.f32 %v312_v44, %v311_v53  ;;  %v2482_v53 = vsub.f32 %v7055_v15, %v7973_v29 }
 0x25f   :  { %v3304_v24 = vmul.f32 %v3240_v59, %v1148_v46  ;;  %1224 = vbcast.lane.b32.xlu1 %v1222_v7, 256  ;;  %v7970_v7 = vld [vmem:[#allocation72_spill] sm:$0xff]  ;;  %v1384_v9 = vrot.slane %v720_v45, %v5388_v22  ;;  %v752_v8 = vmul.f32 %v624_v14, %v530_v5  ;;  %v625_v47 = vrot.slane %v7951_v39, 7 }
 0x260   :  { %2605 = vrot.lane.b32.xlu0 %v1545_v21, %s5295_s23  ;;  %v2481_v41 = vsub.f32 %v7019_v60, %v7970_v7  ;;  %v537_v25 = vadd.f32 %v536_v20, %v535_v12  ;;  %v1243_v44 = vrot.slane %v7962_v49, %v5451_v57  ;;  %v5262_v14 = vld [vmem:[%s7814_s0 + $0x190] sm:$0xff]  ;;  %v5263_v7 = vld [vmem:[%s7814_s0 + $0x98] sm:$0xff] }
 0x261   :  { %5174 = vmatmul.mubr.msk.f32.gmra.mrb[14].mxu1 %vm3330_vm13, %v3304_v24  ;;  %v2584_v27 = vpop.permute.xlu1 %2583  ;;  %v1512_v15 = vrot.slane %v752_v8, %v5388_v22  ;;  %v1547_v12 = vsub.f32 %v7062_v28, %v1384_v9  ;;  %v7975_v20 = vld [vmem:[#allocation32_spill] sm:$0xff]  ;;  %v7977_v8 = vld [vmem:[#allocation77_spill] sm:$0xff] }
 0x262   :  { %v2648_v43 = vpop.permute.xlu0 %2647  ;;  %v3015_v38 = vsel %vm2997_vm9, %v5259_v13, %v2584_v27  ;;  %v7971_v27 = vld [vmem:[#allocation73_spill] sm:$0xff]  ;;  %v753_v33 = vmul.f32 %v625_v47, %v537_v25 }
 0x263   :  { %2669 = vrot.lane.b32.xlu1 %v1577_v10, %s5295_s23  ;;  %v3047_v21 = vsel %vm2997_vm9, %v5260_v26, %v2648_v43  ;;  %v2450_v10 = vsub.f32 %v7035_v42, %v7971_v27  ;;  %v2452_v27 = vsub.f32 %v7156_v50, %v7977_v8 }
 0x264   :  { %1231 = vbcast.lane.b32.xlu0 %v1229_v30, 256  ;;  %v597_v30 = vrot.slane %v7949_v48, 7  ;;  %v1236_v48 = vrot.slane %v7962_v49, %v7944_v56 }
 0x265   :  { %v2838_v36 = vpop.permute.xlu1 %2837 }
 0x266   :  { %v3079_v55 = vsel %vm3062_vm10, %v3014_v54, %v2838_v36  ;;  %v2902_v19 = vpop.permute.xlu0 %2901 }
 0x267   :  { %v3144_v0 = vsel %vm3127_vm11, %v3079_v55, %v2838_v36  ;;  %v3111_v32 = vsel %vm3062_vm10, %v3046_v18, %v2902_v19  ;;  %2607 = vrot.lane.b32.xlu1 %v1546_v62, %s5295_s23  ;;  %v721_v36 = vmul.f32 %v597_v30, %v313_v35 }
 0x268   :  { %v3209_v61 = vsel %vm3192_vm12, %v3144_v0, 0.0  ;;  %2671 = vrot.lane.b32.xlu0 %v1578_v2, %s5295_s23  ;;  %v3176_v1 = vsel %vm3127_vm11, %v3111_v32, %v2902_v19  ;;  %v1579_v19 = vsub.f32 %v7110_v16, %v1512_v15  ;;  %v1516_v0 = vrot.slane %v753_v33, %v5388_v22  ;;  %v5261_v32 = vld [vmem:[%s7814_s0 + $0x90] sm:$0xff]  ;;  %v5265_v15 = vld [vmem:[%s7814_s0 + $0xa0] sm:$0xff] }
 0x269   :  { %v3273_v51 = vmul.f32 %v3209_v61, %v7969_v23  ;;  %v2840_v31 = vpop.permute.xlu1 %2839  ;;  %v3241_v17 = vsel %vm3192_vm12, %v3176_v1, 0.0  ;;  %v1388_v56 = vrot.slane %v721_v36, %v5388_v22 }
 0x26a   :  { %v3080_v59 = vsel %vm3062_vm10, %v3015_v38, %v2840_v31  ;;  %v2904_v46 = vpop.permute.xlu0 %2903 }
 0x26b   :  { %v3145_v34 = vsel %vm3127_vm11, %v3080_v59, %v2840_v31  ;;  %2861 = vrot.lane.b32.xlu1 %v2449_v40, %s5296_s8  ;;  %5128 = vmatprep.mubr.msk.f32.mxu0 %vm3330_vm13, %v3273_v51  ;;  %v3112_v24 = vsel %vm3062_vm10, %v3047_v21, %v2904_v46  ;;  %v1548_v5 = vsub.f32 %v7156_v50, %v1388_v56  ;;  %v7974_v51 = vld [vmem:[#allocation75_spill] sm:$0xff]  ;;  %v7980_v56 = vld [vmem:[#allocation34_spill] sm:$0xff] }
 0x26c   :  { %v3210_v60 = vsel %vm3192_vm12, %v3145_v34, 0.0  ;;  %2925 = vrot.lane.b32.xlu0 %v2481_v41, %s5296_s8  ;;  %v3177_v54 = vsel %vm3127_vm11, %v3112_v24, %v2904_v46  ;;  %v1580_v40 = vsub.f32 %v7168_v52, %v1516_v0  ;;  %v2451_v31 = vsub.f32 %v7062_v28, %v7974_v51  ;;  %v7976_v46 = vld [vmem:[#allocation76_spill] sm:$0xff]  ;;  %v5264_v28 = vld [vmem:[%s7814_s0 + $0x198] sm:$0xff] }
 0x26d   :  { %v3274_v3 = vmul.f32 %v3210_v60, %v7972_v6  ;;  %v1155_v43 = vpop.permute.xlu1 %1154  ;;  %v3242_v62 = vsel %vm3192_vm12, %v3177_v54, 0.0  ;;  %v2483_v26 = vsub.f32 %v7110_v16, %v7976_v46 }
 0x26e   :  { %v3305_v4 = vmul.f32 %v3241_v17, %v1155_v43  ;;  %v2586_v11 = vpop.permute.xlu0 %2585  ;;  %v7979_v17 = vld [vmem:[#allocation14_spill] sm:$0xff] }
 0x26f   :  { %2863 = vrot.lane.b32.xlu1 %v2450_v10, %s5296_s8  ;;  %5129 = vmatmul.mubr.msk.f32.gmra.mrb[16].mxu0 %vm3330_vm13, %v3274_v3  ;;  %v3016_v61 = vsel %vm2997_vm9, %v5261_v32, %v2586_v11  ;;  %v7978_v10 = vld [vmem:[#allocation33_spill] sm:$0xff]  ;;  %v2484_v30 = vsub.f32 %v7168_v52, %v7979_v17  ;;  %v1250_v11 = vrot.slane %v7962_v49, %v7917_v63 }
 0x270   :  { %2927 = vrot.lane.b32.xlu0 %v2482_v53, %s5296_s8  ;;  %5176 = vmatprep.mubr.msk.f32.mxu1 %vm3330_vm13, %v3305_v4  ;;  %v1257_v52 = vrot.slane %v7962_v49, %v7920_v37 }
 0x271   :  { %v2650_v42 = vpop.permute.xlu1 %2649 }
 0x272   :  { %v1162_v39 = vpop.permute.xlu0 %1161  ;;  %v3048_v57 = vsel %vm2997_vm9, %v5262_v14, %v2650_v42 }
 0x273   :  { %v3306_v18 = vmul.f32 %v3242_v62, %v1162_v39  ;;  %1238 = vbcast.lane.b32.xlu1 %v1236_v48, 256  ;;  %v5266_v62 = vld [vmem:[%s7814_s0 + $0x1a0] sm:$0xff] }
 0x274   :  { %2609 = vrot.lane.b32.xlu0 %v1547_v12, %s5295_s23 }
 0x275   :  { %5177 = vmatmul.mubr.msk.f32.gmra.mrb[16].mxu1 %vm3330_vm13, %v3306_v18  ;;  %v2588_v55 = vpop.permute.xlu1 %2587 }
 0x276   :  { %v2652_v2 = vpop.permute.xlu0 %2651  ;;  %v3017_v41 = vsel %vm2997_vm9, %v5263_v7, %v2588_v55  ;;  %v5267_v55 = vld [vmem:[%s7814_s0 + $0xa8] sm:$0xff] }
 0x277   :  { %2673 = vrot.lane.b32.xlu1 %v1579_v19, %s5295_s23  ;;  %v3049_v60 = vsel %vm2997_vm9, %v5264_v28, %v2652_v2 }
 0x278   :  { %1245 = vbcast.lane.b32.xlu0 %v1243_v44, 256 }
 0x279   :  { %v2842_v45 = vpop.permute.xlu1 %2841 }
 0x27a   :  { %v3081_v22 = vsel %vm3062_vm10, %v3016_v61, %v2842_v45  ;;  %v2906_v58 = vpop.permute.xlu0 %2905 }
 0x27b   :  { %v3146_v13 = vsel %vm3127_vm11, %v3081_v22, %v2842_v45  ;;  %v3113_v38 = vsel %vm3062_vm10, %v3048_v57, %v2906_v58  ;;  %2611 = vrot.lane.b32.xlu1 %v1548_v5, %s5295_s23  ;;  %v5268_v45 = vld [vmem:[%s7814_s0 + $0x1a8] sm:$0xff] }
 0x27c   :  { %v3211_v23 = vsel %vm3192_vm12, %v3146_v13, 0.0  ;;  %2675 = vrot.lane.b32.xlu0 %v1580_v40, %s5295_s23  ;;  %v3178_v21 = vsel %vm3127_vm11, %v3113_v38, %v2906_v58  ;;  %v7981_v58 = vld [vmem:[#allocation35_spill] sm:$0xff] }
 0x27d   :  { %v3275_v1 = vmul.f32 %v3211_v23, %v7975_v20  ;;  %v2844_v59 = vpop.permute.xlu1 %2843  ;;  %v3243_v43 = vsel %vm3192_vm12, %v3178_v21, 0.0 }
 0x27e   :  { %v3082_v34 = vsel %vm3062_vm10, %v3017_v41, %v2844_v59  ;;  %v2908_v35 = vpop.permute.xlu0 %2907 }
 0x27f   :  { %v3147_v24 = vsel %vm3127_vm11, %v3082_v34, %v2844_v59  ;;  %2865 = vrot.lane.b32.xlu1 %v2451_v31, %s5296_s8  ;;  %5131 = vmatprep.mubr.msk.f32.mxu0 %vm3330_vm13, %v3275_v1  ;;  %v3114_v16 = vsel %vm3062_vm10, %v3049_v60, %v2908_v35 }
 0x280   :  { %v3212_v9 = vsel %vm3192_vm12, %v3147_v24, 0.0  ;;  %2929 = vrot.lane.b32.xlu0 %v2483_v26, %s5296_s8  ;;  %v3179_v4 = vsel %vm3127_vm11, %v3114_v16, %v2908_v35  ;;  %v5269_v26 = vld [vmem:[%s7814_s0 + $0xb0] sm:$0xff] }
 0x281   :  { %v3276_v6 = vmul.f32 %v3212_v9, %v7978_v10  ;;  %v1169_v3 = vpop.permute.xlu1 %1168  ;;  %v3244_v25 = vsel %vm3192_vm12, %v3179_v4, 0.0  ;;  %v5270_v35 = vld [vmem:[%s7814_s0 + $0x1b0] sm:$0xff] }
 0x282   :  { %v3307_v29 = vmul.f32 %v3243_v43, %v1169_v3  ;;  %v2590_v53 = vpop.permute.xlu0 %2589 }
 0x283   :  { %2867 = vrot.lane.b32.xlu1 %v2452_v27, %s5296_s8  ;;  %5132 = vmatmul.mubr.msk.f32.gmra.mrb[18].mxu0 %vm3330_vm13, %v3276_v6  ;;  %v3018_v36 = vsel %vm2997_vm9, %v5265_v15, %v2590_v53  ;;  %v5271_v27 = vld [vmem:[%s7814_s0 + $0xb8] sm:$0xff]  ;;  %v7982_v6 = vld [vmem:[#allocation36_spill] sm:$0xff] }
 0x284   :  { %2931 = vrot.lane.b32.xlu0 %v2484_v30, %s5296_s8  ;;  %5179 = vmatprep.mubr.msk.f32.mxu1 %vm3330_vm13, %v3307_v29  ;;  %v5272_v53 = vld [vmem:[%s7814_s0 + $0x1b8] sm:$0xff] }
 0x285   :  { %v2654_v50 = vpop.permute.xlu1 %2653 }
 0x286   :  { %v1176_v47 = vpop.permute.xlu0 %1175  ;;  %v3050_v37 = vsel %vm2997_vm9, %v5266_v62, %v2654_v50 }
 0x287   :  { %v3308_v54 = vmul.f32 %v3244_v25, %v1176_v47  ;;  %1252 = vbcast.lane.b32.xlu1 %v1250_v11, 256  ;;  %v7983_v47 = vld [vmem:[#allocation37_spill] sm:$0xff] }
 0x288   :  { %1259 = vbcast.lane.b32.xlu0 %v1257_v52, 256 }
 0x289   :  { %5180 = vmatmul.mubr.msk.f32.gmra.mrb[18].mxu1 %vm3330_vm13, %v3308_v54  ;;  %v2592_v42 = vpop.permute.xlu1 %2591 }
 0x28a   :  { %v2656_v48 = vpop.permute.xlu0 %2655  ;;  %v3019_v19 = vsel %vm2997_vm9, %v5267_v55, %v2592_v42 }
 0x28b   :  { %v3051_v5 = vsel %vm2997_vm9, %v5268_v45, %v2656_v48  ;;  %v7448_v45 = vld [vmem:[%s7816_s3] ss:$0 sm:$0xff] }
 0x28d   :  { %v2846_v63 = vpop.permute.xlu1 %2845 }
 0x28e   :  { %v3083_v49 = vsel %vm3062_vm10, %v3018_v36, %v2846_v63  ;;  %v2910_v39 = vpop.permute.xlu0 %2909 }
 0x28f   :  { %v3148_v12 = vsel %vm3127_vm11, %v3083_v49, %v2846_v63  ;;  %v3115_v33 = vsel %vm3062_vm10, %v3050_v37, %v2910_v39 }
 0x290   :  { %v3213_v18 = vsel %vm3192_vm12, %v3148_v12, 0.0  ;;  %v3180_v0 = vsel %vm3127_vm11, %v3115_v33, %v2910_v39  ;;  %v5273_v33 = vld [vmem:[%s7814_s0 + $0xc0] sm:$0xff] }
 0x291   :  { %v3277_v2 = vmul.f32 %v3213_v18, %v7980_v56  ;;  %v2848_v44 = vpop.permute.xlu1 %2847  ;;  %v3245_v38 = vsel %vm3192_vm12, %v3180_v0, 0.0 }
 0x292   :  { %v3084_v32 = vsel %vm3062_vm10, %v3019_v19, %v2848_v44  ;;  %v2912_v61 = vpop.permute.xlu0 %2911  ;;  %v5274_v19 = vld [vmem:[%s7814_s0 + $0x1c0] sm:$0xff] }
 0x293   :  { %v3149_v14 = vsel %vm3127_vm11, %v3084_v32, %v2848_v44  ;;  %5134 = vmatprep.mubr.msk.f32.mxu0 %vm3330_vm13, %v3277_v2  ;;  %v3116_v22 = vsel %vm3062_vm10, %v3051_v5, %v2912_v61  ;;  %v5275_v5 = vld [vmem:[%s7814_s0 + $0xc8] sm:$0xff] }
 0x294   :  { %v3214_v57 = vsel %vm3192_vm12, %v3149_v14, 0.0  ;;  %v3181_v31 = vsel %vm3127_vm11, %v3116_v22, %v2912_v61 }
 0x295   :  { %v3278_v40 = vmul.f32 %v3214_v57, %v7981_v58  ;;  %v1183_v13 = vpop.permute.xlu1 %1182  ;;  %v3246_v41 = vsel %vm3192_vm12, %v3181_v31, 0.0  ;;  %v7984_v57 = vld [vmem:[#allocation38_spill] sm:$0xff] }
 0x296   :  { %v3309_v23 = vmul.f32 %v3245_v38, %v1183_v13  ;;  %v2594_v51 = vpop.permute.xlu0 %2593 }
 0x297   :  { %5135 = vmatmul.mubr.msk.f32.gmra.mrb[20].mxu0 %vm3330_vm13, %v3278_v40  ;;  %v3020_v21 = vsel %vm2997_vm9, %v5269_v26, %v2594_v51  ;;  %v5276_v51 = vld [vmem:[%s7814_s0 + $0x1c8] sm:$0xff] }
 0x298   :  { %5182 = vmatprep.mubr.msk.f32.mxu1 %vm3330_vm13, %v3309_v23  ;;  %v7985_v26 = vld [vmem:[#allocation39_spill] sm:$0xff] }
 0x299   :  { %v2658_v7 = vpop.permute.xlu1 %2657 }
 0x29a   :  { %v1190_v20 = vpop.permute.xlu0 %1189  ;;  %v3052_v28 = vsel %vm2997_vm9, %v5270_v35, %v2658_v7 }
 0x29b   :  { %v3310_v1 = vmul.f32 %v3246_v41, %v1190_v20 }
 0x29d   :  { %5183 = vmatmul.mubr.msk.f32.gmra.mrb[20].mxu1 %vm3330_vm13, %v3310_v1  ;;  %v2596_v59 = vpop.permute.xlu1 %2595 }
 0x29e   :  { %v2660_v46 = vpop.permute.xlu0 %2659  ;;  %v3021_v10 = vsel %vm2997_vm9, %v5271_v27, %v2596_v59 }
 0x29f   :  { %v3053_v4 = vsel %vm2997_vm9, %v5272_v53, %v2660_v46 }
 0x2a1   :  { %v2850_v34 = vpop.permute.xlu1 %2849 }
 0x2a2   :  { %v3085_v60 = vsel %vm3062_vm10, %v3020_v21, %v2850_v34  ;;  %v2914_v24 = vpop.permute.xlu0 %2913 }
 0x2a3   :  { %v3150_v9 = vsel %vm3127_vm11, %v3085_v60, %v2850_v34  ;;  %v3117_v16 = vsel %vm3062_vm10, %v3052_v28, %v2914_v24 }
 0x2a4   :  { %v3215_v8 = vsel %vm3192_vm12, %v3150_v9, 0.0  ;;  %v3182_v17 = vsel %vm3127_vm11, %v3117_v16, %v2914_v24 }
 0x2a5   :  { %v3279_v3 = vmul.f32 %v3215_v8, %v7982_v6  ;;  %v2852_v43 = vpop.permute.xlu1 %2851  ;;  %v3247_v42 = vsel %vm3192_vm12, %v3182_v17, 0.0 }
 0x2a6   :  { %v3086_v30 = vsel %vm3062_vm10, %v3021_v10, %v2852_v43  ;;  %v2916_v29 = vpop.permute.xlu0 %2915 }
 0x2a7   :  { %v3151_v50 = vsel %vm3127_vm11, %v3086_v30, %v2852_v43  ;;  %5137 = vmatprep.mubr.msk.f32.mxu0 %vm3330_vm13, %v3279_v3  ;;  %v3118_v25 = vsel %vm3062_vm10, %v3053_v4, %v2916_v29 }
 0x2a8   :  { %v3216_v11 = vsel %vm3192_vm12, %v3151_v50, 0.0  ;;  %v3183_v36 = vsel %vm3127_vm11, %v3118_v25, %v2916_v29 }
 0x2a9   :  { %v3280_v52 = vmul.f32 %v3216_v11, %v7983_v47  ;;  %v1197_v54 = vpop.permute.xlu1 %1196  ;;  %v3248_v62 = vsel %vm3192_vm12, %v3183_v36, 0.0 }
 0x2aa   :  { %v3311_v48 = vmul.f32 %v3247_v42, %v1197_v54  ;;  %v2598_v15 = vpop.permute.xlu0 %2597 }
 0x2ab   :  { %5138 = vmatmul.mubr.msk.f32.gmra.mrb[22].mxu0 %vm3330_vm13, %v3280_v52  ;;  %v3022_v18 = vsel %vm2997_vm9, %v5273_v33, %v2598_v15 }
 0x2ac   :  { %5185 = vmatprep.mubr.msk.f32.mxu1 %vm3330_vm13, %v3311_v48 }
 0x2ad   :  { %v2662_v63 = vpop.permute.xlu1 %2661 }
 0x2ae   :  { %v1204_v37 = vpop.permute.xlu0 %1203  ;;  %v3054_v56 = vsel %vm2997_vm9, %v5274_v19, %v2662_v63 }
 0x2af   :  { %v3312_v49 = vmul.f32 %v3248_v62, %v1204_v37 }
 0x2b1   :  { %5186 = vmatmul.mubr.msk.f32.gmra.mrb[22].mxu1 %vm3330_vm13, %v3312_v49  ;;  %v2600_v39 = vpop.permute.xlu1 %2599 }
 0x2b2   :  { %v2664_v12 = vpop.permute.xlu0 %2663  ;;  %v3023_v14 = vsel %vm2997_vm9, %v5275_v5, %v2600_v39 }
 0x2b3   :  { %v3055_v31 = vsel %vm2997_vm9, %v5276_v51, %v2664_v12 }
 0x2b5   :  { %v2854_v55 = vpop.permute.xlu1 %2853 }
 0x2b6   :  { %v3087_v2 = vsel %vm3062_vm10, %v3022_v18, %v2854_v55  ;;  %v2918_v44 = vpop.permute.xlu0 %2917 }
 0x2b7   :  { %v3152_v0 = vsel %vm3127_vm11, %v3087_v2, %v2854_v55  ;;  %v3119_v32 = vsel %vm3062_vm10, %v3054_v56, %v2918_v44  ;;  %v5277_v55 = vld [vmem:[%s7814_s0 + $0xd0] sm:$0xff] }
 0x2b8   :  { %v3217_v61 = vsel %vm3192_vm12, %v3152_v0, 0.0  ;;  %v3184_v40 = vsel %vm3127_vm11, %v3119_v32, %v2918_v44  ;;  %v5278_v0 = vld [vmem:[%s7814_s0 + $0x1d0] sm:$0xff] }
 0x2b9   :  { %v3281_v22 = vmul.f32 %v3217_v61, %v7984_v57  ;;  %v2856_v58 = vpop.permute.xlu1 %2855  ;;  %v3249_v28 = vsel %vm3192_vm12, %v3184_v40, 0.0  ;;  %v5279_v61 = vld [vmem:[%s7814_s0 + $0xd8] sm:$0xff] }
 0x2ba   :  { %v3088_v13 = vsel %vm3062_vm10, %v3023_v14, %v2856_v58  ;;  %v2920_v38 = vpop.permute.xlu0 %2919  ;;  %v5106_v23 = vpop.f32.mrb[0].mxu0 }
 0x2bb   :  { %v3153_v7 = vsel %vm3127_vm11, %v3088_v13, %v2856_v58  ;;  %v3595_v41 = vadd.f32 %v5106_v23, %v7448_v45  ;;  %v3589_v20 = vpop.f32.mrb[1].mxu0  ;;  %5140 = vmatprep.mubr.msk.f32.mxu0 %vm3330_vm13, %v3281_v22  ;;  %v3120_v59 = vsel %vm3062_vm10, %v3055_v31, %v2920_v38  ;;  %v5280_v58 = vld [vmem:[%s7814_s0 + $0x1d8] sm:$0xff] }
 0x2bc   :  { %v3218_v1 = vsel %vm3192_vm12, %v3153_v7, 0.0  ;;  %v3590_v46 = vadd.f32 %v7448_v45, %v3589_v20  ;;  %v3185_v8 = vsel %vm3127_vm11, %v3120_v59, %v2920_v38 }
 0x2bd   :  { %v3282_v21 = vmul.f32 %v3218_v1, %v7985_v26  ;;  %v3909_v34 = vmax.f32 %v3595_v41, 0.0  ;;  %v1211_v35 = vpop.permute.xlu1 %1210  ;;  %v3250_v11 = vsel %vm3192_vm12, %v3185_v8, 0.0 }
 0x2be   :  { %v3908_v60 = vmax.f32 %v3590_v46, 0.0  ;;  %v3313_v24 = vmul.f32 %v3249_v28, %v1211_v35  ;;  %v2602_v9 = vpop.permute.xlu0 %2601  ;;  %v5154_v16 = vpop.f32.mrb[0].mxu1  ;;  %v7986_v35 = vld [vmem:[#allocation40_spill] sm:$0xff] }
 0x2bf   :  { %v3980_v27 = vsel %vm3972_vm14, %v3909_v34, -inf  ;;  %v3755_v10 = vadd.f32 %v5154_v16, %v7448_v45  ;;  %5141 = vmatmul.mubr.msk.f32.gmra.mrb[24].mxu0 %vm3330_vm13, %v3282_v21  ;;  %v3749_v6 = vpop.f32.mrb[1].mxu1  ;;  %v3024_v19 = vsel %vm2997_vm9, %v5277_v55, %v2602_v9 }
 0x2c0   :  { %v3981_v3 = vrot.slane %v3980_v27, 4  ;;  %v3973_v43 = vsel %vm3972_vm14, %v3908_v60, -inf  ;;  %v3750_v17 = vadd.f32 %v7448_v45, %v3749_v6  ;;  %5188 = vmatprep.mubr.msk.f32.mxu1 %vm3330_vm13, %v3313_v24 }
 0x2c1   :  { %v3974_v30 = vrot.slane %v3973_v43, 4  ;;  %v3941_v29 = vmax.f32 %v3755_v10, 0.0  ;;  %v2666_v53 = vpop.permute.xlu1 %2665 }
 0x2c2   :  { %v3982_v4 = vmax.f32 %v3980_v27, %v3981_v3  ;;  %v3940_v50 = vmax.f32 %v3750_v17, 0.0  ;;  %v1218_v25 = vpop.permute.xlu0 %1217  ;;  %v3056_v32 = vsel %vm2997_vm9, %v5278_v0, %v2666_v53 }
 0x2c3   :  { %v3975_v47 = vmax.f32 %v3973_v43, %v3974_v30  ;;  %v4204_v52 = vsel %vm3972_vm14, %v3941_v29, -inf  ;;  %v3314_v54 = vmul.f32 %v3250_v11, %v1218_v25 }
 0x2c4   :  { %v3983_v42 = vrot.slane %v3982_v4, 2  ;;  %v4205_v48 = vrot.slane %v4204_v52, 4  ;;  %v4197_v15 = vsel %vm3972_vm14, %v3940_v50, -inf }
 0x2c5   :  { %v3976_v36 = vrot.slane %v3975_v47, 2  ;;  %v4198_v63 = vrot.slane %v4197_v15, 4  ;;  %5189 = vmatmul.mubr.msk.f32.gmra.mrb[24].mxu1 %vm3330_vm13, %v3314_v54  ;;  %v2604_v62 = vpop.permute.xlu1 %2603  ;;  %v7987_v54 = vld [vmem:[#allocation41_spill] sm:$0xff] }
 0x2c6   :  { %v3984_v37 = vmax.f32 %v3982_v4, %v3983_v42  ;;  %v4206_v49 = vmax.f32 %v4204_v52, %v4205_v48  ;;  %v2668_v39 = vpop.permute.xlu0 %2667  ;;  %v3025_v5 = vsel %vm2997_vm9, %v5279_v61, %v2604_v62 }
 0x2c7   :  { %v3977_v12 = vmax.f32 %v3975_v47, %v3976_v36  ;;  %v4199_v33 = vmax.f32 %v4197_v15, %v4198_v63  ;;  %v3057_v40 = vsel %vm2997_vm9, %v5280_v58, %v2668_v39 }
 0x2c8   :  { %v3985_v18 = vrot.slane %v3984_v37, 1  ;;  %v4207_v56 = vrot.slane %v4206_v49, 2 }
 0x2c9   :  { %v3978_v2 = vrot.slane %v3977_v12, 1  ;;  %v4200_v44 = vrot.slane %v4199_v33, 2  ;;  %v2858_v14 = vpop.permute.xlu1 %2857 }
 0x2ca   :  { %v3986_v57 = vmax.f32 %v3984_v37, %v3985_v18  ;;  %v4208_v22 = vmax.f32 %v4206_v49, %v4207_v56  ;;  %v3089_v13 = vsel %vm3062_vm10, %v3024_v19, %v2858_v14  ;;  %v2922_v38 = vpop.permute.xlu0 %2921 }
 0x2cb   :  { %v3979_v23 = vmax.f32 %v3977_v12, %v3978_v2  ;;  %v4201_v51 = vmax.f32 %v4199_v33, %v4200_v44  ;;  %v3154_v31 = vsel %vm3127_vm11, %v3089_v13, %v2858_v14  ;;  %v3121_v7 = vsel %vm3062_vm10, %v3056_v32, %v2922_v38  ;;  %v5109_v41 = vpop.f32.mrb[2].mxu0 }
 0x2cc   :  { %v4971_v20 = vpack.c.bf16 %v3986_v57, %v3986_v57  ;;  %v4209_v1 = vrot.slane %v4208_v22, 1  ;;  %v3219_v59 = vsel %vm3192_vm12, %v3154_v31, 0.0  ;;  %v3186_v46 = vsel %vm3127_vm11, %v3121_v7, %v2922_v38  ;;  %v3599_v26 = vpop.f32.mrb[3].mxu0 }
 0x2cd   :  { %v4970_v21 = vpack.c.bf16 %v3979_v23, %v3979_v23  ;;  %v4202_v34 = vrot.slane %v4201_v51, 1  ;;  %v3283_v28 = vmul.f32 %v3219_v59, %v7986_v35  ;;  %v3605_v60 = vadd.f32 %v5109_v41, %v7448_v45  ;;  %v2860_v24 = vpop.permute.xlu1 %2859 }
 0x2ce   :  { %v4678_v9 = vunpack.c.l.b16 %v4971_v20  ;;  %v4210_v16 = vmax.f32 %v4208_v22, %v4209_v1  ;;  %v3600_v8 = vadd.f32 %v7448_v45, %v3599_v26  ;;  %v3090_v27 = vsel %vm3062_vm10, %v3025_v5, %v2860_v24  ;;  %v2924_v10 = vpop.permute.xlu0 %2923  ;;  %v5157_v6 = vpop.f32.mrb[2].mxu1 }
 0x2cf   :  { %v4677_v3 = vunpack.c.l.b16 %v4970_v21  ;;  %v4203_v43 = vmax.f32 %v4201_v51, %v4202_v34  ;;  %v3911_v17 = vmax.f32 %v3605_v60, 0.0  ;;  %v3155_v30 = vsel %vm3127_vm11, %v3090_v27, %v2860_v24  ;;  %5143 = vmatprep.mubr.msk.f32.mxu0 %vm3330_vm13, %v3283_v28  ;;  %v3759_v29 = vpop.f32.mrb[3].mxu1  ;;  %v5282_v21 = vld [vmem:[%s7814_s0 + $0x1e0] sm:$0xff]  ;;  %v5283_v27 = vld [vmem:[%s7814_s0 + $0xe8] sm:$0xff] }
 0x2d0   :  { %v5003_v53 = vpack.c.bf16 %v4210_v16, %v4210_v16  ;;  %v3910_v4 = vmax.f32 %v3600_v8, 0.0  ;;  %v3220_v50 = vsel %vm3192_vm12, %v3155_v30, 0.0  ;;  %v3122_v11 = vsel %vm3062_vm10, %v3057_v40, %v2924_v10 }
 0x2d1   :  { %v7510_v25 = vsel %vm4741_vm15, %v4678_v9, %v4677_v3  ;;  %v5002_v47 = vpack.c.bf16 %v4203_v43, %v4203_v43  ;;  %v3994_v52 = vsel %vm3972_vm14, %v3911_v17, -inf  ;;  %v3284_v42 = vmul.f32 %v3220_v50, %v7987_v54  ;;  %v1225_v48 = vpop.permute.xlu1 %1224 }
 0x2d2   :  { %v4710_v15 = vunpack.c.l.b16 %v5003_v53  ;;  %v3995_v36 = vrot.slane %v3994_v52, 4  ;;  %v3987_v63 = vsel %vm3972_vm14, %v3910_v4, -inf  ;;  %v3187_v62 = vsel %vm3127_vm11, %v3122_v11, %v2924_v10  ;;  %v2606_v37 = vpop.permute.xlu0 %2605 }
 0x2d3   :  { %v4709_v49 = vunpack.c.l.b16 %v5002_v47  ;;  %v3988_v39 = vrot.slane %v3987_v63, 4  ;;  %v3765_v12 = vadd.f32 %v5157_v6, %v7448_v45  ;;  %v3760_v33 = vadd.f32 %v7448_v45, %v3759_v29  ;;  %5144 = vmatmul.mubr.msk.f32.gmra.mrb[26].mxu0 %vm3330_vm13, %v3284_v42  ;;  %v5284_v6 = vld [vmem:[%s7814_s0 + $0x1e8] sm:$0xff] }
 0x2d4   :  { %v3996_v18 = vmax.f32 %v3994_v52, %v3995_v36  ;;  %v3251_v55 = vsel %vm3192_vm12, %v3186_v46, 0.0  ;;  %v3252_v5 = vsel %vm3192_vm12, %v3187_v62, 0.0  ;;  %v5281_v46 = vld [vmem:[%s7814_s0 + $0xe0] sm:$0xff] }
 0x2d5   :  { %v7521_v19 = vsel %vm4741_vm15, %v4710_v15, %v4709_v49  ;;  %v3989_v56 = vmax.f32 %v3987_v63, %v3988_v39  ;;  %v3943_v2 = vmax.f32 %v3765_v12, 0.0  ;;  %v3942_v44 = vmax.f32 %v3760_v33, 0.0  ;;  %v2670_v0 = vpop.permute.xlu1 %2669 }
 0x2d6   :  { %v3997_v32 = vrot.slane %v3996_v18, 2  ;;  %v3315_v61 = vmul.f32 %v3251_v55, %v1225_v48  ;;  %v1232_v14 = vpop.permute.xlu0 %1231  ;;  %v3026_v26 = vsel %vm2997_vm9, %v5281_v46, %v2606_v37  ;;  %v3058_v34 = vsel %vm2997_vm9, %v5282_v21, %v2670_v0 }
 0x2d7   :  { %v3990_v57 = vrot.slane %v3989_v56, 2  ;;  %v4218_v22 = vsel %vm3972_vm14, %v3943_v2, -inf  ;;  %v4211_v58 = vsel %vm3972_vm14, %v3942_v44, -inf  ;;  %v3316_v40 = vmul.f32 %v3252_v5, %v1232_v14 }
 0x2d8   :  { %v3998_v13 = vmax.f32 %v3996_v18, %v3997_v32  ;;  %v4219_v38 = vrot.slane %v4218_v22, 4  ;;  %v4212_v23 = vrot.slane %v4211_v58, 4  ;;  %5191 = vmatprep.mubr.msk.f32.mxu1 %vm3330_vm13, %v3315_v61  ;;  %v7988_v61 = vld [vmem:[#allocation42_spill] sm:$0xff] }
 0x2d9   :  { %v3991_v51 = vmax.f32 %v3989_v56, %v3990_v57  ;;  %5192 = vmatmul.mubr.msk.f32.gmra.mrb[26].mxu1 %vm3330_vm13, %v3316_v40  ;;  %v2608_v31 = vpop.permute.xlu1 %2607 }
 0x2da   :  { %v3999_v7 = vrot.slane %v3998_v13, 1  ;;  %v4220_v41 = vmax.f32 %v4218_v22, %v4219_v38  ;;  %v4213_v20 = vmax.f32 %v4211_v58, %v4212_v23  ;;  %v2672_v1 = vpop.permute.xlu0 %2671  ;;  %v3027_v10 = vsel %vm2997_vm9, %v5283_v27, %v2608_v31 }
 0x2db   :  { %v3992_v59 = vrot.slane %v3991_v51, 1  ;;  %v5112_v35 = vpop.f32.mrb[4].mxu0  ;;  %v3059_v3 = vsel %vm2997_vm9, %v5284_v6, %v2672_v1 }
 0x2dc   :  { %v4000_v28 = vmax.f32 %v3998_v13, %v3999_v7  ;;  %v4221_v60 = vrot.slane %v4220_v41, 2  ;;  %v4214_v24 = vrot.slane %v4213_v20, 2  ;;  %v3615_v9 = vadd.f32 %v5112_v35, %v7448_v45  ;;  %v3609_v16 = vpop.f32.mrb[5].mxu0 }
 0x2dd   :  { %v3993_v8 = vmax.f32 %v3991_v51, %v3992_v59  ;;  %v3610_v43 = vadd.f32 %v7448_v45, %v3609_v16  ;;  %v2862_v17 = vpop.permute.xlu1 %2861 }
 0x2de   :  { %v4973_v30 = vpack.c.bf16 %v4000_v28, %v4000_v28  ;;  %v4222_v29 = vmax.f32 %v4220_v41, %v4221_v60  ;;  %v4215_v53 = vmax.f32 %v4213_v20, %v4214_v24  ;;  %v3913_v4 = vmax.f32 %v3615_v9, 0.0  ;;  %v2926_v50 = vpop.permute.xlu0 %2925  ;;  %v5160_v11 = vpop.f32.mrb[4].mxu1  ;;  %v7989_v28 = vld [vmem:[#allocation43_spill] sm:$0xff] }
 0x2df   :  { %v4972_v47 = vpack.c.bf16 %v3993_v8, %v3993_v8  ;;  %v3912_v52 = vmax.f32 %v3610_v43, 0.0  ;;  %v3091_v54 = vsel %vm3062_vm10, %v3026_v26, %v2862_v17  ;;  %v3123_v42 = vsel %vm3062_vm10, %v3058_v34, %v2926_v50  ;;  %v3769_v48 = vpop.f32.mrb[5].mxu1 }
 0x2e0   :  { %v4680_v15 = vunpack.c.l.b16 %v4973_v30  ;;  %v4223_v36 = vrot.slane %v4222_v29, 1  ;;  %v4216_v63 = vrot.slane %v4215_v53, 1  ;;  %v4008_v62 = vsel %vm3972_vm14, %v3913_v4, -inf }
 0x2e1   :  { %v4679_v37 = vunpack.c.l.b16 %v4972_v47  ;;  %v4009_v49 = vrot.slane %v4008_v62, 4  ;;  %v4001_v39 = vsel %vm3972_vm14, %v3912_v52, -inf  ;;  %v3156_v12 = vsel %vm3127_vm11, %v3091_v54, %v2862_v17  ;;  %v2864_v33 = vpop.permute.xlu1 %2863 }
 0x2e2   :  { %v4224_v18 = vmax.f32 %v4222_v29, %v4223_v36  ;;  %v4217_v55 = vmax.f32 %v4215_v53, %v4216_v63  ;;  %v4002_v56 = vrot.slane %v4001_v39, 4  ;;  %v3221_v2 = vsel %vm3192_vm12, %v3156_v12, 0.0  ;;  %v2928_v44 = vpop.permute.xlu0 %2927  ;;  %v5285_v53 = vld [vmem:[%s7814_s0 + $0xf0] sm:$0xff] }
 0x2e3   :  { %v4744_v0 = vsel %vm4743_vm0, %v4679_v37, %v7510_v25  ;;  %v4010_v32 = vmax.f32 %v4008_v62, %v4009_v49  ;;  %v3285_v5 = vmul.f32 %v3221_v2, %v7988_v61  ;;  %v3188_v14 = vsel %vm3127_vm11, %v3123_v42, %v2926_v50  ;;  %v5286_v50 = vld [vmem:[%s7814_s0 + $0x1f0] sm:$0xff] }
 0x2e4   :  { %v5005_v57 = vpack.c.bf16 %v4224_v18, %v4224_v18  ;;  %v5004_v22 = vpack.c.bf16 %v4217_v55, %v4217_v55  ;;  %v4003_v58 = vmax.f32 %v4001_v39, %v4002_v56  ;;  %v7557_v40 = vsel %vm4745_vm1, %v4680_v15, %v4744_v0 }
 0x2e5   :  { %v4011_v13 = vrot.slane %v4010_v32, 2  ;;  %v3775_v38 = vadd.f32 %v5160_v11, %v7448_v45  ;;  %v3770_v23 = vadd.f32 %v7448_v45, %v3769_v48  ;;  %v3092_v51 = vsel %vm3062_vm10, %v3027_v10, %v2864_v33  ;;  %5146 = vmatprep.mubr.msk.f32.mxu0 %vm3330_vm13, %v3285_v5  ;;  %v1239_v25 = vpop.permute.xlu1 %1238 }
 0x2e6   :  { %v4712_v31 = vunpack.c.l.b16 %v5005_v57  ;;  %v4711_v7 = vunpack.c.l.b16 %v5004_v22  ;;  %v4004_v41 = vrot.slane %v4003_v58, 2  ;;  %v3157_v20 = vsel %vm3127_vm11, %v3092_v51, %v2864_v33  ;;  %v2610_v1 = vpop.permute.xlu0 %2609 }
 0x2e7   :  { %v4012_v59 = vmax.f32 %v4010_v32, %v4011_v13  ;;  %v3945_v46 = vmax.f32 %v3775_v38, 0.0  ;;  %v3944_v26 = vmax.f32 %v3770_v23, 0.0  ;;  %v3222_v21 = vsel %vm3192_vm12, %v3157_v20, 0.0  ;;  %v5287_v32 = vld [vmem:[%s7814_s0 + $0xf8] sm:$0xff] }
 0x2e8   :  { %v4777_v34 = vsel %vm4743_vm0, %v4711_v7, %v7521_v19  ;;  %v4005_v35 = vmax.f32 %v4003_v58, %v4004_v41  ;;  %v3286_v60 = vmul.f32 %v3222_v21, %v7989_v28  ;;  %v3124_v24 = vsel %vm3062_vm10, %v3059_v3, %v2928_v44  ;;  %v5288_v58 = vld [vmem:[%s7814_s0 + $0x1f8] sm:$0xff] }
 0x2e9   :  { %v4013_v9 = vrot.slane %v4012_v59, 1  ;;  %v4232_v16 = vsel %vm3972_vm14, %v3945_v46, -inf  ;;  %v4225_v8 = vsel %vm3972_vm14, %v3944_v26, -inf  ;;  %v7572_v27 = vsel %vm4745_vm1, %v4712_v31, %v4777_v34  ;;  %v2674_v10 = vpop.permute.xlu1 %2673 }
 0x2ea   :  { %v4006_v6 = vrot.slane %v4005_v35, 1  ;;  %v4233_v43 = vrot.slane %v4232_v16, 4  ;;  %v4226_v17 = vrot.slane %v4225_v8, 4  ;;  %v3189_v19 = vsel %vm3127_vm11, %v3124_v24, %v2928_v44  ;;  %5147 = vmatmul.mubr.msk.f32.gmra.mrb[28].mxu0 %vm3330_vm13, %v3286_v60  ;;  %v1246_v30 = vpop.permute.xlu0 %1245 }
 0x2eb   :  { %v4014_v29 = vmax.f32 %v4012_v59, %v4013_v9  ;;  %v3253_v3 = vsel %vm3192_vm12, %v3188_v14, 0.0  ;;  %v3028_v4 = vsel %vm2997_vm9, %v5285_v53, %v2610_v1  ;;  %v7585_v11 = vsel %vm2997_vm9, %v5286_v50, %v2674_v10  ;;  %v5115_v47 = vpop.f32.mrb[6].mxu0 }
 0x2ec   :  { %v4007_v52 = vmax.f32 %v4005_v35, %v4006_v6  ;;  %v4234_v54 = vmax.f32 %v4232_v16, %v4233_v43  ;;  %v4227_v42 = vmax.f32 %v4225_v8, %v4226_v17  ;;  %v3317_v48 = vmul.f32 %v3253_v3, %v1239_v25  ;;  %v3619_v15 = vpop.f32.mrb[7].mxu0 }
 0x2ed   :  { %v4975_v36 = vpack.c.bf16 %v4014_v29, %v4014_v29  ;;  %v3254_v63 = vsel %vm3192_vm12, %v3189_v19, 0.0  ;;  %v3625_v62 = vadd.f32 %v5115_v47, %v7448_v45  ;;  %v3620_v37 = vadd.f32 %v7448_v45, %v3619_v15  ;;  %v2612_v49 = vpop.permute.xlu1 %2611  ;;  %v7990_v15 = vld [vmem:[#allocation44_spill] sm:$0xff] }
 0x2ee   :  { %v4974_v39 = vpack.c.bf16 %v4007_v52, %v4007_v52  ;;  %v4235_v12 = vrot.slane %v4234_v54, 2  ;;  %v4228_v33 = vrot.slane %v4227_v42, 2  ;;  %5194 = vmatprep.mubr.msk.f32.mxu1 %vm3330_vm13, %v3317_v48  ;;  %v3318_v18 = vmul.f32 %v3254_v63, %v1246_v30  ;;  %v2676_v55 = vpop.permute.xlu0 %2675  ;;  %v5163_v56 = vpop.f32.mrb[6].mxu1 }
 0x2ef   :  { %v4682_v2 = vunpack.c.l.b16 %v4975_v36  ;;  %v3915_v44 = vmax.f32 %v3625_v62, 0.0  ;;  %v3914_v0 = vmax.f32 %v3620_v37, 0.0  ;;  %v3029_v61 = vsel %vm2997_vm9, %v5287_v32, %v2612_v49  ;;  %v3779_v5 = vpop.f32.mrb[7].mxu1 }
 0x2f0   :  { %v4681_v14 = vunpack.c.l.b16 %v4974_v39  ;;  %v4236_v57 = vmax.f32 %v4234_v54, %v4235_v12  ;;  %v4229_v22 = vmax.f32 %v4227_v42, %v4228_v33  ;;  %5195 = vmatmul.mubr.msk.f32.gmra.mrb[28].mxu1 %vm3330_vm13, %v3318_v18  ;;  %v3061_v13 = vsel %vm2997_vm9, %v5288_v58, %v2676_v55 }
 0x2f1   :  { %v4022_v38 = vsel %vm3972_vm14, %v3915_v44, -inf  ;;  %v4015_v23 = vsel %vm3972_vm14, %v3914_v0, -inf  ;;  %v3785_v51 = vadd.f32 %v5163_v56, %v7448_v45  ;;  %v3780_v25 = vadd.f32 %v7448_v45, %v3779_v5  ;;  %v2866_v31 = vpop.permute.xlu1 %2865 }
 0x2f2   :  { %v4748_v7 = vsel %vm4747_vm2, %v4681_v14, %v7557_v40  ;;  %v4237_v41 = vrot.slane %v4236_v57, 1  ;;  %v4230_v20 = vrot.slane %v4229_v22, 1  ;;  %v4023_v1 = vrot.slane %v4022_v38, 4  ;;  %v2930_v59 = vpop.permute.xlu0 %2929 }
 0x2f3   :  { %v4016_v46 = vrot.slane %v4015_v23, 4  ;;  %v7607_v26 = vsel %vm4749_vm3, %v4682_v2, %v4748_v7  ;;  %v3947_v21 = vmax.f32 %v3785_v51, 0.0  ;;  %v3946_v34 = vmax.f32 %v3780_v25, 0.0 }
 0x2f4   :  { %v4238_v35 = vmax.f32 %v4236_v57, %v4237_v41  ;;  %v4231_v28 = vmax.f32 %v4229_v22, %v4230_v20  ;;  %v4024_v60 = vmax.f32 %v4022_v38, %v4023_v1  ;;  %v3093_v24 = vsel %vm3062_vm10, %v3028_v4, %v2866_v31  ;;  %v7991_v57 = vld [vmem:[#allocation45_spill] sm:$0xff] }
 0x2f5   :  { %v4017_v9 = vmax.f32 %v4015_v23, %v4016_v46  ;;  %v4246_v16 = vsel %vm3972_vm14, %v3947_v21, -inf  ;;  %v4239_v40 = vsel %vm3972_vm14, %v3946_v34, -inf  ;;  %v3158_v8 = vsel %vm3127_vm11, %v3093_v24, %v2866_v31  ;;  %v2868_v10 = vpop.permute.xlu1 %2867 }
 0x2f6   :  { %v5007_v6 = vpack.c.bf16 %v4238_v35, %v4238_v35  ;;  %v5006_v43 = vpack.c.bf16 %v4231_v28, %v4231_v28  ;;  %v4025_v17 = vrot.slane %v4024_v60, 2  ;;  %v4247_v19 = vrot.slane %v4246_v16, 4  ;;  %v2932_v30 = vpop.permute.xlu0 %2931 }
 0x2f7   :  { %v4018_v29 = vrot.slane %v4017_v9, 2  ;;  %v4240_v3 = vrot.slane %v4239_v40, 4  ;;  %v3223_v53 = vsel %vm3192_vm12, %v3158_v8, 0.0  ;;  %v3125_v4 = vsel %vm3062_vm10, %v7585_v11, %v2930_v59 }
 0x2f8   :  { %v4714_v50 = vunpack.c.l.b16 %v5007_v6  ;;  %v4713_v47 = vunpack.c.l.b16 %v5006_v43  ;;  %v4026_v52 = vmax.f32 %v4024_v60, %v4025_v17  ;;  %v4248_v54 = vmax.f32 %v4246_v16, %v4247_v19 }
 0x2f9   :  { %v4019_v42 = vmax.f32 %v4017_v9, %v4018_v29  ;;  %v4241_v48 = vmax.f32 %v4239_v40, %v4240_v3  ;;  %v3287_v36 = vmul.f32 %v3223_v53, %v7990_v15  ;;  %v3190_v63 = vsel %vm3127_vm11, %v3125_v4, %v2930_v59  ;;  %v1253_v55 = vpop.permute.xlu1 %1252 }
 0x2fa   :  { %v4779_v62 = vsel %vm4747_vm2, %v4713_v47, %v7572_v27  ;;  %v4027_v37 = vrot.slane %v4026_v52, 1  ;;  %v4249_v49 = vrot.slane %v4248_v54, 2  ;;  %v3094_v39 = vsel %vm3062_vm10, %v3029_v61, %v2868_v10  ;;  %v1260_v32 = vpop.permute.xlu0 %1259 }
 0x2fb   :  { %v4020_v12 = vrot.slane %v4019_v42, 1  ;;  %v4242_v11 = vrot.slane %v4241_v48, 2  ;;  %v4780_v33 = vsel %vm4749_vm3, %v4714_v50, %v4779_v62  ;;  %v3159_v18 = vsel %vm3127_vm11, %v3094_v39, %v2868_v10  ;;  %5149 = vmatprep.mubr.msk.f32.mxu0 %vm3330_vm13, %v3287_v36  ;;  %v5118_v56 = vpop.f32.mrb[8].mxu0 }
 0x2fc   :  { %v4028_v2 = vmax.f32 %v4026_v52, %v4027_v37  ;;  %v4250_v44 = vmax.f32 %v4248_v54, %v4249_v49  ;;  %v3224_v0 = vsel %vm3192_vm12, %v3159_v18, 0.0  ;;  %v3126_v27 = vsel %vm3062_vm10, %v3061_v13, %v2932_v30  ;;  %v3629_v5 = vpop.f32.mrb[9].mxu0 }
 0x2fd   :  { %v4021_v14 = vmax.f32 %v4019_v42, %v4020_v12  ;;  %v4243_v61 = vmax.f32 %v4241_v48, %v4242_v11  ;;  %v3288_v22 = vmul.f32 %v3224_v0, %v7991_v57  ;;  %v3191_v58 = vsel %vm3127_vm11, %v3126_v27, %v2932_v30 }
 0x2fe   :  { %v4977_v38 = vpack.c.bf16 %v4028_v2, %v4028_v2  ;;  %v4251_v23 = vrot.slane %v4250_v44, 1  ;;  %v3255_v51 = vsel %vm3192_vm12, %v3190_v63, 0.0  ;;  %v3256_v25 = vsel %vm3192_vm12, %v3191_v58, 0.0  ;;  %v5166_v31 = vpop.f32.mrb[8].mxu1 }
 0x2ff   :  { %v4976_v7 = vpack.c.bf16 %v4021_v14, %v4021_v14  ;;  %v4244_v41 = vrot.slane %v4243_v61, 1  ;;  %v3319_v20 = vmul.f32 %v3255_v51, %v1253_v55  ;;  %v3320_v1 = vmul.f32 %v3256_v25, %v1260_v32  ;;  %5150 = vmatmul.mubr.msk.f32.gmra.mrb[30].mxu0 %vm3330_vm13, %v3288_v22  ;;  %v3789_v13 = vpop.f32.mrb[9].mxu1 }
 0x300   :  { %v4252_v59 = vmax.f32 %v4250_v44, %v4251_v23  ;;  %v3635_v46 = vadd.f32 %v5118_v56, %v7448_v45  ;;  %v3630_v21 = vadd.f32 %v7448_v45, %v3629_v5  ;;  %v3795_v28 = vadd.f32 %v5166_v31, %v7448_v45 }
 0x301   :  { %v4683_v34 = vunpack.c.l.b16 %v4976_v7  ;;  %v4245_v35 = vmax.f32 %v4243_v61, %v4244_v41  ;;  %5197 = vmatprep.mubr.msk.f32.mxu1 %vm3330_vm13, %v3319_v20  ;;  %v3790_v60 = vadd.f32 %v7448_v45, %v3789_v13  ;;  %v4684_v24 = vunpack.c.l.b16 %v4977_v38 }
 0x302   :  { %v5009_v9 = vpack.c.bf16 %v4252_v59, %v4252_v59  ;;  %v3917_v16 = vmax.f32 %v3635_v46, 0.0  ;;  %v3916_v40 = vmax.f32 %v3630_v21, 0.0  ;;  %5198 = vmatmul.mubr.msk.f32.gmra.mrb[30].mxu1 %vm3330_vm13, %v3320_v1  ;;  %v3949_v6 = vmax.f32 %v3795_v28, 0.0 }
 0x303   :  { %v4752_v8 = vsel %vm4751_vm4, %v4683_v34, %v7607_v26  ;;  %v5008_v10 = vpack.c.bf16 %v4245_v35, %v4245_v35  ;;  %v3948_v43 = vmax.f32 %v3790_v60, 0.0 }
 0x304   :  { %v4754_v17 = vsel %vm4753_vm5, %v4684_v24, %v4752_v8  ;;  %v4036_v19 = vsel %vm3972_vm14, %v3917_v16, -inf  ;;  %v4029_v30 = vsel %vm3972_vm14, %v3916_v40, -inf  ;;  %v4716_v50 = vunpack.c.l.b16 %v5009_v9 }
 0x305   :  { %v4804_v29 = vpack.c.b16 %v4754_v17, %v4754_v17  ;;  %v4715_v3 = vunpack.c.l.b16 %v5008_v10  ;;  %v4037_v53 = vrot.slane %v4036_v19, 4  ;;  %v4030_v4 = vrot.slane %v4029_v30, 4 }
 0x306   :  { %v4260_v47 = vsel %vm3972_vm14, %v3949_v6, -inf  ;;  %v4253_v52 = vsel %vm3972_vm14, %v3948_v43, -inf }
 0x307   :  { %4821 = vst.msk [vmem:[%s7817_s4] sm:$0xf] %vm4820_vm6, %v4804_v29  ;;  %v4781_v26 = vsel %vm4751_vm4, %v4715_v3, %v4780_v33  ;;  %v4038_v54 = vmax.f32 %v4036_v19, %v4037_v53  ;;  %v4031_v42 = vmax.f32 %v4029_v30, %v4030_v4  ;;  %v4261_v48 = vrot.slane %v4260_v47, 4 }
 0x308   :  { %v4782_v15 = vsel %vm4753_vm5, %v4716_v50, %v4781_v26  ;;  %v4254_v36 = vrot.slane %v4253_v52, 4 }
 0x309   :  { %v4808_v63 = vpack.c.b16 %v4782_v15, %v4782_v15  ;;  %v4039_v62 = vrot.slane %v4038_v54, 2  ;;  %v4032_v37 = vrot.slane %v4031_v42, 2  ;;  %v4262_v49 = vmax.f32 %v4260_v47, %v4261_v48 }
 0x30a   :  { %v4255_v39 = vmax.f32 %v4253_v52, %v4254_v36 }
 0x30b   :  { %4825 = vst.msk [vmem:[%s7817_s4 + $0x10] sm:$0xf] %vm4820_vm6, %v4808_v63  ;;  %v4040_v12 = vmax.f32 %v4038_v54, %v4039_v62  ;;  %v4033_v11 = vmax.f32 %v4031_v42, %v4032_v37  ;;  %v4263_v18 = vrot.slane %v4262_v49, 2  ;;  %v5121_v33 = vpop.f32.mrb[10].mxu0 }
 0x30c   :  { %v4256_v55 = vrot.slane %v4255_v39, 2  ;;  %v3645_v56 = vadd.f32 %v5121_v33, %v7448_v45  ;;  %v3639_v2 = vpop.f32.mrb[11].mxu0 }
 0x30d   :  { %v4041_v44 = vrot.slane %v4040_v12, 1  ;;  %v4034_v0 = vrot.slane %v4033_v11, 1  ;;  %v4264_v27 = vmax.f32 %v4262_v49, %v4263_v18  ;;  %v3640_v32 = vadd.f32 %v7448_v45, %v3639_v2 }
 0x30e   :  { %v4257_v5 = vmax.f32 %v4255_v39, %v4256_v55  ;;  %v3919_v14 = vmax.f32 %v3645_v56, 0.0  ;;  %v5169_v61 = vpop.f32.mrb[10].mxu1 }
 0x30f   :  { %v4042_v57 = vmax.f32 %v4040_v12, %v4041_v44  ;;  %v4035_v22 = vmax.f32 %v4033_v11, %v4034_v0  ;;  %v4265_v58 = vrot.slane %v4264_v27, 1  ;;  %v3918_v38 = vmax.f32 %v3640_v32, 0.0  ;;  %v3799_v23 = vpop.f32.mrb[11].mxu1 }
 0x310   :  { %v4258_v51 = vrot.slane %v4257_v5, 1  ;;  %v4050_v25 = vsel %vm3972_vm14, %v3919_v14, -inf  ;;  %v3805_v31 = vadd.f32 %v5169_v61, %v7448_v45  ;;  %v3800_v7 = vadd.f32 %v7448_v45, %v3799_v23 }
 0x311   :  { %v4979_v41 = vpack.c.bf16 %v4042_v57, %v4042_v57  ;;  %v4978_v20 = vpack.c.bf16 %v4035_v22, %v4035_v22  ;;  %v4266_v1 = vmax.f32 %v4264_v27, %v4265_v58  ;;  %v4051_v13 = vrot.slane %v4050_v25, 4 }
 0x312   :  { %v4259_v59 = vmax.f32 %v4257_v5, %v4258_v51  ;;  %v4043_v46 = vsel %vm3972_vm14, %v3918_v38, -inf  ;;  %v3951_v21 = vmax.f32 %v3805_v31, 0.0  ;;  %v3950_v34 = vmax.f32 %v3800_v7, 0.0 }
 0x313   :  { %v4686_v35 = vunpack.c.l.b16 %v4979_v41  ;;  %v4685_v28 = vunpack.c.l.b16 %v4978_v20  ;;  %v5011_v60 = vpack.c.bf16 %v4266_v1, %v4266_v1  ;;  %v4052_v24 = vmax.f32 %v4050_v25, %v4051_v13 }
 0x314   :  { %v5010_v9 = vpack.c.bf16 %v4259_v59, %v4259_v59  ;;  %v4044_v16 = vrot.slane %v4043_v46, 4  ;;  %v4274_v40 = vsel %vm3972_vm14, %v3951_v21, -inf  ;;  %v4267_v8 = vsel %vm3972_vm14, %v3950_v34, -inf }
 0x315   :  { %v4755_v10 = vsel %vm4741_vm15, %v4686_v35, %v4685_v28  ;;  %v4718_v6 = vunpack.c.l.b16 %v5011_v60  ;;  %v4053_v43 = vrot.slane %v4052_v24, 2  ;;  %v4275_v17 = vrot.slane %v4274_v40, 4 }
 0x316   :  { %v4717_v19 = vunpack.c.l.b16 %v5010_v9  ;;  %v4045_v30 = vmax.f32 %v4043_v46, %v4044_v16  ;;  %v4268_v29 = vrot.slane %v4267_v8, 4 }
 0x317   :  { %v4054_v3 = vmax.f32 %v4052_v24, %v4053_v43  ;;  %v4276_v53 = vmax.f32 %v4274_v40, %v4275_v17 }
 0x318   :  { %v4783_v4 = vsel %vm4741_vm15, %v4718_v6, %v4717_v19  ;;  %v4046_v50 = vrot.slane %v4045_v30, 2  ;;  %v4269_v47 = vmax.f32 %v4267_v8, %v4268_v29 }
 0x319   :  { %v4055_v52 = vrot.slane %v4054_v3, 1  ;;  %v4277_v26 = vrot.slane %v4276_v53, 2 }
 0x31a   :  { %v4047_v54 = vmax.f32 %v4045_v30, %v4046_v50  ;;  %v4270_v42 = vrot.slane %v4269_v47, 2 }
 0x31b   :  { %v4056_v48 = vmax.f32 %v4054_v3, %v4055_v52  ;;  %v4278_v15 = vmax.f32 %v4276_v53, %v4277_v26  ;;  %v5124_v36 = vpop.f32.mrb[12].mxu0 }
 0x31c   :  { %v4048_v63 = vrot.slane %v4047_v54, 1  ;;  %v4271_v62 = vmax.f32 %v4269_v47, %v4270_v42  ;;  %v3655_v37 = vadd.f32 %v5124_v36, %v7448_v45  ;;  %v3649_v49 = vpop.f32.mrb[13].mxu0 }
 0x31d   :  { %v4279_v39 = vrot.slane %v4278_v15, 1  ;;  %v3650_v12 = vadd.f32 %v7448_v45, %v3649_v49  ;;  %v4981_v55 = vpack.c.bf16 %v4056_v48, %v4056_v48 }
 0x31e   :  { %v4049_v11 = vmax.f32 %v4047_v54, %v4048_v63  ;;  %v4272_v18 = vrot.slane %v4271_v62, 1  ;;  %v3921_v33 = vmax.f32 %v3655_v37, 0.0 }
 0x31f   :  { %v4280_v56 = vmax.f32 %v4278_v15, %v4279_v39  ;;  %v3920_v2 = vmax.f32 %v3650_v12, 0.0  ;;  %v5172_v44 = vpop.f32.mrb[12].mxu1  ;;  %v4688_v31 = vunpack.c.l.b16 %v4981_v55 }
 0x320   :  { %v4980_v0 = vpack.c.bf16 %v4049_v11, %v4049_v11  ;;  %v4273_v27 = vmax.f32 %v4271_v62, %v4272_v18  ;;  %v4064_v32 = vsel %vm3972_vm14, %v3921_v33, -inf  ;;  %v3815_v5 = vadd.f32 %v5172_v44, %v7448_v45  ;;  %v3809_v14 = vpop.f32.mrb[13].mxu1 }
 0x321   :  { %v5013_v61 = vpack.c.bf16 %v4280_v56, %v4280_v56  ;;  %v4065_v57 = vrot.slane %v4064_v32, 4  ;;  %v4057_v22 = vsel %vm3972_vm14, %v3920_v2, -inf  ;;  %v3810_v58 = vadd.f32 %v7448_v45, %v3809_v14 }
 0x322   :  { %v4687_v38 = vunpack.c.l.b16 %v4980_v0  ;;  %v5012_v23 = vpack.c.bf16 %v4273_v27, %v4273_v27  ;;  %v4058_v51 = vrot.slane %v4057_v22, 4  ;;  %v3953_v25 = vmax.f32 %v3815_v5, 0.0 }
 0x323   :  { %v4720_v7 = vunpack.c.l.b16 %v5013_v61  ;;  %v4066_v41 = vmax.f32 %v4064_v32, %v4065_v57  ;;  %v3952_v20 = vmax.f32 %v3810_v58, 0.0 }
 0x324   :  { %v4756_v1 = vsel %vm4743_vm0, %v4687_v38, %v4755_v10  ;;  %v4719_v13 = vunpack.c.l.b16 %v5012_v23  ;;  %v4059_v59 = vmax.f32 %v4057_v22, %v4058_v51  ;;  %v4288_v46 = vsel %vm3972_vm14, %v3953_v25, -inf  ;;  %v7687_v22 = vld [vmem:[%s7816_s3] ss:$0 sm:$0xff] }
 0x325   :  { %v4067_v21 = vrot.slane %v4066_v41, 2  ;;  %v4757_v34 = vsel %vm4745_vm1, %v4688_v31, %v4756_v1  ;;  %v4289_v35 = vrot.slane %v4288_v46, 4  ;;  %v4281_v28 = vsel %vm3972_vm14, %v3952_v20, -inf }
 0x326   :  { %v4784_v60 = vsel %vm4743_vm0, %v4719_v13, %v4783_v4  ;;  %v4060_v24 = vrot.slane %v4059_v59, 2  ;;  %v4282_v9 = vrot.slane %v4281_v28, 4 }
 0x327   :  { %v4068_v16 = vmax.f32 %v4066_v41, %v4067_v21  ;;  %v4290_v40 = vmax.f32 %v4288_v46, %v4289_v35  ;;  %v4785_v8 = vsel %vm4745_vm1, %v4720_v7, %v4784_v60 }
 0x328   :  { %v4061_v6 = vmax.f32 %v4059_v59, %v4060_v24  ;;  %v4283_v10 = vmax.f32 %v4281_v28, %v4282_v9 }
 0x329   :  { %v4069_v43 = vrot.slane %v4068_v16, 1  ;;  %v4291_v17 = vrot.slane %v4290_v40, 2 }
 0x32a   :  { %v4062_v19 = vrot.slane %v4061_v6, 1  ;;  %v4284_v30 = vrot.slane %v4283_v10, 2 }
 0x32b   :  { %v4070_v29 = vmax.f32 %v4068_v16, %v4069_v43  ;;  %v4292_v3 = vmax.f32 %v4290_v40, %v4291_v17 }
 0x32c   :  { %v4063_v53 = vmax.f32 %v4061_v6, %v4062_v19  ;;  %v4285_v50 = vmax.f32 %v4283_v10, %v4284_v30 }
 0x32d   :  { %v4983_v47 = vpack.c.bf16 %v4070_v29, %v4070_v29  ;;  %v4293_v52 = vrot.slane %v4292_v3, 1 }
 0x32e   :  { %v4982_v26 = vpack.c.bf16 %v4063_v53, %v4063_v53  ;;  %v4286_v4 = vrot.slane %v4285_v50, 1  ;;  %v5127_v54 = vpop.f32.mrb[14].mxu0 }
 0x32f   :  { %v4294_v42 = vmax.f32 %v4292_v3, %v4293_v52  ;;  %v3665_v48 = vadd.f32 %v5127_v54, %v7448_v45  ;;  %v3659_v15 = vpop.f32.mrb[15].mxu0  ;;  %v4690_v37 = vunpack.c.l.b16 %v4983_v47 }
 0x330   :  { %v4689_v36 = vunpack.c.l.b16 %v4982_v26  ;;  %v4287_v63 = vmax.f32 %v4285_v50, %v4286_v4  ;;  %v3660_v62 = vadd.f32 %v7448_v45, %v3659_v15 }
 0x331   :  { %v5015_v49 = vpack.c.bf16 %v4294_v42, %v4294_v42  ;;  %v3923_v39 = vmax.f32 %v3665_v48, 0.0 }
 0x332   :  { %v4758_v12 = vsel %vm4747_vm2, %v4689_v36, %v4757_v34  ;;  %v5014_v11 = vpack.c.bf16 %v4287_v63, %v4287_v63  ;;  %v3922_v18 = vmax.f32 %v3660_v62, 0.0 }
 0x333   :  { %v4078_v33 = vsel %vm3972_vm14, %v3923_v39, -inf  ;;  %v4759_v55 = vsel %vm4749_vm3, %v4690_v37, %v4758_v12  ;;  %v4722_v27 = vunpack.c.l.b16 %v5015_v49 }
 0x334   :  { %v4721_v56 = vunpack.c.l.b16 %v5014_v11  ;;  %v4079_v2 = vrot.slane %v4078_v33, 4  ;;  %v4071_v44 = vsel %vm3972_vm14, %v3922_v18, -inf  ;;  %v5175_v0 = vpop.f32.mrb[14].mxu1 }
 0x335   :  { %v4072_v32 = vrot.slane %v4071_v44, 4  ;;  %v3825_v5 = vadd.f32 %v5175_v0, %v7448_v45  ;;  %v3819_v14 = vpop.f32.mrb[15].mxu1 }
 0x336   :  { %v4786_v61 = vsel %vm4747_vm2, %v4721_v56, %v4785_v8  ;;  %v4080_v57 = vmax.f32 %v4078_v33, %v4079_v2  ;;  %v3820_v58 = vadd.f32 %v7687_v22, %v3819_v14 }
 0x337   :  { %v4073_v38 = vmax.f32 %v4071_v44, %v4072_v32  ;;  %v3955_v23 = vmax.f32 %v3825_v5, 0.0  ;;  %v4787_v51 = vsel %vm4749_vm3, %v4722_v27, %v4786_v61 }
 0x338   :  { %v4081_v25 = vrot.slane %v4080_v57, 2  ;;  %v3954_v31 = vmax.f32 %v3820_v58, 0.0 }
 0x339   :  { %v4074_v7 = vrot.slane %v4073_v38, 2  ;;  %v4302_v45 = vsel %vm3972_vm14, %v3955_v23, -inf }
 0x33a   :  { %v4082_v41 = vmax.f32 %v4080_v57, %v4081_v25  ;;  %v4303_v20 = vrot.slane %v4302_v45, 4  ;;  %v4295_v1 = vsel %vm3972_vm14, %v3954_v31, -inf }
 0x33b   :  { %v4075_v13 = vmax.f32 %v4073_v38, %v4074_v7  ;;  %v4296_v59 = vrot.slane %v4295_v1, 4 }
 0x33c   :  { %v4083_v46 = vrot.slane %v4082_v41, 1  ;;  %v4304_v21 = vmax.f32 %v4302_v45, %v4303_v20 }
 0x33d   :  { %v4076_v34 = vrot.slane %v4075_v13, 1  ;;  %v4297_v35 = vmax.f32 %v4295_v1, %v4296_v59 }
 0x33e   :  { %v4084_v28 = vmax.f32 %v4082_v41, %v4083_v46  ;;  %v4305_v60 = vrot.slane %v4304_v21, 2 }
 0x33f   :  { %v4077_v24 = vmax.f32 %v4075_v13, %v4076_v34  ;;  %v4298_v9 = vrot.slane %v4297_v35, 2 }
 0x340   :  { %v4985_v16 = vpack.c.bf16 %v4084_v28, %v4084_v28  ;;  %v4306_v40 = vmax.f32 %v4304_v21, %v4305_v60 }
 0x341   :  { %v4984_v8 = vpack.c.bf16 %v4077_v24, %v4077_v24  ;;  %v4299_v6 = vmax.f32 %v4297_v35, %v4298_v9 }
 0x342   :  { %v4307_v10 = vrot.slane %v4306_v40, 1  ;;  %v5130_v43 = vpop.f32.mrb[16].mxu0  ;;  %v4692_v3 = vunpack.c.l.b16 %v4985_v16 }
 0x343   :  { %v4691_v17 = vunpack.c.l.b16 %v4984_v8  ;;  %v4300_v19 = vrot.slane %v4299_v6, 1  ;;  %v3675_v30 = vadd.f32 %v7687_v22, %v5130_v43  ;;  %v3669_v29 = vpop.f32.mrb[17].mxu0 }
 0x344   :  { %v4308_v53 = vmax.f32 %v4306_v40, %v4307_v10  ;;  %v3670_v50 = vadd.f32 %v7687_v22, %v3669_v29 }
 0x345   :  { %v4760_v47 = vsel %vm4751_vm4, %v4691_v17, %v4759_v55  ;;  %v4301_v52 = vmax.f32 %v4299_v6, %v4300_v19  ;;  %v3925_v26 = vmax.f32 %v3675_v30, 0.0 }
 0x346   :  { %v4761_v4 = vsel %vm4753_vm5, %v4692_v3, %v4760_v47  ;;  %v5017_v54 = vpack.c.bf16 %v4308_v53, %v4308_v53  ;;  %v3924_v42 = vmax.f32 %v3670_v50, 0.0 }
 0x347   :  { %v4805_v48 = vpack.c.b16 %v4761_v4, %v4761_v4  ;;  %v5016_v15 = vpack.c.bf16 %v4301_v52, %v4301_v52  ;;  %v4092_v36 = vsel %vm3972_vm14, %v3925_v26, -inf }
 0x348   :  { %v4093_v63 = vrot.slane %v4092_v36, 4  ;;  %v4085_v62 = vsel %vm3972_vm14, %v3924_v42, -inf  ;;  %v5178_v37 = vpop.f32.mrb[16].mxu1  ;;  %v4724_v18 = vunpack.c.l.b16 %v5017_v54 }
 0x349   :  { %4822 = vst.msk [vmem:[%s7817_s4 + $0x4] sm:$0xf] %vm4820_vm6, %v4805_v48  ;;  %v4723_v49 = vunpack.c.l.b16 %v5016_v15  ;;  %v4086_v39 = vrot.slane %v4085_v62, 4  ;;  %v3835_v12 = vadd.f32 %v7687_v22, %v5178_v37  ;;  %v3829_v11 = vpop.f32.mrb[17].mxu1 }
 0x34a   :  { %v4094_v33 = vmax.f32 %v4092_v36, %v4093_v63  ;;  %v3830_v55 = vadd.f32 %v7687_v22, %v3829_v11 }
 0x34b   :  { %v4788_v56 = vsel %vm4751_vm4, %v4723_v49, %v4787_v51  ;;  %v4087_v2 = vmax.f32 %v4085_v62, %v4086_v39  ;;  %v3957_v44 = vmax.f32 %v3835_v12, 0.0 }
 0x34c   :  { %v4789_v0 = vsel %vm4753_vm5, %v4724_v18, %v4788_v56  ;;  %v4095_v27 = vrot.slane %v4094_v33, 2  ;;  %v3956_v32 = vmax.f32 %v3830_v55, 0.0 }
 0x34d   :  { %v4809_v5 = vpack.c.b16 %v4789_v0, %v4789_v0  ;;  %v4088_v14 = vrot.slane %v4087_v2, 2  ;;  %v4316_v61 = vsel %vm3972_vm14, %v3957_v44, -inf }
 0x34e   :  { %v4096_v57 = vmax.f32 %v4094_v33, %v4095_v27  ;;  %v4317_v58 = vrot.slane %v4316_v61, 4  ;;  %v4309_v38 = vsel %vm3972_vm14, %v3956_v32, -inf }
 0x34f   :  { %4826 = vst.msk [vmem:[%s7817_s4 + $0x14] sm:$0xf] %vm4820_vm6, %v4809_v5  ;;  %v4089_v23 = vmax.f32 %v4087_v2, %v4088_v14  ;;  %v4310_v51 = vrot.slane %v4309_v38, 4 }
 0x350   :  { %v4097_v25 = vrot.slane %v4096_v57, 1  ;;  %v4318_v31 = vmax.f32 %v4316_v61, %v4317_v58 }
 0x351   :  { %v4090_v7 = vrot.slane %v4089_v23, 1  ;;  %v4311_v45 = vmax.f32 %v4309_v38, %v4310_v51 }
 0x352   :  { %v4098_v41 = vmax.f32 %v4096_v57, %v4097_v25  ;;  %v4319_v20 = vrot.slane %v4318_v31, 2 }
 0x353   :  { %v4091_v1 = vmax.f32 %v4089_v23, %v4090_v7  ;;  %v4312_v13 = vrot.slane %v4311_v45, 2 }
 0x354   :  { %v4987_v59 = vpack.c.bf16 %v4098_v41, %v4098_v41  ;;  %v4320_v46 = vmax.f32 %v4318_v31, %v4319_v20 }
 0x355   :  { %v4986_v21 = vpack.c.bf16 %v4091_v1, %v4091_v1  ;;  %v4313_v34 = vmax.f32 %v4311_v45, %v4312_v13 }
 0x356   :  { %v4694_v35 = vunpack.c.l.b16 %v4987_v59  ;;  %v4321_v28 = vrot.slane %v4320_v46, 1  ;;  %v5133_v60 = vpop.f32.mrb[18].mxu0 }
 0x357   :  { %v4693_v24 = vunpack.c.l.b16 %v4986_v21  ;;  %v4314_v9 = vrot.slane %v4313_v34, 1  ;;  %v3685_v16 = vadd.f32 %v7687_v22, %v5133_v60  ;;  %v3679_v40 = vpop.f32.mrb[19].mxu0 }
 0x358   :  { %v4322_v8 = vmax.f32 %v4320_v46, %v4321_v28  ;;  %v3680_v6 = vadd.f32 %v7687_v22, %v3679_v40 }
 0x359   :  { %v4762_v10 = vsel %vm4741_vm15, %v4694_v35, %v4693_v24  ;;  %v4315_v43 = vmax.f32 %v4313_v34, %v4314_v9  ;;  %v3927_v17 = vmax.f32 %v3685_v16, 0.0 }
 0x35a   :  { %v5019_v19 = vpack.c.bf16 %v4322_v8, %v4322_v8  ;;  %v3926_v30 = vmax.f32 %v3680_v6, 0.0 }
 0x35b   :  { %v5018_v29 = vpack.c.bf16 %v4315_v43, %v4315_v43  ;;  %v4106_v3 = vsel %vm3972_vm14, %v3927_v17, -inf }
 0x35c   :  { %v4726_v53 = vunpack.c.l.b16 %v5019_v19  ;;  %v4107_v50 = vrot.slane %v4106_v3, 4  ;;  %v4099_v47 = vsel %vm3972_vm14, %v3926_v30, -inf  ;;  %v5181_v52 = vpop.f32.mrb[18].mxu1 }
 0x35d   :  { %v4725_v26 = vunpack.c.l.b16 %v5018_v29  ;;  %v4100_v4 = vrot.slane %v4099_v47, 4  ;;  %v3845_v54 = vadd.f32 %v7687_v22, %v5181_v52  ;;  %v3839_v42 = vpop.f32.mrb[19].mxu1 }
 0x35e   :  { %v4108_v48 = vmax.f32 %v4106_v3, %v4107_v50  ;;  %v3840_v15 = vadd.f32 %v7687_v22, %v3839_v42 }
 0x35f   :  { %v4790_v36 = vsel %vm4741_vm15, %v4726_v53, %v4725_v26  ;;  %v4101_v63 = vmax.f32 %v4099_v47, %v4100_v4  ;;  %v3959_v62 = vmax.f32 %v3845_v54, 0.0 }
 0x360   :  { %v4109_v37 = vrot.slane %v4108_v48, 2  ;;  %v3958_v49 = vmax.f32 %v3840_v15, 0.0 }
 0x361   :  { %v4102_v39 = vrot.slane %v4101_v63, 2  ;;  %v4330_v12 = vsel %vm3972_vm14, %v3959_v62, -inf }
 0x362   :  { %v4110_v11 = vmax.f32 %v4108_v48, %v4109_v37  ;;  %v4331_v18 = vrot.slane %v4330_v12, 4  ;;  %v4323_v33 = vsel %vm3972_vm14, %v3958_v49, -inf }
 0x363   :  { %v4103_v55 = vmax.f32 %v4101_v63, %v4102_v39  ;;  %v4324_v56 = vrot.slane %v4323_v33, 4 }
 0x364   :  { %v4111_v2 = vrot.slane %v4110_v11, 1  ;;  %v4332_v44 = vmax.f32 %v4330_v12, %v4331_v18 }
 0x365   :  { %v4104_v0 = vrot.slane %v4103_v55, 1  ;;  %v4325_v27 = vmax.f32 %v4323_v33, %v4324_v56 }
 0x366   :  { %v4112_v32 = vmax.f32 %v4110_v11, %v4111_v2  ;;  %v4333_v5 = vrot.slane %v4332_v44, 2 }
 0x367   :  { %v4105_v14 = vmax.f32 %v4103_v55, %v4104_v0  ;;  %v4326_v61 = vrot.slane %v4325_v27, 2 }
 0x368   :  { %v4989_v57 = vpack.c.bf16 %v4112_v32, %v4112_v32  ;;  %v4334_v58 = vmax.f32 %v4332_v44, %v4333_v5 }
 0x369   :  { %v4988_v38 = vpack.c.bf16 %v4105_v14, %v4105_v14  ;;  %v4327_v23 = vmax.f32 %v4325_v27, %v4326_v61 }
 0x36a   :  { %v4335_v51 = vrot.slane %v4334_v58, 1  ;;  %v5136_v25 = vpop.f32.mrb[20].mxu0  ;;  %v4696_v20 = vunpack.c.l.b16 %v4989_v57 }
 0x36b   :  { %v4695_v31 = vunpack.c.l.b16 %v4988_v38  ;;  %v4328_v7 = vrot.slane %v4327_v23, 1  ;;  %v3695_v45 = vadd.f32 %v7687_v22, %v5136_v25  ;;  %v3689_v41 = vpop.f32.mrb[21].mxu0 }
 0x36c   :  { %v4336_v1 = vmax.f32 %v4334_v58, %v4335_v51  ;;  %v3690_v13 = vadd.f32 %v7687_v22, %v3689_v41 }
 0x36d   :  { %v4763_v59 = vsel %vm4743_vm0, %v4695_v31, %v4762_v10  ;;  %v4329_v46 = vmax.f32 %v4327_v23, %v4328_v7  ;;  %v3929_v21 = vmax.f32 %v3695_v45, 0.0 }
 0x36e   :  { %v5021_v34 = vpack.c.bf16 %v4336_v1, %v4336_v1  ;;  %v3928_v35 = vmax.f32 %v3690_v13, 0.0  ;;  %v4764_v28 = vsel %vm4745_vm1, %v4696_v20, %v4763_v59 }
 0x36f   :  { %v5020_v60 = vpack.c.bf16 %v4329_v46, %v4329_v46  ;;  %v4120_v24 = vsel %vm3972_vm14, %v3929_v21, -inf }
 0x370   :  { %v4121_v9 = vrot.slane %v4120_v24, 4  ;;  %v4113_v16 = vsel %vm3972_vm14, %v3928_v35, -inf  ;;  %v5184_v40 = vpop.f32.mrb[20].mxu1  ;;  %v4728_v19 = vunpack.c.l.b16 %v5021_v34 }
 0x371   :  { %v4727_v8 = vunpack.c.l.b16 %v5020_v60  ;;  %v4114_v6 = vrot.slane %v4113_v16, 4  ;;  %v3855_v43 = vadd.f32 %v7687_v22, %v5184_v40  ;;  %v3849_v17 = vpop.f32.mrb[21].mxu1 }
 0x372   :  { %v4122_v10 = vmax.f32 %v4120_v24, %v4121_v9  ;;  %v3850_v30 = vadd.f32 %v7687_v22, %v3849_v17 }
 0x373   :  { %v4791_v29 = vsel %vm4743_vm0, %v4727_v8, %v4790_v36  ;;  %v4115_v3 = vmax.f32 %v4113_v16, %v4114_v6  ;;  %v3961_v53 = vmax.f32 %v3855_v43, 0.0 }
 0x374   :  { %v4123_v50 = vrot.slane %v4122_v10, 2  ;;  %v3960_v47 = vmax.f32 %v3850_v30, 0.0  ;;  %v4792_v52 = vsel %vm4745_vm1, %v4728_v19, %v4791_v29 }
 0x375   :  { %v4116_v26 = vrot.slane %v4115_v3, 2  ;;  %v4344_v4 = vsel %vm3972_vm14, %v3961_v53, -inf }
 0x376   :  { %v4124_v54 = vmax.f32 %v4122_v10, %v4123_v50  ;;  %v4345_v42 = vrot.slane %v4344_v4, 4  ;;  %v4337_v48 = vsel %vm3972_vm14, %v3960_v47, -inf }
 0x377   :  { %v4117_v15 = vmax.f32 %v4115_v3, %v4116_v26  ;;  %v4338_v63 = vrot.slane %v4337_v48, 4 }
 0x378   :  { %v4125_v62 = vrot.slane %v4124_v54, 1  ;;  %v4346_v37 = vmax.f32 %v4344_v4, %v4345_v42 }
 0x379   :  { %v4118_v49 = vrot.slane %v4117_v15, 1  ;;  %v4339_v39 = vmax.f32 %v4337_v48, %v4338_v63 }
 0x37a   :  { %v4126_v36 = vmax.f32 %v4124_v54, %v4125_v62  ;;  %v4347_v12 = vrot.slane %v4346_v37, 2 }
 0x37b   :  { %v4119_v11 = vmax.f32 %v4117_v15, %v4118_v49  ;;  %v4340_v18 = vrot.slane %v4339_v39, 2 }
 0x37c   :  { %v4991_v33 = vpack.c.bf16 %v4126_v36, %v4126_v36  ;;  %v4348_v55 = vmax.f32 %v4346_v37, %v4347_v12 }
 0x37d   :  { %v4990_v56 = vpack.c.bf16 %v4119_v11, %v4119_v11  ;;  %v4341_v2 = vmax.f32 %v4339_v39, %v4340_v18 }
 0x37e   :  { %v4349_v44 = vrot.slane %v4348_v55, 1  ;;  %v5139_v0 = vpop.f32.mrb[22].mxu0  ;;  %v4698_v61 = vunpack.c.l.b16 %v4991_v33 }
 0x37f   :  { %v4697_v27 = vunpack.c.l.b16 %v4990_v56  ;;  %v4342_v32 = vrot.slane %v4341_v2, 1  ;;  %v3705_v5 = vadd.f32 %v7687_v22, %v5139_v0  ;;  %v3699_v14 = vpop.f32.mrb[23].mxu0 }
 0x380   :  { %v4350_v57 = vmax.f32 %v4348_v55, %v4349_v44  ;;  %v3700_v58 = vadd.f32 %v7687_v22, %v3699_v14 }
 0x381   :  { %v4765_v38 = vsel %vm4747_vm2, %v4697_v27, %v4764_v28  ;;  %v4343_v23 = vmax.f32 %v4341_v2, %v4342_v32  ;;  %v3931_v51 = vmax.f32 %v3705_v5, 0.0 }
 0x382   :  { %v5023_v25 = vpack.c.bf16 %v4350_v57, %v4350_v57  ;;  %v3930_v31 = vmax.f32 %v3700_v58, 0.0  ;;  %v4766_v7 = vsel %vm4749_vm3, %v4698_v61, %v4765_v38 }
 0x383   :  { %v5022_v45 = vpack.c.bf16 %v4343_v23, %v4343_v23  ;;  %v4134_v41 = vsel %vm3972_vm14, %v3931_v51, -inf }
 0x384   :  { %v4135_v20 = vrot.slane %v4134_v41, 4  ;;  %v4127_v1 = vsel %vm3972_vm14, %v3930_v31, -inf  ;;  %v5187_v13 = vpop.f32.mrb[22].mxu1  ;;  %v4730_v35 = vunpack.c.l.b16 %v5023_v25 }
 0x385   :  { %v4729_v59 = vunpack.c.l.b16 %v5022_v45  ;;  %v4128_v46 = vrot.slane %v4127_v1, 4  ;;  %v3865_v21 = vadd.f32 %v7687_v22, %v5187_v13  ;;  %v3859_v34 = vpop.f32.mrb[23].mxu1 }
 0x386   :  { %v4136_v28 = vmax.f32 %v4134_v41, %v4135_v20  ;;  %v3860_v60 = vadd.f32 %v7687_v22, %v3859_v34 }
 0x387   :  { %v4793_v24 = vsel %vm4747_vm2, %v4729_v59, %v4792_v52  ;;  %v4129_v9 = vmax.f32 %v4127_v1, %v4128_v46  ;;  %v3963_v16 = vmax.f32 %v3865_v21, 0.0 }
 0x388   :  { %v4137_v40 = vrot.slane %v4136_v28, 2  ;;  %v3962_v8 = vmax.f32 %v3860_v60, 0.0  ;;  %v4794_v6 = vsel %vm4749_vm3, %v4730_v35, %v4793_v24 }
 0x389   :  { %v4130_v43 = vrot.slane %v4129_v9, 2  ;;  %v4358_v17 = vsel %vm3972_vm14, %v3963_v16, -inf }
 0x38a   :  { %v4138_v19 = vmax.f32 %v4136_v28, %v4137_v40  ;;  %v4359_v10 = vrot.slane %v4358_v17, 4  ;;  %v4351_v30 = vsel %vm3972_vm14, %v3962_v8, -inf }
 0x38b   :  { %v4131_v29 = vmax.f32 %v4129_v9, %v4130_v43  ;;  %v4352_v3 = vrot.slane %v4351_v30, 4 }
 0x38c   :  { %v4139_v53 = vrot.slane %v4138_v19, 1  ;;  %v4360_v50 = vmax.f32 %v4358_v17, %v4359_v10 }
 0x38d   :  { %v4132_v47 = vrot.slane %v4131_v29, 1  ;;  %v4353_v26 = vmax.f32 %v4351_v30, %v4352_v3 }
 0x38e   :  { %v4140_v52 = vmax.f32 %v4138_v19, %v4139_v53  ;;  %v4361_v4 = vrot.slane %v4360_v50, 2 }
 0x38f   :  { %v4133_v54 = vmax.f32 %v4131_v29, %v4132_v47  ;;  %v4354_v42 = vrot.slane %v4353_v26, 2 }
 0x390   :  { %v4993_v48 = vpack.c.bf16 %v4140_v52, %v4140_v52  ;;  %v4362_v15 = vmax.f32 %v4360_v50, %v4361_v4 }
 0x391   :  { %v4992_v63 = vpack.c.bf16 %v4133_v54, %v4133_v54  ;;  %v4355_v62 = vmax.f32 %v4353_v26, %v4354_v42 }
 0x392   :  { %v4363_v37 = vrot.slane %v4362_v15, 1  ;;  %v5142_v49 = vpop.f32.mrb[24].mxu0  ;;  %v4700_v18 = vunpack.c.l.b16 %v4993_v48 }
 0x393   :  { %v4699_v39 = vunpack.c.l.b16 %v4992_v63  ;;  %v4356_v36 = vrot.slane %v4355_v62, 1  ;;  %v3715_v12 = vadd.f32 %v7687_v22, %v5142_v49  ;;  %v3709_v11 = vpop.f32.mrb[25].mxu0 }
 0x394   :  { %v4364_v33 = vmax.f32 %v4362_v15, %v4363_v37  ;;  %v3710_v55 = vadd.f32 %v7687_v22, %v3709_v11 }
 0x395   :  { %v4767_v56 = vsel %vm4751_vm4, %v4699_v39, %v4766_v7  ;;  %v4357_v2 = vmax.f32 %v4355_v62, %v4356_v36  ;;  %v3933_v44 = vmax.f32 %v3715_v12, 0.0 }
 0x396   :  { %v4768_v0 = vsel %vm4753_vm5, %v4700_v18, %v4767_v56  ;;  %v5025_v27 = vpack.c.bf16 %v4364_v33, %v4364_v33  ;;  %v3932_v32 = vmax.f32 %v3710_v55, 0.0 }
 0x397   :  { %v4806_v5 = vpack.c.b16 %v4768_v0, %v4768_v0  ;;  %v5024_v14 = vpack.c.bf16 %v4357_v2, %v4357_v2  ;;  %v4148_v61 = vsel %vm3972_vm14, %v3933_v44, -inf }
 0x398   :  { %v4149_v57 = vrot.slane %v4148_v61, 4  ;;  %v4141_v58 = vsel %vm3972_vm14, %v3932_v32, -inf  ;;  %v5190_v38 = vpop.f32.mrb[24].mxu1  ;;  %v4732_v7 = vunpack.c.l.b16 %v5025_v27 }
 0x399   :  { %4823 = vst.msk [vmem:[%s7817_s4 + $0x8] sm:$0xf] %vm4820_vm6, %v4806_v5  ;;  %v4731_v23 = vunpack.c.l.b16 %v5024_v14  ;;  %v4142_v51 = vrot.slane %v4141_v58, 4  ;;  %v3875_v25 = vadd.f32 %v7687_v22, %v5190_v38  ;;  %v3869_v31 = vpop.f32.mrb[25].mxu1 }
 0x39a   :  { %v4150_v45 = vmax.f32 %v4148_v61, %v4149_v57  ;;  %v3870_v41 = vadd.f32 %v7687_v22, %v3869_v31 }
 0x39b   :  { %v4795_v20 = vsel %vm4751_vm4, %v4731_v23, %v4794_v6  ;;  %v4143_v1 = vmax.f32 %v4141_v58, %v4142_v51  ;;  %v3965_v13 = vmax.f32 %v3875_v25, 0.0 }
 0x39c   :  { %v4796_v59 = vsel %vm4753_vm5, %v4732_v7, %v4795_v20  ;;  %v4151_v46 = vrot.slane %v4150_v45, 2  ;;  %v3964_v21 = vmax.f32 %v3870_v41, 0.0 }
 0x39d   :  { %v4810_v34 = vpack.c.b16 %v4796_v59, %v4796_v59  ;;  %v4144_v35 = vrot.slane %v4143_v1, 2  ;;  %v4372_v28 = vsel %vm3972_vm14, %v3965_v13, -inf }
 0x39e   :  { %v4152_v60 = vmax.f32 %v4150_v45, %v4151_v46  ;;  %v4373_v24 = vrot.slane %v4372_v28, 4  ;;  %v4365_v9 = vsel %vm3972_vm14, %v3964_v21, -inf }
 0x39f   :  { %4827 = vst.msk [vmem:[%s7817_s4 + $0x18] sm:$0xf] %vm4820_vm6, %v4810_v34  ;;  %v4145_v16 = vmax.f32 %v4143_v1, %v4144_v35  ;;  %v4366_v40 = vrot.slane %v4365_v9, 4 }
 0x3a0   :  { %v4153_v8 = vrot.slane %v4152_v60, 1  ;;  %v4374_v6 = vmax.f32 %v4372_v28, %v4373_v24 }
 0x3a1   :  { %v4146_v43 = vrot.slane %v4145_v16, 1  ;;  %v4367_v17 = vmax.f32 %v4365_v9, %v4366_v40 }
 0x3a2   :  { %v4154_v19 = vmax.f32 %v4152_v60, %v4153_v8  ;;  %v4375_v10 = vrot.slane %v4374_v6, 2 }
 0x3a3   :  { %v4147_v30 = vmax.f32 %v4145_v16, %v4146_v43  ;;  %v4368_v29 = vrot.slane %v4367_v17, 2 }
 0x3a4   :  { %v4995_v3 = vpack.c.bf16 %v4154_v19, %v4154_v19  ;;  %v4376_v53 = vmax.f32 %v4374_v6, %v4375_v10 }
 0x3a5   :  { %v4994_v50 = vpack.c.bf16 %v4147_v30, %v4147_v30  ;;  %v4369_v47 = vmax.f32 %v4367_v17, %v4368_v29 }
 0x3a6   :  { %v4702_v26 = vunpack.c.l.b16 %v4995_v3  ;;  %v4377_v52 = vrot.slane %v4376_v53, 1  ;;  %v5145_v4 = vpop.f32.mrb[26].mxu0 }
 0x3a7   :  { %v4701_v54 = vunpack.c.l.b16 %v4994_v50  ;;  %v4370_v42 = vrot.slane %v4369_v47, 1  ;;  %v3725_v48 = vadd.f32 %v7687_v22, %v5145_v4  ;;  %v3719_v15 = vpop.f32.mrb[27].mxu0 }
 0x3a8   :  { %v4378_v63 = vmax.f32 %v4376_v53, %v4377_v52  ;;  %v3720_v62 = vadd.f32 %v7687_v22, %v3719_v15 }
 0x3a9   :  { %v4769_v37 = vsel %vm4741_vm15, %v4702_v26, %v4701_v54  ;;  %v4371_v49 = vmax.f32 %v4369_v47, %v4370_v42  ;;  %v3935_v39 = vmax.f32 %v3725_v48, 0.0 }
 0x3aa   :  { %v5027_v36 = vpack.c.bf16 %v4378_v63, %v4378_v63  ;;  %v3934_v12 = vmax.f32 %v3720_v62, 0.0 }
 0x3ab   :  { %v5026_v11 = vpack.c.bf16 %v4371_v49, %v4371_v49  ;;  %v4162_v18 = vsel %vm3972_vm14, %v3935_v39, -inf }
 0x3ac   :  { %v4734_v33 = vunpack.c.l.b16 %v5027_v36  ;;  %v4163_v55 = vrot.slane %v4162_v18, 4  ;;  %v4155_v56 = vsel %vm3972_vm14, %v3934_v12, -inf  ;;  %v5193_v2 = vpop.f32.mrb[26].mxu1 }
 0x3ad   :  { %v4733_v44 = vunpack.c.l.b16 %v5026_v11  ;;  %v4156_v0 = vrot.slane %v4155_v56, 4  ;;  %v3885_v27 = vadd.f32 %v7687_v22, %v5193_v2  ;;  %v3879_v32 = vpop.f32.mrb[27].mxu1 }
 0x3ae   :  { %v4164_v5 = vmax.f32 %v4162_v18, %v4163_v55  ;;  %v3880_v14 = vadd.f32 %v7687_v22, %v3879_v32 }
 0x3af   :  { %v4797_v61 = vsel %vm4741_vm15, %v4734_v33, %v4733_v44  ;;  %v4157_v57 = vmax.f32 %v4155_v56, %v4156_v0  ;;  %v3967_v58 = vmax.f32 %v3885_v27, 0.0 }
 0x3b0   :  { %v4165_v38 = vrot.slane %v4164_v5, 2  ;;  %v3966_v23 = vmax.f32 %v3880_v14, 0.0 }
 0x3b1   :  { %v4158_v51 = vrot.slane %v4157_v57, 2  ;;  %v4386_v25 = vsel %vm3972_vm14, %v3967_v58, -inf }
 0x3b2   :  { %v4166_v31 = vmax.f32 %v4164_v5, %v4165_v38  ;;  %v4387_v7 = vrot.slane %v4386_v25, 4  ;;  %v4379_v45 = vsel %vm3972_vm14, %v3966_v23, -inf }
 0x3b3   :  { %v4159_v41 = vmax.f32 %v4157_v57, %v4158_v51  ;;  %v4380_v20 = vrot.slane %v4379_v45, 4 }
 0x3b4   :  { %v4167_v1 = vrot.slane %v4166_v31, 1  ;;  %v4388_v13 = vmax.f32 %v4386_v25, %v4387_v7 }
 0x3b5   :  { %v4160_v59 = vrot.slane %v4159_v41, 1  ;;  %v4381_v46 = vmax.f32 %v4379_v45, %v4380_v20 }
 0x3b6   :  { %v4168_v21 = vmax.f32 %v4166_v31, %v4167_v1  ;;  %v4389_v34 = vrot.slane %v4388_v13, 2 }
 0x3b7   :  { %v4161_v35 = vmax.f32 %v4159_v41, %v4160_v59  ;;  %v4382_v28 = vrot.slane %v4381_v46, 2 }
 0x3b8   :  { %v4997_v60 = vpack.c.bf16 %v4168_v21, %v4168_v21  ;;  %v4390_v24 = vmax.f32 %v4388_v13, %v4389_v34 }
 0x3b9   :  { %v4996_v9 = vpack.c.bf16 %v4161_v35, %v4161_v35  ;;  %v4383_v16 = vmax.f32 %v4381_v46, %v4382_v28 }
 0x3ba   :  { %v4391_v40 = vrot.slane %v4390_v24, 1  ;;  %v4704_v43 = vunpack.c.l.b16 %v4997_v60 }
 0x3bb   :  { %v4703_v8 = vunpack.c.l.b16 %v4996_v9  ;;  %v4384_v6 = vrot.slane %v4383_v16, 1 }
 0x3bc   :  { %v4392_v17 = vmax.f32 %v4390_v24, %v4391_v40 }
 0x3bd   :  { %v4770_v19 = vsel %vm4743_vm0, %v4703_v8, %v4769_v37  ;;  %v4385_v10 = vmax.f32 %v4383_v16, %v4384_v6  ;;  %v5148_v30 = vpop.f32.mrb[28].mxu0 }
 0x3be   :  { %v5029_v29 = vpack.c.bf16 %v4392_v17, %v4392_v17  ;;  %v3735_v3 = vadd.f32 %v7687_v22, %v5148_v30  ;;  %v3729_v53 = vpop.f32.mrb[29].mxu0  ;;  %v4771_v50 = vsel %vm4745_vm1, %v4704_v43, %v4770_v19 }
 0x3bf   :  { %v5028_v47 = vpack.c.bf16 %v4385_v10, %v4385_v10  ;;  %v3730_v26 = vadd.f32 %v7687_v22, %v3729_v53 }
 0x3c0   :  { %v3937_v52 = vmax.f32 %v3735_v3, 0.0  ;;  %v4736_v42 = vunpack.c.l.b16 %v5029_v29 }
 0x3c1   :  { %v4735_v4 = vunpack.c.l.b16 %v5028_v47  ;;  %v3936_v54 = vmax.f32 %v3730_v26, 0.0 }
 0x3c2   :  { %v4176_v48 = vsel %vm3972_vm14, %v3937_v52, -inf }
 0x3c3   :  { %v4798_v15 = vsel %vm4743_vm0, %v4735_v4, %v4797_v61  ;;  %v4177_v63 = vrot.slane %v4176_v48, 4  ;;  %v4169_v62 = vsel %vm3972_vm14, %v3936_v54, -inf  ;;  %v5196_v37 = vpop.f32.mrb[28].mxu1 }
 0x3c4   :  { %v4170_v49 = vrot.slane %v4169_v62, 4  ;;  %v3895_v39 = vadd.f32 %v7687_v22, %v5196_v37  ;;  %v3889_v36 = vpop.f32.mrb[29].mxu1  ;;  %v4799_v12 = vsel %vm4745_vm1, %v4736_v42, %v4798_v15 }
 0x3c5   :  { %v4178_v11 = vmax.f32 %v4176_v48, %v4177_v63  ;;  %v3890_v18 = vadd.f32 %v7687_v22, %v3889_v36 }
 0x3c6   :  { %v4171_v33 = vmax.f32 %v4169_v62, %v4170_v49  ;;  %v3969_v55 = vmax.f32 %v3895_v39, 0.0 }
 0x3c7   :  { %v4179_v56 = vrot.slane %v4178_v11, 2  ;;  %v3968_v2 = vmax.f32 %v3890_v18, 0.0 }
 0x3c8   :  { %v4172_v44 = vrot.slane %v4171_v33, 2  ;;  %v4400_v0 = vsel %vm3972_vm14, %v3969_v55, -inf }
 0x3c9   :  { %v4180_v27 = vmax.f32 %v4178_v11, %v4179_v56  ;;  %v4401_v32 = vrot.slane %v4400_v0, 4  ;;  %v4393_v5 = vsel %vm3972_vm14, %v3968_v2, -inf }
 0x3ca   :  { %v4173_v14 = vmax.f32 %v4171_v33, %v4172_v44  ;;  %v4394_v61 = vrot.slane %v4393_v5, 4 }
 0x3cb   :  { %v4181_v57 = vrot.slane %v4180_v27, 1  ;;  %v4402_v58 = vmax.f32 %v4400_v0, %v4401_v32 }
 0x3cc   :  { %v4174_v38 = vrot.slane %v4173_v14, 1  ;;  %v4395_v23 = vmax.f32 %v4393_v5, %v4394_v61 }
 0x3cd   :  { %v4182_v51 = vmax.f32 %v4180_v27, %v4181_v57  ;;  %v4403_v25 = vrot.slane %v4402_v58, 2 }
 0x3ce   :  { %v4175_v31 = vmax.f32 %v4173_v14, %v4174_v38  ;;  %v4396_v7 = vrot.slane %v4395_v23, 2 }
 0x3cf   :  { %v4999_v45 = vpack.c.bf16 %v4182_v51, %v4182_v51  ;;  %v4404_v41 = vmax.f32 %v4402_v58, %v4403_v25 }
 0x3d0   :  { %v4998_v20 = vpack.c.bf16 %v4175_v31, %v4175_v31  ;;  %v4397_v1 = vmax.f32 %v4395_v23, %v4396_v7 }
 0x3d1   :  { %v4405_v13 = vrot.slane %v4404_v41, 1  ;;  %v4706_v34 = vunpack.c.l.b16 %v4999_v45 }
 0x3d2   :  { %v4705_v59 = vunpack.c.l.b16 %v4998_v20  ;;  %v4398_v46 = vrot.slane %v4397_v1, 1  ;;  %v5151_v21 = vpop.f32.mrb[30].mxu0 }
 0x3d3   :  { %v4406_v35 = vmax.f32 %v4404_v41, %v4405_v13  ;;  %v3745_v28 = vadd.f32 %v7687_v22, %v5151_v21  ;;  %v3739_v60 = vpop.f32.mrb[31].mxu0 }
 0x3d4   :  { %v4772_v24 = vsel %vm4747_vm2, %v4705_v59, %v4771_v50  ;;  %v4399_v9 = vmax.f32 %v4397_v1, %v4398_v46  ;;  %v3740_v16 = vadd.f32 %v7687_v22, %v3739_v60 }
 0x3d5   :  { %v5031_v40 = vpack.c.bf16 %v4406_v35, %v4406_v35  ;;  %v3939_v8 = vmax.f32 %v3745_v28, 0.0  ;;  %v4773_v6 = vsel %vm4749_vm3, %v4706_v34, %v4772_v24  ;;  %v5199_v43 = vpop.f32.mrb[30].mxu1 }
 0x3d6   :  { %v5030_v17 = vpack.c.bf16 %v4399_v9, %v4399_v9  ;;  %v3938_v19 = vmax.f32 %v3740_v16, 0.0  ;;  %v3905_v10 = vadd.f32 %v7687_v22, %v5199_v43  ;;  %v3899_v30 = vpop.f32.mrb[31].mxu1 }
 0x3d7   :  { %v4190_v29 = vsel %vm3972_vm14, %v3939_v8, -inf  ;;  %v3900_v3 = vadd.f32 %v7687_v22, %v3899_v30  ;;  %v4738_v52 = vunpack.c.l.b16 %v5031_v40 }
 0x3d8   :  { %v4737_v53 = vunpack.c.l.b16 %v5030_v17  ;;  %v4191_v47 = vrot.slane %v4190_v29, 4  ;;  %v4183_v50 = vsel %vm3972_vm14, %v3938_v19, -inf  ;;  %v3971_v26 = vmax.f32 %v3905_v10, 0.0 }
 0x3d9   :  { %v4184_v4 = vrot.slane %v4183_v50, 4  ;;  %v3970_v54 = vmax.f32 %v3900_v3, 0.0 }
 0x3da   :  { %v4800_v42 = vsel %vm4747_vm2, %v4737_v53, %v4799_v12  ;;  %v4192_v48 = vmax.f32 %v4190_v29, %v4191_v47  ;;  %v4414_v15 = vsel %vm3972_vm14, %v3971_v26, -inf }
 0x3db   :  { %v4185_v63 = vmax.f32 %v4183_v50, %v4184_v4  ;;  %v4415_v62 = vrot.slane %v4414_v15, 4  ;;  %v4407_v37 = vsel %vm3972_vm14, %v3970_v54, -inf  ;;  %v4801_v49 = vsel %vm4749_vm3, %v4738_v52, %v4800_v42 }
 0x3dc   :  { %v4193_v22 = vrot.slane %v4192_v48, 2  ;;  %v4408_v39 = vrot.slane %v4407_v37, 4 }
 0x3dd   :  { %v4186_v36 = vrot.slane %v4185_v63, 2  ;;  %v4416_v11 = vmax.f32 %v4414_v15, %v4415_v62 }
 0x3de   :  { %v4194_v18 = vmax.f32 %v4192_v48, %v4193_v22  ;;  %v4409_v33 = vmax.f32 %v4407_v37, %v4408_v39 }
 0x3df   :  { %v4187_v55 = vmax.f32 %v4185_v63, %v4186_v36  ;;  %v4417_v56 = vrot.slane %v4416_v11, 2 }
 0x3e0   :  { %v4195_v2 = vrot.slane %v4194_v18, 1  ;;  %v4410_v44 = vrot.slane %v4409_v33, 2 }
 0x3e1   :  { %v4188_v12 = vrot.slane %v4187_v55, 1  ;;  %v4418_v0 = vmax.f32 %v4416_v11, %v4417_v56 }
 0x3e2   :  { %v4196_v27 = vmax.f32 %v4194_v18, %v4195_v2  ;;  %v4411_v32 = vmax.f32 %v4409_v33, %v4410_v44 }
 0x3e3   :  { %v4189_v5 = vmax.f32 %v4187_v55, %v4188_v12  ;;  %v4419_v14 = vrot.slane %v4418_v0, 1 }
 0x3e4   :  { %v5001_v61 = vpack.c.bf16 %v4196_v27, %v4196_v27  ;;  %v4412_v57 = vrot.slane %v4411_v32, 1 }
 0x3e5   :  { %v5000_v58 = vpack.c.bf16 %v4189_v5, %v4189_v5  ;;  %v4420_v38 = vmax.f32 %v4418_v0, %v4419_v14 }
 0x3e6   :  { %v4413_v23 = vmax.f32 %v4411_v32, %v4412_v57  ;;  %v4708_v31 = vunpack.c.l.b16 %v5001_v61 }
 0x3e7   :  { %v4707_v51 = vunpack.c.l.b16 %v5000_v58  ;;  %v5033_v25 = vpack.c.bf16 %v4420_v38, %v4420_v38 }
 0x3e8   :  { %v5032_v7 = vpack.c.bf16 %v4413_v23, %v4413_v23 }
 0x3e9   :  { %v4774_v45 = vsel %vm4751_vm4, %v4707_v51, %v4773_v6  ;;  %v4740_v13 = vunpack.c.l.b16 %v5033_v25 }
 0x3ea   :  { %v4775_v41 = vsel %vm4753_vm5, %v4708_v31, %v4774_v45  ;;  %v4739_v20 = vunpack.c.l.b16 %v5032_v7 }
 0x3eb   :  { %v4807_v1 = vpack.c.b16 %v4775_v41, %v4775_v41 }
 0x3ec   :  { %v4802_v59 = vsel %vm4751_vm4, %v4739_v20, %v4801_v49 }
 0x3ed   :  { %4824 = vst.msk [vmem:[%s7817_s4 + $0xc] sm:$0xf] %vm4820_vm6, %v4807_v1  ;;  %v4803_v46 = vsel %vm4753_vm5, %v4740_v13, %v4802_v59 }
 0x3ee   :  { %v4811_v21 = vpack.c.b16 %v4803_v46, %v4803_v46 }
 0x3f0   :  { %4828 = vst.msk [vmem:[%s7817_s4 + $0x1c] sm:$0xf] %vm4820_vm6, %v4811_v21 }

</bundles_post_ra>
